<compile_context>
chip_gen: v7x
topology: tpu7x:2x2x1
jax: 0.10.0
libtpu: 0.0.40
codegen_flags: <defaults>
</compile_context>

<pallas_src>
import functools
from collections import OrderedDict

import jax
import jax.numpy as jnp
from jax.experimental import pallas as pl
from jax.experimental.pallas import tpu as pltpu


def _round_up(x, m):
    return (x + m - 1) // m * m


_VMEM_LIMIT = 32 * 1024 * 1024  # per-batch blocks here are far below this


# ----------------------------------------------------------------------------
# Pallas kernel 1: direct convolution (no im2col).
#   Per grid step (one batch element): accumulate kh*kw taps with in-kernel
#   matmuls over contiguous VMEM windows of the phase-decomposed padded input,
#   then bias (+ ReLU) (+ fused residual add) epilogue, store bf16/f32.
# ----------------------------------------------------------------------------
def _conv_kernel(*refs, kh, kw, stride, oh, ow, act, has_res):
    if has_res:
        x_ref, w_ref, b_ref, r_ref, o_ref = refs
    else:
        x_ref, w_ref, b_ref, o_ref = refs
        r_ref = None

    s = stride
    acc = None
    for di in range(kh):
        for dj in range(kw):
            t = di * kw + dj
            ph = (di % s) * s + (dj % s)          # phase index
            i0 = di // s
            j0 = dj // s
            tap = x_ref[ph, i0:i0 + oh, j0:j0 + ow, :]          # (oh, ow, cin) bf16
            tap2 = tap.reshape(oh * ow, -1)
            contrib = jnp.dot(tap2, w_ref[t],
                              preferred_element_type=jnp.float32)
            acc = contrib if acc is None else acc + contrib
    acc = acc + b_ref[...]                                       # (M,Cout)+(1,Cout)
    if act == "relu":
        acc = jnp.maximum(acc, 0.0)
    if r_ref is not None:
        acc = acc + r_ref[...].astype(jnp.float32)               # fused FPN add
    o_ref[...] = acc.astype(o_ref.dtype)


def conv2d(x, w, b, stride=1, padding=0, act="none", residual=None,
           out_dtype=jnp.bfloat16):
    """x: (N,H,W,Cin); w: (kh,kw,Cin,Cout) HWIO; b: (Cout,).
    residual (optional): (N,OH,OW,Cout) added after bias/act (fused FPN add)."""
    kh, kw, cin, cout = w.shape
    N, H, W, _ = x.shape
    s = stride
    oh = (H + 2 * padding - kh) // s + 1
    ow = (W + 2 * padding - kw) // s + 1
    Hp, Wp = H + 2 * padding, W + 2 * padding
    Hpp, Wpp = _round_up(Hp, s), _round_up(Wp, s)

    xb = x.astype(jnp.bfloat16)
    if padding or Hpp != Hp or Wpp != Wp:
        xb = jnp.pad(xb, ((0, 0),
                          (padding, padding + Hpp - Hp),
                          (padding, padding + Wpp - Wp),
                          (0, 0)))
    Ph, Pw = Hpp // s, Wpp // s
    if s == 1:
        xph = xb.reshape(N, 1, Ph, Pw, cin)
    else:
        # phase decomposition: xph[n, a*s+b, i, j, c] = xpad[n, s*i+a, s*j+b, c]
        # (same total bytes as the padded input; lets every tap be a contiguous
        #  static window in VMEM -> no strided loads, no im2col blowup)
        xph = xb.reshape(N, Ph, s, Pw, s, cin).transpose(0, 2, 4, 1, 3, 5)
        xph = xph.reshape(N, s * s, Ph, Pw, cin)

    wt = w.astype(jnp.bfloat16).reshape(kh * kw, cin, cout)
    bias2 = b.astype(jnp.float32).reshape(1, cout)

    inputs = [xph, wt, bias2]
    in_specs = [
        pl.BlockSpec((None, s * s, Ph, Pw, cin), lambda n: (n, 0, 0, 0, 0)),
        pl.BlockSpec((kh * kw, cin, cout), lambda n: (0, 0, 0)),
        pl.BlockSpec((1, cout), lambda n: (0, 0)),
    ]
    res_bytes = 0
    if residual is not None:
        res2 = residual.reshape(N, oh * ow, cout).astype(jnp.bfloat16)
        inputs.append(res2)
        in_specs.append(pl.BlockSpec((None, oh * ow, cout), lambda n: (n, 0, 0)))
        res_bytes = res2.size * 2

    out_itemsize = jnp.dtype(out_dtype).itemsize
    flops = 2 * N * oh * ow * kh * kw * cin * cout
    bytes_accessed = (xph.size * 2 + wt.size * 2 + bias2.size * 4
                      + res_bytes + N * oh * ow * cout * out_itemsize)

    out = pl.pallas_call(
        functools.partial(_conv_kernel, kh=kh, kw=kw, stride=s, oh=oh, ow=ow,
                          act=act, has_res=residual is not None),
        grid=(N,),
        out_shape=jax.ShapeDtypeStruct((N, oh * ow, cout), out_dtype),
        in_specs=in_specs,
        out_specs=pl.BlockSpec((None, oh * ow, cout), lambda n: (n, 0, 0)),
        compiler_params=pltpu.CompilerParams(
            dimension_semantics=("parallel",),
            vmem_limit_bytes=_VMEM_LIMIT,
        ),
        cost_estimate=pl.CostEstimate(flops=int(flops), transcendentals=0,
                                      bytes_accessed=int(bytes_accessed)),
    )(*inputs)
    return out.reshape(N, oh, ow, cout)


# ----------------------------------------------------------------------------
# Pallas kernel 2: fused DB head at 1/4 resolution.
#   3x3 conv (32->16, in-kernel taps) + ReLU, 1x1 (16->2), sigmoid,
#   k*(p-t) differentiable binarization -> single (M,3) output block.
# ----------------------------------------------------------------------------
def _head_kernel(x_ref, w1_ref, b1_ref, w2_ref, b2_ref, o_ref, *, oh, ow, k):
    feat = None
    for di in range(3):
        for dj in range(3):
            t = di * 3 + dj
            tap = x_ref[di:di + oh, dj:dj + ow, :].reshape(oh * ow, -1)
            c = jnp.dot(tap, w1_ref[t], preferred_element_type=jnp.float32)
            feat = c if feat is None else feat + c
    feat = jnp.maximum(feat + b1_ref[...], 0.0)                     # (M,16) f32
    logits = jnp.dot(feat, w2_ref[...],
                     preferred_element_type=jnp.float32) + b2_ref[...]   # (M,2)
    pt = jax.nn.sigmoid(logits)                                     # prob, thresh
    binv = jax.nn.sigmoid(k * (pt[:, 0:1] - pt[:, 1:2]))            # binarization
    o_ref[...] = jnp.concatenate([pt, binv], axis=1)                # (M,3)


def db_head_fused(fuse, w1, b1, w2, b2, k=50.0):
    """fuse: (N,h,w,32) bf16 -> (N,h,w,3) f32 maps [prob, thresh, binary]."""
    N, h, w, c = fuse.shape
    co1 = w1.shape[-1]
    xp = jnp.pad(fuse.astype(jnp.bfloat16), ((0, 0), (1, 1), (1, 1), (0, 0)))
    Hp, Wp = h + 2, w + 2
    w1t = w1.astype(jnp.bfloat16).reshape(9, c, co1)
    b1t = b1.astype(jnp.float32).reshape(1, co1)
    w2t = w2.astype(jnp.float32)
    b2t = b2.astype(jnp.float32).reshape(1, 2)
    M = h * w

    flops = 2 * N * M * (9 * c * co1 + co1 * 2)
    bytes_accessed = xp.size * 2 + w1t.size * 2 + N * M * 3 * 4 + 256

    out = pl.pallas_call(
        functools.partial(_head_kernel, oh=h, ow=w, k=k),
        grid=(N,),
        out_shape=jax.ShapeDtypeStruct((N, M, 3), jnp.float32),
        in_specs=[
            pl.BlockSpec((None, Hp, Wp, c), lambda n: (n, 0, 0, 0)),
            pl.BlockSpec((9, c, co1), lambda n: (0, 0, 0)),
            pl.BlockSpec((1, co1), lambda n: (0, 0)),
            pl.BlockSpec((co1, 2), lambda n: (0, 0)),
            pl.BlockSpec((1, 2), lambda n: (0, 0)),
        ],
        out_specs=pl.BlockSpec((None, M, 3), lambda n: (n, 0, 0)),
        compiler_params=pltpu.CompilerParams(
            dimension_semantics=("parallel",),
            vmem_limit_bytes=_VMEM_LIMIT,
        ),
        cost_estimate=pl.CostEstimate(flops=int(flops),
                                      transcendentals=int(3 * N * M),
                                      bytes_accessed=int(bytes_accessed)),
    )(xp, w1t, b1t, w2t, b2t)
    return out.reshape(N, h, w, 3)


def upsample_nearest(x, factor):
    if factor == 1:
        return x
    return jnp.repeat(jnp.repeat(x, factor, axis=1), factor, axis=2)


# ----------------------------------------------------------------------------
# Parameter init (deterministic, Kaiming-style) + head-branch fusion
# ----------------------------------------------------------------------------
_CONV_DEFS = [
    # name,  kh, kw, cin, cout
    ("stem", 3, 3, 3, 8),
    ("c2", 3, 3, 8, 16),
    ("c3", 3, 3, 16, 24),
    ("c4", 3, 3, 24, 32),
    ("c5", 3, 3, 32, 48),
    ("in5", 1, 1, 48, 32),
    ("in4", 1, 1, 32, 32),
    ("in3", 1, 1, 24, 32),
    ("in2", 1, 1, 16, 32),
    ("p5", 3, 3, 32, 8),
    ("p4", 3, 3, 32, 8),
    ("p3", 3, 3, 32, 8),
    ("p2", 3, 3, 32, 8),
    ("prob1", 3, 3, 32, 8),
    ("prob2", 1, 1, 8, 1),
    ("thr1", 3, 3, 32, 8),
    ("thr2", 1, 1, 8, 1),
]


def init_params(key):
    params = {}
    keys = jax.random.split(key, len(_CONV_DEFS))
    for k, (name, kh, kw, cin, cout) in zip(keys, _CONV_DEFS):
        fan_in = kh * kw * cin
        w = jax.random.normal(k, (kh, kw, cin, cout), jnp.float32) * (2.0 / fan_in) ** 0.5
        b = jnp.zeros((cout,), jnp.float32)
        params[name] = (w, b)

    # Fuse prob1 + thr1 (both read `fuse`): one 3x3 conv with Cout = 8 + 8 = 16.
    pw1, pb1 = params["prob1"]
    tw1, tb1 = params["thr1"]
    params["head1"] = (jnp.concatenate([pw1, tw1], axis=-1),
                       jnp.concatenate([pb1, tb1], axis=0))

    # Fold prob2 / thr2 1x1 convs into a (16,2) block-diagonal matrix applied
    # inside the fused head kernel.
    pw2, pb2 = params["prob2"]
    tw2, tb2 = params["thr2"]
    w2 = jnp.zeros((16, 2), jnp.float32)
    w2 = w2.at[:8, 0].set(pw2.reshape(8)).at[8:, 1].set(tw2.reshape(8))
    b2 = jnp.stack([pb2[0], tb2[0]]).reshape(1, 2)
    params["head2"] = (w2, b2)
    return params


# ----------------------------------------------------------------------------
# DBModel forward: backbone -> neck -> head
# ----------------------------------------------------------------------------
def db_model_forward(params, x_nchw, training=True):
    x = jnp.transpose(x_nchw, (0, 2, 3, 1))  # NCHW -> NHWC

    # ---- backbone (multi-scale features at strides 4/8/16/32) ----
    s = conv2d(x, *params["stem"], stride=2, padding=1, act="relu")   # /2
    c2 = conv2d(s, *params["c2"], stride=2, padding=1, act="relu")    # /4
    c3 = conv2d(c2, *params["c3"], stride=2, padding=1, act="relu")   # /8
    c4 = conv2d(c3, *params["c4"], stride=2, padding=1, act="relu")   # /16
    c5 = conv2d(c4, *params["c5"], stride=2, padding=1, act="relu")   # /32

    # ---- neck (FPN-style; upsample+add fused into the lateral 1x1 convs) ----
    in5 = conv2d(c5, *params["in5"])                                          # /32
    out4 = conv2d(c4, *params["in4"], residual=upsample_nearest(in5, 2))      # /16
    out3 = conv2d(c3, *params["in3"], residual=upsample_nearest(out4, 2))     # /8
    out2 = conv2d(c2, *params["in2"], residual=upsample_nearest(out3, 2))     # /4

    p5 = conv2d(in5, *params["p5"], padding=1)
    p4 = conv2d(out4, *params["p4"], padding=1)
    p3 = conv2d(out3, *params["p3"], padding=1)
    p2 = conv2d(out2, *params["p2"], padding=1)
    fuse = jnp.concatenate([upsample_nearest(p5, 8), upsample_nearest(p4, 4),
                            upsample_nearest(p3, 2), p2], axis=-1)    # (N,H/4,W/4,32) bf16

    # ---- head: one fused kernel (3x3 conv + ReLU + 1x1 + sigmoid + binarize) ----
    w1, b1 = params["head1"]
    w2, b2 = params["head2"]
    head = db_head_fused(fuse, w1, b1, w2, b2, k=50.0)                # (N,h4,w4,3) f32

    # nearest upsample commutes with the elementwise head math -> identical to
    # binarizing at full resolution, but 16x less head work / traffic.
    prob = jnp.transpose(upsample_nearest(head[..., 0:1], 4), (0, 3, 1, 2))    # NCHW
    thresh = jnp.transpose(upsample_nearest(head[..., 1:2], 4), (0, 3, 1, 2))
    binary = jnp.transpose(upsample_nearest(head[..., 2:3], 4), (0, 3, 1, 2))

    if training:
        return OrderedDict([("prob", prob), ("thresh", thresh), ("binary", binary)])
    return OrderedDict([("prob", prob)])


if __name__ == "__main__":
    key = jax.random.PRNGKey(0)
    x = jax.random.normal(key, (2, 3, 32, 32), jnp.float32)   # NCHW, PyTorch-style
    params = init_params(jax.random.PRNGKey(0))
    fwd = jax.jit(functools.partial(db_model_forward, training=True))
    out = fwd(params, x)
    jax.block_until_ready(out["binary"])
    assert out["prob"].shape == (2, 1, 32, 32)
    assert out["thresh"].shape == (2, 1, 32, 32)
    assert out["binary"].shape == (2, 1, 32, 32)
    print("KERNEL_OK")
</pallas_src>

<mosaic_0001>
module attributes {stable_mosaic.version = 11 : i64} {
  func.func @_conv_kernel(%arg0: i32, %arg1: memref<1x4x17x17x3xbf16, #tpu.memory_space<vmem>>, %arg2: memref<9x3x8xbf16, #tpu.memory_space<vmem>>, %arg3: memref<1x8xf32, #tpu.memory_space<vmem>>, %arg4: memref<1x256x8xbf16, #tpu.memory_space<vmem>>) attributes {dimension_semantics = [#tpu.dimension_semantics<parallel>], iteration_bounds = array<i64: 2>, scalar_prefetch = 0 : i64, scratch_operands = 0 : i64, tpu.core_type = #tpu.core_type<tc>, window_params = [{transform_indices = @transform_0, window_bounds = array<i64: 1, 4, 17, 17, 3>}, {pipeline_mode = #tpu.pipeline_mode<synchronous>, transform_indices = @transform_1, window_bounds = array<i64: 9, 3, 8>}, {pipeline_mode = #tpu.pipeline_mode<synchronous>, transform_indices = @transform_2, window_bounds = array<i64: 1, 8>}, {transform_indices = @transform_3, window_bounds = array<i64: 1, 256, 8>}]} {
    %c0 = arith.constant 0 : index
    %c0_0 = arith.constant 0 : index
    %c0_1 = arith.constant 0 : index
    %c0_2 = arith.constant 0 : index
    %c0_3 = arith.constant 0 : index
    %0 = vector.load %arg1[%c0, %c0_0, %c0_1, %c0_2, %c0_3] : memref<1x4x17x17x3xbf16, #tpu.memory_space<vmem>>, vector<1x1x16x16x3xbf16>
    %1 = vector.shape_cast %0 : vector<1x1x16x16x3xbf16> to vector<16x16x3xbf16>
    %2 = vector.shape_cast %1 : vector<16x16x3xbf16> to vector<256x3xbf16>
    %c0_4 = arith.constant 0 : index
    %c0_5 = arith.constant 0 : index
    %c0_6 = arith.constant 0 : index
    %3 = vector.load %arg2[%c0_4, %c0_5, %c0_6] : memref<9x3x8xbf16, #tpu.memory_space<vmem>>, vector<1x3x8xbf16>
    %4 = vector.shape_cast %3 : vector<1x3x8xbf16> to vector<3x8xbf16>
    %cst = arith.constant dense<0.000000e+00> : vector<256x8xf32>
    %5 = tpu.matmul %2, %4, %cst {dimension_numbers = #tpu.dot_dimension_numbers<[1], [0], [0], [1], [0, 0, 1, 1], [], []>} : vector<256x3xbf16>, vector<3x8xbf16>, vector<256x8xf32> -> vector<256x8xf32>
    %c0_7 = arith.constant 0 : index
    %c1 = arith.constant 1 : index
    %c0_8 = arith.constant 0 : index
    %c0_9 = arith.constant 0 : index
    %c0_10 = arith.constant 0 : index
    %6 = vector.load %arg1[%c0_7, %c1, %c0_8, %c0_9, %c0_10] : memref<1x4x17x17x3xbf16, #tpu.memory_space<vmem>>, vector<1x1x16x16x3xbf16>
    %7 = vector.shape_cast %6 : vector<1x1x16x16x3xbf16> to vector<16x16x3xbf16>
    %8 = vector.shape_cast %7 : vector<16x16x3xbf16> to vector<256x3xbf16>
    %c1_11 = arith.constant 1 : index
    %c0_12 = arith.constant 0 : index
    %c0_13 = arith.constant 0 : index
    %9 = vector.load %arg2[%c1_11, %c0_12, %c0_13] : memref<9x3x8xbf16, #tpu.memory_space<vmem>>, vector<1x3x8xbf16>
    %10 = vector.shape_cast %9 : vector<1x3x8xbf16> to vector<3x8xbf16>
    %cst_14 = arith.constant dense<0.000000e+00> : vector<256x8xf32>
    %11 = tpu.matmul %8, %10, %cst_14 {dimension_numbers = #tpu.dot_dimension_numbers<[1], [0], [0], [1], [0, 0, 1, 1], [], []>} : vector<256x3xbf16>, vector<3x8xbf16>, vector<256x8xf32> -> vector<256x8xf32>
    %12 = arith.addf %5, %11 : vector<256x8xf32>
    %c0_15 = arith.constant 0 : index
    %c0_16 = arith.constant 0 : index
    %c0_17 = arith.constant 0 : index
    %c1_18 = arith.constant 1 : index
    %c0_19 = arith.constant 0 : index
    %13 = vector.load %arg1[%c0_15, %c0_16, %c0_17, %c1_18, %c0_19] : memref<1x4x17x17x3xbf16, #tpu.memory_space<vmem>>, vector<1x1x16x16x3xbf16>
    %14 = vector.shape_cast %13 : vector<1x1x16x16x3xbf16> to vector<16x16x3xbf16>
    %15 = vector.shape_cast %14 : vector<16x16x3xbf16> to vector<256x3xbf16>
    %c2 = arith.constant 2 : index
    %c0_20 = arith.constant 0 : index
    %c0_21 = arith.constant 0 : index
    %16 = vector.load %arg2[%c2, %c0_20, %c0_21] : memref<9x3x8xbf16, #tpu.memory_space<vmem>>, vector<1x3x8xbf16>
    %17 = vector.shape_cast %16 : vector<1x3x8xbf16> to vector<3x8xbf16>
    %cst_22 = arith.constant dense<0.000000e+00> : vector<256x8xf32>
    %18 = tpu.matmul %15, %17, %cst_22 {dimension_numbers = #tpu.dot_dimension_numbers<[1], [0], [0], [1], [0, 0, 1, 1], [], []>} : vector<256x3xbf16>, vector<3x8xbf16>, vector<256x8xf32> -> vector<256x8xf32>
    %19 = arith.addf %12, %18 : vector<256x8xf32>
    %c0_23 = arith.constant 0 : index
    %c2_24 = arith.constant 2 : index
    %c0_25 = arith.constant 0 : index
    %c0_26 = arith.constant 0 : index
    %c0_27 = arith.constant 0 : index
    %20 = vector.load %arg1[%c0_23, %c2_24, %c0_25, %c0_26, %c0_27] : memref<1x4x17x17x3xbf16, #tpu.memory_space<vmem>>, vector<1x1x16x16x3xbf16>
    %21 = vector.shape_cast %20 : vector<1x1x16x16x3xbf16> to vector<16x16x3xbf16>
    %22 = vector.shape_cast %21 : vector<16x16x3xbf16> to vector<256x3xbf16>
    %c3 = arith.constant 3 : index
    %c0_28 = arith.constant 0 : index
    %c0_29 = arith.constant 0 : index
    %23 = vector.load %arg2[%c3, %c0_28, %c0_29] : memref<9x3x8xbf16, #tpu.memory_space<vmem>>, vector<1x3x8xbf16>
    %24 = vector.shape_cast %23 : vector<1x3x8xbf16> to vector<3x8xbf16>
    %cst_30 = arith.constant dense<0.000000e+00> : vector<256x8xf32>
    %25 = tpu.matmul %22, %24, %cst_30 {dimension_numbers = #tpu.dot_dimension_numbers<[1], [0], [0], [1], [0, 0, 1, 1], [], []>} : vector<256x3xbf16>, vector<3x8xbf16>, vector<256x8xf32> -> vector<256x8xf32>
    %26 = arith.addf %19, %25 : vector<256x8xf32>
    %c0_31 = arith.constant 0 : index
    %c3_32 = arith.constant 3 : index
    %c0_33 = arith.constant 0 : index
    %c0_34 = arith.constant 0 : index
    %c0_35 = arith.constant 0 : index
    %27 = vector.load %arg1[%c0_31, %c3_32, %c0_33, %c0_34, %c0_35] : memref<1x4x17x17x3xbf16, #tpu.memory_space<vmem>>, vector<1x1x16x16x3xbf16>
    %28 = vector.shape_cast %27 : vector<1x1x16x16x3xbf16> to vector<16x16x3xbf16>
    %29 = vector.shape_cast %28 : vector<16x16x3xbf16> to vector<256x3xbf16>
    %c4 = arith.constant 4 : index
    %c0_36 = arith.constant 0 : index
    %c0_37 = arith.constant 0 : index
    %30 = vector.load %arg2[%c4, %c0_36, %c0_37] : memref<9x3x8xbf16, #tpu.memory_space<vmem>>, vector<1x3x8xbf16>
    %31 = vector.shape_cast %30 : vector<1x3x8xbf16> to vector<3x8xbf16>
    %cst_38 = arith.constant dense<0.000000e+00> : vector<256x8xf32>
    %32 = tpu.matmul %29, %31, %cst_38 {dimension_numbers = #tpu.dot_dimension_numbers<[1], [0], [0], [1], [0, 0, 1, 1], [], []>} : vector<256x3xbf16>, vector<3x8xbf16>, vector<256x8xf32> -> vector<256x8xf32>
    %33 = arith.addf %26, %32 : vector<256x8xf32>
    %c0_39 = arith.constant 0 : index
    %c2_40 = arith.constant 2 : index
    %c0_41 = arith.constant 0 : index
    %c1_42 = arith.constant 1 : index
    %c0_43 = arith.constant 0 : index
    %34 = vector.load %arg1[%c0_39, %c2_40, %c0_41, %c1_42, %c0_43] : memref<1x4x17x17x3xbf16, #tpu.memory_space<vmem>>, vector<1x1x16x16x3xbf16>
    %35 = vector.shape_cast %34 : vector<1x1x16x16x3xbf16> to vector<16x16x3xbf16>
    %36 = vector.shape_cast %35 : vector<16x16x3xbf16> to vector<256x3xbf16>
    %c5 = arith.constant 5 : index
    %c0_44 = arith.constant 0 : index
    %c0_45 = arith.constant 0 : index
    %37 = vector.load %arg2[%c5, %c0_44, %c0_45] : memref<9x3x8xbf16, #tpu.memory_space<vmem>>, vector<1x3x8xbf16>
    %38 = vector.shape_cast %37 : vector<1x3x8xbf16> to vector<3x8xbf16>
    %cst_46 = arith.constant dense<0.000000e+00> : vector<256x8xf32>
    %39 = tpu.matmul %36, %38, %cst_46 {dimension_numbers = #tpu.dot_dimension_numbers<[1], [0], [0], [1], [0, 0, 1, 1], [], []>} : vector<256x3xbf16>, vector<3x8xbf16>, vector<256x8xf32> -> vector<256x8xf32>
    %40 = arith.addf %33, %39 : vector<256x8xf32>
    %c0_47 = arith.constant 0 : index
    %c0_48 = arith.constant 0 : index
    %c1_49 = arith.constant 1 : index
    %c0_50 = arith.constant 0 : index
    %c0_51 = arith.constant 0 : index
    %41 = vector.load %arg1[%c0_47, %c0_48, %c1_49, %c0_50, %c0_51] : memref<1x4x17x17x3xbf16, #tpu.memory_space<vmem>>, vector<1x1x16x16x3xbf16>
    %42 = vector.shape_cast %41 : vector<1x1x16x16x3xbf16> to vector<16x16x3xbf16>
    %43 = vector.shape_cast %42 : vector<16x16x3xbf16> to vector<256x3xbf16>
    %c6 = arith.constant 6 : index
    %c0_52 = arith.constant 0 : index
    %c0_53 = arith.constant 0 : index
    %44 = vector.load %arg2[%c6, %c0_52, %c0_53] : memref<9x3x8xbf16, #tpu.memory_space<vmem>>, vector<1x3x8xbf16>
    %45 = vector.shape_cast %44 : vector<1x3x8xbf16> to vector<3x8xbf16>
    %cst_54 = arith.constant dense<0.000000e+00> : vector<256x8xf32>
    %46 = tpu.matmul %43, %45, %cst_54 {dimension_numbers = #tpu.dot_dimension_numbers<[1], [0], [0], [1], [0, 0, 1, 1], [], []>} : vector<256x3xbf16>, vector<3x8xbf16>, vector<256x8xf32> -> vector<256x8xf32>
    %47 = arith.addf %40, %46 : vector<256x8xf32>
    %c0_55 = arith.constant 0 : index
    %c1_56 = arith.constant 1 : index
    %c1_57 = arith.constant 1 : index
    %c0_58 = arith.constant 0 : index
    %c0_59 = arith.constant 0 : index
    %48 = vector.load %arg1[%c0_55, %c1_56, %c1_57, %c0_58, %c0_59] : memref<1x4x17x17x3xbf16, #tpu.memory_space<vmem>>, vector<1x1x16x16x3xbf16>
    %49 = vector.shape_cast %48 : vector<1x1x16x16x3xbf16> to vector<16x16x3xbf16>
    %50 = vector.shape_cast %49 : vector<16x16x3xbf16> to vector<256x3xbf16>
    %c7 = arith.constant 7 : index
    %c0_60 = arith.constant 0 : index
    %c0_61 = arith.constant 0 : index
    %51 = vector.load %arg2[%c7, %c0_60, %c0_61] : memref<9x3x8xbf16, #tpu.memory_space<vmem>>, vector<1x3x8xbf16>
    %52 = vector.shape_cast %51 : vector<1x3x8xbf16> to vector<3x8xbf16>
    %cst_62 = arith.constant dense<0.000000e+00> : vector<256x8xf32>
    %53 = tpu.matmul %50, %52, %cst_62 {dimension_numbers = #tpu.dot_dimension_numbers<[1], [0], [0], [1], [0, 0, 1, 1], [], []>} : vector<256x3xbf16>, vector<3x8xbf16>, vector<256x8xf32> -> vector<256x8xf32>
    %54 = arith.addf %47, %53 : vector<256x8xf32>
    %c0_63 = arith.constant 0 : index
    %c0_64 = arith.constant 0 : index
    %c1_65 = arith.constant 1 : index
    %c1_66 = arith.constant 1 : index
    %c0_67 = arith.constant 0 : index
    %55 = vector.load %arg1[%c0_63, %c0_64, %c1_65, %c1_66, %c0_67] : memref<1x4x17x17x3xbf16, #tpu.memory_space<vmem>>, vector<1x1x16x16x3xbf16>
    %56 = vector.shape_cast %55 : vector<1x1x16x16x3xbf16> to vector<16x16x3xbf16>
    %57 = vector.shape_cast %56 : vector<16x16x3xbf16> to vector<256x3xbf16>
    %c8 = arith.constant 8 : index
    %c0_68 = arith.constant 0 : index
    %c0_69 = arith.constant 0 : index
    %58 = vector.load %arg2[%c8, %c0_68, %c0_69] : memref<9x3x8xbf16, #tpu.memory_space<vmem>>, vector<1x3x8xbf16>
    %59 = vector.shape_cast %58 : vector<1x3x8xbf16> to vector<3x8xbf16>
    %cst_70 = arith.constant dense<0.000000e+00> : vector<256x8xf32>
    %60 = tpu.matmul %57, %59, %cst_70 {dimension_numbers = #tpu.dot_dimension_numbers<[1], [0], [0], [1], [0, 0, 1, 1], [], []>} : vector<256x3xbf16>, vector<3x8xbf16>, vector<256x8xf32> -> vector<256x8xf32>
    %61 = arith.addf %54, %60 : vector<256x8xf32>
    %c0_71 = arith.constant 0 : index
    %c0_72 = arith.constant 0 : index
    %62 = vector.load %arg3[%c0_71, %c0_72] : memref<1x8xf32, #tpu.memory_space<vmem>>, vector<1x8xf32>
    %63 = vector.broadcast %62 : vector<1x8xf32> to vector<256x8xf32>
    %64 = arith.addf %61, %63 : vector<256x8xf32>
    %cst_73 = arith.constant 0.000000e+00 : f32
    %65 = vector.broadcast %cst_73 : f32 to vector<256x8xf32>
    %66 = arith.maximumf %64, %65 : vector<256x8xf32>
    %67 = arith.truncf %66 : vector<256x8xf32> to vector<256x8xbf16>
    %c0_74 = arith.constant 0 : index
    %c0_75 = arith.constant 0 : index
    %c0_76 = arith.constant 0 : index
    %68 = vector.load %arg4[%c0_74, %c0_75, %c0_76] : memref<1x256x8xbf16, #tpu.memory_space<vmem>>, vector<1x256x8xbf16>
    %69 = vector.shape_cast %68 : vector<1x256x8xbf16> to vector<256x8xbf16>
    %70 = vector.shape_cast %67 : vector<256x8xbf16> to vector<1x256x8xbf16>
    tpu.vector_store %arg4[%c0_74, %c0_75, %c0_76], %70 {strides = array<i32>} : memref<1x256x8xbf16, #tpu.memory_space<vmem>>, vector<1x256x8xbf16>,
    return
  }
  func.func @transform_0(%arg0: i32) -> (i32, i32, i32, i32, i32) {
    %c0_i32 = arith.constant 0 : i32
    %c0_i32_0 = arith.constant 0 : i32
    %c0_i32_1 = arith.constant 0 : i32
    %c0_i32_2 = arith.constant 0 : i32
    %c0_i32_3 = arith.constant 0 : i32
    return %arg0, %c0_i32, %c0_i32_0, %c0_i32_1, %c0_i32_2 : i32, i32, i32, i32, i32
  }
  func.func @transform_1(%arg0: i32) -> (i32, i32, i32) {
    %c0_i32 = arith.constant 0 : i32
    %c0_i32_0 = arith.constant 0 : i32
    %c0_i32_1 = arith.constant 0 : i32
    %c0_i32_2 = arith.constant 0 : i32
    return %c0_i32, %c0_i32_0, %c0_i32_1 : i32, i32, i32
  }
  func.func @transform_2(%arg0: i32) -> (i32, i32) {
    %c0_i32 = arith.constant 0 : i32
    %c0_i32_0 = arith.constant 0 : i32
    %c0_i32_1 = arith.constant 0 : i32
    return %c0_i32, %c0_i32_0 : i32, i32
  }
  func.func @transform_3(%arg0: i32) -> (i32, i32, i32) {
    %c0_i32 = arith.constant 0 : i32
    %c0_i32_0 = arith.constant 0 : i32
    %c0_i32_1 = arith.constant 0 : i32
    return %arg0, %c0_i32, %c0_i32_0 : i32, i32, i32
  }
}

module attributes {stable_mosaic.version = 11 : i64} {
  func.func @_conv_kernel(%arg0: i32, %arg1: memref<1x4x9x9x8xbf16, #tpu.memory_space<vmem>>, %arg2: memref<9x8x16xbf16, #tpu.memory_space<vmem>>, %arg3: memref<1x16xf32, #tpu.memory_space<vmem>>, %arg4: memref<1x64x16xbf16, #tpu.memory_space<vmem>>) attributes {dimension_semantics = [#tpu.dimension_semantics<parallel>], iteration_bounds = array<i64: 2>, scalar_prefetch = 0 : i64, scratch_operands = 0 : i64, tpu.core_type = #tpu.core_type<tc>, window_params = [{transform_indices = @transform_0, window_bounds = array<i64: 1, 4, 9, 9, 8>}, {pipeline_mode = #tpu.pipeline_mode<synchronous>, transform_indices = @transform_1, window_bounds = array<i64: 9, 8, 16>}, {pipeline_mode = #tpu.pipeline_mode<synchronous>, transform_indices = @transform_2, window_bounds = array<i64: 1, 16>}, {transform_indices = @transform_3, window_bounds = array<i64: 1, 64, 16>}]} {
    %c0 = arith.constant 0 : index
    %c0_0 = arith.constant 0 : index
    %c0_1 = arith.constant 0 : index
    %c0_2 = arith.constant 0 : index
    %c0_3 = arith.constant 0 : index
    %0 = vector.load %arg1[%c0, %c0_0, %c0_1, %c0_2, %c0_3] : memref<1x4x9x9x8xbf16, #tpu.memory_space<vmem>>, vector<1x1x8x8x8xbf16>
    %1 = vector.shape_cast %0 : vector<1x1x8x8x8xbf16> to vector<8x8x8xbf16>
    %2 = vector.shape_cast %1 : vector<8x8x8xbf16> to vector<64x8xbf16>
    %c0_4 = arith.constant 0 : index
    %c0_5 = arith.constant 0 : index
    %c0_6 = arith.constant 0 : index
    %3 = vector.load %arg2[%c0_4, %c0_5, %c0_6] : memref<9x8x16xbf16, #tpu.memory_space<vmem>>, vector<1x8x16xbf16>
    %4 = vector.shape_cast %3 : vector<1x8x16xbf16> to vector<8x16xbf16>
    %cst = arith.constant dense<0.000000e+00> : vector<64x16xf32>
    %5 = tpu.matmul %2, %4, %cst {dimension_numbers = #tpu.dot_dimension_numbers<[1], [0], [0], [1], [0, 0, 1, 1], [], []>} : vector<64x8xbf16>, vector<8x16xbf16>, vector<64x16xf32> -> vector<64x16xf32>
    %c0_7 = arith.constant 0 : index
    %c1 = arith.constant 1 : index
    %c0_8 = arith.constant 0 : index
    %c0_9 = arith.constant 0 : index
    %c0_10 = arith.constant 0 : index
    %6 = vector.load %arg1[%c0_7, %c1, %c0_8, %c0_9, %c0_10] : memref<1x4x9x9x8xbf16, #tpu.memory_space<vmem>>, vector<1x1x8x8x8xbf16>
    %7 = vector.shape_cast %6 : vector<1x1x8x8x8xbf16> to vector<8x8x8xbf16>
    %8 = vector.shape_cast %7 : vector<8x8x8xbf16> to vector<64x8xbf16>
    %c1_11 = arith.constant 1 : index
    %c0_12 = arith.constant 0 : index
    %c0_13 = arith.constant 0 : index
    %9 = vector.load %arg2[%c1_11, %c0_12, %c0_13] : memref<9x8x16xbf16, #tpu.memory_space<vmem>>, vector<1x8x16xbf16>
    %10 = vector.shape_cast %9 : vector<1x8x16xbf16> to vector<8x16xbf16>
    %cst_14 = arith.constant dense<0.000000e+00> : vector<64x16xf32>
    %11 = tpu.matmul %8, %10, %cst_14 {dimension_numbers = #tpu.dot_dimension_numbers<[1], [0], [0], [1], [0, 0, 1, 1], [], []>} : vector<64x8xbf16>, vector<8x16xbf16>, vector<64x16xf32> -> vector<64x16xf32>
    %12 = arith.addf %5, %11 : vector<64x16xf32>
    %c0_15 = arith.constant 0 : index
    %c0_16 = arith.constant 0 : index
    %c0_17 = arith.constant 0 : index
    %c1_18 = arith.constant 1 : index
    %c0_19 = arith.constant 0 : index
    %13 = vector.load %arg1[%c0_15, %c0_16, %c0_17, %c1_18, %c0_19] : memref<1x4x9x9x8xbf16, #tpu.memory_space<vmem>>, vector<1x1x8x8x8xbf16>
    %14 = vector.shape_cast %13 : vector<1x1x8x8x8xbf16> to vector<8x8x8xbf16>
    %15 = vector.shape_cast %14 : vector<8x8x8xbf16> to vector<64x8xbf16>
    %c2 = arith.constant 2 : index
    %c0_20 = arith.constant 0 : index
    %c0_21 = arith.constant 0 : index
    %16 = vector.load %arg2[%c2, %c0_20, %c0_21] : memref<9x8x16xbf16, #tpu.memory_space<vmem>>, vector<1x8x16xbf16>
    %17 = vector.shape_cast %16 : vector<1x8x16xbf16> to vector<8x16xbf16>
    %cst_22 = arith.constant dense<0.000000e+00> : vector<64x16xf32>
    %18 = tpu.matmul %15, %17, %cst_22 {dimension_numbers = #tpu.dot_dimension_numbers<[1], [0], [0], [1], [0, 0, 1, 1], [], []>} : vector<64x8xbf16>, vector<8x16xbf16>, vector<64x16xf32> -> vector<64x16xf32>
    %19 = arith.addf %12, %18 : vector<64x16xf32>
    %c0_23 = arith.constant 0 : index
    %c2_24 = arith.constant 2 : index
    %c0_25 = arith.constant 0 : index
    %c0_26 = arith.constant 0 : index
    %c0_27 = arith.constant 0 : index
    %20 = vector.load %arg1[%c0_23, %c2_24, %c0_25, %c0_26, %c0_27] : memref<1x4x9x9x8xbf16, #tpu.memory_space<vmem>>, vector<1x1x8x8x8xbf16>
    %21 = vector.shape_cast %20 : vector<1x1x8x8x8xbf16> to vector<8x8x8xbf16>
    %22 = vector.shape_cast %21 : vector<8x8x8xbf16> to vector<64x8xbf16>
    %c3 = arith.constant 3 : index
    %c0_28 = arith.constant 0 : index
    %c0_29 = arith.constant 0 : index
    %23 = vector.load %arg2[%c3, %c0_28, %c0_29] : memref<9x8x16xbf16, #tpu.memory_space<vmem>>, vector<1x8x16xbf16>
    %24 = vector.shape_cast %23 : vector<1x8x16xbf16> to vector<8x16xbf16>
    %cst_30 = arith.constant dense<0.000000e+00> : vector<64x16xf32>
    %25 = tpu.matmul %22, %24, %cst_30 {dimension_numbers = #tpu.dot_dimension_numbers<[1], [0], [0], [1], [0, 0, 1, 1], [], []>} : vector<64x8xbf16>, vector<8x16xbf16>, vector<64x16xf32> -> vector<64x16xf32>
    %26 = arith.addf %19, %25 : vector<64x16xf32>
    %c0_31 = arith.constant 0 : index
    %c3_32 = arith.constant 3 : index
    %c0_33 = arith.constant 0 : index
    %c0_34 = arith.constant 0 : index
    %c0_35 = arith.constant 0 : index
    %27 = vector.load %arg1[%c0_31, %c3_32, %c0_33, %c0_34, %c0_35] : memref<1x4x9x9x8xbf16, #tpu.memory_space<vmem>>, vector<1x1x8x8x8xbf16>
    %28 = vector.shape_cast %27 : vector<1x1x8x8x8xbf16> to vector<8x8x8xbf16>
    %29 = vector.shape_cast %28 : vector<8x8x8xbf16> to vector<64x8xbf16>
    %c4 = arith.constant 4 : index
    %c0_36 = arith.constant 0 : index
    %c0_37 = arith.constant 0 : index
    %30 = vector.load %arg2[%c4, %c0_36, %c0_37] : memref<9x8x16xbf16, #tpu.memory_space<vmem>>, vector<1x8x16xbf16>
    %31 = vector.shape_cast %30 : vector<1x8x16xbf16> to vector<8x16xbf16>
    %cst_38 = arith.constant dense<0.000000e+00> : vector<64x16xf32>
    %32 = tpu.matmul %29, %31, %cst_38 {dimension_numbers = #tpu.dot_dimension_numbers<[1], [0], [0], [1], [0, 0, 1, 1], [], []>} : vector<64x8xbf16>, vector<8x16xbf16>, vector<64x16xf32> -> vector<64x16xf32>
    %33 = arith.addf %26, %32 : vector<64x16xf32>
    %c0_39 = arith.constant 0 : index
    %c2_40 = arith.constant 2 : index
    %c0_41 = arith.constant 0 : index
    %c1_42 = arith.constant 1 : index
    %c0_43 = arith.constant 0 : index
    %34 = vector.load %arg1[%c0_39, %c2_40, %c0_41, %c1_42, %c0_43] : memref<1x4x9x9x8xbf16, #tpu.memory_space<vmem>>, vector<1x1x8x8x8xbf16>
    %35 = vector.shape_cast %34 : vector<1x1x8x8x8xbf16> to vector<8x8x8xbf16>
    %36 = vector.shape_cast %35 : vector<8x8x8xbf16> to vector<64x8xbf16>
    %c5 = arith.constant 5 : index
    %c0_44 = arith.constant 0 : index
    %c0_45 = arith.constant 0 : index
    %37 = vector.load %arg2[%c5, %c0_44, %c0_45] : memref<9x8x16xbf16, #tpu.memory_space<vmem>>, vector<1x8x16xbf16>
    %38 = vector.shape_cast %37 : vector<1x8x16xbf16> to vector<8x16xbf16>
    %cst_46 = arith.constant dense<0.000000e+00> : vector<64x16xf32>
    %39 = tpu.matmul %36, %38, %cst_46 {dimension_numbers = #tpu.dot_dimension_numbers<[1], [0], [0], [1], [0, 0, 1, 1], [], []>} : vector<64x8xbf16>, vector<8x16xbf16>, vector<64x16xf32> -> vector<64x16xf32>
    %40 = arith.addf %33, %39 : vector<64x16xf32>
    %c0_47 = arith.constant 0 : index
    %c0_48 = arith.constant 0 : index
    %c1_49 = arith.constant 1 : index
    %c0_50 = arith.constant 0 : index
    %c0_51 = arith.constant 0 : index
    %41 = vector.load %arg1[%c0_47, %c0_48, %c1_49, %c0_50, %c0_51] : memref<1x4x9x9x8xbf16, #tpu.memory_space<vmem>>, vector<1x1x8x8x8xbf16>
    %42 = vector.shape_cast %41 : vector<1x1x8x8x8xbf16> to vector<8x8x8xbf16>
    %43 = vector.shape_cast %42 : vector<8x8x8xbf16> to vector<64x8xbf16>
    %c6 = arith.constant 6 : index
    %c0_52 = arith.constant 0 : index
    %c0_53 = arith.constant 0 : index
    %44 = vector.load %arg2[%c6, %c0_52, %c0_53] : memref<9x8x16xbf16, #tpu.memory_space<vmem>>, vector<1x8x16xbf16>
    %45 = vector.shape_cast %44 : vector<1x8x16xbf16> to vector<8x16xbf16>
    %cst_54 = arith.constant dense<0.000000e+00> : vector<64x16xf32>
    %46 = tpu.matmul %43, %45, %cst_54 {dimension_numbers = #tpu.dot_dimension_numbers<[1], [0], [0], [1], [0, 0, 1, 1], [], []>} : vector<64x8xbf16>, vector<8x16xbf16>, vector<64x16xf32> -> vector<64x16xf32>
    %47 = arith.addf %40, %46 : vector<64x16xf32>
    %c0_55 = arith.constant 0 : index
    %c1_56 = arith.constant 1 : index
    %c1_57 = arith.constant 1 : index
    %c0_58 = arith.constant 0 : index
    %c0_59 = arith.constant 0 : index
    %48 = vector.load %arg1[%c0_55, %c1_56, %c1_57, %c0_58, %c0_59] : memref<1x4x9x9x8xbf16, #tpu.memory_space<vmem>>, vector<1x1x8x8x8xbf16>
    %49 = vector.shape_cast %48 : vector<1x1x8x8x8xbf16> to vector<8x8x8xbf16>
    %50 = vector.shape_cast %49 : vector<8x8x8xbf16> to vector<64x8xbf16>
    %c7 = arith.constant 7 : index
    %c0_60 = arith.constant 0 : index
    %c0_61 = arith.constant 0 : index
    %51 = vector.load %arg2[%c7, %c0_60, %c0_61] : memref<9x8x16xbf16, #tpu.memory_space<vmem>>, vector<1x8x16xbf16>
    %52 = vector.shape_cast %51 : vector<1x8x16xbf16> to vector<8x16xbf16>
    %cst_62 = arith.constant dense<0.000000e+00> : vector<64x16xf32>
    %53 = tpu.matmul %50, %52, %cst_62 {dimension_numbers = #tpu.dot_dimension_numbers<[1], [0], [0], [1], [0, 0, 1, 1], [], []>} : vector<64x8xbf16>, vector<8x16xbf16>, vector<64x16xf32> -> vector<64x16xf32>
    %54 = arith.addf %47, %53 : vector<64x16xf32>
    %c0_63 = arith.constant 0 : index
    %c0_64 = arith.constant 0 : index
    %c1_65 = arith.constant 1 : index
    %c1_66 = arith.constant 1 : index
    %c0_67 = arith.constant 0 : index
    %55 = vector.load %arg1[%c0_63, %c0_64, %c1_65, %c1_66, %c0_67] : memref<1x4x9x9x8xbf16, #tpu.memory_space<vmem>>, vector<1x1x8x8x8xbf16>
    %56 = vector.shape_cast %55 : vector<1x1x8x8x8xbf16> to vector<8x8x8xbf16>
    %57 = vector.shape_cast %56 : vector<8x8x8xbf16> to vector<64x8xbf16>
    %c8 = arith.constant 8 : index
    %c0_68 = arith.constant 0 : index
    %c0_69 = arith.constant 0 : index
    %58 = vector.load %arg2[%c8, %c0_68, %c0_69] : memref<9x8x16xbf16, #tpu.memory_space<vmem>>, vector<1x8x16xbf16>
    %59 = vector.shape_cast %58 : vector<1x8x16xbf16> to vector<8x16xbf16>
    %cst_70 = arith.constant dense<0.000000e+00> : vector<64x16xf32>
    %60 = tpu.matmul %57, %59, %cst_70 {dimension_numbers = #tpu.dot_dimension_numbers<[1], [0], [0], [1], [0, 0, 1, 1], [], []>} : vector<64x8xbf16>, vector<8x16xbf16>, vector<64x16xf32> -> vector<64x16xf32>
    %61 = arith.addf %54, %60 : vector<64x16xf32>
    %c0_71 = arith.constant 0 : index
    %c0_72 = arith.constant 0 : index
    %62 = vector.load %arg3[%c0_71, %c0_72] : memref<1x16xf32, #tpu.memory_space<vmem>>, vector<1x16xf32>
    %63 = vector.broadcast %62 : vector<1x16xf32> to vector<64x16xf32>
    %64 = arith.addf %61, %63 : vector<64x16xf32>
    %cst_73 = arith.constant 0.000000e+00 : f32
    %65 = vector.broadcast %cst_73 : f32 to vector<64x16xf32>
    %66 = arith.maximumf %64, %65 : vector<64x16xf32>
    %67 = arith.truncf %66 : vector<64x16xf32> to vector<64x16xbf16>
    %c0_74 = arith.constant 0 : index
    %c0_75 = arith.constant 0 : index
    %c0_76 = arith.constant 0 : index
    %68 = vector.load %arg4[%c0_74, %c0_75, %c0_76] : memref<1x64x16xbf16, #tpu.memory_space<vmem>>, vector<1x64x16xbf16>
    %69 = vector.shape_cast %68 : vector<1x64x16xbf16> to vector<64x16xbf16>
    %70 = vector.shape_cast %67 : vector<64x16xbf16> to vector<1x64x16xbf16>
    tpu.vector_store %arg4[%c0_74, %c0_75, %c0_76], %70 {strides = array<i32>} : memref<1x64x16xbf16, #tpu.memory_space<vmem>>, vector<1x64x16xbf16>,
    return
  }
  func.func @transform_0(%arg0: i32) -> (i32, i32, i32, i32, i32) {
    %c0_i32 = arith.constant 0 : i32
    %c0_i32_0 = arith.constant 0 : i32
    %c0_i32_1 = arith.constant 0 : i32
    %c0_i32_2 = arith.constant 0 : i32
    %c0_i32_3 = arith.constant 0 : i32
    return %arg0, %c0_i32, %c0_i32_0, %c0_i32_1, %c0_i32_2 : i32, i32, i32, i32, i32
  }
  func.func @transform_1(%arg0: i32) -> (i32, i32, i32) {
    %c0_i32 = arith.constant 0 : i32
    %c0_i32_0 = arith.constant 0 : i32
    %c0_i32_1 = arith.constant 0 : i32
    %c0_i32_2 = arith.constant 0 : i32
    return %c0_i32, %c0_i32_0, %c0_i32_1 : i32, i32, i32
  }
  func.func @transform_2(%arg0: i32) -> (i32, i32) {
    %c0_i32 = arith.constant 0 : i32
    %c0_i32_0 = arith.constant 0 : i32
    %c0_i32_1 = arith.constant 0 : i32
    return %c0_i32, %c0_i32_0 : i32, i32
  }
  func.func @transform_3(%arg0: i32) -> (i32, i32, i32) {
    %c0_i32 = arith.constant 0 : i32
    %c0_i32_0 = arith.constant 0 : i32
    %c0_i32_1 = arith.constant 0 : i32
    return %arg0, %c0_i32, %c0_i32_0 : i32, i32, i32
  }
}

module attributes {stable_mosaic.version = 11 : i64} {
  func.func @_conv_kernel(%arg0: i32, %arg1: memref<1x4x5x5x16xbf16, #tpu.memory_space<vmem>>, %arg2: memref<9x16x24xbf16, #tpu.memory_space<vmem>>, %arg3: memref<1x24xf32, #tpu.memory_space<vmem>>, %arg4: memref<1x16x24xbf16, #tpu.memory_space<vmem>>) attributes {dimension_semantics = [#tpu.dimension_semantics<parallel>], iteration_bounds = array<i64: 2>, scalar_prefetch = 0 : i64, scratch_operands = 0 : i64, tpu.core_type = #tpu.core_type<tc>, window_params = [{transform_indices = @transform_0, window_bounds = array<i64: 1, 4, 5, 5, 16>}, {pipeline_mode = #tpu.pipeline_mode<synchronous>, transform_indices = @transform_1, window_bounds = array<i64: 9, 16, 24>}, {pipeline_mode = #tpu.pipeline_mode<synchronous>, transform_indices = @transform_2, window_bounds = array<i64: 1, 24>}, {transform_indices = @transform_3, window_bounds = array<i64: 1, 16, 24>}]} {
    %c0 = arith.constant 0 : index
    %c0_0 = arith.constant 0 : index
    %c0_1 = arith.constant 0 : index
    %c0_2 = arith.constant 0 : index
    %c0_3 = arith.constant 0 : index
    %0 = vector.load %arg1[%c0, %c0_0, %c0_1, %c0_2, %c0_3] : memref<1x4x5x5x16xbf16, #tpu.memory_space<vmem>>, vector<1x1x4x4x16xbf16>
    %1 = vector.shape_cast %0 : vector<1x1x4x4x16xbf16> to vector<4x4x16xbf16>
    %2 = vector.shape_cast %1 : vector<4x4x16xbf16> to vector<16x16xbf16>
    %c0_4 = arith.constant 0 : index
    %c0_5 = arith.constant 0 : index
    %c0_6 = arith.constant 0 : index
    %3 = vector.load %arg2[%c0_4, %c0_5, %c0_6] : memref<9x16x24xbf16, #tpu.memory_space<vmem>>, vector<1x16x24xbf16>
    %4 = vector.shape_cast %3 : vector<1x16x24xbf16> to vector<16x24xbf16>
    %cst = arith.constant dense<0.000000e+00> : vector<16x24xf32>
    %5 = tpu.matmul %2, %4, %cst {dimension_numbers = #tpu.dot_dimension_numbers<[1], [0], [0], [1], [0, 0, 1, 1], [], []>} : vector<16x16xbf16>, vector<16x24xbf16>, vector<16x24xf32> -> vector<16x24xf32>
    %c0_7 = arith.constant 0 : index
    %c1 = arith.constant 1 : index
    %c0_8 = arith.constant 0 : index
    %c0_9 = arith.constant 0 : index
    %c0_10 = arith.constant 0 : index
    %6 = vector.load %arg1[%c0_7, %c1, %c0_8, %c0_9, %c0_10] : memref<1x4x5x5x16xbf16, #tpu.memory_space<vmem>>, vector<1x1x4x4x16xbf16>
    %7 = vector.shape_cast %6 : vector<1x1x4x4x16xbf16> to vector<4x4x16xbf16>
    %8 = vector.shape_cast %7 : vector<4x4x16xbf16> to vector<16x16xbf16>
    %c1_11 = arith.constant 1 : index
    %c0_12 = arith.constant 0 : index
    %c0_13 = arith.constant 0 : index
    %9 = vector.load %arg2[%c1_11, %c0_12, %c0_13] : memref<9x16x24xbf16, #tpu.memory_space<vmem>>, vector<1x16x24xbf16>
    %10 = vector.shape_cast %9 : vector<1x16x24xbf16> to vector<16x24xbf16>
    %cst_14 = arith.constant dense<0.000000e+00> : vector<16x24xf32>
    %11 = tpu.matmul %8, %10, %cst_14 {dimension_numbers = #tpu.dot_dimension_numbers<[1], [0], [0], [1], [0, 0, 1, 1], [], []>} : vector<16x16xbf16>, vector<16x24xbf16>, vector<16x24xf32> -> vector<16x24xf32>
    %12 = arith.addf %5, %11 : vector<16x24xf32>
    %c0_15 = arith.constant 0 : index
    %c0_16 = arith.constant 0 : index
    %c0_17 = arith.constant 0 : index
    %c1_18 = arith.constant 1 : index
    %c0_19 = arith.constant 0 : index
    %13 = vector.load %arg1[%c0_15, %c0_16, %c0_17, %c1_18, %c0_19] : memref<1x4x5x5x16xbf16, #tpu.memory_space<vmem>>, vector<1x1x4x4x16xbf16>
    %14 = vector.shape_cast %13 : vector<1x1x4x4x16xbf16> to vector<4x4x16xbf16>
    %15 = vector.shape_cast %14 : vector<4x4x16xbf16> to vector<16x16xbf16>
    %c2 = arith.constant 2 : index
    %c0_20 = arith.constant 0 : index
    %c0_21 = arith.constant 0 : index
    %16 = vector.load %arg2[%c2, %c0_20, %c0_21] : memref<9x16x24xbf16, #tpu.memory_space<vmem>>, vector<1x16x24xbf16>
    %17 = vector.shape_cast %16 : vector<1x16x24xbf16> to vector<16x24xbf16>
    %cst_22 = arith.constant dense<0.000000e+00> : vector<16x24xf32>
    %18 = tpu.matmul %15, %17, %cst_22 {dimension_numbers = #tpu.dot_dimension_numbers<[1], [0], [0], [1], [0, 0, 1, 1], [], []>} : vector<16x16xbf16>, vector<16x24xbf16>, vector<16x24xf32> -> vector<16x24xf32>
    %19 = arith.addf %12, %18 : vector<16x24xf32>
    %c0_23 = arith.constant 0 : index
    %c2_24 = arith.constant 2 : index
    %c0_25 = arith.constant 0 : index
    %c0_26 = arith.constant 0 : index
    %c0_27 = arith.constant 0 : index
    %20 = vector.load %arg1[%c0_23, %c2_24, %c0_25, %c0_26, %c0_27] : memref<1x4x5x5x16xbf16, #tpu.memory_space<vmem>>, vector<1x1x4x4x16xbf16>
    %21 = vector.shape_cast %20 : vector<1x1x4x4x16xbf16> to vector<4x4x16xbf16>
    %22 = vector.shape_cast %21 : vector<4x4x16xbf16> to vector<16x16xbf16>
    %c3 = arith.constant 3 : index
    %c0_28 = arith.constant 0 : index
    %c0_29 = arith.constant 0 : index
    %23 = vector.load %arg2[%c3, %c0_28, %c0_29] : memref<9x16x24xbf16, #tpu.memory_space<vmem>>, vector<1x16x24xbf16>
    %24 = vector.shape_cast %23 : vector<1x16x24xbf16> to vector<16x24xbf16>
    %cst_30 = arith.constant dense<0.000000e+00> : vector<16x24xf32>
    %25 = tpu.matmul %22, %24, %cst_30 {dimension_numbers = #tpu.dot_dimension_numbers<[1], [0], [0], [1], [0, 0, 1, 1], [], []>} : vector<16x16xbf16>, vector<16x24xbf16>, vector<16x24xf32> -> vector<16x24xf32>
    %26 = arith.addf %19, %25 : vector<16x24xf32>
    %c0_31 = arith.constant 0 : index
    %c3_32 = arith.constant 3 : index
    %c0_33 = arith.constant 0 : index
    %c0_34 = arith.constant 0 : index
    %c0_35 = arith.constant 0 : index
    %27 = vector.load %arg1[%c0_31, %c3_32, %c0_33, %c0_34, %c0_35] : memref<1x4x5x5x16xbf16, #tpu.memory_space<vmem>>, vector<1x1x4x4x16xbf16>
    %28 = vector.shape_cast %27 : vector<1x1x4x4x16xbf16> to vector<4x4x16xbf16>
    %29 = vector.shape_cast %28 : vector<4x4x16xbf16> to vector<16x16xbf16>
    %c4 = arith.constant 4 : index
    %c0_36 = arith.constant 0 : index
    %c0_37 = arith.constant 0 : index
    %30 = vector.load %arg2[%c4, %c0_36, %c0_37] : memref<9x16x24xbf16, #tpu.memory_space<vmem>>, vector<1x16x24xbf16>
    %31 = vector.shape_cast %30 : vector<1x16x24xbf16> to vector<16x24xbf16>
    %cst_38 = arith.constant dense<0.000000e+00> : vector<16x24xf32>
    %32 = tpu.matmul %29, %31, %cst_38 {dimension_numbers = #tpu.dot_dimension_numbers<[1], [0], [0], [1], [0, 0, 1, 1], [], []>} : vector<16x16xbf16>, vector<16x24xbf16>, vector<16x24xf32> -> vector<16x24xf32>
    %33 = arith.addf %26, %32 : vector<16x24xf32>
    %c0_39 = arith.constant 0 : index
    %c2_40 = arith.constant 2 : index
    %c0_41 = arith.constant 0 : index
    %c1_42 = arith.constant 1 : index
    %c0_43 = arith.constant 0 : index
    %34 = vector.load %arg1[%c0_39, %c2_40, %c0_41, %c1_42, %c0_43] : memref<1x4x5x5x16xbf16, #tpu.memory_space<vmem>>, vector<1x1x4x4x16xbf16>
    %35 = vector.shape_cast %34 : vector<1x1x4x4x16xbf16> to vector<4x4x16xbf16>
    %36 = vector.shape_cast %35 : vector<4x4x16xbf16> to vector<16x16xbf16>
    %c5 = arith.constant 5 : index
    %c0_44 = arith.constant 0 : index
    %c0_45 = arith.constant 0 : index
    %37 = vector.load %arg2[%c5, %c0_44, %c0_45] : memref<9x16x24xbf16, #tpu.memory_space<vmem>>, vector<1x16x24xbf16>
    %38 = vector.shape_cast %37 : vector<1x16x24xbf16> to vector<16x24xbf16>
    %cst_46 = arith.constant dense<0.000000e+00> : vector<16x24xf32>
    %39 = tpu.matmul %36, %38, %cst_46 {dimension_numbers = #tpu.dot_dimension_numbers<[1], [0], [0], [1], [0, 0, 1, 1], [], []>} : vector<16x16xbf16>, vector<16x24xbf16>, vector<16x24xf32> -> vector<16x24xf32>
    %40 = arith.addf %33, %39 : vector<16x24xf32>
    %c0_47 = arith.constant 0 : index
    %c0_48 = arith.constant 0 : index
    %c1_49 = arith.constant 1 : index
    %c0_50 = arith.constant 0 : index
    %c0_51 = arith.constant 0 : index
    %41 = vector.load %arg1[%c0_47, %c0_48, %c1_49, %c0_50, %c0_51] : memref<1x4x5x5x16xbf16, #tpu.memory_space<vmem>>, vector<1x1x4x4x16xbf16>
    %42 = vector.shape_cast %41 : vector<1x1x4x4x16xbf16> to vector<4x4x16xbf16>
    %43 = vector.shape_cast %42 : vector<4x4x16xbf16> to vector<16x16xbf16>
    %c6 = arith.constant 6 : index
    %c0_52 = arith.constant 0 : index
    %c0_53 = arith.constant 0 : index
    %44 = vector.load %arg2[%c6, %c0_52, %c0_53] : memref<9x16x24xbf16, #tpu.memory_space<vmem>>, vector<1x16x24xbf16>
    %45 = vector.shape_cast %44 : vector<1x16x24xbf16> to vector<16x24xbf16>
    %cst_54 = arith.constant dense<0.000000e+00> : vector<16x24xf32>
    %46 = tpu.matmul %43, %45, %cst_54 {dimension_numbers = #tpu.dot_dimension_numbers<[1], [0], [0], [1], [0, 0, 1, 1], [], []>} : vector<16x16xbf16>, vector<16x24xbf16>, vector<16x24xf32> -> vector<16x24xf32>
    %47 = arith.addf %40, %46 : vector<16x24xf32>
    %c0_55 = arith.constant 0 : index
    %c1_56 = arith.constant 1 : index
    %c1_57 = arith.constant 1 : index
    %c0_58 = arith.constant 0 : index
    %c0_59 = arith.constant 0 : index
    %48 = vector.load %arg1[%c0_55, %c1_56, %c1_57, %c0_58, %c0_59] : memref<1x4x5x5x16xbf16, #tpu.memory_space<vmem>>, vector<1x1x4x4x16xbf16>
    %49 = vector.shape_cast %48 : vector<1x1x4x4x16xbf16> to vector<4x4x16xbf16>
    %50 = vector.shape_cast %49 : vector<4x4x16xbf16> to vector<16x16xbf16>
    %c7 = arith.constant 7 : index
    %c0_60 = arith.constant 0 : index
    %c0_61 = arith.constant 0 : index
    %51 = vector.load %arg2[%c7, %c0_60, %c0_61] : memref<9x16x24xbf16, #tpu.memory_space<vmem>>, vector<1x16x24xbf16>
    %52 = vector.shape_cast %51 : vector<1x16x24xbf16> to vector<16x24xbf16>
    %cst_62 = arith.constant dense<0.000000e+00> : vector<16x24xf32>
    %53 = tpu.matmul %50, %52, %cst_62 {dimension_numbers = #tpu.dot_dimension_numbers<[1], [0], [0], [1], [0, 0, 1, 1], [], []>} : vector<16x16xbf16>, vector<16x24xbf16>, vector<16x24xf32> -> vector<16x24xf32>
    %54 = arith.addf %47, %53 : vector<16x24xf32>
    %c0_63 = arith.constant 0 : index
    %c0_64 = arith.constant 0 : index
    %c1_65 = arith.constant 1 : index
    %c1_66 = arith.constant 1 : index
    %c0_67 = arith.constant 0 : index
    %55 = vector.load %arg1[%c0_63, %c0_64, %c1_65, %c1_66, %c0_67] : memref<1x4x5x5x16xbf16, #tpu.memory_space<vmem>>, vector<1x1x4x4x16xbf16>
    %56 = vector.shape_cast %55 : vector<1x1x4x4x16xbf16> to vector<4x4x16xbf16>
    %57 = vector.shape_cast %56 : vector<4x4x16xbf16> to vector<16x16xbf16>
    %c8 = arith.constant 8 : index
    %c0_68 = arith.constant 0 : index
    %c0_69 = arith.constant 0 : index
    %58 = vector.load %arg2[%c8, %c0_68, %c0_69] : memref<9x16x24xbf16, #tpu.memory_space<vmem>>, vector<1x16x24xbf16>
    %59 = vector.shape_cast %58 : vector<1x16x24xbf16> to vector<16x24xbf16>
    %cst_70 = arith.constant dense<0.000000e+00> : vector<16x24xf32>
    %60 = tpu.matmul %57, %59, %cst_70 {dimension_numbers = #tpu.dot_dimension_numbers<[1], [0], [0], [1], [0, 0, 1, 1], [], []>} : vector<16x16xbf16>, vector<16x24xbf16>, vector<16x24xf32> -> vector<16x24xf32>
    %61 = arith.addf %54, %60 : vector<16x24xf32>
    %c0_71 = arith.constant 0 : index
    %c0_72 = arith.constant 0 : index
    %62 = vector.load %arg3[%c0_71, %c0_72] : memref<1x24xf32, #tpu.memory_space<vmem>>, vector<1x24xf32>
    %63 = vector.broadcast %62 : vector<1x24xf32> to vector<16x24xf32>
    %64 = arith.addf %61, %63 : vector<16x24xf32>
    %cst_73 = arith.constant 0.000000e+00 : f32
    %65 = vector.broadcast %cst_73 : f32 to vector<16x24xf32>
    %66 = arith.maximumf %64, %65 : vector<16x24xf32>
    %67 = arith.truncf %66 : vector<16x24xf32> to vector<16x24xbf16>
    %c0_74 = arith.constant 0 : index
    %c0_75 = arith.constant 0 : index
    %c0_76 = arith.constant 0 : index
    %68 = vector.load %arg4[%c0_74, %c0_75, %c0_76] : memref<1x16x24xbf16, #tpu.memory_space<vmem>>, vector<1x16x24xbf16>
    %69 = vector.shape_cast %68 : vector<1x16x24xbf16> to vector<16x24xbf16>
    %70 = vector.shape_cast %67 : vector<16x24xbf16> to vector<1x16x24xbf16>
    tpu.vector_store %arg4[%c0_74, %c0_75, %c0_76], %70 {strides = array<i32>} : memref<1x16x24xbf16, #tpu.memory_space<vmem>>, vector<1x16x24xbf16>,
    return
  }
  func.func @transform_0(%arg0: i32) -> (i32, i32, i32, i32, i32) {
    %c0_i32 = arith.constant 0 : i32
    %c0_i32_0 = arith.constant 0 : i32
    %c0_i32_1 = arith.constant 0 : i32
    %c0_i32_2 = arith.constant 0 : i32
    %c0_i32_3 = arith.constant 0 : i32
    return %arg0, %c0_i32, %c0_i32_0, %c0_i32_1, %c0_i32_2 : i32, i32, i32, i32, i32
  }
  func.func @transform_1(%arg0: i32) -> (i32, i32, i32) {
    %c0_i32 = arith.constant 0 : i32
    %c0_i32_0 = arith.constant 0 : i32
    %c0_i32_1 = arith.constant 0 : i32
    %c0_i32_2 = arith.constant 0 : i32
    return %c0_i32, %c0_i32_0, %c0_i32_1 : i32, i32, i32
  }
  func.func @transform_2(%arg0: i32) -> (i32, i32) {
    %c0_i32 = arith.constant 0 : i32
    %c0_i32_0 = arith.constant 0 : i32
    %c0_i32_1 = arith.constant 0 : i32
    return %c0_i32, %c0_i32_0 : i32, i32
  }
  func.func @transform_3(%arg0: i32) -> (i32, i32, i32) {
    %c0_i32 = arith.constant 0 : i32
    %c0_i32_0 = arith.constant 0 : i32
    %c0_i32_1 = arith.constant 0 : i32
    return %arg0, %c0_i32, %c0_i32_0 : i32, i32, i32
  }
}

module attributes {stable_mosaic.version = 11 : i64} {
  func.func @_conv_kernel(%arg0: i32, %arg1: memref<1x4x3x3x24xbf16, #tpu.memory_space<vmem>>, %arg2: memref<9x24x32xbf16, #tpu.memory_space<vmem>>, %arg3: memref<1x32xf32, #tpu.memory_space<vmem>>, %arg4: memref<1x4x32xbf16, #tpu.memory_space<vmem>>) attributes {dimension_semantics = [#tpu.dimension_semantics<parallel>], iteration_bounds = array<i64: 2>, scalar_prefetch = 0 : i64, scratch_operands = 0 : i64, tpu.core_type = #tpu.core_type<tc>, window_params = [{transform_indices = @transform_0, window_bounds = array<i64: 1, 4, 3, 3, 24>}, {pipeline_mode = #tpu.pipeline_mode<synchronous>, transform_indices = @transform_1, window_bounds = array<i64: 9, 24, 32>}, {pipeline_mode = #tpu.pipeline_mode<synchronous>, transform_indices = @transform_2, window_bounds = array<i64: 1, 32>}, {transform_indices = @transform_3, window_bounds = array<i64: 1, 4, 32>}]} {
    %c0 = arith.constant 0 : index
    %c0_0 = arith.constant 0 : index
    %c0_1 = arith.constant 0 : index
    %c0_2 = arith.constant 0 : index
    %c0_3 = arith.constant 0 : index
    %0 = vector.load %arg1[%c0, %c0_0, %c0_1, %c0_2, %c0_3] : memref<1x4x3x3x24xbf16, #tpu.memory_space<vmem>>, vector<1x1x2x2x24xbf16>
    %1 = vector.shape_cast %0 : vector<1x1x2x2x24xbf16> to vector<2x2x24xbf16>
    %2 = vector.shape_cast %1 : vector<2x2x24xbf16> to vector<4x24xbf16>
    %c0_4 = arith.constant 0 : index
    %c0_5 = arith.constant 0 : index
    %c0_6 = arith.constant 0 : index
    %3 = vector.load %arg2[%c0_4, %c0_5, %c0_6] : memref<9x24x32xbf16, #tpu.memory_space<vmem>>, vector<1x24x32xbf16>
    %4 = vector.shape_cast %3 : vector<1x24x32xbf16> to vector<24x32xbf16>
    %cst = arith.constant dense<0.000000e+00> : vector<4x32xf32>
    %5 = tpu.matmul %2, %4, %cst {dimension_numbers = #tpu.dot_dimension_numbers<[1], [0], [0], [1], [0, 0, 1, 1], [], []>} : vector<4x24xbf16>, vector<24x32xbf16>, vector<4x32xf32> -> vector<4x32xf32>
    %c0_7 = arith.constant 0 : index
    %c1 = arith.constant 1 : index
    %c0_8 = arith.constant 0 : index
    %c0_9 = arith.constant 0 : index
    %c0_10 = arith.constant 0 : index
    %6 = vector.load %arg1[%c0_7, %c1, %c0_8, %c0_9, %c0_10] : memref<1x4x3x3x24xbf16, #tpu.memory_space<vmem>>, vector<1x1x2x2x24xbf16>
    %7 = vector.shape_cast %6 : vector<1x1x2x2x24xbf16> to vector<2x2x24xbf16>
    %8 = vector.shape_cast %7 : vector<2x2x24xbf16> to vector<4x24xbf16>
    %c1_11 = arith.constant 1 : index
    %c0_12 = arith.constant 0 : index
    %c0_13 = arith.constant 0 : index
    %9 = vector.load %arg2[%c1_11, %c0_12, %c0_13] : memref<9x24x32xbf16, #tpu.memory_space<vmem>>, vector<1x24x32xbf16>
    %10 = vector.shape_cast %9 : vector<1x24x32xbf16> to vector<24x32xbf16>
    %cst_14 = arith.constant dense<0.000000e+00> : vector<4x32xf32>
    %11 = tpu.matmul %8, %10, %cst_14 {dimension_numbers = #tpu.dot_dimension_numbers<[1], [0], [0], [1], [0, 0, 1, 1], [], []>} : vector<4x24xbf16>, vector<24x32xbf16>, vector<4x32xf32> -> vector<4x32xf32>
    %12 = arith.addf %5, %11 : vector<4x32xf32>
    %c0_15 = arith.constant 0 : index
    %c0_16 = arith.constant 0 : index
    %c0_17 = arith.constant 0 : index
    %c1_18 = arith.constant 1 : index
    %c0_19 = arith.constant 0 : index
    %13 = vector.load %arg1[%c0_15, %c0_16, %c0_17, %c1_18, %c0_19] : memref<1x4x3x3x24xbf16, #tpu.memory_space<vmem>>, vector<1x1x2x2x24xbf16>
    %14 = vector.shape_cast %13 : vector<1x1x2x2x24xbf16> to vector<2x2x24xbf16>
    %15 = vector.shape_cast %14 : vector<2x2x24xbf16> to vector<4x24xbf16>
    %c2 = arith.constant 2 : index
    %c0_20 = arith.constant 0 : index
    %c0_21 = arith.constant 0 : index
    %16 = vector.load %arg2[%c2, %c0_20, %c0_21] : memref<9x24x32xbf16, #tpu.memory_space<vmem>>, vector<1x24x32xbf16>
    %17 = vector.shape_cast %16 : vector<1x24x32xbf16> to vector<24x32xbf16>
    %cst_22 = arith.constant dense<0.000000e+00> : vector<4x32xf32>
    %18 = tpu.matmul %15, %17, %cst_22 {dimension_numbers = #tpu.dot_dimension_numbers<[1], [0], [0], [1], [0, 0, 1, 1], [], []>} : vector<4x24xbf16>, vector<24x32xbf16>, vector<4x32xf32> -> vector<4x32xf32>
    %19 = arith.addf %12, %18 : vector<4x32xf32>
    %c0_23 = arith.constant 0 : index
    %c2_24 = arith.constant 2 : index
    %c0_25 = arith.constant 0 : index
    %c0_26 = arith.constant 0 : index
    %c0_27 = arith.constant 0 : index
    %20 = vector.load %arg1[%c0_23, %c2_24, %c0_25, %c0_26, %c0_27] : memref<1x4x3x3x24xbf16, #tpu.memory_space<vmem>>, vector<1x1x2x2x24xbf16>
    %21 = vector.shape_cast %20 : vector<1x1x2x2x24xbf16> to vector<2x2x24xbf16>
    %22 = vector.shape_cast %21 : vector<2x2x24xbf16> to vector<4x24xbf16>
    %c3 = arith.constant 3 : index
    %c0_28 = arith.constant 0 : index
    %c0_29 = arith.constant 0 : index
    %23 = vector.load %arg2[%c3, %c0_28, %c0_29] : memref<9x24x32xbf16, #tpu.memory_space<vmem>>, vector<1x24x32xbf16>
    %24 = vector.shape_cast %23 : vector<1x24x32xbf16> to vector<24x32xbf16>
    %cst_30 = arith.constant dense<0.000000e+00> : vector<4x32xf32>
    %25 = tpu.matmul %22, %24, %cst_30 {dimension_numbers = #tpu.dot_dimension_numbers<[1], [0], [0], [1], [0, 0, 1, 1], [], []>} : vector<4x24xbf16>, vector<24x32xbf16>, vector<4x32xf32> -> vector<4x32xf32>
    %26 = arith.addf %19, %25 : vector<4x32xf32>
    %c0_31 = arith.constant 0 : index
    %c3_32 = arith.constant 3 : index
    %c0_33 = arith.constant 0 : index
    %c0_34 = arith.constant 0 : index
    %c0_35 = arith.constant 0 : index
    %27 = vector.load %arg1[%c0_31, %c3_32, %c0_33, %c0_34, %c0_35] : memref<1x4x3x3x24xbf16, #tpu.memory_space<vmem>>, vector<1x1x2x2x24xbf16>
    %28 = vector.shape_cast %27 : vector<1x1x2x2x24xbf16> to vector<2x2x24xbf16>
    %29 = vector.shape_cast %28 : vector<2x2x24xbf16> to vector<4x24xbf16>
    %c4 = arith.constant 4 : index
    %c0_36 = arith.constant 0 : index
    %c0_37 = arith.constant 0 : index
    %30 = vector.load %arg2[%c4, %c0_36, %c0_37] : memref<9x24x32xbf16, #tpu.memory_space<vmem>>, vector<1x24x32xbf16>
    %31 = vector.shape_cast %30 : vector<1x24x32xbf16> to vector<24x32xbf16>
    %cst_38 = arith.constant dense<0.000000e+00> : vector<4x32xf32>
    %32 = tpu.matmul %29, %31, %cst_38 {dimension_numbers = #tpu.dot_dimension_numbers<[1], [0], [0], [1], [0, 0, 1, 1], [], []>} : vector<4x24xbf16>, vector<24x32xbf16>, vector<4x32xf32> -> vector<4x32xf32>
    %33 = arith.addf %26, %32 : vector<4x32xf32>
    %c0_39 = arith.constant 0 : index
    %c2_40 = arith.constant 2 : index
    %c0_41 = arith.constant 0 : index
    %c1_42 = arith.constant 1 : index
    %c0_43 = arith.constant 0 : index
    %34 = vector.load %arg1[%c0_39, %c2_40, %c0_41, %c1_42, %c0_43] : memref<1x4x3x3x24xbf16, #tpu.memory_space<vmem>>, vector<1x1x2x2x24xbf16>
    %35 = vector.shape_cast %34 : vector<1x1x2x2x24xbf16> to vector<2x2x24xbf16>
    %36 = vector.shape_cast %35 : vector<2x2x24xbf16> to vector<4x24xbf16>
    %c5 = arith.constant 5 : index
    %c0_44 = arith.constant 0 : index
    %c0_45 = arith.constant 0 : index
    %37 = vector.load %arg2[%c5, %c0_44, %c0_45] : memref<9x24x32xbf16, #tpu.memory_space<vmem>>, vector<1x24x32xbf16>
    %38 = vector.shape_cast %37 : vector<1x24x32xbf16> to vector<24x32xbf16>
    %cst_46 = arith.constant dense<0.000000e+00> : vector<4x32xf32>
    %39 = tpu.matmul %36, %38, %cst_46 {dimension_numbers = #tpu.dot_dimension_numbers<[1], [0], [0], [1], [0, 0, 1, 1], [], []>} : vector<4x24xbf16>, vector<24x32xbf16>, vector<4x32xf32> -> vector<4x32xf32>
    %40 = arith.addf %33, %39 : vector<4x32xf32>
    %c0_47 = arith.constant 0 : index
    %c0_48 = arith.constant 0 : index
    %c1_49 = arith.constant 1 : index
    %c0_50 = arith.constant 0 : index
    %c0_51 = arith.constant 0 : index
    %41 = vector.load %arg1[%c0_47, %c0_48, %c1_49, %c0_50, %c0_51] : memref<1x4x3x3x24xbf16, #tpu.memory_space<vmem>>, vector<1x1x2x2x24xbf16>
    %42 = vector.shape_cast %41 : vector<1x1x2x2x24xbf16> to vector<2x2x24xbf16>
    %43 = vector.shape_cast %42 : vector<2x2x24xbf16> to vector<4x24xbf16>
    %c6 = arith.constant 6 : index
    %c0_52 = arith.constant 0 : index
    %c0_53 = arith.constant 0 : index
    %44 = vector.load %arg2[%c6, %c0_52, %c0_53] : memref<9x24x32xbf16, #tpu.memory_space<vmem>>, vector<1x24x32xbf16>
    %45 = vector.shape_cast %44 : vector<1x24x32xbf16> to vector<24x32xbf16>
    %cst_54 = arith.constant dense<0.000000e+00> : vector<4x32xf32>
    %46 = tpu.matmul %43, %45, %cst_54 {dimension_numbers = #tpu.dot_dimension_numbers<[1], [0], [0], [1], [0, 0, 1, 1], [], []>} : vector<4x24xbf16>, vector<24x32xbf16>, vector<4x32xf32> -> vector<4x32xf32>
    %47 = arith.addf %40, %46 : vector<4x32xf32>
    %c0_55 = arith.constant 0 : index
    %c1_56 = arith.constant 1 : index
    %c1_57 = arith.constant 1 : index
    %c0_58 = arith.constant 0 : index
    %c0_59 = arith.constant 0 : index
    %48 = vector.load %arg1[%c0_55, %c1_56, %c1_57, %c0_58, %c0_59] : memref<1x4x3x3x24xbf16, #tpu.memory_space<vmem>>, vector<1x1x2x2x24xbf16>
    %49 = vector.shape_cast %48 : vector<1x1x2x2x24xbf16> to vector<2x2x24xbf16>
    %50 = vector.shape_cast %49 : vector<2x2x24xbf16> to vector<4x24xbf16>
    %c7 = arith.constant 7 : index
    %c0_60 = arith.constant 0 : index
    %c0_61 = arith.constant 0 : index
    %51 = vector.load %arg2[%c7, %c0_60, %c0_61] : memref<9x24x32xbf16, #tpu.memory_space<vmem>>, vector<1x24x32xbf16>
    %52 = vector.shape_cast %51 : vector<1x24x32xbf16> to vector<24x32xbf16>
    %cst_62 = arith.constant dense<0.000000e+00> : vector<4x32xf32>
    %53 = tpu.matmul %50, %52, %cst_62 {dimension_numbers = #tpu.dot_dimension_numbers<[1], [0], [0], [1], [0, 0, 1, 1], [], []>} : vector<4x24xbf16>, vector<24x32xbf16>, vector<4x32xf32> -> vector<4x32xf32>
    %54 = arith.addf %47, %53 : vector<4x32xf32>
    %c0_63 = arith.constant 0 : index
    %c0_64 = arith.constant 0 : index
    %c1_65 = arith.constant 1 : index
    %c1_66 = arith.constant 1 : index
    %c0_67 = arith.constant 0 : index
    %55 = vector.load %arg1[%c0_63, %c0_64, %c1_65, %c1_66, %c0_67] : memref<1x4x3x3x24xbf16, #tpu.memory_space<vmem>>, vector<1x1x2x2x24xbf16>
    %56 = vector.shape_cast %55 : vector<1x1x2x2x24xbf16> to vector<2x2x24xbf16>
    %57 = vector.shape_cast %56 : vector<2x2x24xbf16> to vector<4x24xbf16>
    %c8 = arith.constant 8 : index
    %c0_68 = arith.constant 0 : index
    %c0_69 = arith.constant 0 : index
    %58 = vector.load %arg2[%c8, %c0_68, %c0_69] : memref<9x24x32xbf16, #tpu.memory_space<vmem>>, vector<1x24x32xbf16>
    %59 = vector.shape_cast %58 : vector<1x24x32xbf16> to vector<24x32xbf16>
    %cst_70 = arith.constant dense<0.000000e+00> : vector<4x32xf32>
    %60 = tpu.matmul %57, %59, %cst_70 {dimension_numbers = #tpu.dot_dimension_numbers<[1], [0], [0], [1], [0, 0, 1, 1], [], []>} : vector<4x24xbf16>, vector<24x32xbf16>, vector<4x32xf32> -> vector<4x32xf32>
    %61 = arith.addf %54, %60 : vector<4x32xf32>
    %c0_71 = arith.constant 0 : index
    %c0_72 = arith.constant 0 : index
    %62 = vector.load %arg3[%c0_71, %c0_72] : memref<1x32xf32, #tpu.memory_space<vmem>>, vector<1x32xf32>
    %63 = vector.broadcast %62 : vector<1x32xf32> to vector<4x32xf32>
    %64 = arith.addf %61, %63 : vector<4x32xf32>
    %cst_73 = arith.constant 0.000000e+00 : f32
    %65 = vector.broadcast %cst_73 : f32 to vector<4x32xf32>
    %66 = arith.maximumf %64, %65 : vector<4x32xf32>
    %67 = arith.truncf %66 : vector<4x32xf32> to vector<4x32xbf16>
    %c0_74 = arith.constant 0 : index
    %c0_75 = arith.constant 0 : index
    %c0_76 = arith.constant 0 : index
    %68 = vector.load %arg4[%c0_74, %c0_75, %c0_76] : memref<1x4x32xbf16, #tpu.memory_space<vmem>>, vector<1x4x32xbf16>
    %69 = vector.shape_cast %68 : vector<1x4x32xbf16> to vector<4x32xbf16>
    %70 = vector.shape_cast %67 : vector<4x32xbf16> to vector<1x4x32xbf16>
    tpu.vector_store %arg4[%c0_74, %c0_75, %c0_76], %70 {strides = array<i32>} : memref<1x4x32xbf16, #tpu.memory_space<vmem>>, vector<1x4x32xbf16>,
    return
  }
  func.func @transform_0(%arg0: i32) -> (i32, i32, i32, i32, i32) {
    %c0_i32 = arith.constant 0 : i32
    %c0_i32_0 = arith.constant 0 : i32
    %c0_i32_1 = arith.constant 0 : i32
    %c0_i32_2 = arith.constant 0 : i32
    %c0_i32_3 = arith.constant 0 : i32
    return %arg0, %c0_i32, %c0_i32_0, %c0_i32_1, %c0_i32_2 : i32, i32, i32, i32, i32
  }
  func.func @transform_1(%arg0: i32) -> (i32, i32, i32) {
    %c0_i32 = arith.constant 0 : i32
    %c0_i32_0 = arith.constant 0 : i32
    %c0_i32_1 = arith.constant 0 : i32
    %c0_i32_2 = arith.constant 0 : i32
    return %c0_i32, %c0_i32_0, %c0_i32_1 : i32, i32, i32
  }
  func.func @transform_2(%arg0: i32) -> (i32, i32) {
    %c0_i32 = arith.constant 0 : i32
    %c0_i32_0 = arith.constant 0 : i32
    %c0_i32_1 = arith.constant 0 : i32
    return %c0_i32, %c0_i32_0 : i32, i32
  }
  func.func @transform_3(%arg0: i32) -> (i32, i32, i32) {
    %c0_i32 = arith.constant 0 : i32
    %c0_i32_0 = arith.constant 0 : i32
    %c0_i32_1 = arith.constant 0 : i32
    return %arg0, %c0_i32, %c0_i32_0 : i32, i32, i32
  }
}

module attributes {stable_mosaic.version = 11 : i64} {
  func.func @_conv_kernel(%arg0: i32, %arg1: memref<1x4x2x2x32xbf16, #tpu.memory_space<vmem>>, %arg2: memref<9x32x48xbf16, #tpu.memory_space<vmem>>, %arg3: memref<1x48xf32, #tpu.memory_space<vmem>>, %arg4: memref<1x1x48xbf16, #tpu.memory_space<vmem>>) attributes {dimension_semantics = [#tpu.dimension_semantics<parallel>], iteration_bounds = array<i64: 2>, scalar_prefetch = 0 : i64, scratch_operands = 0 : i64, tpu.core_type = #tpu.core_type<tc>, window_params = [{transform_indices = @transform_0, window_bounds = array<i64: 1, 4, 2, 2, 32>}, {pipeline_mode = #tpu.pipeline_mode<synchronous>, transform_indices = @transform_1, window_bounds = array<i64: 9, 32, 48>}, {pipeline_mode = #tpu.pipeline_mode<synchronous>, transform_indices = @transform_2, window_bounds = array<i64: 1, 48>}, {transform_indices = @transform_3, window_bounds = array<i64: 1, 1, 48>}]} {
    %c0 = arith.constant 0 : index
    %c0_0 = arith.constant 0 : index
    %c0_1 = arith.constant 0 : index
    %c0_2 = arith.constant 0 : index
    %c0_3 = arith.constant 0 : index
    %0 = vector.load %arg1[%c0, %c0_0, %c0_1, %c0_2, %c0_3] : memref<1x4x2x2x32xbf16, #tpu.memory_space<vmem>>, vector<1x1x1x1x32xbf16>
    %1 = vector.shape_cast %0 : vector<1x1x1x1x32xbf16> to vector<1x1x32xbf16>
    %2 = vector.shape_cast %1 : vector<1x1x32xbf16> to vector<1x32xbf16>
    %c0_4 = arith.constant 0 : index
    %c0_5 = arith.constant 0 : index
    %c0_6 = arith.constant 0 : index
    %3 = vector.load %arg2[%c0_4, %c0_5, %c0_6] : memref<9x32x48xbf16, #tpu.memory_space<vmem>>, vector<1x32x48xbf16>
    %4 = vector.shape_cast %3 : vector<1x32x48xbf16> to vector<32x48xbf16>
    %cst = arith.constant dense<0.000000e+00> : vector<1x48xf32>
    %5 = tpu.matmul %2, %4, %cst {dimension_numbers = #tpu.dot_dimension_numbers<[1], [0], [0], [1], [0, 0, 1, 1], [], []>} : vector<1x32xbf16>, vector<32x48xbf16>, vector<1x48xf32> -> vector<1x48xf32>
    %c0_7 = arith.constant 0 : index
    %c1 = arith.constant 1 : index
    %c0_8 = arith.constant 0 : index
    %c0_9 = arith.constant 0 : index
    %c0_10 = arith.constant 0 : index
    %6 = vector.load %arg1[%c0_7, %c1, %c0_8, %c0_9, %c0_10] : memref<1x4x2x2x32xbf16, #tpu.memory_space<vmem>>, vector<1x1x1x1x32xbf16>
    %7 = vector.shape_cast %6 : vector<1x1x1x1x32xbf16> to vector<1x1x32xbf16>
    %8 = vector.shape_cast %7 : vector<1x1x32xbf16> to vector<1x32xbf16>
    %c1_11 = arith.constant 1 : index
    %c0_12 = arith.constant 0 : index
    %c0_13 = arith.constant 0 : index
    %9 = vector.load %arg2[%c1_11, %c0_12, %c0_13] : memref<9x32x48xbf16, #tpu.memory_space<vmem>>, vector<1x32x48xbf16>
    %10 = vector.shape_cast %9 : vector<1x32x48xbf16> to vector<32x48xbf16>
    %cst_14 = arith.constant dense<0.000000e+00> : vector<1x48xf32>
    %11 = tpu.matmul %8, %10, %cst_14 {dimension_numbers = #tpu.dot_dimension_numbers<[1], [0], [0], [1], [0, 0, 1, 1], [], []>} : vector<1x32xbf16>, vector<32x48xbf16>, vector<1x48xf32> -> vector<1x48xf32>
    %12 = arith.addf %5, %11 : vector<1x48xf32>
    %c0_15 = arith.constant 0 : index
    %c0_16 = arith.constant 0 : index
    %c0_17 = arith.constant 0 : index
    %c1_18 = arith.constant 1 : index
    %c0_19 = arith.constant 0 : index
    %13 = vector.load %arg1[%c0_15, %c0_16, %c0_17, %c1_18, %c0_19] : memref<1x4x2x2x32xbf16, #tpu.memory_space<vmem>>, vector<1x1x1x1x32xbf16>
    %14 = vector.shape_cast %13 : vector<1x1x1x1x32xbf16> to vector<1x1x32xbf16>
    %15 = vector.shape_cast %14 : vector<1x1x32xbf16> to vector<1x32xbf16>
    %c2 = arith.constant 2 : index
    %c0_20 = arith.constant 0 : index
    %c0_21 = arith.constant 0 : index
    %16 = vector.load %arg2[%c2, %c0_20, %c0_21] : memref<9x32x48xbf16, #tpu.memory_space<vmem>>, vector<1x32x48xbf16>
    %17 = vector.shape_cast %16 : vector<1x32x48xbf16> to vector<32x48xbf16>
    %cst_22 = arith.constant dense<0.000000e+00> : vector<1x48xf32>
    %18 = tpu.matmul %15, %17, %cst_22 {dimension_numbers = #tpu.dot_dimension_numbers<[1], [0], [0], [1], [0, 0, 1, 1], [], []>} : vector<1x32xbf16>, vector<32x48xbf16>, vector<1x48xf32> -> vector<1x48xf32>
    %19 = arith.addf %12, %18 : vector<1x48xf32>
    %c0_23 = arith.constant 0 : index
    %c2_24 = arith.constant 2 : index
    %c0_25 = arith.constant 0 : index
    %c0_26 = arith.constant 0 : index
    %c0_27 = arith.constant 0 : index
    %20 = vector.load %arg1[%c0_23, %c2_24, %c0_25, %c0_26, %c0_27] : memref<1x4x2x2x32xbf16, #tpu.memory_space<vmem>>, vector<1x1x1x1x32xbf16>
    %21 = vector.shape_cast %20 : vector<1x1x1x1x32xbf16> to vector<1x1x32xbf16>
    %22 = vector.shape_cast %21 : vector<1x1x32xbf16> to vector<1x32xbf16>
    %c3 = arith.constant 3 : index
    %c0_28 = arith.constant 0 : index
    %c0_29 = arith.constant 0 : index
    %23 = vector.load %arg2[%c3, %c0_28, %c0_29] : memref<9x32x48xbf16, #tpu.memory_space<vmem>>, vector<1x32x48xbf16>
    %24 = vector.shape_cast %23 : vector<1x32x48xbf16> to vector<32x48xbf16>
    %cst_30 = arith.constant dense<0.000000e+00> : vector<1x48xf32>
    %25 = tpu.matmul %22, %24, %cst_30 {dimension_numbers = #tpu.dot_dimension_numbers<[1], [0], [0], [1], [0, 0, 1, 1], [], []>} : vector<1x32xbf16>, vector<32x48xbf16>, vector<1x48xf32> -> vector<1x48xf32>
    %26 = arith.addf %19, %25 : vector<1x48xf32>
    %c0_31 = arith.constant 0 : index
    %c3_32 = arith.constant 3 : index
    %c0_33 = arith.constant 0 : index
    %c0_34 = arith.constant 0 : index
    %c0_35 = arith.constant 0 : index
    %27 = vector.load %arg1[%c0_31, %c3_32, %c0_33, %c0_34, %c0_35] : memref<1x4x2x2x32xbf16, #tpu.memory_space<vmem>>, vector<1x1x1x1x32xbf16>
    %28 = vector.shape_cast %27 : vector<1x1x1x1x32xbf16> to vector<1x1x32xbf16>
    %29 = vector.shape_cast %28 : vector<1x1x32xbf16> to vector<1x32xbf16>
    %c4 = arith.constant 4 : index
    %c0_36 = arith.constant 0 : index
    %c0_37 = arith.constant 0 : index
    %30 = vector.load %arg2[%c4, %c0_36, %c0_37] : memref<9x32x48xbf16, #tpu.memory_space<vmem>>, vector<1x32x48xbf16>
    %31 = vector.shape_cast %30 : vector<1x32x48xbf16> to vector<32x48xbf16>
    %cst_38 = arith.constant dense<0.000000e+00> : vector<1x48xf32>
    %32 = tpu.matmul %29, %31, %cst_38 {dimension_numbers = #tpu.dot_dimension_numbers<[1], [0], [0], [1], [0, 0, 1, 1], [], []>} : vector<1x32xbf16>, vector<32x48xbf16>, vector<1x48xf32> -> vector<1x48xf32>
    %33 = arith.addf %26, %32 : vector<1x48xf32>
    %c0_39 = arith.constant 0 : index
    %c2_40 = arith.constant 2 : index
    %c0_41 = arith.constant 0 : index
    %c1_42 = arith.constant 1 : index
    %c0_43 = arith.constant 0 : index
    %34 = vector.load %arg1[%c0_39, %c2_40, %c0_41, %c1_42, %c0_43] : memref<1x4x2x2x32xbf16, #tpu.memory_space<vmem>>, vector<1x1x1x1x32xbf16>
    %35 = vector.shape_cast %34 : vector<1x1x1x1x32xbf16> to vector<1x1x32xbf16>
    %36 = vector.shape_cast %35 : vector<1x1x32xbf16> to vector<1x32xbf16>
    %c5 = arith.constant 5 : index
    %c0_44 = arith.constant 0 : index
    %c0_45 = arith.constant 0 : index
    %37 = vector.load %arg2[%c5, %c0_44, %c0_45] : memref<9x32x48xbf16, #tpu.memory_space<vmem>>, vector<1x32x48xbf16>
    %38 = vector.shape_cast %37 : vector<1x32x48xbf16> to vector<32x48xbf16>
    %cst_46 = arith.constant dense<0.000000e+00> : vector<1x48xf32>
    %39 = tpu.matmul %36, %38, %cst_46 {dimension_numbers = #tpu.dot_dimension_numbers<[1], [0], [0], [1], [0, 0, 1, 1], [], []>} : vector<1x32xbf16>, vector<32x48xbf16>, vector<1x48xf32> -> vector<1x48xf32>
    %40 = arith.addf %33, %39 : vector<1x48xf32>
    %c0_47 = arith.constant 0 : index
    %c0_48 = arith.constant 0 : index
    %c1_49 = arith.constant 1 : index
    %c0_50 = arith.constant 0 : index
    %c0_51 = arith.constant 0 : index
    %41 = vector.load %arg1[%c0_47, %c0_48, %c1_49, %c0_50, %c0_51] : memref<1x4x2x2x32xbf16, #tpu.memory_space<vmem>>, vector<1x1x1x1x32xbf16>
    %42 = vector.shape_cast %41 : vector<1x1x1x1x32xbf16> to vector<1x1x32xbf16>
    %43 = vector.shape_cast %42 : vector<1x1x32xbf16> to vector<1x32xbf16>
    %c6 = arith.constant 6 : index
    %c0_52 = arith.constant 0 : index
    %c0_53 = arith.constant 0 : index
    %44 = vector.load %arg2[%c6, %c0_52, %c0_53] : memref<9x32x48xbf16, #tpu.memory_space<vmem>>, vector<1x32x48xbf16>
    %45 = vector.shape_cast %44 : vector<1x32x48xbf16> to vector<32x48xbf16>
    %cst_54 = arith.constant dense<0.000000e+00> : vector<1x48xf32>
    %46 = tpu.matmul %43, %45, %cst_54 {dimension_numbers = #tpu.dot_dimension_numbers<[1], [0], [0], [1], [0, 0, 1, 1], [], []>} : vector<1x32xbf16>, vector<32x48xbf16>, vector<1x48xf32> -> vector<1x48xf32>
    %47 = arith.addf %40, %46 : vector<1x48xf32>
    %c0_55 = arith.constant 0 : index
    %c1_56 = arith.constant 1 : index
    %c1_57 = arith.constant 1 : index
    %c0_58 = arith.constant 0 : index
    %c0_59 = arith.constant 0 : index
    %48 = vector.load %arg1[%c0_55, %c1_56, %c1_57, %c0_58, %c0_59] : memref<1x4x2x2x32xbf16, #tpu.memory_space<vmem>>, vector<1x1x1x1x32xbf16>
    %49 = vector.shape_cast %48 : vector<1x1x1x1x32xbf16> to vector<1x1x32xbf16>
    %50 = vector.shape_cast %49 : vector<1x1x32xbf16> to vector<1x32xbf16>
    %c7 = arith.constant 7 : index
    %c0_60 = arith.constant 0 : index
    %c0_61 = arith.constant 0 : index
    %51 = vector.load %arg2[%c7, %c0_60, %c0_61] : memref<9x32x48xbf16, #tpu.memory_space<vmem>>, vector<1x32x48xbf16>
    %52 = vector.shape_cast %51 : vector<1x32x48xbf16> to vector<32x48xbf16>
    %cst_62 = arith.constant dense<0.000000e+00> : vector<1x48xf32>
    %53 = tpu.matmul %50, %52, %cst_62 {dimension_numbers = #tpu.dot_dimension_numbers<[1], [0], [0], [1], [0, 0, 1, 1], [], []>} : vector<1x32xbf16>, vector<32x48xbf16>, vector<1x48xf32> -> vector<1x48xf32>
    %54 = arith.addf %47, %53 : vector<1x48xf32>
    %c0_63 = arith.constant 0 : index
    %c0_64 = arith.constant 0 : index
    %c1_65 = arith.constant 1 : index
    %c1_66 = arith.constant 1 : index
    %c0_67 = arith.constant 0 : index
    %55 = vector.load %arg1[%c0_63, %c0_64, %c1_65, %c1_66, %c0_67] : memref<1x4x2x2x32xbf16, #tpu.memory_space<vmem>>, vector<1x1x1x1x32xbf16>
    %56 = vector.shape_cast %55 : vector<1x1x1x1x32xbf16> to vector<1x1x32xbf16>
    %57 = vector.shape_cast %56 : vector<1x1x32xbf16> to vector<1x32xbf16>
    %c8 = arith.constant 8 : index
    %c0_68 = arith.constant 0 : index
    %c0_69 = arith.constant 0 : index
    %58 = vector.load %arg2[%c8, %c0_68, %c0_69] : memref<9x32x48xbf16, #tpu.memory_space<vmem>>, vector<1x32x48xbf16>
    %59 = vector.shape_cast %58 : vector<1x32x48xbf16> to vector<32x48xbf16>
    %cst_70 = arith.constant dense<0.000000e+00> : vector<1x48xf32>
    %60 = tpu.matmul %57, %59, %cst_70 {dimension_numbers = #tpu.dot_dimension_numbers<[1], [0], [0], [1], [0, 0, 1, 1], [], []>} : vector<1x32xbf16>, vector<32x48xbf16>, vector<1x48xf32> -> vector<1x48xf32>
    %61 = arith.addf %54, %60 : vector<1x48xf32>
    %c0_71 = arith.constant 0 : index
    %c0_72 = arith.constant 0 : index
    %62 = vector.load %arg3[%c0_71, %c0_72] : memref<1x48xf32, #tpu.memory_space<vmem>>, vector<1x48xf32>
    %63 = arith.addf %61, %62 : vector<1x48xf32>
    %cst_73 = arith.constant 0.000000e+00 : f32
    %64 = vector.broadcast %cst_73 : f32 to vector<1x48xf32>
    %65 = arith.maximumf %63, %64 : vector<1x48xf32>
    %66 = arith.truncf %65 : vector<1x48xf32> to vector<1x48xbf16>
    %c0_74 = arith.constant 0 : index
    %c0_75 = arith.constant 0 : index
    %c0_76 = arith.constant 0 : index
    %67 = vector.load %arg4[%c0_74, %c0_75, %c0_76] : memref<1x1x48xbf16, #tpu.memory_space<vmem>>, vector<1x1x48xbf16>
    %68 = vector.shape_cast %67 : vector<1x1x48xbf16> to vector<1x48xbf16>
    %69 = vector.shape_cast %66 : vector<1x48xbf16> to vector<1x1x48xbf16>
    tpu.vector_store %arg4[%c0_74, %c0_75, %c0_76], %69 {strides = array<i32>} : memref<1x1x48xbf16, #tpu.memory_space<vmem>>, vector<1x1x48xbf16>,
    return
  }
  func.func @transform_0(%arg0: i32) -> (i32, i32, i32, i32, i32) {
    %c0_i32 = arith.constant 0 : i32
    %c0_i32_0 = arith.constant 0 : i32
    %c0_i32_1 = arith.constant 0 : i32
    %c0_i32_2 = arith.constant 0 : i32
    %c0_i32_3 = arith.constant 0 : i32
    return %arg0, %c0_i32, %c0_i32_0, %c0_i32_1, %c0_i32_2 : i32, i32, i32, i32, i32
  }
  func.func @transform_1(%arg0: i32) -> (i32, i32, i32) {
    %c0_i32 = arith.constant 0 : i32
    %c0_i32_0 = arith.constant 0 : i32
    %c0_i32_1 = arith.constant 0 : i32
    %c0_i32_2 = arith.constant 0 : i32
    return %c0_i32, %c0_i32_0, %c0_i32_1 : i32, i32, i32
  }
  func.func @transform_2(%arg0: i32) -> (i32, i32) {
    %c0_i32 = arith.constant 0 : i32
    %c0_i32_0 = arith.constant 0 : i32
    %c0_i32_1 = arith.constant 0 : i32
    return %c0_i32, %c0_i32_0 : i32, i32
  }
  func.func @transform_3(%arg0: i32) -> (i32, i32, i32) {
    %c0_i32 = arith.constant 0 : i32
    %c0_i32_0 = arith.constant 0 : i32
    %c0_i32_1 = arith.constant 0 : i32
    return %arg0, %c0_i32, %c0_i32_0 : i32, i32, i32
  }
}

module attributes {stable_mosaic.version = 11 : i64} {
  func.func @_conv_kernel(%arg0: i32, %arg1: memref<1x1x1x1x48xbf16, #tpu.memory_space<vmem>>, %arg2: memref<1x48x32xbf16, #tpu.memory_space<vmem>>, %arg3: memref<1x32xf32, #tpu.memory_space<vmem>>, %arg4: memref<1x1x32xbf16, #tpu.memory_space<vmem>>) attributes {dimension_semantics = [#tpu.dimension_semantics<parallel>], iteration_bounds = array<i64: 2>, scalar_prefetch = 0 : i64, scratch_operands = 0 : i64, tpu.core_type = #tpu.core_type<tc>, window_params = [{transform_indices = @transform_0, window_bounds = array<i64: 1, 1, 1, 1, 48>}, {pipeline_mode = #tpu.pipeline_mode<synchronous>, transform_indices = @transform_1, window_bounds = array<i64: 1, 48, 32>}, {pipeline_mode = #tpu.pipeline_mode<synchronous>, transform_indices = @transform_2, window_bounds = array<i64: 1, 32>}, {transform_indices = @transform_3, window_bounds = array<i64: 1, 1, 32>}]} {
    %c0 = arith.constant 0 : index
    %c0_0 = arith.constant 0 : index
    %c0_1 = arith.constant 0 : index
    %c0_2 = arith.constant 0 : index
    %c0_3 = arith.constant 0 : index
    %0 = vector.load %arg1[%c0, %c0_0, %c0_1, %c0_2, %c0_3] : memref<1x1x1x1x48xbf16, #tpu.memory_space<vmem>>, vector<1x1x1x1x48xbf16>
    %1 = vector.shape_cast %0 : vector<1x1x1x1x48xbf16> to vector<1x1x48xbf16>
    %2 = vector.shape_cast %1 : vector<1x1x48xbf16> to vector<1x48xbf16>
    %c0_4 = arith.constant 0 : index
    %c0_5 = arith.constant 0 : index
    %c0_6 = arith.constant 0 : index
    %3 = vector.load %arg2[%c0_4, %c0_5, %c0_6] : memref<1x48x32xbf16, #tpu.memory_space<vmem>>, vector<1x48x32xbf16>
    %4 = vector.shape_cast %3 : vector<1x48x32xbf16> to vector<48x32xbf16>
    %cst = arith.constant dense<0.000000e+00> : vector<1x32xf32>
    %5 = tpu.matmul %2, %4, %cst {dimension_numbers = #tpu.dot_dimension_numbers<[1], [0], [0], [1], [0, 0, 1, 1], [], []>} : vector<1x48xbf16>, vector<48x32xbf16>, vector<1x32xf32> -> vector<1x32xf32>
    %c0_7 = arith.constant 0 : index
    %c0_8 = arith.constant 0 : index
    %6 = vector.load %arg3[%c0_7, %c0_8] : memref<1x32xf32, #tpu.memory_space<vmem>>, vector<1x32xf32>
    %7 = arith.addf %5, %6 : vector<1x32xf32>
    %8 = arith.truncf %7 : vector<1x32xf32> to vector<1x32xbf16>
    %c0_9 = arith.constant 0 : index
    %c0_10 = arith.constant 0 : index
    %c0_11 = arith.constant 0 : index
    %9 = vector.load %arg4[%c0_9, %c0_10, %c0_11] : memref<1x1x32xbf16, #tpu.memory_space<vmem>>, vector<1x1x32xbf16>
    %10 = vector.shape_cast %9 : vector<1x1x32xbf16> to vector<1x32xbf16>
    %11 = vector.shape_cast %8 : vector<1x32xbf16> to vector<1x1x32xbf16>
    tpu.vector_store %arg4[%c0_9, %c0_10, %c0_11], %11 {strides = array<i32>} : memref<1x1x32xbf16, #tpu.memory_space<vmem>>, vector<1x1x32xbf16>,
    return
  }
  func.func @transform_0(%arg0: i32) -> (i32, i32, i32, i32, i32) {
    %c0_i32 = arith.constant 0 : i32
    %c0_i32_0 = arith.constant 0 : i32
    %c0_i32_1 = arith.constant 0 : i32
    %c0_i32_2 = arith.constant 0 : i32
    %c0_i32_3 = arith.constant 0 : i32
    return %arg0, %c0_i32, %c0_i32_0, %c0_i32_1, %c0_i32_2 : i32, i32, i32, i32, i32
  }
  func.func @transform_1(%arg0: i32) -> (i32, i32, i32) {
    %c0_i32 = arith.constant 0 : i32
    %c0_i32_0 = arith.constant 0 : i32
    %c0_i32_1 = arith.constant 0 : i32
    %c0_i32_2 = arith.constant 0 : i32
    return %c0_i32, %c0_i32_0, %c0_i32_1 : i32, i32, i32
  }
  func.func @transform_2(%arg0: i32) -> (i32, i32) {
    %c0_i32 = arith.constant 0 : i32
    %c0_i32_0 = arith.constant 0 : i32
    %c0_i32_1 = arith.constant 0 : i32
    return %c0_i32, %c0_i32_0 : i32, i32
  }
  func.func @transform_3(%arg0: i32) -> (i32, i32, i32) {
    %c0_i32 = arith.constant 0 : i32
    %c0_i32_0 = arith.constant 0 : i32
    %c0_i32_1 = arith.constant 0 : i32
    return %arg0, %c0_i32, %c0_i32_0 : i32, i32, i32
  }
}

module attributes {stable_mosaic.version = 11 : i64} {
  func.func @_conv_kernel(%arg0: i32, %arg1: memref<1x1x2x2x32xbf16, #tpu.memory_space<vmem>>, %arg2: memref<1x32x32xbf16, #tpu.memory_space<vmem>>, %arg3: memref<1x32xf32, #tpu.memory_space<vmem>>, %arg4: memref<1x4x32xbf16, #tpu.memory_space<vmem>>, %arg5: memref<1x4x32xbf16, #tpu.memory_space<vmem>>) attributes {dimension_semantics = [#tpu.dimension_semantics<parallel>], iteration_bounds = array<i64: 2>, scalar_prefetch = 0 : i64, scratch_operands = 0 : i64, tpu.core_type = #tpu.core_type<tc>, window_params = [{transform_indices = @transform_0, window_bounds = array<i64: 1, 1, 2, 2, 32>}, {pipeline_mode = #tpu.pipeline_mode<synchronous>, transform_indices = @transform_1, window_bounds = array<i64: 1, 32, 32>}, {pipeline_mode = #tpu.pipeline_mode<synchronous>, transform_indices = @transform_2, window_bounds = array<i64: 1, 32>}, {transform_indices = @transform_3, window_bounds = array<i64: 1, 4, 32>}, {transform_indices = @transform_4, window_bounds = array<i64: 1, 4, 32>}]} {
    %c0 = arith.constant 0 : index
    %c0_0 = arith.constant 0 : index
    %c0_1 = arith.constant 0 : index
    %c0_2 = arith.constant 0 : index
    %c0_3 = arith.constant 0 : index
    %0 = vector.load %arg1[%c0, %c0_0, %c0_1, %c0_2, %c0_3] : memref<1x1x2x2x32xbf16, #tpu.memory_space<vmem>>, vector<1x1x2x2x32xbf16>
    %1 = vector.shape_cast %0 : vector<1x1x2x2x32xbf16> to vector<2x2x32xbf16>
    %2 = vector.shape_cast %1 : vector<2x2x32xbf16> to vector<4x32xbf16>
    %c0_4 = arith.constant 0 : index
    %c0_5 = arith.constant 0 : index
    %c0_6 = arith.constant 0 : index
    %3 = vector.load %arg2[%c0_4, %c0_5, %c0_6] : memref<1x32x32xbf16, #tpu.memory_space<vmem>>, vector<1x32x32xbf16>
    %4 = vector.shape_cast %3 : vector<1x32x32xbf16> to vector<32x32xbf16>
    %cst = arith.constant dense<0.000000e+00> : vector<4x32xf32>
    %5 = tpu.matmul %2, %4, %cst {dimension_numbers = #tpu.dot_dimension_numbers<[1], [0], [0], [1], [0, 0, 1, 1], [], []>} : vector<4x32xbf16>, vector<32x32xbf16>, vector<4x32xf32> -> vector<4x32xf32>
    %c0_7 = arith.constant 0 : index
    %c0_8 = arith.constant 0 : index
    %6 = vector.load %arg3[%c0_7, %c0_8] : memref<1x32xf32, #tpu.memory_space<vmem>>, vector<1x32xf32>
    %7 = vector.broadcast %6 : vector<1x32xf32> to vector<4x32xf32>
    %8 = arith.addf %5, %7 : vector<4x32xf32>
    %c0_9 = arith.constant 0 : index
    %c0_10 = arith.constant 0 : index
    %c0_11 = arith.constant 0 : index
    %9 = vector.load %arg4[%c0_9, %c0_10, %c0_11] : memref<1x4x32xbf16, #tpu.memory_space<vmem>>, vector<1x4x32xbf16>
    %10 = vector.shape_cast %9 : vector<1x4x32xbf16> to vector<4x32xbf16>
    %11 = arith.extf %10 : vector<4x32xbf16> to vector<4x32xf32>
    %12 = arith.addf %8, %11 : vector<4x32xf32>
    %13 = arith.truncf %12 : vector<4x32xf32> to vector<4x32xbf16>
    %c0_12 = arith.constant 0 : index
    %c0_13 = arith.constant 0 : index
    %c0_14 = arith.constant 0 : index
    %14 = vector.load %arg5[%c0_12, %c0_13, %c0_14] : memref<1x4x32xbf16, #tpu.memory_space<vmem>>, vector<1x4x32xbf16>
    %15 = vector.shape_cast %14 : vector<1x4x32xbf16> to vector<4x32xbf16>
    %16 = vector.shape_cast %13 : vector<4x32xbf16> to vector<1x4x32xbf16>
    tpu.vector_store %arg5[%c0_12, %c0_13, %c0_14], %16 {strides = array<i32>} : memref<1x4x32xbf16, #tpu.memory_space<vmem>>, vector<1x4x32xbf16>,
    return
  }
  func.func @transform_0(%arg0: i32) -> (i32, i32, i32, i32, i32) {
    %c0_i32 = arith.constant 0 : i32
    %c0_i32_0 = arith.constant 0 : i32
    %c0_i32_1 = arith.constant 0 : i32
    %c0_i32_2 = arith.constant 0 : i32
    %c0_i32_3 = arith.constant 0 : i32
    return %arg0, %c0_i32, %c0_i32_0, %c0_i32_1, %c0_i32_2 : i32, i32, i32, i32, i32
  }
  func.func @transform_1(%arg0: i32) -> (i32, i32, i32) {
    %c0_i32 = arith.constant 0 : i32
    %c0_i32_0 = arith.constant 0 : i32
    %c0_i32_1 = arith.constant 0 : i32
    %c0_i32_2 = arith.constant 0 : i32
    return %c0_i32, %c0_i32_0, %c0_i32_1 : i32, i32, i32
  }
  func.func @transform_2(%arg0: i32) -> (i32, i32) {
    %c0_i32 = arith.constant 0 : i32
    %c0_i32_0 = arith.constant 0 : i32
    %c0_i32_1 = arith.constant 0 : i32
    return %c0_i32, %c0_i32_0 : i32, i32
  }
  func.func @transform_3(%arg0: i32) -> (i32, i32, i32) {
    %c0_i32 = arith.constant 0 : i32
    %c0_i32_0 = arith.constant 0 : i32
    %c0_i32_1 = arith.constant 0 : i32
    return %arg0, %c0_i32, %c0_i32_0 : i32, i32, i32
  }
  func.func @transform_4(%arg0: i32) -> (i32, i32, i32) {
    %c0_i32 = arith.constant 0 : i32
    %c0_i32_0 = arith.constant 0 : i32
    %c0_i32_1 = arith.constant 0 : i32
    return %arg0, %c0_i32, %c0_i32_0 : i32, i32, i32
  }
}

module attributes {stable_mosaic.version = 11 : i64} {
  func.func @_conv_kernel(%arg0: i32, %arg1: memref<1x1x4x4x24xbf16, #tpu.memory_space<vmem>>, %arg2: memref<1x24x32xbf16, #tpu.memory_space<vmem>>, %arg3: memref<1x32xf32, #tpu.memory_space<vmem>>, %arg4: memref<1x16x32xbf16, #tpu.memory_space<vmem>>, %arg5: memref<1x16x32xbf16, #tpu.memory_space<vmem>>) attributes {dimension_semantics = [#tpu.dimension_semantics<parallel>], iteration_bounds = array<i64: 2>, scalar_prefetch = 0 : i64, scratch_operands = 0 : i64, tpu.core_type = #tpu.core_type<tc>, window_params = [{transform_indices = @transform_0, window_bounds = array<i64: 1, 1, 4, 4, 24>}, {pipeline_mode = #tpu.pipeline_mode<synchronous>, transform_indices = @transform_1, window_bounds = array<i64: 1, 24, 32>}, {pipeline_mode = #tpu.pipeline_mode<synchronous>, transform_indices = @transform_2, window_bounds = array<i64: 1, 32>}, {transform_indices = @transform_3, window_bounds = array<i64: 1, 16, 32>}, {transform_indices = @transform_4, window_bounds = array<i64: 1, 16, 32>}]} {
    %c0 = arith.constant 0 : index
    %c0_0 = arith.constant 0 : index
    %c0_1 = arith.constant 0 : index
    %c0_2 = arith.constant 0 : index
    %c0_3 = arith.constant 0 : index
    %0 = vector.load %arg1[%c0, %c0_0, %c0_1, %c0_2, %c0_3] : memref<1x1x4x4x24xbf16, #tpu.memory_space<vmem>>, vector<1x1x4x4x24xbf16>
    %1 = vector.shape_cast %0 : vector<1x1x4x4x24xbf16> to vector<4x4x24xbf16>
    %2 = vector.shape_cast %1 : vector<4x4x24xbf16> to vector<16x24xbf16>
    %c0_4 = arith.constant 0 : index
    %c0_5 = arith.constant 0 : index
    %c0_6 = arith.constant 0 : index
    %3 = vector.load %arg2[%c0_4, %c0_5, %c0_6] : memref<1x24x32xbf16, #tpu.memory_space<vmem>>, vector<1x24x32xbf16>
    %4 = vector.shape_cast %3 : vector<1x24x32xbf16> to vector<24x32xbf16>
    %cst = arith.constant dense<0.000000e+00> : vector<16x32xf32>
    %5 = tpu.matmul %2, %4, %cst {dimension_numbers = #tpu.dot_dimension_numbers<[1], [0], [0], [1], [0, 0, 1, 1], [], []>} : vector<16x24xbf16>, vector<24x32xbf16>, vector<16x32xf32> -> vector<16x32xf32>
    %c0_7 = arith.constant 0 : index
    %c0_8 = arith.constant 0 : index
    %6 = vector.load %arg3[%c0_7, %c0_8] : memref<1x32xf32, #tpu.memory_space<vmem>>, vector<1x32xf32>
    %7 = vector.broadcast %6 : vector<1x32xf32> to vector<16x32xf32>
    %8 = arith.addf %5, %7 : vector<16x32xf32>
    %c0_9 = arith.constant 0 : index
    %c0_10 = arith.constant 0 : index
    %c0_11 = arith.constant 0 : index
    %9 = vector.load %arg4[%c0_9, %c0_10, %c0_11] : memref<1x16x32xbf16, #tpu.memory_space<vmem>>, vector<1x16x32xbf16>
    %10 = vector.shape_cast %9 : vector<1x16x32xbf16> to vector<16x32xbf16>
    %11 = arith.extf %10 : vector<16x32xbf16> to vector<16x32xf32>
    %12 = arith.addf %8, %11 : vector<16x32xf32>
    %13 = arith.truncf %12 : vector<16x32xf32> to vector<16x32xbf16>
    %c0_12 = arith.constant 0 : index
    %c0_13 = arith.constant 0 : index
    %c0_14 = arith.constant 0 : index
    %14 = vector.load %arg5[%c0_12, %c0_13, %c0_14] : memref<1x16x32xbf16, #tpu.memory_space<vmem>>, vector<1x16x32xbf16>
    %15 = vector.shape_cast %14 : vector<1x16x32xbf16> to vector<16x32xbf16>
    %16 = vector.shape_cast %13 : vector<16x32xbf16> to vector<1x16x32xbf16>
    tpu.vector_store %arg5[%c0_12, %c0_13, %c0_14], %16 {strides = array<i32>} : memref<1x16x32xbf16, #tpu.memory_space<vmem>>, vector<1x16x32xbf16>,
    return
  }
  func.func @transform_0(%arg0: i32) -> (i32, i32, i32, i32, i32) {
    %c0_i32 = arith.constant 0 : i32
    %c0_i32_0 = arith.constant 0 : i32
    %c0_i32_1 = arith.constant 0 : i32
    %c0_i32_2 = arith.constant 0 : i32
    %c0_i32_3 = arith.constant 0 : i32
    return %arg0, %c0_i32, %c0_i32_0, %c0_i32_1, %c0_i32_2 : i32, i32, i32, i32, i32
  }
  func.func @transform_1(%arg0: i32) -> (i32, i32, i32) {
    %c0_i32 = arith.constant 0 : i32
    %c0_i32_0 = arith.constant 0 : i32
    %c0_i32_1 = arith.constant 0 : i32
    %c0_i32_2 = arith.constant 0 : i32
    return %c0_i32, %c0_i32_0, %c0_i32_1 : i32, i32, i32
  }
  func.func @transform_2(%arg0: i32) -> (i32, i32) {
    %c0_i32 = arith.constant 0 : i32
    %c0_i32_0 = arith.constant 0 : i32
    %c0_i32_1 = arith.constant 0 : i32
    return %c0_i32, %c0_i32_0 : i32, i32
  }
  func.func @transform_3(%arg0: i32) -> (i32, i32, i32) {
    %c0_i32 = arith.constant 0 : i32
    %c0_i32_0 = arith.constant 0 : i32
    %c0_i32_1 = arith.constant 0 : i32
    return %arg0, %c0_i32, %c0_i32_0 : i32, i32, i32
  }
  func.func @transform_4(%arg0: i32) -> (i32, i32, i32) {
    %c0_i32 = arith.constant 0 : i32
    %c0_i32_0 = arith.constant 0 : i32
    %c0_i32_1 = arith.constant 0 : i32
    return %arg0, %c0_i32, %c0_i32_0 : i32, i32, i32
  }
}

module attributes {stable_mosaic.version = 11 : i64} {
  func.func @_conv_kernel(%arg0: i32, %arg1: memref<1x1x8x8x16xbf16, #tpu.memory_space<vmem>>, %arg2: memref<1x16x32xbf16, #tpu.memory_space<vmem>>, %arg3: memref<1x32xf32, #tpu.memory_space<vmem>>, %arg4: memref<1x64x32xbf16, #tpu.memory_space<vmem>>, %arg5: memref<1x64x32xbf16, #tpu.memory_space<vmem>>) attributes {dimension_semantics = [#tpu.dimension_semantics<parallel>], iteration_bounds = array<i64: 2>, scalar_prefetch = 0 : i64, scratch_operands = 0 : i64, tpu.core_type = #tpu.core_type<tc>, window_params = [{transform_indices = @transform_0, window_bounds = array<i64: 1, 1, 8, 8, 16>}, {pipeline_mode = #tpu.pipeline_mode<synchronous>, transform_indices = @transform_1, window_bounds = array<i64: 1, 16, 32>}, {pipeline_mode = #tpu.pipeline_mode<synchronous>, transform_indices = @transform_2, window_bounds = array<i64: 1, 32>}, {transform_indices = @transform_3, window_bounds = array<i64: 1, 64, 32>}, {transform_indices = @transform_4, window_bounds = array<i64: 1, 64, 32>}]} {
    %c0 = arith.constant 0 : index
    %c0_0 = arith.constant 0 : index
    %c0_1 = arith.constant 0 : index
    %c0_2 = arith.constant 0 : index
    %c0_3 = arith.constant 0 : index
    %0 = vector.load %arg1[%c0, %c0_0, %c0_1, %c0_2, %c0_3] : memref<1x1x8x8x16xbf16, #tpu.memory_space<vmem>>, vector<1x1x8x8x16xbf16>
    %1 = vector.shape_cast %0 : vector<1x1x8x8x16xbf16> to vector<8x8x16xbf16>
    %2 = vector.shape_cast %1 : vector<8x8x16xbf16> to vector<64x16xbf16>
    %c0_4 = arith.constant 0 : index
    %c0_5 = arith.constant 0 : index
    %c0_6 = arith.constant 0 : index
    %3 = vector.load %arg2[%c0_4, %c0_5, %c0_6] : memref<1x16x32xbf16, #tpu.memory_space<vmem>>, vector<1x16x32xbf16>
    %4 = vector.shape_cast %3 : vector<1x16x32xbf16> to vector<16x32xbf16>
    %cst = arith.constant dense<0.000000e+00> : vector<64x32xf32>
    %5 = tpu.matmul %2, %4, %cst {dimension_numbers = #tpu.dot_dimension_numbers<[1], [0], [0], [1], [0, 0, 1, 1], [], []>} : vector<64x16xbf16>, vector<16x32xbf16>, vector<64x32xf32> -> vector<64x32xf32>
    %c0_7 = arith.constant 0 : index
    %c0_8 = arith.constant 0 : index
    %6 = vector.load %arg3[%c0_7, %c0_8] : memref<1x32xf32, #tpu.memory_space<vmem>>, vector<1x32xf32>
    %7 = vector.broadcast %6 : vector<1x32xf32> to vector<64x32xf32>
    %8 = arith.addf %5, %7 : vector<64x32xf32>
    %c0_9 = arith.constant 0 : index
    %c0_10 = arith.constant 0 : index
    %c0_11 = arith.constant 0 : index
    %9 = vector.load %arg4[%c0_9, %c0_10, %c0_11] : memref<1x64x32xbf16, #tpu.memory_space<vmem>>, vector<1x64x32xbf16>
    %10 = vector.shape_cast %9 : vector<1x64x32xbf16> to vector<64x32xbf16>
    %11 = arith.extf %10 : vector<64x32xbf16> to vector<64x32xf32>
    %12 = arith.addf %8, %11 : vector<64x32xf32>
    %13 = arith.truncf %12 : vector<64x32xf32> to vector<64x32xbf16>
    %c0_12 = arith.constant 0 : index
    %c0_13 = arith.constant 0 : index
    %c0_14 = arith.constant 0 : index
    %14 = vector.load %arg5[%c0_12, %c0_13, %c0_14] : memref<1x64x32xbf16, #tpu.memory_space<vmem>>, vector<1x64x32xbf16>
    %15 = vector.shape_cast %14 : vector<1x64x32xbf16> to vector<64x32xbf16>
    %16 = vector.shape_cast %13 : vector<64x32xbf16> to vector<1x64x32xbf16>
    tpu.vector_store %arg5[%c0_12, %c0_13, %c0_14], %16 {strides = array<i32>} : memref<1x64x32xbf16, #tpu.memory_space<vmem>>, vector<1x64x32xbf16>,
    return
  }
  func.func @transform_0(%arg0: i32) -> (i32, i32, i32, i32, i32) {
    %c0_i32 = arith.constant 0 : i32
    %c0_i32_0 = arith.constant 0 : i32
    %c0_i32_1 = arith.constant 0 : i32
    %c0_i32_2 = arith.constant 0 : i32
    %c0_i32_3 = arith.constant 0 : i32
    return %arg0, %c0_i32, %c0_i32_0, %c0_i32_1, %c0_i32_2 : i32, i32, i32, i32, i32
  }
  func.func @transform_1(%arg0: i32) -> (i32, i32, i32) {
    %c0_i32 = arith.constant 0 : i32
    %c0_i32_0 = arith.constant 0 : i32
    %c0_i32_1 = arith.constant 0 : i32
    %c0_i32_2 = arith.constant 0 : i32
    return %c0_i32, %c0_i32_0, %c0_i32_1 : i32, i32, i32
  }
  func.func @transform_2(%arg0: i32) -> (i32, i32) {
    %c0_i32 = arith.constant 0 : i32
    %c0_i32_0 = arith.constant 0 : i32
    %c0_i32_1 = arith.constant 0 : i32
    return %c0_i32, %c0_i32_0 : i32, i32
  }
  func.func @transform_3(%arg0: i32) -> (i32, i32, i32) {
    %c0_i32 = arith.constant 0 : i32
    %c0_i32_0 = arith.constant 0 : i32
    %c0_i32_1 = arith.constant 0 : i32
    return %arg0, %c0_i32, %c0_i32_0 : i32, i32, i32
  }
  func.func @transform_4(%arg0: i32) -> (i32, i32, i32) {
    %c0_i32 = arith.constant 0 : i32
    %c0_i32_0 = arith.constant 0 : i32
    %c0_i32_1 = arith.constant 0 : i32
    return %arg0, %c0_i32, %c0_i32_0 : i32, i32, i32
  }
}

module attributes {stable_mosaic.version = 11 : i64} {
  func.func @_conv_kernel(%arg0: i32, %arg1: memref<1x1x6x6x32xbf16, #tpu.memory_space<vmem>>, %arg2: memref<9x32x8xbf16, #tpu.memory_space<vmem>>, %arg3: memref<1x8xf32, #tpu.memory_space<vmem>>, %arg4: memref<1x16x8xbf16, #tpu.memory_space<vmem>>) attributes {dimension_semantics = [#tpu.dimension_semantics<parallel>], iteration_bounds = array<i64: 2>, scalar_prefetch = 0 : i64, scratch_operands = 0 : i64, tpu.core_type = #tpu.core_type<tc>, window_params = [{transform_indices = @transform_0, window_bounds = array<i64: 1, 1, 6, 6, 32>}, {pipeline_mode = #tpu.pipeline_mode<synchronous>, transform_indices = @transform_1, window_bounds = array<i64: 9, 32, 8>}, {pipeline_mode = #tpu.pipeline_mode<synchronous>, transform_indices = @transform_2, window_bounds = array<i64: 1, 8>}, {transform_indices = @transform_3, window_bounds = array<i64: 1, 16, 8>}]} {
    %c0 = arith.constant 0 : index
    %c0_0 = arith.constant 0 : index
    %c0_1 = arith.constant 0 : index
    %c0_2 = arith.constant 0 : index
    %c0_3 = arith.constant 0 : index
    %0 = vector.load %arg1[%c0, %c0_0, %c0_1, %c0_2, %c0_3] : memref<1x1x6x6x32xbf16, #tpu.memory_space<vmem>>, vector<1x1x4x4x32xbf16>
    %1 = vector.shape_cast %0 : vector<1x1x4x4x32xbf16> to vector<4x4x32xbf16>
    %2 = vector.shape_cast %1 : vector<4x4x32xbf16> to vector<16x32xbf16>
    %c0_4 = arith.constant 0 : index
    %c0_5 = arith.constant 0 : index
    %c0_6 = arith.constant 0 : index
    %3 = vector.load %arg2[%c0_4, %c0_5, %c0_6] : memref<9x32x8xbf16, #tpu.memory_space<vmem>>, vector<1x32x8xbf16>
    %4 = vector.shape_cast %3 : vector<1x32x8xbf16> to vector<32x8xbf16>
    %cst = arith.constant dense<0.000000e+00> : vector<16x8xf32>
    %5 = tpu.matmul %2, %4, %cst {dimension_numbers = #tpu.dot_dimension_numbers<[1], [0], [0], [1], [0, 0, 1, 1], [], []>} : vector<16x32xbf16>, vector<32x8xbf16>, vector<16x8xf32> -> vector<16x8xf32>
    %c0_7 = arith.constant 0 : index
    %c0_8 = arith.constant 0 : index
    %c0_9 = arith.constant 0 : index
    %c1 = arith.constant 1 : index
    %c0_10 = arith.constant 0 : index
    %6 = vector.load %arg1[%c0_7, %c0_8, %c0_9, %c1, %c0_10] : memref<1x1x6x6x32xbf16, #tpu.memory_space<vmem>>, vector<1x1x4x4x32xbf16>
    %7 = vector.shape_cast %6 : vector<1x1x4x4x32xbf16> to vector<4x4x32xbf16>
    %8 = vector.shape_cast %7 : vector<4x4x32xbf16> to vector<16x32xbf16>
    %c1_11 = arith.constant 1 : index
    %c0_12 = arith.constant 0 : index
    %c0_13 = arith.constant 0 : index
    %9 = vector.load %arg2[%c1_11, %c0_12, %c0_13] : memref<9x32x8xbf16, #tpu.memory_space<vmem>>, vector<1x32x8xbf16>
    %10 = vector.shape_cast %9 : vector<1x32x8xbf16> to vector<32x8xbf16>
    %cst_14 = arith.constant dense<0.000000e+00> : vector<16x8xf32>
    %11 = tpu.matmul %8, %10, %cst_14 {dimension_numbers = #tpu.dot_dimension_numbers<[1], [0], [0], [1], [0, 0, 1, 1], [], []>} : vector<16x32xbf16>, vector<32x8xbf16>, vector<16x8xf32> -> vector<16x8xf32>
    %12 = arith.addf %5, %11 : vector<16x8xf32>
    %c0_15 = arith.constant 0 : index
    %c0_16 = arith.constant 0 : index
    %c0_17 = arith.constant 0 : index
    %c2 = arith.constant 2 : index
    %c0_18 = arith.constant 0 : index
    %13 = vector.load %arg1[%c0_15, %c0_16, %c0_17, %c2, %c0_18] : memref<1x1x6x6x32xbf16, #tpu.memory_space<vmem>>, vector<1x1x4x4x32xbf16>
    %14 = vector.shape_cast %13 : vector<1x1x4x4x32xbf16> to vector<4x4x32xbf16>
    %15 = vector.shape_cast %14 : vector<4x4x32xbf16> to vector<16x32xbf16>
    %c2_19 = arith.constant 2 : index
    %c0_20 = arith.constant 0 : index
    %c0_21 = arith.constant 0 : index
    %16 = vector.load %arg2[%c2_19, %c0_20, %c0_21] : memref<9x32x8xbf16, #tpu.memory_space<vmem>>, vector<1x32x8xbf16>
    %17 = vector.shape_cast %16 : vector<1x32x8xbf16> to vector<32x8xbf16>
    %cst_22 = arith.constant dense<0.000000e+00> : vector<16x8xf32>
    %18 = tpu.matmul %15, %17, %cst_22 {dimension_numbers = #tpu.dot_dimension_numbers<[1], [0], [0], [1], [0, 0, 1, 1], [], []>} : vector<16x32xbf16>, vector<32x8xbf16>, vector<16x8xf32> -> vector<16x8xf32>
    %19 = arith.addf %12, %18 : vector<16x8xf32>
    %c0_23 = arith.constant 0 : index
    %c0_24 = arith.constant 0 : index
    %c1_25 = arith.constant 1 : index
    %c0_26 = arith.constant 0 : index
    %c0_27 = arith.constant 0 : index
    %20 = vector.load %arg1[%c0_23, %c0_24, %c1_25, %c0_26, %c0_27] : memref<1x1x6x6x32xbf16, #tpu.memory_space<vmem>>, vector<1x1x4x4x32xbf16>
    %21 = vector.shape_cast %20 : vector<1x1x4x4x32xbf16> to vector<4x4x32xbf16>
    %22 = vector.shape_cast %21 : vector<4x4x32xbf16> to vector<16x32xbf16>
    %c3 = arith.constant 3 : index
    %c0_28 = arith.constant 0 : index
    %c0_29 = arith.constant 0 : index
    %23 = vector.load %arg2[%c3, %c0_28, %c0_29] : memref<9x32x8xbf16, #tpu.memory_space<vmem>>, vector<1x32x8xbf16>
    %24 = vector.shape_cast %23 : vector<1x32x8xbf16> to vector<32x8xbf16>
    %cst_30 = arith.constant dense<0.000000e+00> : vector<16x8xf32>
    %25 = tpu.matmul %22, %24, %cst_30 {dimension_numbers = #tpu.dot_dimension_numbers<[1], [0], [0], [1], [0, 0, 1, 1], [], []>} : vector<16x32xbf16>, vector<32x8xbf16>, vector<16x8xf32> -> vector<16x8xf32>
    %26 = arith.addf %19, %25 : vector<16x8xf32>
    %c0_31 = arith.constant 0 : index
    %c0_32 = arith.constant 0 : index
    %c1_33 = arith.constant 1 : index
    %c1_34 = arith.constant 1 : index
    %c0_35 = arith.constant 0 : index
    %27 = vector.load %arg1[%c0_31, %c0_32, %c1_33, %c1_34, %c0_35] : memref<1x1x6x6x32xbf16, #tpu.memory_space<vmem>>, vector<1x1x4x4x32xbf16>
    %28 = vector.shape_cast %27 : vector<1x1x4x4x32xbf16> to vector<4x4x32xbf16>
    %29 = vector.shape_cast %28 : vector<4x4x32xbf16> to vector<16x32xbf16>
    %c4 = arith.constant 4 : index
    %c0_36 = arith.constant 0 : index
    %c0_37 = arith.constant 0 : index
    %30 = vector.load %arg2[%c4, %c0_36, %c0_37] : memref<9x32x8xbf16, #tpu.memory_space<vmem>>, vector<1x32x8xbf16>
    %31 = vector.shape_cast %30 : vector<1x32x8xbf16> to vector<32x8xbf16>
    %cst_38 = arith.constant dense<0.000000e+00> : vector<16x8xf32>
    %32 = tpu.matmul %29, %31, %cst_38 {dimension_numbers = #tpu.dot_dimension_numbers<[1], [0], [0], [1], [0, 0, 1, 1], [], []>} : vector<16x32xbf16>, vector<32x8xbf16>, vector<16x8xf32> -> vector<16x8xf32>
    %33 = arith.addf %26, %32 : vector<16x8xf32>
    %c0_39 = arith.constant 0 : index
    %c0_40 = arith.constant 0 : index
    %c1_41 = arith.constant 1 : index
    %c2_42 = arith.constant 2 : index
    %c0_43 = arith.constant 0 : index
    %34 = vector.load %arg1[%c0_39, %c0_40, %c1_41, %c2_42, %c0_43] : memref<1x1x6x6x32xbf16, #tpu.memory_space<vmem>>, vector<1x1x4x4x32xbf16>
    %35 = vector.shape_cast %34 : vector<1x1x4x4x32xbf16> to vector<4x4x32xbf16>
    %36 = vector.shape_cast %35 : vector<4x4x32xbf16> to vector<16x32xbf16>
    %c5 = arith.constant 5 : index
    %c0_44 = arith.constant 0 : index
    %c0_45 = arith.constant 0 : index
    %37 = vector.load %arg2[%c5, %c0_44, %c0_45] : memref<9x32x8xbf16, #tpu.memory_space<vmem>>, vector<1x32x8xbf16>
    %38 = vector.shape_cast %37 : vector<1x32x8xbf16> to vector<32x8xbf16>
    %cst_46 = arith.constant dense<0.000000e+00> : vector<16x8xf32>
    %39 = tpu.matmul %36, %38, %cst_46 {dimension_numbers = #tpu.dot_dimension_numbers<[1], [0], [0], [1], [0, 0, 1, 1], [], []>} : vector<16x32xbf16>, vector<32x8xbf16>, vector<16x8xf32> -> vector<16x8xf32>
    %40 = arith.addf %33, %39 : vector<16x8xf32>
    %c0_47 = arith.constant 0 : index
    %c0_48 = arith.constant 0 : index
    %c2_49 = arith.constant 2 : index
    %c0_50 = arith.constant 0 : index
    %c0_51 = arith.constant 0 : index
    %41 = vector.load %arg1[%c0_47, %c0_48, %c2_49, %c0_50, %c0_51] : memref<1x1x6x6x32xbf16, #tpu.memory_space<vmem>>, vector<1x1x4x4x32xbf16>
    %42 = vector.shape_cast %41 : vector<1x1x4x4x32xbf16> to vector<4x4x32xbf16>
    %43 = vector.shape_cast %42 : vector<4x4x32xbf16> to vector<16x32xbf16>
    %c6 = arith.constant 6 : index
    %c0_52 = arith.constant 0 : index
    %c0_53 = arith.constant 0 : index
    %44 = vector.load %arg2[%c6, %c0_52, %c0_53] : memref<9x32x8xbf16, #tpu.memory_space<vmem>>, vector<1x32x8xbf16>
    %45 = vector.shape_cast %44 : vector<1x32x8xbf16> to vector<32x8xbf16>
    %cst_54 = arith.constant dense<0.000000e+00> : vector<16x8xf32>
    %46 = tpu.matmul %43, %45, %cst_54 {dimension_numbers = #tpu.dot_dimension_numbers<[1], [0], [0], [1], [0, 0, 1, 1], [], []>} : vector<16x32xbf16>, vector<32x8xbf16>, vector<16x8xf32> -> vector<16x8xf32>
    %47 = arith.addf %40, %46 : vector<16x8xf32>
    %c0_55 = arith.constant 0 : index
    %c0_56 = arith.constant 0 : index
    %c2_57 = arith.constant 2 : index
    %c1_58 = arith.constant 1 : index
    %c0_59 = arith.constant 0 : index
    %48 = vector.load %arg1[%c0_55, %c0_56, %c2_57, %c1_58, %c0_59] : memref<1x1x6x6x32xbf16, #tpu.memory_space<vmem>>, vector<1x1x4x4x32xbf16>
    %49 = vector.shape_cast %48 : vector<1x1x4x4x32xbf16> to vector<4x4x32xbf16>
    %50 = vector.shape_cast %49 : vector<4x4x32xbf16> to vector<16x32xbf16>
    %c7 = arith.constant 7 : index
    %c0_60 = arith.constant 0 : index
    %c0_61 = arith.constant 0 : index
    %51 = vector.load %arg2[%c7, %c0_60, %c0_61] : memref<9x32x8xbf16, #tpu.memory_space<vmem>>, vector<1x32x8xbf16>
    %52 = vector.shape_cast %51 : vector<1x32x8xbf16> to vector<32x8xbf16>
    %cst_62 = arith.constant dense<0.000000e+00> : vector<16x8xf32>
    %53 = tpu.matmul %50, %52, %cst_62 {dimension_numbers = #tpu.dot_dimension_numbers<[1], [0], [0], [1], [0, 0, 1, 1], [], []>} : vector<16x32xbf16>, vector<32x8xbf16>, vector<16x8xf32> -> vector<16x8xf32>
    %54 = arith.addf %47, %53 : vector<16x8xf32>
    %c0_63 = arith.constant 0 : index
    %c0_64 = arith.constant 0 : index
    %c2_65 = arith.constant 2 : index
    %c2_66 = arith.constant 2 : index
    %c0_67 = arith.constant 0 : index
    %55 = vector.load %arg1[%c0_63, %c0_64, %c2_65, %c2_66, %c0_67] : memref<1x1x6x6x32xbf16, #tpu.memory_space<vmem>>, vector<1x1x4x4x32xbf16>
    %56 = vector.shape_cast %55 : vector<1x1x4x4x32xbf16> to vector<4x4x32xbf16>
    %57 = vector.shape_cast %56 : vector<4x4x32xbf16> to vector<16x32xbf16>
    %c8 = arith.constant 8 : index
    %c0_68 = arith.constant 0 : index
    %c0_69 = arith.constant 0 : index
    %58 = vector.load %arg2[%c8, %c0_68, %c0_69] : memref<9x32x8xbf16, #tpu.memory_space<vmem>>, vector<1x32x8xbf16>
    %59 = vector.shape_cast %58 : vector<1x32x8xbf16> to vector<32x8xbf16>
    %cst_70 = arith.constant dense<0.000000e+00> : vector<16x8xf32>
    %60 = tpu.matmul %57, %59, %cst_70 {dimension_numbers = #tpu.dot_dimension_numbers<[1], [0], [0], [1], [0, 0, 1, 1], [], []>} : vector<16x32xbf16>, vector<32x8xbf16>, vector<16x8xf32> -> vector<16x8xf32>
    %61 = arith.addf %54, %60 : vector<16x8xf32>
    %c0_71 = arith.constant 0 : index
    %c0_72 = arith.constant 0 : index
    %62 = vector.load %arg3[%c0_71, %c0_72] : memref<1x8xf32, #tpu.memory_space<vmem>>, vector<1x8xf32>
    %63 = vector.broadcast %62 : vector<1x8xf32> to vector<16x8xf32>
    %64 = arith.addf %61, %63 : vector<16x8xf32>
    %65 = arith.truncf %64 : vector<16x8xf32> to vector<16x8xbf16>
    %c0_73 = arith.constant 0 : index
    %c0_74 = arith.constant 0 : index
    %c0_75 = arith.constant 0 : index
    %66 = vector.load %arg4[%c0_73, %c0_74, %c0_75] : memref<1x16x8xbf16, #tpu.memory_space<vmem>>, vector<1x16x8xbf16>
    %67 = vector.shape_cast %66 : vector<1x16x8xbf16> to vector<16x8xbf16>
    %68 = vector.shape_cast %65 : vector<16x8xbf16> to vector<1x16x8xbf16>
    tpu.vector_store %arg4[%c0_73, %c0_74, %c0_75], %68 {strides = array<i32>} : memref<1x16x8xbf16, #tpu.memory_space<vmem>>, vector<1x16x8xbf16>,
    return
  }
  func.func @transform_0(%arg0: i32) -> (i32, i32, i32, i32, i32) {
    %c0_i32 = arith.constant 0 : i32
    %c0_i32_0 = arith.constant 0 : i32
    %c0_i32_1 = arith.constant 0 : i32
    %c0_i32_2 = arith.constant 0 : i32
    %c0_i32_3 = arith.constant 0 : i32
    return %arg0, %c0_i32, %c0_i32_0, %c0_i32_1, %c0_i32_2 : i32, i32, i32, i32, i32
  }
  func.func @transform_1(%arg0: i32) -> (i32, i32, i32) {
    %c0_i32 = arith.constant 0 : i32
    %c0_i32_0 = arith.constant 0 : i32
    %c0_i32_1 = arith.constant 0 : i32
    %c0_i32_2 = arith.constant 0 : i32
    return %c0_i32, %c0_i32_0, %c0_i32_1 : i32, i32, i32
  }
  func.func @transform_2(%arg0: i32) -> (i32, i32) {
    %c0_i32 = arith.constant 0 : i32
    %c0_i32_0 = arith.constant 0 : i32
    %c0_i32_1 = arith.constant 0 : i32
    return %c0_i32, %c0_i32_0 : i32, i32
  }
  func.func @transform_3(%arg0: i32) -> (i32, i32, i32) {
    %c0_i32 = arith.constant 0 : i32
    %c0_i32_0 = arith.constant 0 : i32
    %c0_i32_1 = arith.constant 0 : i32
    return %arg0, %c0_i32, %c0_i32_0 : i32, i32, i32
  }
}

module attributes {stable_mosaic.version = 11 : i64} {
  func.func @_conv_kernel(%arg0: i32, %arg1: memref<1x1x10x10x32xbf16, #tpu.memory_space<vmem>>, %arg2: memref<9x32x8xbf16, #tpu.memory_space<vmem>>, %arg3: memref<1x8xf32, #tpu.memory_space<vmem>>, %arg4: memref<1x64x8xbf16, #tpu.memory_space<vmem>>) attributes {dimension_semantics = [#tpu.dimension_semantics<parallel>], iteration_bounds = array<i64: 2>, scalar_prefetch = 0 : i64, scratch_operands = 0 : i64, tpu.core_type = #tpu.core_type<tc>, window_params = [{transform_indices = @transform_0, window_bounds = array<i64: 1, 1, 10, 10, 32>}, {pipeline_mode = #tpu.pipeline_mode<synchronous>, transform_indices = @transform_1, window_bounds = array<i64: 9, 32, 8>}, {pipeline_mode = #tpu.pipeline_mode<synchronous>, transform_indices = @transform_2, window_bounds = array<i64: 1, 8>}, {transform_indices = @transform_3, window_bounds = array<i64: 1, 64, 8>}]} {
    %c0 = arith.constant 0 : index
    %c0_0 = arith.constant 0 : index
    %c0_1 = arith.constant 0 : index
    %c0_2 = arith.constant 0 : index
    %c0_3 = arith.constant 0 : index
    %0 = vector.load %arg1[%c0, %c0_0, %c0_1, %c0_2, %c0_3] : memref<1x1x10x10x32xbf16, #tpu.memory_space<vmem>>, vector<1x1x8x8x32xbf16>
    %1 = vector.shape_cast %0 : vector<1x1x8x8x32xbf16> to vector<8x8x32xbf16>
    %2 = vector.shape_cast %1 : vector<8x8x32xbf16> to vector<64x32xbf16>
    %c0_4 = arith.constant 0 : index
    %c0_5 = arith.constant 0 : index
    %c0_6 = arith.constant 0 : index
    %3 = vector.load %arg2[%c0_4, %c0_5, %c0_6] : memref<9x32x8xbf16, #tpu.memory_space<vmem>>, vector<1x32x8xbf16>
    %4 = vector.shape_cast %3 : vector<1x32x8xbf16> to vector<32x8xbf16>
    %cst = arith.constant dense<0.000000e+00> : vector<64x8xf32>
    %5 = tpu.matmul %2, %4, %cst {dimension_numbers = #tpu.dot_dimension_numbers<[1], [0], [0], [1], [0, 0, 1, 1], [], []>} : vector<64x32xbf16>, vector<32x8xbf16>, vector<64x8xf32> -> vector<64x8xf32>
    %c0_7 = arith.constant 0 : index
    %c0_8 = arith.constant 0 : index
    %c0_9 = arith.constant 0 : index
    %c1 = arith.constant 1 : index
    %c0_10 = arith.constant 0 : index
    %6 = vector.load %arg1[%c0_7, %c0_8, %c0_9, %c1, %c0_10] : memref<1x1x10x10x32xbf16, #tpu.memory_space<vmem>>, vector<1x1x8x8x32xbf16>
    %7 = vector.shape_cast %6 : vector<1x1x8x8x32xbf16> to vector<8x8x32xbf16>
    %8 = vector.shape_cast %7 : vector<8x8x32xbf16> to vector<64x32xbf16>
    %c1_11 = arith.constant 1 : index
    %c0_12 = arith.constant 0 : index
    %c0_13 = arith.constant 0 : index
    %9 = vector.load %arg2[%c1_11, %c0_12, %c0_13] : memref<9x32x8xbf16, #tpu.memory_space<vmem>>, vector<1x32x8xbf16>
    %10 = vector.shape_cast %9 : vector<1x32x8xbf16> to vector<32x8xbf16>
    %cst_14 = arith.constant dense<0.000000e+00> : vector<64x8xf32>
    %11 = tpu.matmul %8, %10, %cst_14 {dimension_numbers = #tpu.dot_dimension_numbers<[1], [0], [0], [1], [0, 0, 1, 1], [], []>} : vector<64x32xbf16>, vector<32x8xbf16>, vector<64x8xf32> -> vector<64x8xf32>
    %12 = arith.addf %5, %11 : vector<64x8xf32>
    %c0_15 = arith.constant 0 : index
    %c0_16 = arith.constant 0 : index
    %c0_17 = arith.constant 0 : index
    %c2 = arith.constant 2 : index
    %c0_18 = arith.constant 0 : index
    %13 = vector.load %arg1[%c0_15, %c0_16, %c0_17, %c2, %c0_18] : memref<1x1x10x10x32xbf16, #tpu.memory_space<vmem>>, vector<1x1x8x8x32xbf16>
    %14 = vector.shape_cast %13 : vector<1x1x8x8x32xbf16> to vector<8x8x32xbf16>
    %15 = vector.shape_cast %14 : vector<8x8x32xbf16> to vector<64x32xbf16>
    %c2_19 = arith.constant 2 : index
    %c0_20 = arith.constant 0 : index
    %c0_21 = arith.constant 0 : index
    %16 = vector.load %arg2[%c2_19, %c0_20, %c0_21] : memref<9x32x8xbf16, #tpu.memory_space<vmem>>, vector<1x32x8xbf16>
    %17 = vector.shape_cast %16 : vector<1x32x8xbf16> to vector<32x8xbf16>
    %cst_22 = arith.constant dense<0.000000e+00> : vector<64x8xf32>
    %18 = tpu.matmul %15, %17, %cst_22 {dimension_numbers = #tpu.dot_dimension_numbers<[1], [0], [0], [1], [0, 0, 1, 1], [], []>} : vector<64x32xbf16>, vector<32x8xbf16>, vector<64x8xf32> -> vector<64x8xf32>
    %19 = arith.addf %12, %18 : vector<64x8xf32>
    %c0_23 = arith.constant 0 : index
    %c0_24 = arith.constant 0 : index
    %c1_25 = arith.constant 1 : index
    %c0_26 = arith.constant 0 : index
    %c0_27 = arith.constant 0 : index
    %20 = vector.load %arg1[%c0_23, %c0_24, %c1_25, %c0_26, %c0_27] : memref<1x1x10x10x32xbf16, #tpu.memory_space<vmem>>, vector<1x1x8x8x32xbf16>
    %21 = vector.shape_cast %20 : vector<1x1x8x8x32xbf16> to vector<8x8x32xbf16>
    %22 = vector.shape_cast %21 : vector<8x8x32xbf16> to vector<64x32xbf16>
    %c3 = arith.constant 3 : index
    %c0_28 = arith.constant 0 : index
    %c0_29 = arith.constant 0 : index
    %23 = vector.load %arg2[%c3, %c0_28, %c0_29] : memref<9x32x8xbf16, #tpu.memory_space<vmem>>, vector<1x32x8xbf16>
    %24 = vector.shape_cast %23 : vector<1x32x8xbf16> to vector<32x8xbf16>
    %cst_30 = arith.constant dense<0.000000e+00> : vector<64x8xf32>
    %25 = tpu.matmul %22, %24, %cst_30 {dimension_numbers = #tpu.dot_dimension_numbers<[1], [0], [0], [1], [0, 0, 1, 1], [], []>} : vector<64x32xbf16>, vector<32x8xbf16>, vector<64x8xf32> -> vector<64x8xf32>
    %26 = arith.addf %19, %25 : vector<64x8xf32>
    %c0_31 = arith.constant 0 : index
    %c0_32 = arith.constant 0 : index
    %c1_33 = arith.constant 1 : index
    %c1_34 = arith.constant 1 : index
    %c0_35 = arith.constant 0 : index
    %27 = vector.load %arg1[%c0_31, %c0_32, %c1_33, %c1_34, %c0_35] : memref<1x1x10x10x32xbf16, #tpu.memory_space<vmem>>, vector<1x1x8x8x32xbf16>
    %28 = vector.shape_cast %27 : vector<1x1x8x8x32xbf16> to vector<8x8x32xbf16>
    %29 = vector.shape_cast %28 : vector<8x8x32xbf16> to vector<64x32xbf16>
    %c4 = arith.constant 4 : index
    %c0_36 = arith.constant 0 : index
    %c0_37 = arith.constant 0 : index
    %30 = vector.load %arg2[%c4, %c0_36, %c0_37] : memref<9x32x8xbf16, #tpu.memory_space<vmem>>, vector<1x32x8xbf16>
    %31 = vector.shape_cast %30 : vector<1x32x8xbf16> to vector<32x8xbf16>
    %cst_38 = arith.constant dense<0.000000e+00> : vector<64x8xf32>
    %32 = tpu.matmul %29, %31, %cst_38 {dimension_numbers = #tpu.dot_dimension_numbers<[1], [0], [0], [1], [0, 0, 1, 1], [], []>} : vector<64x32xbf16>, vector<32x8xbf16>, vector<64x8xf32> -> vector<64x8xf32>
    %33 = arith.addf %26, %32 : vector<64x8xf32>
    %c0_39 = arith.constant 0 : index
    %c0_40 = arith.constant 0 : index
    %c1_41 = arith.constant 1 : index
    %c2_42 = arith.constant 2 : index
    %c0_43 = arith.constant 0 : index
    %34 = vector.load %arg1[%c0_39, %c0_40, %c1_41, %c2_42, %c0_43] : memref<1x1x10x10x32xbf16, #tpu.memory_space<vmem>>, vector<1x1x8x8x32xbf16>
    %35 = vector.shape_cast %34 : vector<1x1x8x8x32xbf16> to vector<8x8x32xbf16>
    %36 = vector.shape_cast %35 : vector<8x8x32xbf16> to vector<64x32xbf16>
    %c5 = arith.constant 5 : index
    %c0_44 = arith.constant 0 : index
    %c0_45 = arith.constant 0 : index
    %37 = vector.load %arg2[%c5, %c0_44, %c0_45] : memref<9x32x8xbf16, #tpu.memory_space<vmem>>, vector<1x32x8xbf16>
    %38 = vector.shape_cast %37 : vector<1x32x8xbf16> to vector<32x8xbf16>
    %cst_46 = arith.constant dense<0.000000e+00> : vector<64x8xf32>
    %39 = tpu.matmul %36, %38, %cst_46 {dimension_numbers = #tpu.dot_dimension_numbers<[1], [0], [0], [1], [0, 0, 1, 1], [], []>} : vector<64x32xbf16>, vector<32x8xbf16>, vector<64x8xf32> -> vector<64x8xf32>
    %40 = arith.addf %33, %39 : vector<64x8xf32>
    %c0_47 = arith.constant 0 : index
    %c0_48 = arith.constant 0 : index
    %c2_49 = arith.constant 2 : index
    %c0_50 = arith.constant 0 : index
    %c0_51 = arith.constant 0 : index
    %41 = vector.load %arg1[%c0_47, %c0_48, %c2_49, %c0_50, %c0_51] : memref<1x1x10x10x32xbf16, #tpu.memory_space<vmem>>, vector<1x1x8x8x32xbf16>
    %42 = vector.shape_cast %41 : vector<1x1x8x8x32xbf16> to vector<8x8x32xbf16>
    %43 = vector.shape_cast %42 : vector<8x8x32xbf16> to vector<64x32xbf16>
    %c6 = arith.constant 6 : index
    %c0_52 = arith.constant 0 : index
    %c0_53 = arith.constant 0 : index
    %44 = vector.load %arg2[%c6, %c0_52, %c0_53] : memref<9x32x8xbf16, #tpu.memory_space<vmem>>, vector<1x32x8xbf16>
    %45 = vector.shape_cast %44 : vector<1x32x8xbf16> to vector<32x8xbf16>
    %cst_54 = arith.constant dense<0.000000e+00> : vector<64x8xf32>
    %46 = tpu.matmul %43, %45, %cst_54 {dimension_numbers = #tpu.dot_dimension_numbers<[1], [0], [0], [1], [0, 0, 1, 1], [], []>} : vector<64x32xbf16>, vector<32x8xbf16>, vector<64x8xf32> -> vector<64x8xf32>
    %47 = arith.addf %40, %46 : vector<64x8xf32>
    %c0_55 = arith.constant 0 : index
    %c0_56 = arith.constant 0 : index
    %c2_57 = arith.constant 2 : index
    %c1_58 = arith.constant 1 : index
    %c0_59 = arith.constant 0 : index
    %48 = vector.load %arg1[%c0_55, %c0_56, %c2_57, %c1_58, %c0_59] : memref<1x1x10x10x32xbf16, #tpu.memory_space<vmem>>, vector<1x1x8x8x32xbf16>
    %49 = vector.shape_cast %48 : vector<1x1x8x8x32xbf16> to vector<8x8x32xbf16>
    %50 = vector.shape_cast %49 : vector<8x8x32xbf16> to vector<64x32xbf16>
    %c7 = arith.constant 7 : index
    %c0_60 = arith.constant 0 : index
    %c0_61 = arith.constant 0 : index
    %51 = vector.load %arg2[%c7, %c0_60, %c0_61] : memref<9x32x8xbf16, #tpu.memory_space<vmem>>, vector<1x32x8xbf16>
    %52 = vector.shape_cast %51 : vector<1x32x8xbf16> to vector<32x8xbf16>
    %cst_62 = arith.constant dense<0.000000e+00> : vector<64x8xf32>
    %53 = tpu.matmul %50, %52, %cst_62 {dimension_numbers = #tpu.dot_dimension_numbers<[1], [0], [0], [1], [0, 0, 1, 1], [], []>} : vector<64x32xbf16>, vector<32x8xbf16>, vector<64x8xf32> -> vector<64x8xf32>
    %54 = arith.addf %47, %53 : vector<64x8xf32>
    %c0_63 = arith.constant 0 : index
    %c0_64 = arith.constant 0 : index
    %c2_65 = arith.constant 2 : index
    %c2_66 = arith.constant 2 : index
    %c0_67 = arith.constant 0 : index
    %55 = vector.load %arg1[%c0_63, %c0_64, %c2_65, %c2_66, %c0_67] : memref<1x1x10x10x32xbf16, #tpu.memory_space<vmem>>, vector<1x1x8x8x32xbf16>
    %56 = vector.shape_cast %55 : vector<1x1x8x8x32xbf16> to vector<8x8x32xbf16>
    %57 = vector.shape_cast %56 : vector<8x8x32xbf16> to vector<64x32xbf16>
    %c8 = arith.constant 8 : index
    %c0_68 = arith.constant 0 : index
    %c0_69 = arith.constant 0 : index
    %58 = vector.load %arg2[%c8, %c0_68, %c0_69] : memref<9x32x8xbf16, #tpu.memory_space<vmem>>, vector<1x32x8xbf16>
    %59 = vector.shape_cast %58 : vector<1x32x8xbf16> to vector<32x8xbf16>
    %cst_70 = arith.constant dense<0.000000e+00> : vector<64x8xf32>
    %60 = tpu.matmul %57, %59, %cst_70 {dimension_numbers = #tpu.dot_dimension_numbers<[1], [0], [0], [1], [0, 0, 1, 1], [], []>} : vector<64x32xbf16>, vector<32x8xbf16>, vector<64x8xf32> -> vector<64x8xf32>
    %61 = arith.addf %54, %60 : vector<64x8xf32>
    %c0_71 = arith.constant 0 : index
    %c0_72 = arith.constant 0 : index
    %62 = vector.load %arg3[%c0_71, %c0_72] : memref<1x8xf32, #tpu.memory_space<vmem>>, vector<1x8xf32>
    %63 = vector.broadcast %62 : vector<1x8xf32> to vector<64x8xf32>
    %64 = arith.addf %61, %63 : vector<64x8xf32>
    %65 = arith.truncf %64 : vector<64x8xf32> to vector<64x8xbf16>
    %c0_73 = arith.constant 0 : index
    %c0_74 = arith.constant 0 : index
    %c0_75 = arith.constant 0 : index
    %66 = vector.load %arg4[%c0_73, %c0_74, %c0_75] : memref<1x64x8xbf16, #tpu.memory_space<vmem>>, vector<1x64x8xbf16>
    %67 = vector.shape_cast %66 : vector<1x64x8xbf16> to vector<64x8xbf16>
    %68 = vector.shape_cast %65 : vector<64x8xbf16> to vector<1x64x8xbf16>
    tpu.vector_store %arg4[%c0_73, %c0_74, %c0_75], %68 {strides = array<i32>} : memref<1x64x8xbf16, #tpu.memory_space<vmem>>, vector<1x64x8xbf16>,
    return
  }
  func.func @transform_0(%arg0: i32) -> (i32, i32, i32, i32, i32) {
    %c0_i32 = arith.constant 0 : i32
    %c0_i32_0 = arith.constant 0 : i32
    %c0_i32_1 = arith.constant 0 : i32
    %c0_i32_2 = arith.constant 0 : i32
    %c0_i32_3 = arith.constant 0 : i32
    return %arg0, %c0_i32, %c0_i32_0, %c0_i32_1, %c0_i32_2 : i32, i32, i32, i32, i32
  }
  func.func @transform_1(%arg0: i32) -> (i32, i32, i32) {
    %c0_i32 = arith.constant 0 : i32
    %c0_i32_0 = arith.constant 0 : i32
    %c0_i32_1 = arith.constant 0 : i32
    %c0_i32_2 = arith.constant 0 : i32
    return %c0_i32, %c0_i32_0, %c0_i32_1 : i32, i32, i32
  }
  func.func @transform_2(%arg0: i32) -> (i32, i32) {
    %c0_i32 = arith.constant 0 : i32
    %c0_i32_0 = arith.constant 0 : i32
    %c0_i32_1 = arith.constant 0 : i32
    return %c0_i32, %c0_i32_0 : i32, i32
  }
  func.func @transform_3(%arg0: i32) -> (i32, i32, i32) {
    %c0_i32 = arith.constant 0 : i32
    %c0_i32_0 = arith.constant 0 : i32
    %c0_i32_1 = arith.constant 0 : i32
    return %arg0, %c0_i32, %c0_i32_0 : i32, i32, i32
  }
}

module attributes {stable_mosaic.version = 11 : i64} {
  func.func @_conv_kernel(%arg0: i32, %arg1: memref<1x1x4x4x32xbf16, #tpu.memory_space<vmem>>, %arg2: memref<9x32x8xbf16, #tpu.memory_space<vmem>>, %arg3: memref<1x8xf32, #tpu.memory_space<vmem>>, %arg4: memref<1x4x8xbf16, #tpu.memory_space<vmem>>) attributes {dimension_semantics = [#tpu.dimension_semantics<parallel>], iteration_bounds = array<i64: 2>, scalar_prefetch = 0 : i64, scratch_operands = 0 : i64, tpu.core_type = #tpu.core_type<tc>, window_params = [{transform_indices = @transform_0, window_bounds = array<i64: 1, 1, 4, 4, 32>}, {pipeline_mode = #tpu.pipeline_mode<synchronous>, transform_indices = @transform_1, window_bounds = array<i64: 9, 32, 8>}, {pipeline_mode = #tpu.pipeline_mode<synchronous>, transform_indices = @transform_2, window_bounds = array<i64: 1, 8>}, {transform_indices = @transform_3, window_bounds = array<i64: 1, 4, 8>}]} {
    %c0 = arith.constant 0 : index
    %c0_0 = arith.constant 0 : index
    %c0_1 = arith.constant 0 : index
    %c0_2 = arith.constant 0 : index
    %c0_3 = arith.constant 0 : index
    %0 = vector.load %arg1[%c0, %c0_0, %c0_1, %c0_2, %c0_3] : memref<1x1x4x4x32xbf16, #tpu.memory_space<vmem>>, vector<1x1x2x2x32xbf16>
    %1 = vector.shape_cast %0 : vector<1x1x2x2x32xbf16> to vector<2x2x32xbf16>
    %2 = vector.shape_cast %1 : vector<2x2x32xbf16> to vector<4x32xbf16>
    %c0_4 = arith.constant 0 : index
    %c0_5 = arith.constant 0 : index
    %c0_6 = arith.constant 0 : index
    %3 = vector.load %arg2[%c0_4, %c0_5, %c0_6] : memref<9x32x8xbf16, #tpu.memory_space<vmem>>, vector<1x32x8xbf16>
    %4 = vector.shape_cast %3 : vector<1x32x8xbf16> to vector<32x8xbf16>
    %cst = arith.constant dense<0.000000e+00> : vector<4x8xf32>
    %5 = tpu.matmul %2, %4, %cst {dimension_numbers = #tpu.dot_dimension_numbers<[1], [0], [0], [1], [0, 0, 1, 1], [], []>} : vector<4x32xbf16>, vector<32x8xbf16>, vector<4x8xf32> -> vector<4x8xf32>
    %c0_7 = arith.constant 0 : index
    %c0_8 = arith.constant 0 : index
    %c0_9 = arith.constant 0 : index
    %c1 = arith.constant 1 : index
    %c0_10 = arith.constant 0 : index
    %6 = vector.load %arg1[%c0_7, %c0_8, %c0_9, %c1, %c0_10] : memref<1x1x4x4x32xbf16, #tpu.memory_space<vmem>>, vector<1x1x2x2x32xbf16>
    %7 = vector.shape_cast %6 : vector<1x1x2x2x32xbf16> to vector<2x2x32xbf16>
    %8 = vector.shape_cast %7 : vector<2x2x32xbf16> to vector<4x32xbf16>
    %c1_11 = arith.constant 1 : index
    %c0_12 = arith.constant 0 : index
    %c0_13 = arith.constant 0 : index
    %9 = vector.load %arg2[%c1_11, %c0_12, %c0_13] : memref<9x32x8xbf16, #tpu.memory_space<vmem>>, vector<1x32x8xbf16>
    %10 = vector.shape_cast %9 : vector<1x32x8xbf16> to vector<32x8xbf16>
    %cst_14 = arith.constant dense<0.000000e+00> : vector<4x8xf32>
    %11 = tpu.matmul %8, %10, %cst_14 {dimension_numbers = #tpu.dot_dimension_numbers<[1], [0], [0], [1], [0, 0, 1, 1], [], []>} : vector<4x32xbf16>, vector<32x8xbf16>, vector<4x8xf32> -> vector<4x8xf32>
    %12 = arith.addf %5, %11 : vector<4x8xf32>
    %c0_15 = arith.constant 0 : index
    %c0_16 = arith.constant 0 : index
    %c0_17 = arith.constant 0 : index
    %c2 = arith.constant 2 : index
    %c0_18 = arith.constant 0 : index
    %13 = vector.load %arg1[%c0_15, %c0_16, %c0_17, %c2, %c0_18] : memref<1x1x4x4x32xbf16, #tpu.memory_space<vmem>>, vector<1x1x2x2x32xbf16>
    %14 = vector.shape_cast %13 : vector<1x1x2x2x32xbf16> to vector<2x2x32xbf16>
    %15 = vector.shape_cast %14 : vector<2x2x32xbf16> to vector<4x32xbf16>
    %c2_19 = arith.constant 2 : index
    %c0_20 = arith.constant 0 : index
    %c0_21 = arith.constant 0 : index
    %16 = vector.load %arg2[%c2_19, %c0_20, %c0_21] : memref<9x32x8xbf16, #tpu.memory_space<vmem>>, vector<1x32x8xbf16>
    %17 = vector.shape_cast %16 : vector<1x32x8xbf16> to vector<32x8xbf16>
    %cst_22 = arith.constant dense<0.000000e+00> : vector<4x8xf32>
    %18 = tpu.matmul %15, %17, %cst_22 {dimension_numbers = #tpu.dot_dimension_numbers<[1], [0], [0], [1], [0, 0, 1, 1], [], []>} : vector<4x32xbf16>, vector<32x8xbf16>, vector<4x8xf32> -> vector<4x8xf32>
    %19 = arith.addf %12, %18 : vector<4x8xf32>
    %c0_23 = arith.constant 0 : index
    %c0_24 = arith.constant 0 : index
    %c1_25 = arith.constant 1 : index
    %c0_26 = arith.constant 0 : index
    %c0_27 = arith.constant 0 : index
    %20 = vector.load %arg1[%c0_23, %c0_24, %c1_25, %c0_26, %c0_27] : memref<1x1x4x4x32xbf16, #tpu.memory_space<vmem>>, vector<1x1x2x2x32xbf16>
    %21 = vector.shape_cast %20 : vector<1x1x2x2x32xbf16> to vector<2x2x32xbf16>
    %22 = vector.shape_cast %21 : vector<2x2x32xbf16> to vector<4x32xbf16>
    %c3 = arith.constant 3 : index
    %c0_28 = arith.constant 0 : index
    %c0_29 = arith.constant 0 : index
    %23 = vector.load %arg2[%c3, %c0_28, %c0_29] : memref<9x32x8xbf16, #tpu.memory_space<vmem>>, vector<1x32x8xbf16>
    %24 = vector.shape_cast %23 : vector<1x32x8xbf16> to vector<32x8xbf16>
    %cst_30 = arith.constant dense<0.000000e+00> : vector<4x8xf32>
    %25 = tpu.matmul %22, %24, %cst_30 {dimension_numbers = #tpu.dot_dimension_numbers<[1], [0], [0], [1], [0, 0, 1, 1], [], []>} : vector<4x32xbf16>, vector<32x8xbf16>, vector<4x8xf32> -> vector<4x8xf32>
    %26 = arith.addf %19, %25 : vector<4x8xf32>
    %c0_31 = arith.constant 0 : index
    %c0_32 = arith.constant 0 : index
    %c1_33 = arith.constant 1 : index
    %c1_34 = arith.constant 1 : index
    %c0_35 = arith.constant 0 : index
    %27 = vector.load %arg1[%c0_31, %c0_32, %c1_33, %c1_34, %c0_35] : memref<1x1x4x4x32xbf16, #tpu.memory_space<vmem>>, vector<1x1x2x2x32xbf16>
    %28 = vector.shape_cast %27 : vector<1x1x2x2x32xbf16> to vector<2x2x32xbf16>
    %29 = vector.shape_cast %28 : vector<2x2x32xbf16> to vector<4x32xbf16>
    %c4 = arith.constant 4 : index
    %c0_36 = arith.constant 0 : index
    %c0_37 = arith.constant 0 : index
    %30 = vector.load %arg2[%c4, %c0_36, %c0_37] : memref<9x32x8xbf16, #tpu.memory_space<vmem>>, vector<1x32x8xbf16>
    %31 = vector.shape_cast %30 : vector<1x32x8xbf16> to vector<32x8xbf16>
    %cst_38 = arith.constant dense<0.000000e+00> : vector<4x8xf32>
    %32 = tpu.matmul %29, %31, %cst_38 {dimension_numbers = #tpu.dot_dimension_numbers<[1], [0], [0], [1], [0, 0, 1, 1], [], []>} : vector<4x32xbf16>, vector<32x8xbf16>, vector<4x8xf32> -> vector<4x8xf32>
    %33 = arith.addf %26, %32 : vector<4x8xf32>
    %c0_39 = arith.constant 0 : index
    %c0_40 = arith.constant 0 : index
    %c1_41 = arith.constant 1 : index
    %c2_42 = arith.constant 2 : index
    %c0_43 = arith.constant 0 : index
    %34 = vector.load %arg1[%c0_39, %c0_40, %c1_41, %c2_42, %c0_43] : memref<1x1x4x4x32xbf16, #tpu.memory_space<vmem>>, vector<1x1x2x2x32xbf16>
    %35 = vector.shape_cast %34 : vector<1x1x2x2x32xbf16> to vector<2x2x32xbf16>
    %36 = vector.shape_cast %35 : vector<2x2x32xbf16> to vector<4x32xbf16>
    %c5 = arith.constant 5 : index
    %c0_44 = arith.constant 0 : index
    %c0_45 = arith.constant 0 : index
    %37 = vector.load %arg2[%c5, %c0_44, %c0_45] : memref<9x32x8xbf16, #tpu.memory_space<vmem>>, vector<1x32x8xbf16>
    %38 = vector.shape_cast %37 : vector<1x32x8xbf16> to vector<32x8xbf16>
    %cst_46 = arith.constant dense<0.000000e+00> : vector<4x8xf32>
    %39 = tpu.matmul %36, %38, %cst_46 {dimension_numbers = #tpu.dot_dimension_numbers<[1], [0], [0], [1], [0, 0, 1, 1], [], []>} : vector<4x32xbf16>, vector<32x8xbf16>, vector<4x8xf32> -> vector<4x8xf32>
    %40 = arith.addf %33, %39 : vector<4x8xf32>
    %c0_47 = arith.constant 0 : index
    %c0_48 = arith.constant 0 : index
    %c2_49 = arith.constant 2 : index
    %c0_50 = arith.constant 0 : index
    %c0_51 = arith.constant 0 : index
    %41 = vector.load %arg1[%c0_47, %c0_48, %c2_49, %c0_50, %c0_51] : memref<1x1x4x4x32xbf16, #tpu.memory_space<vmem>>, vector<1x1x2x2x32xbf16>
    %42 = vector.shape_cast %41 : vector<1x1x2x2x32xbf16> to vector<2x2x32xbf16>
    %43 = vector.shape_cast %42 : vector<2x2x32xbf16> to vector<4x32xbf16>
    %c6 = arith.constant 6 : index
    %c0_52 = arith.constant 0 : index
    %c0_53 = arith.constant 0 : index
    %44 = vector.load %arg2[%c6, %c0_52, %c0_53] : memref<9x32x8xbf16, #tpu.memory_space<vmem>>, vector<1x32x8xbf16>
    %45 = vector.shape_cast %44 : vector<1x32x8xbf16> to vector<32x8xbf16>
    %cst_54 = arith.constant dense<0.000000e+00> : vector<4x8xf32>
    %46 = tpu.matmul %43, %45, %cst_54 {dimension_numbers = #tpu.dot_dimension_numbers<[1], [0], [0], [1], [0, 0, 1, 1], [], []>} : vector<4x32xbf16>, vector<32x8xbf16>, vector<4x8xf32> -> vector<4x8xf32>
    %47 = arith.addf %40, %46 : vector<4x8xf32>
    %c0_55 = arith.constant 0 : index
    %c0_56 = arith.constant 0 : index
    %c2_57 = arith.constant 2 : index
    %c1_58 = arith.constant 1 : index
    %c0_59 = arith.constant 0 : index
    %48 = vector.load %arg1[%c0_55, %c0_56, %c2_57, %c1_58, %c0_59] : memref<1x1x4x4x32xbf16, #tpu.memory_space<vmem>>, vector<1x1x2x2x32xbf16>
    %49 = vector.shape_cast %48 : vector<1x1x2x2x32xbf16> to vector<2x2x32xbf16>
    %50 = vector.shape_cast %49 : vector<2x2x32xbf16> to vector<4x32xbf16>
    %c7 = arith.constant 7 : index
    %c0_60 = arith.constant 0 : index
    %c0_61 = arith.constant 0 : index
    %51 = vector.load %arg2[%c7, %c0_60, %c0_61] : memref<9x32x8xbf16, #tpu.memory_space<vmem>>, vector<1x32x8xbf16>
    %52 = vector.shape_cast %51 : vector<1x32x8xbf16> to vector<32x8xbf16>
    %cst_62 = arith.constant dense<0.000000e+00> : vector<4x8xf32>
    %53 = tpu.matmul %50, %52, %cst_62 {dimension_numbers = #tpu.dot_dimension_numbers<[1], [0], [0], [1], [0, 0, 1, 1], [], []>} : vector<4x32xbf16>, vector<32x8xbf16>, vector<4x8xf32> -> vector<4x8xf32>
    %54 = arith.addf %47, %53 : vector<4x8xf32>
    %c0_63 = arith.constant 0 : index
    %c0_64 = arith.constant 0 : index
    %c2_65 = arith.constant 2 : index
    %c2_66 = arith.constant 2 : index
    %c0_67 = arith.constant 0 : index
    %55 = vector.load %arg1[%c0_63, %c0_64, %c2_65, %c2_66, %c0_67] : memref<1x1x4x4x32xbf16, #tpu.memory_space<vmem>>, vector<1x1x2x2x32xbf16>
    %56 = vector.shape_cast %55 : vector<1x1x2x2x32xbf16> to vector<2x2x32xbf16>
    %57 = vector.shape_cast %56 : vector<2x2x32xbf16> to vector<4x32xbf16>
    %c8 = arith.constant 8 : index
    %c0_68 = arith.constant 0 : index
    %c0_69 = arith.constant 0 : index
    %58 = vector.load %arg2[%c8, %c0_68, %c0_69] : memref<9x32x8xbf16, #tpu.memory_space<vmem>>, vector<1x32x8xbf16>
    %59 = vector.shape_cast %58 : vector<1x32x8xbf16> to vector<32x8xbf16>
    %cst_70 = arith.constant dense<0.000000e+00> : vector<4x8xf32>
    %60 = tpu.matmul %57, %59, %cst_70 {dimension_numbers = #tpu.dot_dimension_numbers<[1], [0], [0], [1], [0, 0, 1, 1], [], []>} : vector<4x32xbf16>, vector<32x8xbf16>, vector<4x8xf32> -> vector<4x8xf32>
    %61 = arith.addf %54, %60 : vector<4x8xf32>
    %c0_71 = arith.constant 0 : index
    %c0_72 = arith.constant 0 : index
    %62 = vector.load %arg3[%c0_71, %c0_72] : memref<1x8xf32, #tpu.memory_space<vmem>>, vector<1x8xf32>
    %63 = vector.broadcast %62 : vector<1x8xf32> to vector<4x8xf32>
    %64 = arith.addf %61, %63 : vector<4x8xf32>
    %65 = arith.truncf %64 : vector<4x8xf32> to vector<4x8xbf16>
    %c0_73 = arith.constant 0 : index
    %c0_74 = arith.constant 0 : index
    %c0_75 = arith.constant 0 : index
    %66 = vector.load %arg4[%c0_73, %c0_74, %c0_75] : memref<1x4x8xbf16, #tpu.memory_space<vmem>>, vector<1x4x8xbf16>
    %67 = vector.shape_cast %66 : vector<1x4x8xbf16> to vector<4x8xbf16>
    %68 = vector.shape_cast %65 : vector<4x8xbf16> to vector<1x4x8xbf16>
    tpu.vector_store %arg4[%c0_73, %c0_74, %c0_75], %68 {strides = array<i32>} : memref<1x4x8xbf16, #tpu.memory_space<vmem>>, vector<1x4x8xbf16>,
    return
  }
  func.func @transform_0(%arg0: i32) -> (i32, i32, i32, i32, i32) {
    %c0_i32 = arith.constant 0 : i32
    %c0_i32_0 = arith.constant 0 : i32
    %c0_i32_1 = arith.constant 0 : i32
    %c0_i32_2 = arith.constant 0 : i32
    %c0_i32_3 = arith.constant 0 : i32
    return %arg0, %c0_i32, %c0_i32_0, %c0_i32_1, %c0_i32_2 : i32, i32, i32, i32, i32
  }
  func.func @transform_1(%arg0: i32) -> (i32, i32, i32) {
    %c0_i32 = arith.constant 0 : i32
    %c0_i32_0 = arith.constant 0 : i32
    %c0_i32_1 = arith.constant 0 : i32
    %c0_i32_2 = arith.constant 0 : i32
    return %c0_i32, %c0_i32_0, %c0_i32_1 : i32, i32, i32
  }
  func.func @transform_2(%arg0: i32) -> (i32, i32) {
    %c0_i32 = arith.constant 0 : i32
    %c0_i32_0 = arith.constant 0 : i32
    %c0_i32_1 = arith.constant 0 : i32
    return %c0_i32, %c0_i32_0 : i32, i32
  }
  func.func @transform_3(%arg0: i32) -> (i32, i32, i32) {
    %c0_i32 = arith.constant 0 : i32
    %c0_i32_0 = arith.constant 0 : i32
    %c0_i32_1 = arith.constant 0 : i32
    return %arg0, %c0_i32, %c0_i32_0 : i32, i32, i32
  }
}

module attributes {stable_mosaic.version = 11 : i64} {
  func.func @_conv_kernel(%arg0: i32, %arg1: memref<1x1x3x3x32xbf16, #tpu.memory_space<vmem>>, %arg2: memref<9x32x8xbf16, #tpu.memory_space<vmem>>, %arg3: memref<1x8xf32, #tpu.memory_space<vmem>>, %arg4: memref<1x1x8xbf16, #tpu.memory_space<vmem>>) attributes {dimension_semantics = [#tpu.dimension_semantics<parallel>], iteration_bounds = array<i64: 2>, scalar_prefetch = 0 : i64, scratch_operands = 0 : i64, tpu.core_type = #tpu.core_type<tc>, window_params = [{transform_indices = @transform_0, window_bounds = array<i64: 1, 1, 3, 3, 32>}, {pipeline_mode = #tpu.pipeline_mode<synchronous>, transform_indices = @transform_1, window_bounds = array<i64: 9, 32, 8>}, {pipeline_mode = #tpu.pipeline_mode<synchronous>, transform_indices = @transform_2, window_bounds = array<i64: 1, 8>}, {transform_indices = @transform_3, window_bounds = array<i64: 1, 1, 8>}]} {
    %c0 = arith.constant 0 : index
    %c0_0 = arith.constant 0 : index
    %c0_1 = arith.constant 0 : index
    %c0_2 = arith.constant 0 : index
    %c0_3 = arith.constant 0 : index
    %0 = vector.load %arg1[%c0, %c0_0, %c0_1, %c0_2, %c0_3] : memref<1x1x3x3x32xbf16, #tpu.memory_space<vmem>>, vector<1x1x1x1x32xbf16>
    %1 = vector.shape_cast %0 : vector<1x1x1x1x32xbf16> to vector<1x1x32xbf16>
    %2 = vector.shape_cast %1 : vector<1x1x32xbf16> to vector<1x32xbf16>
    %c0_4 = arith.constant 0 : index
    %c0_5 = arith.constant 0 : index
    %c0_6 = arith.constant 0 : index
    %3 = vector.load %arg2[%c0_4, %c0_5, %c0_6] : memref<9x32x8xbf16, #tpu.memory_space<vmem>>, vector<1x32x8xbf16>
    %4 = vector.shape_cast %3 : vector<1x32x8xbf16> to vector<32x8xbf16>
    %cst = arith.constant dense<0.000000e+00> : vector<1x8xf32>
    %5 = tpu.matmul %2, %4, %cst {dimension_numbers = #tpu.dot_dimension_numbers<[1], [0], [0], [1], [0, 0, 1, 1], [], []>} : vector<1x32xbf16>, vector<32x8xbf16>, vector<1x8xf32> -> vector<1x8xf32>
    %c0_7 = arith.constant 0 : index
    %c0_8 = arith.constant 0 : index
    %c0_9 = arith.constant 0 : index
    %c1 = arith.constant 1 : index
    %c0_10 = arith.constant 0 : index
    %6 = vector.load %arg1[%c0_7, %c0_8, %c0_9, %c1, %c0_10] : memref<1x1x3x3x32xbf16, #tpu.memory_space<vmem>>, vector<1x1x1x1x32xbf16>
    %7 = vector.shape_cast %6 : vector<1x1x1x1x32xbf16> to vector<1x1x32xbf16>
    %8 = vector.shape_cast %7 : vector<1x1x32xbf16> to vector<1x32xbf16>
    %c1_11 = arith.constant 1 : index
    %c0_12 = arith.constant 0 : index
    %c0_13 = arith.constant 0 : index
    %9 = vector.load %arg2[%c1_11, %c0_12, %c0_13] : memref<9x32x8xbf16, #tpu.memory_space<vmem>>, vector<1x32x8xbf16>
    %10 = vector.shape_cast %9 : vector<1x32x8xbf16> to vector<32x8xbf16>
    %cst_14 = arith.constant dense<0.000000e+00> : vector<1x8xf32>
    %11 = tpu.matmul %8, %10, %cst_14 {dimension_numbers = #tpu.dot_dimension_numbers<[1], [0], [0], [1], [0, 0, 1, 1], [], []>} : vector<1x32xbf16>, vector<32x8xbf16>, vector<1x8xf32> -> vector<1x8xf32>
    %12 = arith.addf %5, %11 : vector<1x8xf32>
    %c0_15 = arith.constant 0 : index
    %c0_16 = arith.constant 0 : index
    %c0_17 = arith.constant 0 : index
    %c2 = arith.constant 2 : index
    %c0_18 = arith.constant 0 : index
    %13 = vector.load %arg1[%c0_15, %c0_16, %c0_17, %c2, %c0_18] : memref<1x1x3x3x32xbf16, #tpu.memory_space<vmem>>, vector<1x1x1x1x32xbf16>
    %14 = vector.shape_cast %13 : vector<1x1x1x1x32xbf16> to vector<1x1x32xbf16>
    %15 = vector.shape_cast %14 : vector<1x1x32xbf16> to vector<1x32xbf16>
    %c2_19 = arith.constant 2 : index
    %c0_20 = arith.constant 0 : index
    %c0_21 = arith.constant 0 : index
    %16 = vector.load %arg2[%c2_19, %c0_20, %c0_21] : memref<9x32x8xbf16, #tpu.memory_space<vmem>>, vector<1x32x8xbf16>
    %17 = vector.shape_cast %16 : vector<1x32x8xbf16> to vector<32x8xbf16>
    %cst_22 = arith.constant dense<0.000000e+00> : vector<1x8xf32>
    %18 = tpu.matmul %15, %17, %cst_22 {dimension_numbers = #tpu.dot_dimension_numbers<[1], [0], [0], [1], [0, 0, 1, 1], [], []>} : vector<1x32xbf16>, vector<32x8xbf16>, vector<1x8xf32> -> vector<1x8xf32>
    %19 = arith.addf %12, %18 : vector<1x8xf32>
    %c0_23 = arith.constant 0 : index
    %c0_24 = arith.constant 0 : index
    %c1_25 = arith.constant 1 : index
    %c0_26 = arith.constant 0 : index
    %c0_27 = arith.constant 0 : index
    %20 = vector.load %arg1[%c0_23, %c0_24, %c1_25, %c0_26, %c0_27] : memref<1x1x3x3x32xbf16, #tpu.memory_space<vmem>>, vector<1x1x1x1x32xbf16>
    %21 = vector.shape_cast %20 : vector<1x1x1x1x32xbf16> to vector<1x1x32xbf16>
    %22 = vector.shape_cast %21 : vector<1x1x32xbf16> to vector<1x32xbf16>
    %c3 = arith.constant 3 : index
    %c0_28 = arith.constant 0 : index
    %c0_29 = arith.constant 0 : index
    %23 = vector.load %arg2[%c3, %c0_28, %c0_29] : memref<9x32x8xbf16, #tpu.memory_space<vmem>>, vector<1x32x8xbf16>
    %24 = vector.shape_cast %23 : vector<1x32x8xbf16> to vector<32x8xbf16>
    %cst_30 = arith.constant dense<0.000000e+00> : vector<1x8xf32>
    %25 = tpu.matmul %22, %24, %cst_30 {dimension_numbers = #tpu.dot_dimension_numbers<[1], [0], [0], [1], [0, 0, 1, 1], [], []>} : vector<1x32xbf16>, vector<32x8xbf16>, vector<1x8xf32> -> vector<1x8xf32>
    %26 = arith.addf %19, %25 : vector<1x8xf32>
    %c0_31 = arith.constant 0 : index
    %c0_32 = arith.constant 0 : index
    %c1_33 = arith.constant 1 : index
    %c1_34 = arith.constant 1 : index
    %c0_35 = arith.constant 0 : index
    %27 = vector.load %arg1[%c0_31, %c0_32, %c1_33, %c1_34, %c0_35] : memref<1x1x3x3x32xbf16, #tpu.memory_space<vmem>>, vector<1x1x1x1x32xbf16>
    %28 = vector.shape_cast %27 : vector<1x1x1x1x32xbf16> to vector<1x1x32xbf16>
    %29 = vector.shape_cast %28 : vector<1x1x32xbf16> to vector<1x32xbf16>
    %c4 = arith.constant 4 : index
    %c0_36 = arith.constant 0 : index
    %c0_37 = arith.constant 0 : index
    %30 = vector.load %arg2[%c4, %c0_36, %c0_37] : memref<9x32x8xbf16, #tpu.memory_space<vmem>>, vector<1x32x8xbf16>
    %31 = vector.shape_cast %30 : vector<1x32x8xbf16> to vector<32x8xbf16>
    %cst_38 = arith.constant dense<0.000000e+00> : vector<1x8xf32>
    %32 = tpu.matmul %29, %31, %cst_38 {dimension_numbers = #tpu.dot_dimension_numbers<[1], [0], [0], [1], [0, 0, 1, 1], [], []>} : vector<1x32xbf16>, vector<32x8xbf16>, vector<1x8xf32> -> vector<1x8xf32>
    %33 = arith.addf %26, %32 : vector<1x8xf32>
    %c0_39 = arith.constant 0 : index
    %c0_40 = arith.constant 0 : index
    %c1_41 = arith.constant 1 : index
    %c2_42 = arith.constant 2 : index
    %c0_43 = arith.constant 0 : index
    %34 = vector.load %arg1[%c0_39, %c0_40, %c1_41, %c2_42, %c0_43] : memref<1x1x3x3x32xbf16, #tpu.memory_space<vmem>>, vector<1x1x1x1x32xbf16>
    %35 = vector.shape_cast %34 : vector<1x1x1x1x32xbf16> to vector<1x1x32xbf16>
    %36 = vector.shape_cast %35 : vector<1x1x32xbf16> to vector<1x32xbf16>
    %c5 = arith.constant 5 : index
    %c0_44 = arith.constant 0 : index
    %c0_45 = arith.constant 0 : index
    %37 = vector.load %arg2[%c5, %c0_44, %c0_45] : memref<9x32x8xbf16, #tpu.memory_space<vmem>>, vector<1x32x8xbf16>
    %38 = vector.shape_cast %37 : vector<1x32x8xbf16> to vector<32x8xbf16>
    %cst_46 = arith.constant dense<0.000000e+00> : vector<1x8xf32>
    %39 = tpu.matmul %36, %38, %cst_46 {dimension_numbers = #tpu.dot_dimension_numbers<[1], [0], [0], [1], [0, 0, 1, 1], [], []>} : vector<1x32xbf16>, vector<32x8xbf16>, vector<1x8xf32> -> vector<1x8xf32>
    %40 = arith.addf %33, %39 : vector<1x8xf32>
    %c0_47 = arith.constant 0 : index
    %c0_48 = arith.constant 0 : index
    %c2_49 = arith.constant 2 : index
    %c0_50 = arith.constant 0 : index
    %c0_51 = arith.constant 0 : index
    %41 = vector.load %arg1[%c0_47, %c0_48, %c2_49, %c0_50, %c0_51] : memref<1x1x3x3x32xbf16, #tpu.memory_space<vmem>>, vector<1x1x1x1x32xbf16>
    %42 = vector.shape_cast %41 : vector<1x1x1x1x32xbf16> to vector<1x1x32xbf16>
    %43 = vector.shape_cast %42 : vector<1x1x32xbf16> to vector<1x32xbf16>
    %c6 = arith.constant 6 : index
    %c0_52 = arith.constant 0 : index
    %c0_53 = arith.constant 0 : index
    %44 = vector.load %arg2[%c6, %c0_52, %c0_53] : memref<9x32x8xbf16, #tpu.memory_space<vmem>>, vector<1x32x8xbf16>
    %45 = vector.shape_cast %44 : vector<1x32x8xbf16> to vector<32x8xbf16>
    %cst_54 = arith.constant dense<0.000000e+00> : vector<1x8xf32>
    %46 = tpu.matmul %43, %45, %cst_54 {dimension_numbers = #tpu.dot_dimension_numbers<[1], [0], [0], [1], [0, 0, 1, 1], [], []>} : vector<1x32xbf16>, vector<32x8xbf16>, vector<1x8xf32> -> vector<1x8xf32>
    %47 = arith.addf %40, %46 : vector<1x8xf32>
    %c0_55 = arith.constant 0 : index
    %c0_56 = arith.constant 0 : index
    %c2_57 = arith.constant 2 : index
    %c1_58 = arith.constant 1 : index
    %c0_59 = arith.constant 0 : index
    %48 = vector.load %arg1[%c0_55, %c0_56, %c2_57, %c1_58, %c0_59] : memref<1x1x3x3x32xbf16, #tpu.memory_space<vmem>>, vector<1x1x1x1x32xbf16>
    %49 = vector.shape_cast %48 : vector<1x1x1x1x32xbf16> to vector<1x1x32xbf16>
    %50 = vector.shape_cast %49 : vector<1x1x32xbf16> to vector<1x32xbf16>
    %c7 = arith.constant 7 : index
    %c0_60 = arith.constant 0 : index
    %c0_61 = arith.constant 0 : index
    %51 = vector.load %arg2[%c7, %c0_60, %c0_61] : memref<9x32x8xbf16, #tpu.memory_space<vmem>>, vector<1x32x8xbf16>
    %52 = vector.shape_cast %51 : vector<1x32x8xbf16> to vector<32x8xbf16>
    %cst_62 = arith.constant dense<0.000000e+00> : vector<1x8xf32>
    %53 = tpu.matmul %50, %52, %cst_62 {dimension_numbers = #tpu.dot_dimension_numbers<[1], [0], [0], [1], [0, 0, 1, 1], [], []>} : vector<1x32xbf16>, vector<32x8xbf16>, vector<1x8xf32> -> vector<1x8xf32>
    %54 = arith.addf %47, %53 : vector<1x8xf32>
    %c0_63 = arith.constant 0 : index
    %c0_64 = arith.constant 0 : index
    %c2_65 = arith.constant 2 : index
    %c2_66 = arith.constant 2 : index
    %c0_67 = arith.constant 0 : index
    %55 = vector.load %arg1[%c0_63, %c0_64, %c2_65, %c2_66, %c0_67] : memref<1x1x3x3x32xbf16, #tpu.memory_space<vmem>>, vector<1x1x1x1x32xbf16>
    %56 = vector.shape_cast %55 : vector<1x1x1x1x32xbf16> to vector<1x1x32xbf16>
    %57 = vector.shape_cast %56 : vector<1x1x32xbf16> to vector<1x32xbf16>
    %c8 = arith.constant 8 : index
    %c0_68 = arith.constant 0 : index
    %c0_69 = arith.constant 0 : index
    %58 = vector.load %arg2[%c8, %c0_68, %c0_69] : memref<9x32x8xbf16, #tpu.memory_space<vmem>>, vector<1x32x8xbf16>
    %59 = vector.shape_cast %58 : vector<1x32x8xbf16> to vector<32x8xbf16>
    %cst_70 = arith.constant dense<0.000000e+00> : vector<1x8xf32>
    %60 = tpu.matmul %57, %59, %cst_70 {dimension_numbers = #tpu.dot_dimension_numbers<[1], [0], [0], [1], [0, 0, 1, 1], [], []>} : vector<1x32xbf16>, vector<32x8xbf16>, vector<1x8xf32> -> vector<1x8xf32>
    %61 = arith.addf %54, %60 : vector<1x8xf32>
    %c0_71 = arith.constant 0 : index
    %c0_72 = arith.constant 0 : index
    %62 = vector.load %arg3[%c0_71, %c0_72] : memref<1x8xf32, #tpu.memory_space<vmem>>, vector<1x8xf32>
    %63 = arith.addf %61, %62 : vector<1x8xf32>
    %64 = arith.truncf %63 : vector<1x8xf32> to vector<1x8xbf16>
    %c0_73 = arith.constant 0 : index
    %c0_74 = arith.constant 0 : index
    %c0_75 = arith.constant 0 : index
    %65 = vector.load %arg4[%c0_73, %c0_74, %c0_75] : memref<1x1x8xbf16, #tpu.memory_space<vmem>>, vector<1x1x8xbf16>
    %66 = vector.shape_cast %65 : vector<1x1x8xbf16> to vector<1x8xbf16>
    %67 = vector.shape_cast %64 : vector<1x8xbf16> to vector<1x1x8xbf16>
    tpu.vector_store %arg4[%c0_73, %c0_74, %c0_75], %67 {strides = array<i32>} : memref<1x1x8xbf16, #tpu.memory_space<vmem>>, vector<1x1x8xbf16>,
    return
  }
  func.func @transform_0(%arg0: i32) -> (i32, i32, i32, i32, i32) {
    %c0_i32 = arith.constant 0 : i32
    %c0_i32_0 = arith.constant 0 : i32
    %c0_i32_1 = arith.constant 0 : i32
    %c0_i32_2 = arith.constant 0 : i32
    %c0_i32_3 = arith.constant 0 : i32
    return %arg0, %c0_i32, %c0_i32_0, %c0_i32_1, %c0_i32_2 : i32, i32, i32, i32, i32
  }
  func.func @transform_1(%arg0: i32) -> (i32, i32, i32) {
    %c0_i32 = arith.constant 0 : i32
    %c0_i32_0 = arith.constant 0 : i32
    %c0_i32_1 = arith.constant 0 : i32
    %c0_i32_2 = arith.constant 0 : i32
    return %c0_i32, %c0_i32_0, %c0_i32_1 : i32, i32, i32
  }
  func.func @transform_2(%arg0: i32) -> (i32, i32) {
    %c0_i32 = arith.constant 0 : i32
    %c0_i32_0 = arith.constant 0 : i32
    %c0_i32_1 = arith.constant 0 : i32
    return %c0_i32, %c0_i32_0 : i32, i32
  }
  func.func @transform_3(%arg0: i32) -> (i32, i32, i32) {
    %c0_i32 = arith.constant 0 : i32
    %c0_i32_0 = arith.constant 0 : i32
    %c0_i32_1 = arith.constant 0 : i32
    return %arg0, %c0_i32, %c0_i32_0 : i32, i32, i32
  }
}

module attributes {stable_mosaic.version = 11 : i64} {
  func.func @_head_kernel(%arg0: i32, %arg1: memref<1x10x10x32xbf16, #tpu.memory_space<vmem>>, %arg2: memref<9x32x16xbf16, #tpu.memory_space<vmem>>, %arg3: memref<1x16xf32, #tpu.memory_space<vmem>>, %arg4: memref<16x2xf32, #tpu.memory_space<vmem>>, %arg5: memref<1x2xf32, #tpu.memory_space<vmem>>, %arg6: memref<1x64x3xf32, #tpu.memory_space<vmem>>) attributes {dimension_semantics = [#tpu.dimension_semantics<parallel>], iteration_bounds = array<i64: 2>, scalar_prefetch = 0 : i64, scratch_operands = 0 : i64, tpu.core_type = #tpu.core_type<tc>, window_params = [{transform_indices = @transform_0, window_bounds = array<i64: 1, 10, 10, 32>}, {pipeline_mode = #tpu.pipeline_mode<synchronous>, transform_indices = @transform_1, window_bounds = array<i64: 9, 32, 16>}, {pipeline_mode = #tpu.pipeline_mode<synchronous>, transform_indices = @transform_2, window_bounds = array<i64: 1, 16>}, {pipeline_mode = #tpu.pipeline_mode<synchronous>, transform_indices = @transform_3, window_bounds = array<i64: 16, 2>}, {pipeline_mode = #tpu.pipeline_mode<synchronous>, transform_indices = @transform_4, window_bounds = array<i64: 1, 2>}, {transform_indices = @transform_5, window_bounds = array<i64: 1, 64, 3>}]} {
    %c0 = arith.constant 0 : index
    %c0_0 = arith.constant 0 : index
    %c0_1 = arith.constant 0 : index
    %c0_2 = arith.constant 0 : index
    %0 = vector.load %arg1[%c0, %c0_0, %c0_1, %c0_2] : memref<1x10x10x32xbf16, #tpu.memory_space<vmem>>, vector<1x8x8x32xbf16>
    %1 = vector.shape_cast %0 : vector<1x8x8x32xbf16> to vector<8x8x32xbf16>
    %2 = vector.shape_cast %1 : vector<8x8x32xbf16> to vector<64x32xbf16>
    %c0_3 = arith.constant 0 : index
    %c0_4 = arith.constant 0 : index
    %c0_5 = arith.constant 0 : index
    %3 = vector.load %arg2[%c0_3, %c0_4, %c0_5] : memref<9x32x16xbf16, #tpu.memory_space<vmem>>, vector<1x32x16xbf16>
    %4 = vector.shape_cast %3 : vector<1x32x16xbf16> to vector<32x16xbf16>
    %cst = arith.constant dense<0.000000e+00> : vector<64x16xf32>
    %5 = tpu.matmul %2, %4, %cst {dimension_numbers = #tpu.dot_dimension_numbers<[1], [0], [0], [1], [0, 0, 1, 1], [], []>} : vector<64x32xbf16>, vector<32x16xbf16>, vector<64x16xf32> -> vector<64x16xf32>
    %c0_6 = arith.constant 0 : index
    %c0_7 = arith.constant 0 : index
    %c1 = arith.constant 1 : index
    %c0_8 = arith.constant 0 : index
    %6 = vector.load %arg1[%c0_6, %c0_7, %c1, %c0_8] : memref<1x10x10x32xbf16, #tpu.memory_space<vmem>>, vector<1x8x8x32xbf16>
    %7 = vector.shape_cast %6 : vector<1x8x8x32xbf16> to vector<8x8x32xbf16>
    %8 = vector.shape_cast %7 : vector<8x8x32xbf16> to vector<64x32xbf16>
    %c1_9 = arith.constant 1 : index
    %c0_10 = arith.constant 0 : index
    %c0_11 = arith.constant 0 : index
    %9 = vector.load %arg2[%c1_9, %c0_10, %c0_11] : memref<9x32x16xbf16, #tpu.memory_space<vmem>>, vector<1x32x16xbf16>
    %10 = vector.shape_cast %9 : vector<1x32x16xbf16> to vector<32x16xbf16>
    %cst_12 = arith.constant dense<0.000000e+00> : vector<64x16xf32>
    %11 = tpu.matmul %8, %10, %cst_12 {dimension_numbers = #tpu.dot_dimension_numbers<[1], [0], [0], [1], [0, 0, 1, 1], [], []>} : vector<64x32xbf16>, vector<32x16xbf16>, vector<64x16xf32> -> vector<64x16xf32>
    %12 = arith.addf %5, %11 : vector<64x16xf32>
    %c0_13 = arith.constant 0 : index
    %c0_14 = arith.constant 0 : index
    %c2 = arith.constant 2 : index
    %c0_15 = arith.constant 0 : index
    %13 = vector.load %arg1[%c0_13, %c0_14, %c2, %c0_15] : memref<1x10x10x32xbf16, #tpu.memory_space<vmem>>, vector<1x8x8x32xbf16>
    %14 = vector.shape_cast %13 : vector<1x8x8x32xbf16> to vector<8x8x32xbf16>
    %15 = vector.shape_cast %14 : vector<8x8x32xbf16> to vector<64x32xbf16>
    %c2_16 = arith.constant 2 : index
    %c0_17 = arith.constant 0 : index
    %c0_18 = arith.constant 0 : index
    %16 = vector.load %arg2[%c2_16, %c0_17, %c0_18] : memref<9x32x16xbf16, #tpu.memory_space<vmem>>, vector<1x32x16xbf16>
    %17 = vector.shape_cast %16 : vector<1x32x16xbf16> to vector<32x16xbf16>
    %cst_19 = arith.constant dense<0.000000e+00> : vector<64x16xf32>
    %18 = tpu.matmul %15, %17, %cst_19 {dimension_numbers = #tpu.dot_dimension_numbers<[1], [0], [0], [1], [0, 0, 1, 1], [], []>} : vector<64x32xbf16>, vector<32x16xbf16>, vector<64x16xf32> -> vector<64x16xf32>
    %19 = arith.addf %12, %18 : vector<64x16xf32>
    %c0_20 = arith.constant 0 : index
    %c1_21 = arith.constant 1 : index
    %c0_22 = arith.constant 0 : index
    %c0_23 = arith.constant 0 : index
    %20 = vector.load %arg1[%c0_20, %c1_21, %c0_22, %c0_23] : memref<1x10x10x32xbf16, #tpu.memory_space<vmem>>, vector<1x8x8x32xbf16>
    %21 = vector.shape_cast %20 : vector<1x8x8x32xbf16> to vector<8x8x32xbf16>
    %22 = vector.shape_cast %21 : vector<8x8x32xbf16> to vector<64x32xbf16>
    %c3 = arith.constant 3 : index
    %c0_24 = arith.constant 0 : index
    %c0_25 = arith.constant 0 : index
    %23 = vector.load %arg2[%c3, %c0_24, %c0_25] : memref<9x32x16xbf16, #tpu.memory_space<vmem>>, vector<1x32x16xbf16>
    %24 = vector.shape_cast %23 : vector<1x32x16xbf16> to vector<32x16xbf16>
    %cst_26 = arith.constant dense<0.000000e+00> : vector<64x16xf32>
    %25 = tpu.matmul %22, %24, %cst_26 {dimension_numbers = #tpu.dot_dimension_numbers<[1], [0], [0], [1], [0, 0, 1, 1], [], []>} : vector<64x32xbf16>, vector<32x16xbf16>, vector<64x16xf32> -> vector<64x16xf32>
    %26 = arith.addf %19, %25 : vector<64x16xf32>
    %c0_27 = arith.constant 0 : index
    %c1_28 = arith.constant 1 : index
    %c1_29 = arith.constant 1 : index
    %c0_30 = arith.constant 0 : index
    %27 = vector.load %arg1[%c0_27, %c1_28, %c1_29, %c0_30] : memref<1x10x10x32xbf16, #tpu.memory_space<vmem>>, vector<1x8x8x32xbf16>
    %28 = vector.shape_cast %27 : vector<1x8x8x32xbf16> to vector<8x8x32xbf16>
    %29 = vector.shape_cast %28 : vector<8x8x32xbf16> to vector<64x32xbf16>
    %c4 = arith.constant 4 : index
    %c0_31 = arith.constant 0 : index
    %c0_32 = arith.constant 0 : index
    %30 = vector.load %arg2[%c4, %c0_31, %c0_32] : memref<9x32x16xbf16, #tpu.memory_space<vmem>>, vector<1x32x16xbf16>
    %31 = vector.shape_cast %30 : vector<1x32x16xbf16> to vector<32x16xbf16>
    %cst_33 = arith.constant dense<0.000000e+00> : vector<64x16xf32>
    %32 = tpu.matmul %29, %31, %cst_33 {dimension_numbers = #tpu.dot_dimension_numbers<[1], [0], [0], [1], [0, 0, 1, 1], [], []>} : vector<64x32xbf16>, vector<32x16xbf16>, vector<64x16xf32> -> vector<64x16xf32>
    %33 = arith.addf %26, %32 : vector<64x16xf32>
    %c0_34 = arith.constant 0 : index
    %c1_35 = arith.constant 1 : index
    %c2_36 = arith.constant 2 : index
    %c0_37 = arith.constant 0 : index
    %34 = vector.load %arg1[%c0_34, %c1_35, %c2_36, %c0_37] : memref<1x10x10x32xbf16, #tpu.memory_space<vmem>>, vector<1x8x8x32xbf16>
    %35 = vector.shape_cast %34 : vector<1x8x8x32xbf16> to vector<8x8x32xbf16>
    %36 = vector.shape_cast %35 : vector<8x8x32xbf16> to vector<64x32xbf16>
    %c5 = arith.constant 5 : index
    %c0_38 = arith.constant 0 : index
    %c0_39 = arith.constant 0 : index
    %37 = vector.load %arg2[%c5, %c0_38, %c0_39] : memref<9x32x16xbf16, #tpu.memory_space<vmem>>, vector<1x32x16xbf16>
    %38 = vector.shape_cast %37 : vector<1x32x16xbf16> to vector<32x16xbf16>
    %cst_40 = arith.constant dense<0.000000e+00> : vector<64x16xf32>
    %39 = tpu.matmul %36, %38, %cst_40 {dimension_numbers = #tpu.dot_dimension_numbers<[1], [0], [0], [1], [0, 0, 1, 1], [], []>} : vector<64x32xbf16>, vector<32x16xbf16>, vector<64x16xf32> -> vector<64x16xf32>
    %40 = arith.addf %33, %39 : vector<64x16xf32>
    %c0_41 = arith.constant 0 : index
    %c2_42 = arith.constant 2 : index
    %c0_43 = arith.constant 0 : index
    %c0_44 = arith.constant 0 : index
    %41 = vector.load %arg1[%c0_41, %c2_42, %c0_43, %c0_44] : memref<1x10x10x32xbf16, #tpu.memory_space<vmem>>, vector<1x8x8x32xbf16>
    %42 = vector.shape_cast %41 : vector<1x8x8x32xbf16> to vector<8x8x32xbf16>
    %43 = vector.shape_cast %42 : vector<8x8x32xbf16> to vector<64x32xbf16>
    %c6 = arith.constant 6 : index
    %c0_45 = arith.constant 0 : index
    %c0_46 = arith.constant 0 : index
    %44 = vector.load %arg2[%c6, %c0_45, %c0_46] : memref<9x32x16xbf16, #tpu.memory_space<vmem>>, vector<1x32x16xbf16>
    %45 = vector.shape_cast %44 : vector<1x32x16xbf16> to vector<32x16xbf16>
    %cst_47 = arith.constant dense<0.000000e+00> : vector<64x16xf32>
    %46 = tpu.matmul %43, %45, %cst_47 {dimension_numbers = #tpu.dot_dimension_numbers<[1], [0], [0], [1], [0, 0, 1, 1], [], []>} : vector<64x32xbf16>, vector<32x16xbf16>, vector<64x16xf32> -> vector<64x16xf32>
    %47 = arith.addf %40, %46 : vector<64x16xf32>
    %c0_48 = arith.constant 0 : index
    %c2_49 = arith.constant 2 : index
    %c1_50 = arith.constant 1 : index
    %c0_51 = arith.constant 0 : index
    %48 = vector.load %arg1[%c0_48, %c2_49, %c1_50, %c0_51] : memref<1x10x10x32xbf16, #tpu.memory_space<vmem>>, vector<1x8x8x32xbf16>
    %49 = vector.shape_cast %48 : vector<1x8x8x32xbf16> to vector<8x8x32xbf16>
    %50 = vector.shape_cast %49 : vector<8x8x32xbf16> to vector<64x32xbf16>
    %c7 = arith.constant 7 : index
    %c0_52 = arith.constant 0 : index
    %c0_53 = arith.constant 0 : index
    %51 = vector.load %arg2[%c7, %c0_52, %c0_53] : memref<9x32x16xbf16, #tpu.memory_space<vmem>>, vector<1x32x16xbf16>
    %52 = vector.shape_cast %51 : vector<1x32x16xbf16> to vector<32x16xbf16>
    %cst_54 = arith.constant dense<0.000000e+00> : vector<64x16xf32>
    %53 = tpu.matmul %50, %52, %cst_54 {dimension_numbers = #tpu.dot_dimension_numbers<[1], [0], [0], [1], [0, 0, 1, 1], [], []>} : vector<64x32xbf16>, vector<32x16xbf16>, vector<64x16xf32> -> vector<64x16xf32>
    %54 = arith.addf %47, %53 : vector<64x16xf32>
    %c0_55 = arith.constant 0 : index
    %c2_56 = arith.constant 2 : index
    %c2_57 = arith.constant 2 : index
    %c0_58 = arith.constant 0 : index
    %55 = vector.load %arg1[%c0_55, %c2_56, %c2_57, %c0_58] : memref<1x10x10x32xbf16, #tpu.memory_space<vmem>>, vector<1x8x8x32xbf16>
    %56 = vector.shape_cast %55 : vector<1x8x8x32xbf16> to vector<8x8x32xbf16>
    %57 = vector.shape_cast %56 : vector<8x8x32xbf16> to vector<64x32xbf16>
    %c8 = arith.constant 8 : index
    %c0_59 = arith.constant 0 : index
    %c0_60 = arith.constant 0 : index
    %58 = vector.load %arg2[%c8, %c0_59, %c0_60] : memref<9x32x16xbf16, #tpu.memory_space<vmem>>, vector<1x32x16xbf16>
    %59 = vector.shape_cast %58 : vector<1x32x16xbf16> to vector<32x16xbf16>
    %cst_61 = arith.constant dense<0.000000e+00> : vector<64x16xf32>
    %60 = tpu.matmul %57, %59, %cst_61 {dimension_numbers = #tpu.dot_dimension_numbers<[1], [0], [0], [1], [0, 0, 1, 1], [], []>} : vector<64x32xbf16>, vector<32x16xbf16>, vector<64x16xf32> -> vector<64x16xf32>
    %61 = arith.addf %54, %60 : vector<64x16xf32>
    %c0_62 = arith.constant 0 : index
    %c0_63 = arith.constant 0 : index
    %62 = vector.load %arg3[%c0_62, %c0_63] : memref<1x16xf32, #tpu.memory_space<vmem>>, vector<1x16xf32>
    %63 = vector.broadcast %62 : vector<1x16xf32> to vector<64x16xf32>
    %64 = arith.addf %61, %63 : vector<64x16xf32>
    %cst_64 = arith.constant 0.000000e+00 : f32
    %65 = vector.broadcast %cst_64 : f32 to vector<64x16xf32>
    %66 = arith.maximumf %64, %65 : vector<64x16xf32>
    %c0_65 = arith.constant 0 : index
    %c0_66 = arith.constant 0 : index
    %67 = vector.load %arg4[%c0_65, %c0_66] : memref<16x2xf32, #tpu.memory_space<vmem>>, vector<16x2xf32>
    %cst_67 = arith.constant dense<0.000000e+00> : vector<64x2xf32>
    %68 = tpu.matmul %66, %67, %cst_67 {dimension_numbers = #tpu.dot_dimension_numbers<[1], [0], [0], [1], [0, 0, 1, 1], [], []>} : vector<64x16xf32>, vector<16x2xf32>, vector<64x2xf32> -> vector<64x2xf32>
    %c0_68 = arith.constant 0 : index
    %c0_69 = arith.constant 0 : index
    %69 = vector.load %arg5[%c0_68, %c0_69] : memref<1x2xf32, #tpu.memory_space<vmem>>, vector<1x2xf32>
    %70 = vector.broadcast %69 : vector<1x2xf32> to vector<64x2xf32>
    %71 = arith.addf %68, %70 : vector<64x2xf32>
    %72 = arith.negf %71 : vector<64x2xf32>
    %73 = math.exp %72 : vector<64x2xf32>
    %cst_70 = arith.constant 1.000000e+00 : f32
    %74 = vector.broadcast %cst_70 : f32 to vector<64x2xf32>
    %75 = arith.addf %74, %73 : vector<64x2xf32>
    %76 = arith.divf %74, %75 : vector<64x2xf32>
    %77 = vector.extract_strided_slice %76 {offsets = [0, 0], sizes = [64, 1], strides = [1, 1]} : vector<64x2xf32> to vector<64x1xf32>
    %78 = vector.extract_strided_slice %76 {offsets = [0, 1], sizes = [64, 1], strides = [1, 1]} : vector<64x2xf32> to vector<64x1xf32>
    %79 = arith.subf %77, %78 : vector<64x1xf32>
    %cst_71 = arith.constant 5.000000e+01 : f32
    %80 = vector.broadcast %cst_71 : f32 to vector<64x1xf32>
    %81 = arith.mulf %80, %79 : vector<64x1xf32>
    %82 = arith.negf %81 : vector<64x1xf32>
    %83 = math.exp %82 : vector<64x1xf32>
    %cst_72 = arith.constant 1.000000e+00 : f32
    %84 = vector.broadcast %cst_72 : f32 to vector<64x1xf32>
    %85 = arith.addf %84, %83 : vector<64x1xf32>
    %86 = arith.divf %84, %85 : vector<64x1xf32>
    %87 = tpu.concatenate %76, %86 in 1 : vector<64x2xf32>, vector<64x1xf32> -> vector<64x3xf32>
    %c0_73 = arith.constant 0 : index
    %c0_74 = arith.constant 0 : index
    %c0_75 = arith.constant 0 : index
    %88 = vector.load %arg6[%c0_73, %c0_74, %c0_75] : memref<1x64x3xf32, #tpu.memory_space<vmem>>, vector<1x64x3xf32>
    %89 = vector.shape_cast %88 : vector<1x64x3xf32> to vector<64x3xf32>
    %90 = vector.shape_cast %87 : vector<64x3xf32> to vector<1x64x3xf32>
    tpu.vector_store %arg6[%c0_73, %c0_74, %c0_75], %90 {strides = array<i32>} : memref<1x64x3xf32, #tpu.memory_space<vmem>>, vector<1x64x3xf32>,
    return
  }
  func.func @transform_0(%arg0: i32) -> (i32, i32, i32, i32) {
    %c0_i32 = arith.constant 0 : i32
    %c0_i32_0 = arith.constant 0 : i32
    %c0_i32_1 = arith.constant 0 : i32
    %c0_i32_2 = arith.constant 0 : i32
    return %arg0, %c0_i32, %c0_i32_0, %c0_i32_1 : i32, i32, i32, i32
  }
  func.func @transform_1(%arg0: i32) -> (i32, i32, i32) {
    %c0_i32 = arith.constant 0 : i32
    %c0_i32_0 = arith.constant 0 : i32
    %c0_i32_1 = arith.constant 0 : i32
    %c0_i32_2 = arith.constant 0 : i32
    return %c0_i32, %c0_i32_0, %c0_i32_1 : i32, i32, i32
  }
  func.func @transform_2(%arg0: i32) -> (i32, i32) {
    %c0_i32 = arith.constant 0 : i32
    %c0_i32_0 = arith.constant 0 : i32
    %c0_i32_1 = arith.constant 0 : i32
    return %c0_i32, %c0_i32_0 : i32, i32
  }
  func.func @transform_3(%arg0: i32) -> (i32, i32) {
    %c0_i32 = arith.constant 0 : i32
    %c0_i32_0 = arith.constant 0 : i32
    %c0_i32_1 = arith.constant 0 : i32
    return %c0_i32, %c0_i32_0 : i32, i32
  }
  func.func @transform_4(%arg0: i32) -> (i32, i32) {
    %c0_i32 = arith.constant 0 : i32
    %c0_i32_0 = arith.constant 0 : i32
    %c0_i32_1 = arith.constant 0 : i32
    return %c0_i32, %c0_i32_0 : i32, i32
  }
  func.func @transform_5(%arg0: i32) -> (i32, i32, i32) {
    %c0_i32 = arith.constant 0 : i32
    %c0_i32_0 = arith.constant 0 : i32
    %c0_i32_1 = arith.constant 0 : i32
    return %arg0, %c0_i32, %c0_i32_0 : i32, i32, i32
  }
}

</mosaic_0001>

<bundles_post_ra>
// kernel: db_model_forward.15
= control target key start
LH: loop header
LB: loop body
LE: loop exit
PB: predicated region body
PF: predicated region fallthrough
CT: control target
= control target key end

     0   :  { %s2134_s12 = smov 0   ;;  %s2413_s0 = inlined_call_operand.vmem [shape: bf16[2,4,9,9,8], index: 0, kind: input, shape index: {}]   ;;  %s2414_s1 = inlined_call_operand.vmem [shape: bf16[9,8,16], index: 1, kind: input, shape index: {}]   ;;  %s2415_s2 = inlined_call_operand.vmem [shape: f32[1,16], index: 2, kind: input, shape index: {}]   ;;  %s2416_s3 = inlined_call_operand.vmem [shape: bf16[2,64,16], index: 3, kind: output, shape index: {}]  }
   0x1 LB: > { %s1682_s13 = sadd.s32 4294967295, %s2112_s12   ;;  %p1686_p0 = scmp.ge.s32.totalorder %s2112_s12, 1  ;;  %s2112_s12 = sphi %s2134_s12, %s13_s12  }
   0x2   : > { %p137_p1 = scmp.lt.s32.totalorder %s2112_s12, 3 }
   0x4   : > { %p138_p2 = pnand %p1686_p0, %p137_p1 }
   0x5   : > { %v1698_v0 = vld [vmem:[%s2414_s1 + $0x4] sm:$0xf] (!%p138_p2)  ;;  %vm225_vm0 = vcmask (!%p138_p2), 1043456   ;;  %v2148_v1 = vld [vmem:[%s2414_s1 + $0x10] sm:$0xf] (!%p138_p2)  ;;  %p161_p3 = scmp.lt.s32.totalorder (!%p138_p2), %s1682_s13, 1 }
   0x6   : > { %141 = sbr.rel (%p138_p2) target bundleno = 318 (0x13e), region = 32  ;;  %2063 = vmatprep.subr.msk.bf16.mxu1 (!%p138_p2), %vm225_vm0, %v1698_v0  ;;  %2067 = vmatprep.subr.msk.bf16.mxu0 (!%p138_p2), %vm225_vm0, %v2148_v1  ;;  %v227_v2 = vsel (!%p138_p2), %vm225_vm0, %v1698_v0, 0  ;;  %v2156_v3 = vsel (!%p138_p2), %vm225_vm0, %v2148_v1, 0  ;;  %v180_v4 = vld [vmem:[%s2414_s1] sm:$0xf] (!%p138_p2)  ;;  %vm212_vm1 = vcmask (!%p138_p2), 64512  }
   0x7   : > { %1908 = vmatpush3.bf16.msra.mxu1 (!%p138_p2), %v227_v2  ;;  %1948 = vmatpush3.bf16.msra.mxu0 (!%p138_p2), %v2156_v3  ;;  %v1774_v5 = vld [vmem:[%s2414_s1 + $0x14] sm:$0xf] (!%p138_p2)  ;;  %v327_v6 = vsel (!%p138_p2), %vm225_vm0, %v180_v4, 0  ;;  %v1791_v9 = vld [vmem:[%s2414_s1 + $0x18] sm:$0xf] (!%p138_p2)  ;;  %vm1618_vm5 = vcmask (!%p138_p2), 125952  }
   0x8   : > { %2064 = vmatprep.subr.msk.bf16.mxu1 (!%p138_p2), %vm225_vm0, %v180_v4  ;;  %2069 = vmatprep.subr.msk.bf16.mxu0 (!%p138_p2), %vm225_vm0, %v1774_v5  ;;  %v1020_v7 = vsel (!%p138_p2), %vm225_vm0, %v1774_v5, 0  ;;  %v1715_v10 = vld [vmem:[%s2414_s1 + $0x8] sm:$0xf] (!%p138_p2)  ;;  %vm410_vm2 = vsmask.f32 (!%p138_p2), 3328  ;;  %v2193_v15 = vsel (!%p138_p2), %vm225_vm0, %v1791_v9, 0 }
   0x9   : > { %vm411_vm3 = vsmask.f32 (!%p138_p2), 7440  ;;  %v2196_v16 = vsel (!%p138_p2), %vm225_vm0, %v1715_v10, 0 }
   0xa   : > { %vm2213_vm4 = vmor (!%p138_p2), %vm410_vm2, %vm411_vm3 }
   0xd   : > { %s2420_s13 = smov (!%p161_p3, %s1682_s13), 1 }
   0xe   : > { %s2073_s22 = smul.u32 288, %s2420_s13  ;;  %s1853_s11 = sshll.u32 %s2420_s13, 5 }
   0xf   : > { %s2392_s16 = scalar_lea.vmem %s2416_s3, %s1853_s11 }
  0x10   : > { %s2173_s25 = scalar_lea.vmem %s2413_s0, %s2073_s22 }
  0x11   : > { %v2082_v8 = vld [vmem:[%s2173_s25 + $0x48] ss:$8 sps:$4 sm:$0xff]   ;;  %v2083_v11 = vld [vmem:[%s2173_s25 + $0xd8] ss:$8 sps:$4 sm:$0xff]   ;;  %v1759_v19 = vld [vmem:[%s2173_s25 + $0x94] sm:$0x1] }
  0x12   : > { %1909 = vmatprep.mubr.msk.bf16.mxu1 %vm212_vm1, %v2082_v8  ;;  %v2084_v12 = vld [vmem:[%s2173_s25 + $0x58] ss:$8 sps:$4 sm:$0xff]   ;;  %1949 = vmatprep.mubr.msk.bf16.mxu0 %vm212_vm1, %v2083_v11  ;;  %v2085_v13 = vld [vmem:[%s2173_s25 + $0xe8] ss:$8 sps:$4 sm:$0xff]   ;;  %v1761_v21 = vld [vmem:[%s2173_s25 + $0x9c] sm:$0x1] }
  0x13   : > { %1910 = vmatmul.mubr.msk.bf16.vlgmr.msra.gmra.mrb[0].mxu1 %vm212_vm1, %v2084_v12  ;;  %v2086_v14 = vld [vmem:[%s2173_s25 + $0x68] ss:$8 sps:$4 sm:$0xff]   ;;  %1950 = vmatmul.mubr.msk.bf16.vlgmr.msra.gmra.mrb[0].mxu0 %vm212_vm1, %v2085_v13  ;;  %v2087_v17 = vld [vmem:[%s2173_s25 + $0x78] ss:$8 sps:$4 sm:$0xff]   ;;  %v891_v24 = vshll.u32 %v1759_v19, 16  ;;  %v905_v27 = vshll.u32 %v1761_v21, 16 }
  0x14   : > { %1918 = vmatpush3.bf16.msra.mxu1 %v327_v6  ;;  %1958 = vmatpush3.bf16.msra.mxu0 %v1020_v7  ;;  %v1758_v18 = vld [vmem:[%s2173_s25 + $0x90] sm:$0xf]  ;;  %v1760_v20 = vld [vmem:[%s2173_s25 + $0x98] sm:$0xf]  ;;  %v1762_v28 = vld [vmem:[%s2173_s25 + $0xa0] sm:$0xf] }
  0x15   : > { %1913 = vmatprep.mubr.msk.bf16.mxu1 %vm212_vm1, %v2086_v14  ;;  %v882_v22 = vshrl.u32 %v1758_v18, 16  ;;  %v885_v23 = vshll.u32 %v1758_v18, 16  ;;  %v896_v25 = vshrl.u32 %v1760_v20, 16  ;;  %2070 = vmatprep.subr.msk.bf16.mxu0 %vm225_vm0, %v1791_v9  ;;  %v899_v26 = vshll.u32 %v1760_v20, 16  ;;  %v1763_v29 = vld [vmem:[%s2173_s25 + $0xa4] sm:$0x1] }
  0x16   : > { %2065 = vmatprep.subr.msk.bf16.mxu1 %vm225_vm0, %v1715_v10  ;;  %v893_v32 = vrot.slane %v891_v24, 5  ;;  %v1764_v34 = vld [vmem:[%s2173_s25 + $0xa8] sm:$0xf]  ;;  %v907_v36 = vrot.slane %v905_v27, 5  ;;  %v1765_v37 = vld [vmem:[%s2173_s25 + $0xac] sm:$0x1] }
  0x17   : > { %v884_v30 = vrot.slane %v882_v22, 4  ;;  %v887_v31 = vrot.slane %v885_v23, 5  ;;  %v898_v33 = vrot.slane %v896_v25, 4  ;;  %v901_v35 = vrot.slane %v899_v26, 5  ;;  %v2088_v53 = vld [vmem:[%s2173_s25] ss:$8 sps:$4 sm:$0xff]  }
  0x18   : > { %v910_v38 = vshrl.u32 %v1762_v28, 16  ;;  %v913_v39 = vshll.u32 %v1762_v28, 16  ;;  %v919_v41 = vshll.u32 %v1763_v29, 16  ;;  %v924_v42 = vshrl.u32 %v1764_v34, 16  ;;  %v2089_v59 = vld [vmem:[%s2173_s25 + $0x10] ss:$8 sps:$4 sm:$0xff]  }
  0x19   : > { %v888_v40 = vor.u32 %v887_v31, %v884_v30  ;;  %v927_v43 = vshll.u32 %v1764_v34, 16  ;;  %v902_v45 = vor.u32 %v901_v35, %v898_v33  ;;  %v933_v48 = vshll.u32 %v1765_v37, 16  ;;  %v1766_v60 = vld [vmem:[%s2173_s25 + $0xb0] sm:$0xf]  ;;  %v1767_v61 = vld [vmem:[%s2173_s25 + $0xb4] sm:$0x1] }
  0x1a   : > { %v912_v46 = vrot.slane %v910_v38, 4  ;;  %v915_v47 = vrot.slane %v913_v39, 5  ;;  %v921_v50 = vrot.slane %v919_v41, 5  ;;  %v926_v51 = vrot.slane %v924_v42, 4  ;;  %v1768_v0 = vld [vmem:[%s2173_s25 + $0xb8] sm:$0xf] }
  0x1b   : > { %1914 = vmatmul.mubr.msk.bf16.gmra.mrb[4].mxu1 %vm212_vm1, %v2087_v17  ;;  %v889_v49 = vrot.slane %v888_v40, 4  ;;  %v929_v52 = vrot.slane %v927_v43, 5  ;;  %v903_v54 = vrot.slane %v902_v45, 4  ;;  %v935_v56 = vrot.slane %v933_v48, 5  ;;  %v1769_v2 = vld [vmem:[%s2173_s25 + $0xbc] sm:$0x1] }
  0x1c   : > { %v916_v55 = vor.u32 %v915_v47, %v912_v46  ;;  %1919 = vmatprep.mubr.msk.bf16.mxu1 %vm212_vm1, %v2088_v53  ;;  %v938_v4 = vshrl.u32 %v1766_v60, 16  ;;  %v941_v7 = vshll.u32 %v1766_v60, 16  ;;  %v947_v8 = vshll.u32 %v1767_v61, 16  ;;  %v1770_v9 = vld [vmem:[%s2173_s25 + $0xc0] sm:$0xf] }
  0x1d   : > { %v894_v57 = vsel %vm2213_vm4, %v889_v49, %v893_v32  ;;  %v930_v58 = vor.u32 %v929_v52, %v926_v51  ;;  %v908_v62 = vsel %vm2213_vm4, %v903_v54, %v907_v36  ;;  %v2232_v10 = vld [vmem:[%s2414_s1 + $0xc] sm:$0xf]  ;;  %v952_v13 = vshrl.u32 %v1768_v0, 16  ;;  %v1771_v17 = vld [vmem:[%s2173_s25 + $0xc4] sm:$0x1] }
  0x1e   : > { %v917_v63 = vrot.slane %v916_v55, 4  ;;  %v1775_v5 = vcombine.low %v894_v57, %v908_v62  ;;  %v940_v12 = vrot.slane %v938_v4, 4  ;;  %v955_v14 = vshll.u32 %v1768_v0, 16  ;;  %v1772_v22 = vld [vmem:[%s2173_s25 + $0xc8] sm:$0xf] }
  0x1f   : > { %v931_v6 = vrot.slane %v930_v58, 4  ;;  %v943_v19 = vrot.slane %v941_v7, 5  ;;  %v949_v20 = vrot.slane %v947_v8, 5  ;;  %v961_v21 = vshll.u32 %v1769_v2, 16  ;;  %v2244_v23 = vld [vmem:[%s2414_s1 + $0x1c] sm:$0xf] }
  0x20   : > { %v922_v11 = vsel %vm2213_vm4, %v917_v63, %v921_v50  ;;  %1959 = vmatprep.mubr.msk.bf16.mxu0 %vm212_vm1, %v1775_v5  ;;  %v954_v25 = vrot.slane %v952_v13, 4  ;;  %v957_v26 = vrot.slane %v955_v14, 5  ;;  %v1773_v27 = vld [vmem:[%s2173_s25 + $0xcc] sm:$0x1]  ;;  %v966_v28 = vshrl.u32 %v1770_v9, 16 }
  0x21   : > { %v936_v18 = vsel %vm2213_vm4, %v931_v6, %v935_v56  ;;  %v944_v29 = vor.u32 %v943_v19, %v940_v12  ;;  %v963_v30 = vrot.slane %v961_v21, 5  ;;  %v969_v31 = vshll.u32 %v1770_v9, 16  ;;  %v2092_v53 = vld [vmem:[%s2173_s25 + $0x8] ss:$8 sps:$4 sm:$0xff]   ;;  %v394_v54 = vld [vmem:[%s2173_s25] sm:$0xf] }
  0x22   : > { %v1776_v24 = vcombine.low %v922_v11, %v936_v18  ;;  %v975_v32 = vshll.u32 %v1771_v17, 16  ;;  %v958_v33 = vor.u32 %v957_v26, %v954_v25  ;;  %v968_v34 = vrot.slane %v966_v28, 4  ;;  %v395_v56 = vld [vmem:[%s2173_s25 + $0x4] sm:$0x1]  ;;  %v396_v57 = vld [vmem:[%s2173_s25 + $0x8] sm:$0xf] }
  0x23   : > { %1920 = vmatmul.mubr.msk.bf16.vlgmr.msra.gmra.mrb[0].mxu1 %vm212_vm1, %v2089_v59  ;;  %v980_v35 = vshrl.u32 %v1772_v22, 16  ;;  %v983_v36 = vshll.u32 %v1772_v22, 16  ;;  %v945_v37 = vrot.slane %v944_v29, 4  ;;  %v971_v38 = vrot.slane %v969_v31, 5  ;;  %v397_v58 = vld [vmem:[%s2173_s25 + $0xc] sm:$0x1] }
  0x24   : > { %1928 = vmatpush3.bf16.msra.mxu1 %v2196_v16  ;;  %1960 = vmatmul.mubr.msk.bf16.vlgmr.msra.gmra.mrb[0].mxu0 %vm212_vm1, %v1776_v24  ;;  %v989_v39 = vshll.u32 %v1773_v27, 16  ;;  %v2090_v16 = vld [vmem:[%s2173_s25 + $0x20] ss:$8 sps:$4 sm:$0xff]   ;;  %v959_v40 = vrot.slane %v958_v33, 4  ;;  %v977_v46 = vrot.slane %v975_v32, 5  ;;  %v414_v60 = vshrl.u32 %v394_v54, 16 }
  0x25   : > { %2066 = vmatprep.subr.msk.bf16.mxu1 %vm225_vm0, %v2232_v10  ;;  %1968 = vmatpush3.bf16.msra.mxu0 %v2193_v15  ;;  %v982_v41 = vrot.slane %v980_v35, 4  ;;  %v985_v42 = vrot.slane %v983_v36, 5  ;;  %v950_v43 = vsel %vm2213_vm4, %v945_v37, %v949_v20  ;;  %v972_v45 = vor.u32 %v971_v38, %v968_v34  ;;  %v2091_v15 = vld [vmem:[%s2173_s25 + $0x30] ss:$8 sps:$4 sm:$0xff]   ;;  %v399_v6 = vld [vmem:[%s2173_s25 + $0x14] sm:$0x1] }
  0x26   : > { %2071 = vmatprep.subr.msk.bf16.mxu0 %vm225_vm0, %v2244_v23  ;;  %1923 = vmatprep.mubr.msk.bf16.mxu1 %vm212_vm1, %v2090_v16  ;;  %v964_v47 = vsel %vm2213_vm4, %v959_v40, %v963_v30  ;;  %v991_v49 = vrot.slane %v989_v39, 5  ;;  %v417_v61 = vshll.u32 %v394_v54, 16  ;;  %v423_v62 = vshll.u32 %v395_v56, 16  ;;  %v398_v63 = vld [vmem:[%s2173_s25 + $0x10] sm:$0xf] }
  0x27   : > { %v986_v48 = vor.u32 %v985_v42, %v982_v41  ;;  %v1777_v50 = vcombine.low %v950_v43, %v964_v47  ;;  %v973_v51 = vrot.slane %v972_v45, 4  ;;  %v428_v2 = vshrl.u32 %v396_v57, 16  ;;  %v400_v11 = vld [vmem:[%s2173_s25 + $0x18] sm:$0xf]  ;;  %v401_v18 = vld [vmem:[%s2173_s25 + $0x1c] sm:$0x1] }
  0x28   : > { %v431_v4 = vshll.u32 %v396_v57, 16  ;;  %v437_v5 = vshll.u32 %v397_v58, 16  ;;  %v416_v7 = vrot.slane %v414_v60, 4  ;;  %v419_v8 = vrot.slane %v417_v61, 5  ;;  %v2093_v29 = vld [vmem:[%s2173_s25 + $0x18] ss:$8 sps:$4 sm:$0xff]  }
  0x29   : > { %v987_v52 = vrot.slane %v986_v48, 4  ;;  %1963 = vmatprep.mubr.msk.bf16.mxu0 %vm212_vm1, %v1777_v50  ;;  %v978_v55 = vsel %vm2213_vm4, %v973_v51, %v977_v46  ;;  %v425_v9 = vrot.slane %v423_v62, 5  ;;  %v442_v12 = vshrl.u32 %v398_v63, 16  ;;  %v2094_v37 = vld [vmem:[%s2173_s25 + $0x28] ss:$8 sps:$4 sm:$0xff]  }
  0x2a   : > { %v430_v13 = vrot.slane %v428_v2, 4  ;;  %v433_v14 = vrot.slane %v431_v4, 5  ;;  %v439_v17 = vrot.slane %v437_v5, 5  ;;  %v445_v19 = vshll.u32 %v398_v63, 16  ;;  %v402_v40 = vld [vmem:[%s2173_s25 + $0x20] sm:$0xf] }
  0x2b   : > { %1924 = vmatmul.mubr.msk.bf16.gmra.mrb[4].mxu1 %vm212_vm1, %v2091_v15  ;;  %v992_v59 = vsel %vm2213_vm4, %v987_v52, %v991_v49  ;;  %v420_v20 = vor.u32 %v419_v8, %v416_v7  ;;  %v444_v21 = vrot.slane %v442_v12, 4  ;;  %v451_v22 = vshll.u32 %v399_v6, 16  ;;  %v403_v45 = vld [vmem:[%s2173_s25 + $0x24] sm:$0x1]  ;;  %v404_v46 = vld [vmem:[%s2173_s25 + $0x28] sm:$0xf] }
  0x2c   : > { %v1778_v0 = vcombine.low %v978_v55, %v992_v59  ;;  %v456_v24 = vshrl.u32 %v400_v11, 16  ;;  %v434_v25 = vor.u32 %v433_v14, %v430_v13  ;;  %v447_v26 = vrot.slane %v445_v19, 5  ;;  %v405_v48 = vld [vmem:[%s2173_s25 + $0x2c] sm:$0x1]  ;;  %v406_v55 = vld [vmem:[%s2173_s25 + $0x30] sm:$0xf] }
  0x2d   : > { %v459_v27 = vshll.u32 %v400_v11, 16  ;;  %v465_v28 = vshll.u32 %v401_v18, 16  ;;  %v1258_v30 = vsel %vm225_vm0, %v2244_v23, 0  ;;  %v421_v31 = vrot.slane %v420_v20, 4  ;;  %v2291_v23 = vld [vmem:[%s2414_s1 + $0x20] sm:$0xf] }
  0x2e   : > { %1964 = vmatmul.mubr.msk.bf16.gmra.mrb[4].mxu0 %vm212_vm1, %v1778_v0  ;;  %v453_v32 = vrot.slane %v451_v22, 5  ;;  %v458_v33 = vrot.slane %v456_v24, 4  ;;  %v435_v34 = vrot.slane %v434_v25, 4  ;;  %v448_v35 = vor.u32 %v447_v26, %v444_v21  ;;  %v407_v60 = vld [vmem:[%s2173_s25 + $0x34] sm:$0x1] }
  0x2f   : > { %1969 = vmatprep.mubr.msk.bf16.mxu0 %vm212_vm1, %v2092_v53  ;;  %v461_v36 = vrot.slane %v459_v27, 5  ;;  %v426_v38 = vsel %vm2213_vm4, %v421_v31, %v425_v9  ;;  %v467_v39 = vrot.slane %v465_v28, 5  ;;  %v671_v16 = vsel %vm225_vm0, %v2232_v10, 0  ;;  %v2095_v62 = vld [vmem:[%s2173_s25 + $0x38] ss:$8 sps:$4 sm:$0xff]  }
  0x30   : > { %v440_v41 = vsel %vm2213_vm4, %v435_v34, %v439_v17  ;;  %v449_v42 = vrot.slane %v448_v35, 4  ;;  %v470_v15 = vshrl.u32 %v402_v40, 16  ;;  %v473_v49 = vshll.u32 %v402_v40, 16  ;;  %v408_v0 = vld [vmem:[%s2173_s25 + $0x38] sm:$0xf] }
  0x31   : > { %v462_v43 = vor.u32 %v461_v36, %v458_v33  ;;  %v1716_v47 = vcombine.low %v426_v38, %v440_v41  ;;  %v479_v10 = vshll.u32 %v403_v45, 16  ;;  %v484_v50 = vshrl.u32 %v404_v46, 16  ;;  %v409_v2 = vld [vmem:[%s2173_s25 + $0x3c] sm:$0x1]  ;;  %v2096_v14 = vld [vmem:[%s2173_s25 + $0x50] ss:$8 sps:$4 sm:$0xff]  }
  0x32   : > { %v454_v51 = vsel %vm2213_vm4, %v449_v42, %v453_v32  ;;  %v472_v53 = vrot.slane %v470_v15, 4  ;;  %v487_v54 = vshll.u32 %v404_v46, 16  ;;  %v475_v56 = vrot.slane %v473_v49, 5  ;;  %v2097_v35 = vld [vmem:[%s2173_s25 + $0x60] ss:$8 sps:$4 sm:$0xff]  }
  0x33   : > { %v463_v52 = vrot.slane %v462_v43, 4  ;;  %1929 = vmatprep.mubr.msk.bf16.mxu1 %vm212_vm1, %v1716_v47  ;;  %v481_v57 = vrot.slane %v479_v10, 5  ;;  %v486_v58 = vrot.slane %v484_v50, 4  ;;  %v493_v59 = vshll.u32 %v405_v48, 16  ;;  %v1818_v40 = vld [vmem:[%s2173_s25 + $0xc] sm:$0x1] }
  0x34   : > { %v489_v63 = vrot.slane %v487_v54, 5  ;;  %v498_v4 = vshrl.u32 %v406_v55, 16  ;;  %v476_v6 = vor.u32 %v475_v56, %v472_v53  ;;  %v501_v8 = vshll.u32 %v406_v55, 16  ;;  %v1819_v41 = vld [vmem:[%s2173_s25 + $0x10] sm:$0xf] }
  0x35   : > { %v468_v61 = vsel %vm2213_vm4, %v463_v52, %v467_v39  ;;  %v495_v7 = vrot.slane %v493_v59, 5  ;;  %v507_v12 = vshll.u32 %v407_v60, 16  ;;  %v512_v13 = vshrl.u32 %v408_v0, 16  ;;  %v2100_v39 = vld [vmem:[%s2173_s25 + $0x70] ss:$8 sps:$4 sm:$0xff]  }
  0x36   : > { %1970 = vmatmul.mubr.msk.bf16.vlgmr.msra.gmra.mrb[0].mxu0 %vm212_vm1, %v2093_v29  ;;  %v1717_v5 = vcombine.low %v454_v51, %v468_v61  ;;  %v490_v9 = vor.u32 %v489_v63, %v486_v58  ;;  %v500_v11 = vrot.slane %v498_v4, 4  ;;  %v477_v17 = vrot.slane %v476_v6, 4  ;;  %v1820_v42 = vld [vmem:[%s2173_s25 + $0x14] sm:$0x1]  ;;  %v1821_v48 = vld [vmem:[%s2173_s25 + $0x18] sm:$0xf] }
  0x37   : > { %1978 = vmatpush3.bf16.msra.mxu0 %v1258_v30  ;;  %1973 = vmatprep.mubr.msk.bf16.mxu0 %vm212_vm1, %v2094_v37  ;;  %v503_v18 = vrot.slane %v501_v8, 5  ;;  %v515_v19 = vshll.u32 %v408_v0, 16  ;;  %v521_v20 = vshll.u32 %v409_v2, 16  ;;  %v514_v22 = vrot.slane %v512_v13, 4  ;;  %v2098_v37 = vld [vmem:[%s2173_s25 + $0x90] ss:$8 sps:$4 sm:$0xff]  }
  0x38   : > { %2072 = vmatprep.subr.msk.bf16.mxu0 %vm225_vm0, %v2291_v23  ;;  %1930 = vmatmul.mubr.msk.bf16.vlgmr.msra.gmra.mrb[0].mxu1 %vm212_vm1, %v1717_v5  ;;  %v491_v21 = vrot.slane %v490_v9, 4  ;;  %v482_v24 = vsel %vm2213_vm4, %v477_v17, %v481_v57  ;;  %v509_v26 = vrot.slane %v507_v12, 5  ;;  %v1488_v34 = vsel %vm225_vm0, %v2291_v23, 0  ;;  %v1822_v50 = vld [vmem:[%s2173_s25 + $0x1c] sm:$0x1] }
  0x39   : > { %1938 = vmatpush3.bf16.msra.mxu1 %v671_v16  ;;  %v504_v25 = vor.u32 %v503_v18, %v500_v11  ;;  %v517_v27 = vrot.slane %v515_v19, 5  ;;  %v523_v32 = vrot.slane %v521_v20, 5  ;;  %v1817_v16 = vld [vmem:[%s2173_s25 + $0x8] sm:$0xf]  ;;  %v1359_v23 = vshll.u32 %v1818_v40, 16 }
  0x3a   : > { %2068 = vmatprep.subr.msk.bf16.mxu1 %vm225_vm0, %v2148_v1  ;;  %v496_v28 = vsel %vm2213_vm4, %v491_v21, %v495_v7  ;;  %v1350_v43 = vshrl.u32 %v1817_v16, 16  ;;  %v1353_v45 = vshll.u32 %v1817_v16, 16  ;;  %v1364_v46 = vshrl.u32 %v1819_v41, 16  ;;  %v1823_v51 = vld [vmem:[%s2173_s25 + $0x20] sm:$0xf] }
  0x3b   : > { %v1718_v29 = vcombine.low %v482_v24, %v496_v28  ;;  %v505_v30 = vrot.slane %v504_v25, 4  ;;  %v518_v31 = vor.u32 %v517_v27, %v514_v22  ;;  %v1367_v15 = vshll.u32 %v1819_v41, 16  ;;  %v2099_v52 = vld [vmem:[%s2173_s25 + $0xa0] ss:$8 sps:$4 sm:$0xff]   ;;  %v1824_v58 = vld [vmem:[%s2173_s25 + $0x24] sm:$0x1] }
  0x3c   : > { %v1373_v47 = vshll.u32 %v1820_v42, 16  ;;  %v1352_v49 = vrot.slane %v1350_v43, 4  ;;  %v1355_v10 = vrot.slane %v1353_v45, 5  ;;  %v2101_v53 = vld [vmem:[%s2173_s25 + $0x80] ss:$8 sps:$4 sm:$0xff]   ;;  %v1361_v54 = vrot.slane %v1359_v23, 5 }
  0x3d   : > { %1933 = vmatprep.mubr.msk.bf16.mxu1 %vm212_vm1, %v1718_v29  ;;  %v510_v1 = vsel %vm2213_vm4, %v505_v30, %v509_v26  ;;  %v519_v33 = vrot.slane %v518_v31, 4  ;;  %v1366_v55 = vrot.slane %v1364_v46, 4  ;;  %v1369_v56 = vrot.slane %v1367_v15, 5  ;;  %v2102_v5 = vld [vmem:[%s2173_s25 + $0xb0] ss:$8 sps:$4 sm:$0xff]  }
  0x3e   : > { %1974 = vmatmul.mubr.msk.bf16.gmra.mrb[4].mxu0 %vm212_vm1, %v2095_v62  ;;  %v1375_v57 = vrot.slane %v1373_v47, 5  ;;  %v1356_v59 = vor.u32 %v1355_v10, %v1352_v49  ;;  %v1378_v60 = vshrl.u32 %v1821_v48, 16  ;;  %v1381_v61 = vshll.u32 %v1821_v48, 16  ;;  %v1825_v17 = vld [vmem:[%s2173_s25 + $0x28] sm:$0xf] }
  0x3f   : > { %1979 = vmatprep.mubr.msk.bf16.mxu0 %vm212_vm1, %v2096_v14  ;;  %v524_v36 = vsel %vm2213_vm4, %v519_v33, %v523_v32  ;;  %v1387_v62 = vshll.u32 %v1822_v50, 16  ;;  %v1370_v63 = vor.u32 %v1369_v56, %v1366_v55  ;;  %v1392_v0 = vshrl.u32 %v1823_v51, 16  ;;  %v1826_v20 = vld [vmem:[%s2173_s25 + $0x2c] sm:$0x1]  ;;  %v1827_v21 = vld [vmem:[%s2173_s25 + $0x30] sm:$0xf] }
  0x40   : > { %v1719_v38 = vcombine.low %v510_v1, %v524_v36  ;;  %v1395_v2 = vshll.u32 %v1823_v51, 16  ;;  %v1401_v4 = vshll.u32 %v1824_v58, 16  ;;  %v1357_v6 = vrot.slane %v1356_v59, 4  ;;  %v1828_v22 = vld [vmem:[%s2173_s25 + $0x34] sm:$0x1] }
  0x41   : > { %v1380_v7 = vrot.slane %v1378_v60, 4  ;;  %v1383_v8 = vrot.slane %v1381_v61, 5  ;;  %v1389_v9 = vrot.slane %v1387_v62, 5  ;;  %v1371_v11 = vrot.slane %v1370_v63, 4  ;;  %v2103_v32 = vld [vmem:[%s2173_s25 + $0xc0] ss:$8 sps:$4 sm:$0xff]  }
  0x42   : > { %1934 = vmatmul.mubr.msk.bf16.gmra.mrb[4].mxu1 %vm212_vm1, %v1719_v38  ;;  %v1394_v12 = vrot.slane %v1392_v0, 4  ;;  %v1397_v13 = vrot.slane %v1395_v2, 5  ;;  %v1403_v14 = vrot.slane %v1401_v4, 5  ;;  %v1362_v18 = vsel %vm2213_vm4, %v1357_v6, %v1361_v54  ;;  %v1829_v36 = vld [vmem:[%s2173_s25 + $0x38] sm:$0xf] }
  0x43   : > { %1939 = vmatprep.mubr.msk.bf16.mxu1 %vm212_vm1, %v2098_v37  ;;  %v1384_v19 = vor.u32 %v1383_v8, %v1380_v7  ;;  %v1376_v24 = vsel %vm2213_vm4, %v1371_v11, %v1375_v57  ;;  %v1406_v26 = vshrl.u32 %v1825_v17, 16  ;;  %v1409_v27 = vshll.u32 %v1825_v17, 16  ;;  %v1830_v16 = vld [vmem:[%s2173_s25 + $0x3c] sm:$0x1]  ;;  %v1831_v43 = vld [vmem:[%s2173_s25 + $0x40] sm:$0xf] }
  0x44   : > { %v1398_v25 = vor.u32 %v1397_v13, %v1394_v12  ;;  %v1834_v28 = vcombine.low %v1362_v18, %v1376_v24  ;;  %v1415_v30 = vshll.u32 %v1826_v20, 16  ;;  %v1420_v31 = vshrl.u32 %v1827_v21, 16  ;;  %v1832_v45 = vld [vmem:[%s2173_s25 + $0x44] sm:$0x1]  ;;  %v2104_v15 = vld [vmem:[%s2173_s25 + $0xf8] ss:$8 sps:$4 sm:$0xff]  }
  0x45   : > { %v1385_v29 = vrot.slane %v1384_v19, 4  ;;  %v1408_v33 = vrot.slane %v1406_v26, 4  ;;  %v1434_v23 = vshrl.u32 %v1829_v36, 16  ;;  %v1437_v48 = vshll.u32 %v1829_v36, 16  ;;  %v2105_v8 = vld [vmem:[%s2173_s25 + $0x108] ss:$8 sps:$4 sm:$0xff]  }
  0x46   : > { %1980 = vmatmul.mubr.msk.bf16.vlgmr.msra.gmra.mrb[0].mxu0 %vm212_vm1, %v2097_v35  ;;  %v1399_v1 = vrot.slane %v1398_v25, 4  ;;  %v1423_v35 = vshll.u32 %v1827_v21, 16  ;;  %v1417_v37 = vrot.slane %v1415_v30, 5  ;;  %v1422_v38 = vrot.slane %v1420_v31, 4  ;;  %v1842_v18 = vld [vmem:[%s2415_s2] ss:$0 sm:$0xff] }
  0x47   : > { %1988 = vmatpush3.bf16.msra.mxu0 %v1488_v34  ;;  %1983 = vmatprep.mubr.msk.bf16.mxu0 %vm212_vm1, %v2100_v39  ;;  %v1411_v34 = vrot.slane %v1409_v27, 5  ;;  %v1429_v39 = vshll.u32 %v1828_v22, 16  ;;  %v1443_v49 = vshll.u32 %v1830_v16, 16  ;;  %v1436_v51 = vrot.slane %v1434_v23, 4 }
  0x48   : > { %v1404_v40 = vsel %vm2213_vm4, %v1399_v1, %v1403_v14  ;;  %v1425_v42 = vrot.slane %v1423_v35, 5  ;;  %v1451_v54 = vshll.u32 %v1831_v43, 16  ;;  %v1457_v55 = vshll.u32 %v1832_v45, 16 }
  0x49   : > { %v1412_v41 = vor.u32 %v1411_v34, %v1408_v33  ;;  %v1431_v47 = vrot.slane %v1429_v39, 5  ;;  %v1445_v60 = vrot.slane %v1443_v49, 5 }
  0x4a   : > { %1940 = vmatmul.mubr.msk.bf16.vlgmr.msra.gmra.mrb[0].mxu1 %vm212_vm1, %v2099_v52  ;;  %v1426_v50 = vor.u32 %v1425_v42, %v1422_v38  ;;  %v1448_v52 = vshrl.u32 %v1831_v43, 16  ;;  %v1453_v61 = vrot.slane %v1451_v54, 5  ;;  %v1459_v4 = vrot.slane %v1457_v55, 5 }
  0x4b   : > { %1998 = vmatpush3.bf16.msra.mxu1 %v2156_v3  ;;  %1943 = vmatprep.mubr.msk.bf16.mxu1 %vm212_vm1, %v2102_v5  ;;  %v1390_v3 = vsel %vm2213_vm4, %v1385_v29, %v1389_v9  ;;  %v1413_v10 = vrot.slane %v1412_v41, 4 }
  0x4c   : > { %v1835_v46 = vcombine.low %v1390_v3, %v1404_v40  ;;  %v1427_v57 = vrot.slane %v1426_v50, 4  ;;  %v1450_v58 = vrot.slane %v1448_v52, 4 }
  0x4d   : > { %v1418_v56 = vsel %vm2213_vm4, %v1413_v10, %v1417_v37 }
  0x4e   : > { %1984 = vmatmul.mubr.msk.bf16.gmra.mrb[4].mxu0 %vm212_vm1, %v2101_v53  ;;  %v1439_v53 = vrot.slane %v1437_v48, 5  ;;  %v1432_v62 = vsel %vm2213_vm4, %v1427_v57, %v1431_v47  ;;  %v1454_v2 = vor.u32 %v1453_v61, %v1450_v58 }
  0x4f   : > { %1989 = vmatprep.mubr.msk.bf16.mxu0 %vm212_vm1, %v1834_v28  ;;  %v1836_v63 = vcombine.low %v1418_v56, %v1432_v62 }
  0x50   : > { %v1440_v59 = vor.u32 %v1439_v53, %v1436_v51  ;;  %v1455_v6 = vrot.slane %v1454_v2, 4 }
  0x52   : > { %1944 = vmatmul.mubr.msk.bf16.gmra.mrb[4].mxu1 %vm212_vm1, %v2103_v32  ;;  %v1441_v0 = vrot.slane %v1440_v59, 4  ;;  %v1460_v7 = vsel %vm2213_vm4, %v1455_v6, %v1459_v4 }
  0x53   : > { %1953 = vmatprep.mubr.msk.bf16.mxu1 %vm212_vm1, %v2104_v15 }
  0x54   : > { %v1446_v5 = vsel %vm2213_vm4, %v1441_v0, %v1445_v60 }
  0x55   : > { %v1837_v9 = vcombine.low %v1446_v5, %v1460_v7 }
  0x56   : > { %1990 = vmatmul.mubr.msk.bf16.vlgmr.msra.gmra.mrb[0].mxu0 %vm212_vm1, %v1835_v46 }
  0x57   : > { %1993 = vmatprep.mubr.msk.bf16.mxu0 %vm212_vm1, %v1836_v63 }
  0x5e   : > { %1994 = vmatmul.mubr.msk.bf16.gmra.mrb[4].mxu0 %vm212_vm1, %v1837_v9  ;;  %1954 = vmatmul.mubr.msk.bf16.vlgmr.msra.gmra.mrb[4].mxu1 %vm212_vm1, %v2105_v8 }
 0x11d   : > { %v1941_v11 = vpop.f32.mrb[0].mxu1 }
 0x11e   : > { %v707_v12 = vpop.f32.mrb[1].mxu1 }
 0x11f   : > { %v1942_v13 = vpop.f32.mrb[2].mxu1 }
 0x120   : > { %v710_v14 = vpop.f32.mrb[3].mxu1 }
 0x129   : > { %v1991_v17 = vpop.f32.mrb[0].mxu0 }
 0x12a   : > { %v1999_v19 = vadd.f32 %v1991_v17, %v1941_v11  ;;  %v1524_v20 = vpop.f32.mrb[1].mxu0 }
 0x12b   : > { %v2000_v44 = vadd.f32 %v1524_v20, %v707_v12  ;;  %v1992_v21 = vpop.f32.mrb[2].mxu0 }
 0x12c   : > { %v1572_v22 = vadd.f32 %v1999_v19, %v1842_v18  ;;  %v2001_v24 = vadd.f32 %v1992_v21, %v1942_v13  ;;  %v1527_v25 = vpop.f32.mrb[3].mxu0 }
 0x12d   : > { %v1570_v26 = vadd.f32 %v2000_v44, %v1842_v18  ;;  %v2002_v27 = vadd.f32 %v1527_v25, %v710_v14 }
 0x12e   : > { %v1580_v28 = vmax.f32 %v1572_v22, 0.0  ;;  %v1573_v29 = vadd.f32 %v2001_v24, %v1842_v18 }
 0x12f   : > { %v1578_v30 = vmax.f32 %v1570_v26, 0.0  ;;  %v1571_v31 = vadd.f32 %v2002_v27, %v1842_v18 }
 0x130   : > { %v1856_v32 = vpack.c.bf16 %v1580_v28, %v1580_v28  ;;  %v1581_v1 = vmax.f32 %v1573_v29, 0.0 }
 0x131   : > { %v1854_v33 = vpack.c.bf16 %v1578_v30, %v1578_v30  ;;  %v1579_v34 = vmax.f32 %v1571_v31, 0.0  ;;  %v1995_v3 = vpop.f32.mrb[4].mxu0  ;;  %v1955_v38 = vpop.f32.mrb[4].mxu1 }
 0x132   : > { %1621 = vst.msk [vmem:[%s2392_s16 + $0x8] sm:$0xf] %vm1618_vm5, %v1856_v32  ;;  %v1857_v35 = vpack.c.bf16 %v1581_v1, %v1581_v1  ;;  %v1540_v37 = vpop.f32.mrb[5].mxu0  ;;  %v2003_v16 = vadd.f32 %v1995_v3, %v1955_v38  ;;  %v842_v40 = vpop.f32.mrb[5].mxu1 }
 0x133   : > { %1619 = vst.msk [vmem:[%s2392_s16] sm:$0xf] %vm1618_vm5, %v1854_v33  ;;  %v1855_v36 = vpack.c.bf16 %v1579_v34, %v1579_v34  ;;  %v1996_v39 = vpop.f32.mrb[6].mxu0  ;;  %v2004_v42 = vadd.f32 %v1540_v37, %v842_v40  ;;  %v1956_v43 = vpop.f32.mrb[6].mxu1 }
 0x134   : > { %1622 = vst.msk [vmem:[%s2392_s16 + $0xc] sm:$0xf] %vm1618_vm5, %v1857_v35  ;;  %v1543_v41 = vpop.f32.mrb[7].mxu0  ;;  %v1576_v45 = vadd.f32 %v2003_v16, %v1842_v18  ;;  %v2005_v23 = vadd.f32 %v1996_v39, %v1956_v43  ;;  %v845_v46 = vpop.f32.mrb[7].mxu1 }
 0x135   : > { %1620 = vst.msk [vmem:[%s2392_s16 + $0x4] sm:$0xf] %vm1618_vm5, %v1855_v36  ;;  %v1574_v15 = vadd.f32 %v2004_v42, %v1842_v18  ;;  %v2006_v47 = vadd.f32 %v1543_v41, %v845_v46 }
 0x136   : > { %v1584_v48 = vmax.f32 %v1576_v45, 0.0  ;;  %v1577_v49 = vadd.f32 %v2005_v23, %v1842_v18 }
 0x137   : > { %v1582_v10 = vmax.f32 %v1574_v15, 0.0  ;;  %v1575_v50 = vadd.f32 %v2006_v47, %v1842_v18 }
 0x138   : > { %v1860_v51 = vpack.c.bf16 %v1584_v48, %v1584_v48  ;;  %v1585_v52 = vmax.f32 %v1577_v49, 0.0 }
 0x139   : > { %v1858_v53 = vpack.c.bf16 %v1582_v10, %v1582_v10  ;;  %v1583_v54 = vmax.f32 %v1575_v50, 0.0 }
 0x13a   : > { %1625 = vst.msk [vmem:[%s2392_s16 + $0x18] sm:$0xf] %vm1618_vm5, %v1860_v51  ;;  %v1861_v55 = vpack.c.bf16 %v1585_v52, %v1585_v52 }
 0x13b   : > { %1623 = vst.msk [vmem:[%s2392_s16 + $0x10] sm:$0xf] %vm1618_vm5, %v1858_v53  ;;  %v1859_v56 = vpack.c.bf16 %v1583_v54, %v1583_v54 }
 0x13c   : > { %1626 = vst.msk [vmem:[%s2392_s16 + $0x1c] sm:$0xf] %vm1618_vm5, %v1861_v55 }
 0x13d   : > { %1624 = vst.msk [vmem:[%s2392_s16 + $0x14] sm:$0xf] %vm1618_vm5, %v1859_v56 }
 0x13e PF: > { %s13_s12 = sadd.s32 1, %s2112_s12  }
 0x13f   : > { %p10_p4 = scmp.ge.s32.totalorder %s13_s12, 4  }
 0x141   :  { %12 = sbr.rel (!%p10_p4) target bundleno = 1 (0x1), region = 75 }

// kernel: db_model_forward.16
= control target key start
LH: loop header
LB: loop body
LE: loop exit
PB: predicated region body
PF: predicated region fallthrough
CT: control target
= control target key end

     0   :  { %s1479_s12 = smov 0   ;;  %s1643_s0 = inlined_call_operand.vmem [shape: bf16[2,4,5,5,16], index: 0, kind: input, shape index: {}]   ;;  %s1644_s1 = inlined_call_operand.vmem [shape: bf16[9,16,24], index: 1, kind: input, shape index: {}]   ;;  %s1645_s2 = inlined_call_operand.vmem [shape: f32[1,24], index: 2, kind: input, shape index: {}]   ;;  %s1646_s3 = inlined_call_operand.vmem [shape: bf16[2,16,24], index: 3, kind: output, shape index: {}]  }
   0x1 LB: > { %s1241_s13 = sadd.s32 4294967295, %s1454_s12   ;;  %p1245_p0 = scmp.ge.s32.totalorder %s1454_s12, 1  ;;  %s1454_s12 = sphi %s1479_s12, %s13_s12  }
   0x2   : > { %p137_p1 = scmp.lt.s32.totalorder %s1454_s12, 3 }
   0x4   : > { %p138_p2 = pnand %p1245_p0, %p137_p1 }
   0x5   : > { %v1415_v0 = vld [vmem:[%s1644_s1 + $0x8] sm:$0xff] (!%p138_p2)   ;;  %v195_v1 = vlaneseq (!%p138_p2)  ;;  %v1456_v2 = vmov (!%p138_p2), 0.0   ;;  %v1416_v3 = vld [vmem:[%s1644_s1] sm:$0xff] (!%p138_p2)   ;;  %vm1457_vm0 = vmmov (!%p138_p2), 0   ;;  %p161_p3 = scmp.lt.s32.totalorder (!%p138_p2), %s1241_s13, 1  ;;  %vm213_vm1 = vcmask (!%p138_p2), 130048  }
   0x6   : > { %141 = sbr.rel (%p138_p2) target bundleno = 290 (0x122), region = 32  ;;  %1349 = vmatprep.subr.bf16.mxu0 (!%p138_p2), %v1456_v2  ;;  %1355 = vmatprep.subr.bf16.mxu1 (!%p138_p2), %v1456_v2  ;;  %v1458_v4 = vmov (!%p138_p2), 1983009808   ;;  %vm369_vm2 = vsmask.f32 (!%p138_p2), 1280  ;;  %v1421_v11 = vld [vmem:[%s1644_s1 + $0x10] sm:$0xff] (!%p138_p2)  }
   0x7   : > { %1350 = vmatpush3.bf16.msra.mxu0 (!%p138_p2), %v1415_v0  ;;  %1351 = vmatprep.mubr.msk.bf16.mxu0 (!%p138_p2), %vm1457_vm0, %v1456_v2  ;;  %v193_v5 = vunpack.c.l.s4 (!%p138_p2), %v1458_v4  ;;  %v196_v6 = vshrl.u32 (!%p138_p2), %v195_v1, 7  ;;  %vm370_vm3 = vsmask.f32 (!%p138_p2), 3336  ;;  %vm372_vm4 = vsmask.f32 (!%p138_p2), 5392  ;;  %v1422_v14 = vld [vmem:[%s1644_s1 + $0x18] sm:$0xff] (!%p138_p2)  }
   0x8   : > { %1356 = vmatpush3.bf16.msra.mxu1 (!%p138_p2), %v1416_v3  ;;  %1357 = vmatprep.mubr.msk.bf16.mxu1 (!%p138_p2), %vm1457_vm0, %v1456_v2  ;;  %vm374_vm5 = vsmask.f32 (!%p138_p2), 7448  ;;  %vm371_vm6 = vmor (!%p138_p2), %vm369_vm2, %vm370_vm3  ;;  %v1426_v60 = vld [vmem:[%s1644_s1 + $0x28] sm:$0xff] (!%p138_p2)   ;;  %v1423_v29 = vld [vmem:[%s1644_s1 + $0x20] sm:$0xff] (!%p138_p2)   ;;  %vm1183_vm9 = vcmask (!%p138_p2), 191488  }
   0x9   : > { %1361 = vmatprep.subr.bf16.mxu0 (!%p138_p2), %v1456_v2  ;;  %1367 = vmatprep.subr.bf16.mxu1 (!%p138_p2), %v1456_v2  ;;  %v194_v7 = vunpack.c.0.s8 (!%p138_p2), %v193_v5  ;;  %vm1530_vm7 = vmor (!%p138_p2), %vm371_vm6, %vm372_vm4 }
   0xa   : > { %vm1542_vm8 = vmor (!%p138_p2), %vm1530_vm7, %vm374_vm5 }
   0xb   : > { %v1509_v8 = vsub.s32 (!%p138_p2), %v194_v7, %v196_v6 }
   0xd   : > { %s1652_s13 = smov (!%p161_p3, %s1241_s13), 1 }
   0xe   : > { %s1403_s18 = smul.u32 80, %s1652_s13  ;;  %s1328_s11 = sshll.u32 %s1652_s13, 3 }
   0xf   : > { %s170_s16 = scalar_lea.vmem %s1646_s3, %s1328_s11 }
  0x10   : > { %s1507_s21 = scalar_lea.vmem %s1643_s0, %s1403_s18 }
  0x11   : > { %v1436_v9 = vld.sshfl [vmem:[%s1507_s21 + $0x14] sm:$0xf pattern:$0x76325410] }
  0x12   : > { %v1437_v10 = vld.sshfl [vmem:[%s1507_s21 + $0x1c] sm:$0xf pattern:$0x76325410] }
  0x13   : > { %v1438_v12 = vld.sshfl [vmem:[%s1507_s21] sm:$0xf pattern:$0x76325410]  ;;  %v206_v16 = vcombine.low %v1436_v9, %v1437_v10 }
  0x14   : > { %v1439_v13 = vld.sshfl [vmem:[%s1507_s21 + $0x8] sm:$0xf pattern:$0x76325410] }
  0x15   : > { %v1259_v15 = vld.sshfl [vmem:[%s1507_s21] sm:$0x13 pattern:$0x76325410]  ;;  %1352 = vmatmul.mubr.msk.bf16.vlgmr.msra.gmra.mrb[0].mxu0 %vm213_vm1, %v206_v16  ;;  %v278_v23 = vcombine.low %v1438_v12, %v1439_v13 }
  0x16   : > { %v1260_v17 = vld.sshfl [vmem:[%s1507_s21 + $0x4] sm:$0x13 pattern:$0x76325410]  ;;  %v344_v18 = vcombine.high %v1259_v15, %v1259_v15  ;;  %v377_v21 = vshrl.u32 %v1259_v15, 16  ;;  %v380_v22 = vshll.u32 %v1259_v15, 16  ;;  %1362 = vmatpush3.bf16.msra.mxu0 %v1421_v11  ;;  %1363 = vmatprep.mubr.msk.bf16.mxu0 %vm1457_vm0, %v1456_v2 }
  0x17   : > { %v1261_v19 = vld.sshfl [vmem:[%s1507_s21 + $0x8] sm:$0x13 pattern:$0x76325410]  ;;  %v352_v20 = vcombine.high %v1260_v17, %v1260_v17  ;;  %v391_v27 = vshrl.u32 %v1260_v17, 16  ;;  %v394_v32 = vshll.u32 %v1260_v17, 16  ;;  %1358 = vmatmul.mubr.msk.bf16.vlgmr.msra.gmra.mrb[0].mxu1 %vm213_vm1, %v278_v23  ;;  %1373 = vmatprep.subr.bf16.mxu0 %v1456_v2 }
  0x18   : > { %v1262_v24 = vld.sshfl [vmem:[%s1507_s21 + $0xc] sm:$0x13 pattern:$0x76325410]  ;;  %v360_v25 = vcombine.high %v1261_v19, %v1261_v19  ;;  %v386_v26 = vshll.u32 %v344_v18, 16  ;;  %v379_v30 = vrot.slane %v377_v21, 6  ;;  %1368 = vmatpush3.bf16.msra.mxu1 %v1422_v14  ;;  %1369 = vmatprep.mubr.msk.bf16.mxu1 %vm1457_vm0, %v1456_v2 }
  0x19   : > { %v368_v28 = vcombine.high %v1262_v24, %v1262_v24  ;;  %v382_v31 = vrot.slane %v380_v22, 7  ;;  %v393_v34 = vrot.slane %v391_v27, 6  ;;  %v400_v35 = vshll.u32 %v352_v20, 16  ;;  %1379 = vmatprep.subr.bf16.mxu1 %v1456_v2 }
  0x1a   : > { %v388_v33 = vrot.slane %v386_v26, 7  ;;  %v405_v36 = vshrl.u32 %v1261_v19, 16  ;;  %v396_v38 = vrot.slane %v394_v32, 7  ;;  %v408_v39 = vshll.u32 %v1261_v19, 16 }
  0x1b   : > { %v383_v37 = vor.u32 %v382_v31, %v379_v30  ;;  %v414_v40 = vshll.u32 %v360_v25, 16  ;;  %v1440_v41 = vld.sshfl [vmem:[%s1507_s21 + $0x28] sm:$0xf pattern:$0x76325410]  ;;  %v402_v43 = vrot.slane %v400_v35, 7 }
  0x1c   : > { %v407_v44 = vrot.slane %v405_v36, 6  ;;  %v419_v45 = vshrl.u32 %v1262_v24, 16  ;;  %v422_v46 = vshll.u32 %v1262_v24, 16  ;;  %v397_v49 = vor.u32 %v396_v38, %v393_v34 }
  0x1d   : > { %v1441_v47 = vld.sshfl [vmem:[%s1507_s21 + $0x30] sm:$0xf pattern:$0x76325410]  ;;  %v384_v48 = vrot.slane %v383_v37, 2  ;;  %v410_v50 = vrot.slane %v408_v39, 7 }
  0x1e   : > { %v416_v51 = vrot.slane %v414_v40, 7  ;;  %v421_v52 = vrot.slane %v419_v45, 6  ;;  %v424_v53 = vrot.slane %v422_v46, 7  ;;  %v428_v54 = vshll.u32 %v368_v28, 16 }
  0x1f   : > { %v389_v55 = vsel %vm1542_vm8, %v384_v48, %v388_v33  ;;  %v398_v56 = vrot.slane %v397_v49, 2  ;;  %v411_v57 = vor.u32 %v410_v50, %v407_v44  ;;  %v532_v63 = vcombine.low %v1440_v41, %v1441_v47  ;;  %v1559_v3 = vld.sshfl [vmem:[%s1507_s21 + $0x3c] sm:$0xf pattern:$0x76325410] }
  0x20   : > { %v425_v58 = vor.u32 %v424_v53, %v421_v52  ;;  %v430_v59 = vrot.slane %v428_v54, 7  ;;  %v1287_v4 = vld.sshfl [vmem:[%s1507_s21 + $0x28] sm:$0x13 pattern:$0x76325410] }
  0x21   : > { %v1555_v61 = vsel %vm1542_vm8, %v398_v56, %v402_v43  ;;  %v412_v62 = vrot.slane %v411_v57, 2  ;;  %1370 = vmatmul.mubr.msk.bf16.vlgmr.msra.gmra.mrb[4].mxu1 %vm213_vm1, %v532_v63  ;;  %v1288_v6 = vld.sshfl [vmem:[%s1507_s21 + $0x2c] sm:$0x13 pattern:$0x76325410]  ;;  %v681_v7 = vcombine.high %v1287_v4, %v1287_v4  ;;  %v707_v9 = vshrl.u32 %v1287_v4, 16 }
  0x22   : > { %v426_v0 = vrot.slane %v425_v58, 2  ;;  %v435_v1 = vcombine.low %v389_v55, %v1555_v61  ;;  %v710_v10 = vshll.u32 %v1287_v4, 16  ;;  %1380 = vmatpush3.bf16.msra.mxu1 %v1426_v60  ;;  %v1443_v13 = vld.sshfl [vmem:[%s1507_s21 + $0x44] sm:$0xf pattern:$0x76325410]  ;;  %1381 = vmatprep.mubr.msk.bf16.mxu1 %vm1457_vm0, %v1456_v2  ;;  %v689_v18 = vcombine.high %v1288_v6, %v1288_v6 }
  0x23   : > { %v1564_v5 = vsel %vm1542_vm8, %v412_v62, %v416_v51  ;;  %v1289_v14 = vld.sshfl [vmem:[%s1507_s21 + $0x30] sm:$0x13 pattern:$0x76325410]  ;;  %v721_v15 = vshrl.u32 %v1288_v6, 16  ;;  %v709_v20 = vrot.slane %v707_v9, 6  ;;  %1391 = vmatprep.subr.bf16.mxu1 %v1456_v2  ;;  %v613_v54 = vcombine.low %v1559_v3, %v1443_v13 }
  0x24   : > { %v1570_v11 = vsel %vm1542_vm8, %v426_v0, %v430_v59  ;;  %v443_v12 = vrot.slane %v435_v1, %v1509_v8  ;;  %v1290_v17 = vld.sshfl [vmem:[%s1507_s21 + $0x34] sm:$0x13 pattern:$0x76325410]  ;;  %v697_v19 = vcombine.high %v1289_v14, %v1289_v14  ;;  %v712_v22 = vrot.slane %v710_v10, 7 }
  0x25   : > { %v436_v16 = vcombine.low %v1564_v5, %v1570_v11  ;;  %v705_v21 = vcombine.high %v1290_v17, %v1290_v17  ;;  %v716_v23 = vshll.u32 %v681_v7, 16  ;;  %v723_v24 = vrot.slane %v721_v15, 6  ;;  %v1444_v48 = vld.sshfl [vmem:[%s1507_s21 + $0x4] sm:$0xf pattern:$0x76325410] }
  0x26   : > { %v724_v26 = vshll.u32 %v1288_v6, 16  ;;  %v730_v27 = vshll.u32 %v689_v18, 16  ;;  %v735_v28 = vshrl.u32 %v1289_v14, 16  ;;  %v713_v30 = vor.u32 %v712_v22, %v709_v20  ;;  %v1429_v58 = vld [vmem:[%s1644_s1 + $0x30] sm:$0xff]   ;;  %v1430_v18 = vld [vmem:[%s1644_s1 + $0x38] sm:$0xff]   ;;  %v1433_v22 = vld [vmem:[%s1644_s1 + $0x40] sm:$0xff]  }
  0x27   : > { %v450_v25 = vrot.slane %v436_v16, %v1509_v8  ;;  %v738_v31 = vshll.u32 %v1289_v14, 16  ;;  %v744_v32 = vshll.u32 %v697_v19, 16  ;;  %v718_v34 = vrot.slane %v716_v23, 7 }
  0x28   : > { %v726_v35 = vrot.slane %v724_v26, 7  ;;  %v737_v36 = vrot.slane %v735_v28, 6  ;;  %v714_v37 = vrot.slane %v713_v30, 2  ;;  %v749_v39 = vshrl.u32 %v1290_v17, 16 }
  0x29   : > { %v451_v33 = vcombine.low %v443_v12, %v450_v25  ;;  %v740_v38 = vrot.slane %v738_v31, 7  ;;  %v732_v41 = vrot.slane %v730_v27, 7  ;;  %v752_v43 = vshll.u32 %v1290_v17, 16 }
  0x2a   : > { %v727_v40 = vor.u32 %v726_v35, %v723_v24  ;;  %v758_v44 = vshll.u32 %v705_v21, 16  ;;  %v746_v46 = vrot.slane %v744_v32, 7  ;;  %v751_v47 = vrot.slane %v749_v39, 6 }
  0x2b   : > { %1364 = vmatmul.mubr.msk.bf16.vlgmr.msra.gmra.mrb[4].mxu0 %vm213_vm1, %v451_v33  ;;  %v741_v45 = vor.u32 %v740_v38, %v737_v36  ;;  %v719_v49 = vsel %vm1542_vm8, %v714_v37, %v718_v34  ;;  %v754_v51 = vrot.slane %v752_v43, 7  ;;  %v1445_v52 = vld.sshfl [vmem:[%s1507_s21 + $0xc] sm:$0xf pattern:$0x76325410]  ;;  %v1095_v20 = vcombine.low %v1555_v61, %v1564_v5 }
  0x2c   : > { %1374 = vmatpush3.bf16.msra.mxu0 %v1423_v29  ;;  %1375 = vmatprep.mubr.msk.bf16.mxu0 %vm1457_vm0, %v1456_v2  ;;  %v728_v50 = vrot.slane %v727_v40, 2  ;;  %v760_v57 = vrot.slane %v758_v44, 7  ;;  %v1318_v60 = vld.sshfl [vmem:[%s1507_s21 + $0x10] sm:$0x13 pattern:$0x76325410]  ;;  %v862_v19 = vcombine.low %v1444_v48, %v1445_v52 }
  0x2d   : > { %1385 = vmatprep.subr.bf16.mxu0 %v1456_v2  ;;  %v742_v53 = vrot.slane %v741_v45, 2  ;;  %v755_v56 = vor.u32 %v754_v51, %v751_v47  ;;  %v1035_v0 = vcombine.high %v1318_v60, %v1318_v60  ;;  %v1079_v1 = vshrl.u32 %v1318_v60, 16  ;;  %v1446_v14 = vld.sshfl [vmem:[%s1507_s21 + $0x18] sm:$0xf pattern:$0x76325410] }
  0x2e   : > { %v733_v55 = vsel %vm1542_vm8, %v728_v50, %v732_v41  ;;  %v1082_v3 = vshll.u32 %v1318_v60, 16  ;;  %v1447_v15 = vld.sshfl [vmem:[%s1507_s21 + $0x20] sm:$0xf pattern:$0x76325410]  ;;  %v1103_v26 = vrot.slane %v1095_v20, %v1509_v8 }
  0x2f   : > { %v765_v59 = vcombine.low %v719_v49, %v733_v55  ;;  %v747_v62 = vsel %vm1542_vm8, %v742_v53, %v746_v46  ;;  %v756_v63 = vrot.slane %v755_v56, 2  ;;  %v1081_v6 = vrot.slane %v1079_v1, 6 }
  0x30   : > { %v1088_v7 = vshll.u32 %v1035_v0, 16  ;;  %v1084_v12 = vrot.slane %v1082_v3, 7  ;;  %v943_v5 = vcombine.low %v1446_v14, %v1447_v15 }
  0x31   : > { %v761_v4 = vsel %vm1542_vm8, %v756_v63, %v760_v57  ;;  %v773_v10 = vrot.slane %v765_v59, %v1509_v8 }
  0x32   : > { %v766_v9 = vcombine.low %v747_v62, %v761_v4  ;;  %v1085_v16 = vor.u32 %v1084_v12, %v1081_v6  ;;  %v1090_v17 = vrot.slane %v1088_v7, 7 }
  0x33   : > { %1376 = vmatmul.mubr.msk.bf16.vlgmr.msra.gmra.mrb[8].mxu0 %vm213_vm1, %v613_v54 }
  0x34   : > { %1386 = vmatpush3.bf16.msra.mxu0 %v1429_v58  ;;  %1387 = vmatprep.mubr.msk.bf16.mxu0 %vm1457_vm0, %v1456_v2  ;;  %v780_v13 = vrot.slane %v766_v9, %v1509_v8  ;;  %v1086_v23 = vrot.slane %v1085_v16, 2 }
  0x35   : > { %1397 = vmatprep.subr.bf16.mxu0 %v1456_v2 }
  0x36   : > { %v781_v21 = vcombine.low %v773_v10, %v780_v13  ;;  %v1091_v24 = vsel %vm1542_vm8, %v1086_v23, %v1090_v17  ;;  %v1323_v10 = vld [vmem:[%s1645_s2] ss:$0 sm:$0xff] }
  0x37   : > { %v1096_v25 = vcombine.low %v1570_v11, %v1091_v24 }
  0x38   : > { %1382 = vmatmul.mubr.msk.bf16.vlgmr.msra.gmra.mrb[8].mxu1 %vm213_vm1, %v781_v21 }
  0x39   : > { %1392 = vmatpush3.bf16.msra.mxu1 %v1430_v18  ;;  %1393 = vmatprep.mubr.msk.bf16.mxu1 %vm1457_vm0, %v1456_v2  ;;  %v1110_v61 = vrot.slane %v1096_v25, %v1509_v8 }
  0x3b   : > { %1388 = vmatmul.mubr.msk.bf16.vlgmr.msra.gmra.mrb[12].mxu0 %vm213_vm1, %v862_v19  ;;  %v1111_v27 = vcombine.low %v1103_v26, %v1110_v61 }
  0x3c   : > { %1398 = vmatpush3.bf16.msra.mxu0 %v1433_v22  ;;  %1399 = vmatprep.mubr.msk.bf16.mxu0 %vm1457_vm0, %v1456_v2 }
  0x40   : > { %1394 = vmatmul.mubr.msk.bf16.vlgmr.msra.gmra.mrb[12].mxu1 %vm213_vm1, %v943_v5 }
  0x43   : > { %1400 = vmatmul.mubr.msk.bf16.vlgmr.msra.gmra.mrb[16].mxu0 %vm213_vm1, %v1111_v27 }
  0xe8   : > { %v251_v42 = vpop.f32.mrb[0].mxu0 }
  0xe9   : > { %v1353_v28 = vpop.f32.mrb[1].mxu0 }
  0xea   : > { %v322_v11 = vpop.f32.mrb[0].mxu1  ;;  %v254_v29 = vpop.f32.mrb[2].mxu0 }
  0xeb   : > { %v323_v30 = vadd.f32 %v322_v11, %v251_v42  ;;  %v1359_v31 = vpop.f32.mrb[1].mxu1  ;;  %v1354_v32 = vpop.f32.mrb[3].mxu0 }
  0xec   : > { %v325_v33 = vpop.f32.mrb[2].mxu1 }
  0xed   : > { %v326_v34 = vadd.f32 %v325_v33, %v254_v29  ;;  %v1360_v35 = vpop.f32.mrb[3].mxu1 }
  0xf4   : > { %v576_v36 = vpop.f32.mrb[4].mxu1 }
  0xf5   : > { %v1371_v2 = vpop.f32.mrb[5].mxu1 }
  0xf6   : > { %v579_v37 = vpop.f32.mrb[6].mxu1 }
  0xf7   : > { %v1372_v8 = vpop.f32.mrb[7].mxu1 }
  0xfe   : > { %v495_v38 = vpop.f32.mrb[4].mxu0 }
  0xff   : > { %v502_v39 = vadd.f32 %v495_v38, %v323_v30  ;;  %v1365_v40 = vpop.f32.mrb[5].mxu0 }
 0x100   : > { %v498_v41 = vpop.f32.mrb[6].mxu0 }
 0x101   : > { %v503_v43 = vadd.f32 %v498_v41, %v326_v34  ;;  %v583_v44 = vadd.f32 %v576_v36, %v502_v39  ;;  %v1366_v45 = vpop.f32.mrb[7].mxu0 }
 0x103   : > { %v584_v46 = vadd.f32 %v579_v37, %v503_v43 }
 0x106   : > { %v657_v47 = vpop.f32.mrb[8].mxu0 }
 0x107   : > { %v664_v48 = vadd.f32 %v657_v47, %v583_v44  ;;  %v1377_v49 = vpop.f32.mrb[9].mxu0 }
 0x108   : > { %v660_v50 = vpop.f32.mrb[10].mxu0 }
 0x109   : > { %v665_v51 = vadd.f32 %v660_v50, %v584_v46  ;;  %v1378_v52 = vpop.f32.mrb[11].mxu0 }
 0x10b   : > { %v825_v53 = vpop.f32.mrb[8].mxu1 }
 0x10c   : > { %v832_v54 = vadd.f32 %v825_v53, %v664_v48  ;;  %v1383_v55 = vpop.f32.mrb[9].mxu1 }
 0x10d   : > { %v828_v57 = vpop.f32.mrb[10].mxu1 }
 0x10e   : > { %v906_v56 = vpop.f32.mrb[12].mxu0  ;;  %v833_v59 = vadd.f32 %v828_v57, %v665_v51  ;;  %v1384_v60 = vpop.f32.mrb[11].mxu1 }
 0x10f   : > { %v1389_v58 = vpop.f32.mrb[13].mxu0  ;;  %v913_v62 = vadd.f32 %v906_v56, %v832_v54 }
 0x110   : > { %v909_v63 = vpop.f32.mrb[14].mxu0 }
 0x111   : > { %v1390_v0 = vpop.f32.mrb[15].mxu0  ;;  %v914_v1 = vadd.f32 %v909_v63, %v833_v59 }
 0x113   : > { %v987_v3 = vpop.f32.mrb[12].mxu1 }
 0x114   : > { %v994_v4 = vadd.f32 %v987_v3, %v913_v62  ;;  %v1395_v6 = vpop.f32.mrb[13].mxu1 }
 0x115   : > { %v990_v9 = vpop.f32.mrb[14].mxu1 }
 0x116   : > { %v1155_v7 = vpop.f32.mrb[16].mxu0  ;;  %v995_v13 = vadd.f32 %v990_v9, %v914_v1  ;;  %v1396_v14 = vpop.f32.mrb[15].mxu1 }
 0x117   : > { %v1401_v12 = vpop.f32.mrb[17].mxu0  ;;  %v1162_v15 = vadd.f32 %v1155_v7, %v994_v4 }
 0x118   : > { %v1158_v16 = vpop.f32.mrb[18].mxu0 }
 0x119   : > { %v1402_v17 = vpop.f32.mrb[19].mxu0  ;;  %v1171_v18 = vadd.f32 %v1323_v10, %v1162_v15  ;;  %v1163_v19 = vadd.f32 %v1158_v16, %v995_v13 }
 0x11b   : > { %v1173_v20 = vmax.f32 %v1171_v18, 0.0  ;;  %v1172_v21 = vadd.f32 %v1323_v10, %v1163_v19 }
 0x11d   : > { %v1329_v22 = vpack.c.bf16 %v1173_v20, %v1173_v20  ;;  %v1174_v23 = vmax.f32 %v1172_v21, 0.0 }
 0x11f   : > { %1184 = vst.msk [vmem:[%s170_s16] sm:$0xf] %vm1183_vm9, %v1329_v22  ;;  %v1330_v24 = vpack.c.bf16 %v1174_v23, %v1174_v23 }
 0x121   : > { %1185 = vst.msk [vmem:[%s170_s16 + $0x4] sm:$0xf] %vm1183_vm9, %v1330_v24 }
 0x122 PF: > { %s13_s12 = sadd.s32 1, %s1454_s12  }
 0x123   : > { %p10_p4 = scmp.ge.s32.totalorder %s13_s12, 4  }
 0x125   :  { %12 = sbr.rel (!%p10_p4) target bundleno = 1 (0x1), region = 75 }

// kernel: db_model_forward.14
= control target key start
LH: loop header
LB: loop body
LE: loop exit
PB: predicated region body
PF: predicated region fallthrough
CT: control target
= control target key end

     0   :  { %s6213_s12 = smov 0   ;;  %s7161_s0 = inlined_call_operand.vmem [shape: bf16[2,4,17,17,3], index: 0, kind: input, shape index: {}]   ;;  %s7162_s1 = inlined_call_operand.vmem [shape: bf16[9,3,8], index: 1, kind: input, shape index: {}]   ;;  %s7163_s2 = inlined_call_operand.vmem [shape: f32[1,8], index: 2, kind: input, shape index: {}]   ;;  %s7164_s3 = inlined_call_operand.vmem [shape: bf16[2,256,8], index: 3, kind: output, shape index: {}]  }
   0x1 LB: > { %s4733_s13 = sadd.s32 4294967295, %s6190_s12   ;;  %p4737_p0 = scmp.ge.s32.totalorder %s6190_s12, 1  ;;  %s6190_s12 = sphi %s6213_s12, %s13_s12  }
   0x2   : > { %p137_p1 = scmp.lt.s32.totalorder %s6190_s12, 3 }
   0x4   : > { %p138_p2 = pnand %p4737_p0, %p137_p1 }
   0x5   : > { %v4773_v0 = vld [vmem:[%s7162_s1 + $0x2] sm:$0x3] (!%p138_p2)  ;;  %vm369_vm0 = vcmask (!%p138_p2), 1040384   ;;  %vm370_vm1 = vcmask (!%p138_p2), 1041408   ;;  %p161_p3 = scmp.lt.s32.totalorder (!%p138_p2), %s4733_s13, 1  ;;  %v6192_v1 = vmov (!%p138_p2), 65535  }
   0x6   : > { %141 = sbr.rel (%p138_p2) target bundleno = 523 (0x20b), region = 32  ;;  %v371_v2 = vsel (!%p138_p2), %vm369_vm0, 4294967295, %v6192_v1  ;;  %v4968_v3 = vld [vmem:[%s7162_s1 + $0x8] sm:$0x3] (!%p138_p2)  ;;  %v204_v4 = vld [vmem:[%s7162_s1] sm:$0x3] (!%p138_p2) }
   0x7   : > { %v6230_v5 = vsel (!%p138_p2), %vm370_vm1, %v371_v2, 0  ;;  %v5049_v6 = vld [vmem:[%s7162_s1 + $0xa] sm:$0x3] (!%p138_p2)  ;;  %vm320_vm2 = vcmask (!%p138_p2), 23552   ;;  %v5114_v11 = vld [vmem:[%s7162_s1 + $0xc] sm:$0x3] (!%p138_p2) }
   0x8   : > { %v374_v7 = vand.u32 (!%p138_p2), %v4773_v0, %v6230_v5  ;;  %v6239_v8 = vand.u32 (!%p138_p2), %v4968_v3, %v6230_v5  ;;  %v666_v9 = vand.u32 (!%p138_p2), %v6230_v5, %v204_v4  ;;  %v2807_v10 = vand.u32 (!%p138_p2), %v5049_v6, %v6230_v5  ;;  %v4838_v12 = vld [vmem:[%s7162_s1 + $0x4] sm:$0x3] (!%p138_p2)  ;;  %v5179_v26 = vld [vmem:[%s7162_s1 + $0xe] sm:$0x3] (!%p138_p2)  ;;  %v4903_v37 = vld [vmem:[%s7162_s1 + $0x6] sm:$0x3] (!%p138_p2) }
   0x9   : > { %v6264_v17 = vand.u32 (!%p138_p2), %v5114_v11, %v6230_v5  ;;  %v6269_v19 = vand.u32 (!%p138_p2), %v4838_v12, %v6230_v5  ;;  %vm877_vm3 = vsmask.f32 (!%p138_p2), 3328  ;;  %vm878_vm4 = vsmask.f32 (!%p138_p2), 7440 }
   0xa   : > { %5514 = vmatprep.subr.bf16.mxu1 (!%p138_p2), %v374_v7  ;;  %5650 = vmatprep.subr.bf16.mxu0 (!%p138_p2), %v6239_v8  ;;  %v6300_v40 = vand.u32 (!%p138_p2), %v5179_v26, %v6230_v5  ;;  %vm6312_vm5 = vmor (!%p138_p2), %vm877_vm3, %vm878_vm4  ;;  %v6318_v62 = vand.u32 (!%p138_p2), %v4903_v37, %v6230_v5  ;;  %vm4645_vm6 = vcmask (!%p138_p2), 60416  }
   0xb   : > { %5515 = vmatpush3.bf16.msra.mxu1 (!%p138_p2), %v374_v7  ;;  %5651 = vmatpush3.bf16.msra.mxu0 (!%p138_p2), %v6239_v8 }
   0xc   : > { %5548 = vmatprep.subr.bf16.mxu1 (!%p138_p2), %v666_v9  ;;  %5684 = vmatprep.subr.bf16.mxu0 (!%p138_p2), %v2807_v10 }
   0xd   : > { %s7168_s13 = smov (!%p161_p3, %s4733_s13), 1 }
   0xe   : > { %s6078_s22 = smul.u32 816, %s7168_s13  ;;  %s5328_s11 = sshll.u32 %s7168_s13, 7 }
   0xf   : > { %s7057_s16 = scalar_lea.vmem %s7164_s3, %s5328_s11 }
  0x10   : > { %s6249_s25 = scalar_lea.vmem %s7161_s0, %s6078_s22 }
  0x11   : > { %v6088_v13 = vld [vmem:[%s6249_s25 + $0xcc] sm:$0xff]   ;;  %v6089_v14 = vld [vmem:[%s6249_s25 + $0x264] sm:$0xff]   ;;  %v6090_v15 = vld [vmem:[%s6249_s25 + $0xd8] sm:$0xff]  }
  0x12   : > { %5516 = vmatprep.mubr.msk.bf16.mxu1 %vm320_vm2, %v6088_v13  ;;  %5652 = vmatprep.mubr.msk.bf16.mxu0 %vm320_vm2, %v6089_v14  ;;  %v6091_v16 = vld [vmem:[%s6249_s25 + $0x270] sm:$0xff]   ;;  %v6092_v18 = vld [vmem:[%s6249_s25 + $0xe4] sm:$0xff]   ;;  %v6093_v20 = vld [vmem:[%s6249_s25 + $0x27c] sm:$0xff]  }
  0x13   : > { %5517 = vmatmul.mubr.msk.bf16.vlgmr.msra.gmra.mrb[0].mxu1 %vm320_vm2, %v6090_v15  ;;  %5653 = vmatmul.mubr.msk.bf16.vlgmr.msra.gmra.mrb[0].mxu0 %vm320_vm2, %v6091_v16  ;;  %v6094_v21 = vld [vmem:[%s6249_s25 + $0xf0] sm:$0xff]   ;;  %v6095_v22 = vld [vmem:[%s6249_s25 + $0x288] sm:$0xff]   ;;  %v6096_v23 = vld [vmem:[%s6249_s25 + $0xfc] sm:$0xff]  }
  0x14   : > { %5549 = vmatpush3.bf16.msra.mxu1 %v666_v9  ;;  %5685 = vmatpush3.bf16.msra.mxu0 %v2807_v10  ;;  %v6097_v24 = vld [vmem:[%s6249_s25 + $0x294] sm:$0xff]   ;;  %v6098_v25 = vld [vmem:[%s6249_s25 + $0x108] sm:$0xff]   ;;  %v6099_v27 = vld [vmem:[%s6249_s25 + $0x2a0] sm:$0xff]  }
  0x15   : > { %5520 = vmatprep.mubr.msk.bf16.mxu1 %vm320_vm2, %v6092_v18  ;;  %5656 = vmatprep.mubr.msk.bf16.mxu0 %vm320_vm2, %v6093_v20  ;;  %v6100_v28 = vld [vmem:[%s6249_s25 + $0x114] sm:$0xff]   ;;  %v6101_v29 = vld [vmem:[%s6249_s25 + $0x2ac] sm:$0xff]   ;;  %v5002_v31 = vld [vmem:[%s6249_s25 + $0x19c] sm:$0xf] }
  0x16   : > { %5718 = vmatprep.subr.bf16.mxu0 %v6264_v17  ;;  %5582 = vmatprep.subr.bf16.mxu1 %v6269_v19  ;;  %v5001_v30 = vld [vmem:[%s6249_s25 + $0x198] sm:$0xf]  ;;  %v5003_v32 = vld [vmem:[%s6249_s25 + $0x1a0] sm:$0x1]  ;;  %v2334_v35 = vshll.u32 %v5002_v31, 16  ;;  %v2338_v36 = vshrl.u32 %v5002_v31, 16 }
  0x17   : > { %v2325_v33 = vshrl.u32 %v5001_v30, 16  ;;  %v2328_v34 = vshll.u32 %v5001_v30, 16  ;;  %v2344_v38 = vshll.u32 %v5003_v32, 16  ;;  %v5004_v39 = vld [vmem:[%s6249_s25 + $0x1a4] sm:$0xf]  ;;  %v6103_v56 = vld [vmem:[%s6249_s25 + $0x2b8] sm:$0xff]  }
  0x18   : > { %v2336_v43 = vrot.slane %v2334_v35, 5  ;;  %v2340_v44 = vrot.slane %v2338_v36, 4  ;;  %v5005_v45 = vld [vmem:[%s6249_s25 + $0x1a8] sm:$0xf]  ;;  %v5006_v47 = vld [vmem:[%s6249_s25 + $0x1ac] sm:$0x1] }
  0x19   : > { %v2327_v41 = vrot.slane %v2325_v33, 4  ;;  %v2330_v42 = vrot.slane %v2328_v34, 5  ;;  %v2346_v46 = vrot.slane %v2344_v38, 5  ;;  %v2349_v48 = vshrl.u32 %v5004_v39, 16  ;;  %v6102_v51 = vld [vmem:[%s6249_s25 + $0x120] sm:$0xff]   ;;  %v6104_v4 = vld [vmem:[%s6249_s25 + $0x12c] sm:$0xff]  }
  0x1a   : > { %v2352_v49 = vshll.u32 %v5004_v39, 16  ;;  %v2358_v50 = vshll.u32 %v5005_v45, 16  ;;  %v2341_v53 = vor.u32 %v2340_v44, %v2336_v43  ;;  %v2362_v54 = vshrl.u32 %v5005_v45, 16  ;;  %v5007_v61 = vld [vmem:[%s6249_s25 + $0x1b0] sm:$0xf]  ;;  %v6105_v33 = vld [vmem:[%s6249_s25 + $0x138] sm:$0xff]  }
  0x1b   : > { %5521 = vmatmul.mubr.msk.bf16.gmra.mrb[4].mxu1 %vm320_vm2, %v6094_v21  ;;  %5657 = vmatmul.mubr.msk.bf16.gmra.mrb[4].mxu0 %vm320_vm2, %v6095_v22  ;;  %v2331_v52 = vor.u32 %v2330_v42, %v2327_v41  ;;  %v2368_v55 = vshll.u32 %v5006_v47, 16  ;;  %v2351_v58 = vrot.slane %v2349_v48, 4  ;;  %v5008_v3 = vld [vmem:[%s6249_s25 + $0x1b4] sm:$0xf]  ;;  %v5009_v7 = vld [vmem:[%s6249_s25 + $0x1b8] sm:$0x1] }
  0x1c   : > { %5524 = vmatprep.mubr.msk.bf16.mxu1 %vm320_vm2, %v6096_v23  ;;  %5660 = vmatprep.mubr.msk.bf16.mxu0 %vm320_vm2, %v6097_v24  ;;  %v2354_v59 = vrot.slane %v2352_v49, 5  ;;  %v2360_v60 = vrot.slane %v2358_v50, 5  ;;  %v2342_v0 = vrot.slane %v2341_v53, 4  ;;  %v2364_v1 = vrot.slane %v2362_v54, 4  ;;  %v5010_v22 = vld [vmem:[%s6249_s25 + $0x1bc] sm:$0xf] }
  0x1d   : > { %v2332_v63 = vrot.slane %v2331_v52, 4  ;;  %v2370_v2 = vrot.slane %v2368_v55, 5  ;;  %v2373_v9 = vshrl.u32 %v5007_v61, 16  ;;  %v2376_v10 = vshll.u32 %v5007_v61, 16  ;;  %v5012_v30 = vld [vmem:[%s6249_s25 + $0x1c4] sm:$0x1] }
  0x1e   : > { %v2355_v6 = vor.u32 %v2354_v59, %v2351_v58  ;;  %v2382_v11 = vshll.u32 %v5008_v3, 16  ;;  %v2347_v13 = vsel %vm6312_vm5, %v2342_v0, %v2346_v46  ;;  %v2365_v14 = vor.u32 %v2364_v1, %v2360_v60  ;;  %v5013_v38 = vld [vmem:[%s6249_s25 + $0x1c8] sm:$0xf]  ;;  %v5014_v45 = vld [vmem:[%s6249_s25 + $0x1cc] sm:$0xf] }
  0x1f   : > { %v2337_v12 = vsel %vm6312_vm5, %v2332_v63, %v2336_v43  ;;  %v2386_v15 = vshrl.u32 %v5008_v3, 16  ;;  %v2375_v20 = vrot.slane %v2373_v9, 4  ;;  %v2378_v21 = vrot.slane %v2376_v10, 5  ;;  %v6106_v41 = vld [vmem:[%s6249_s25 + $0x144] sm:$0xff]   ;;  %v5015_v50 = vld [vmem:[%s6249_s25 + $0x1d0] sm:$0x1] }
  0x20   : > { %v5050_v16 = vcombine.low %v2337_v12, %v2347_v13  ;;  %v2356_v18 = vrot.slane %v2355_v6, 4  ;;  %v2366_v23 = vrot.slane %v2365_v14, 4  ;;  %v2384_v24 = vrot.slane %v2382_v11, 5  ;;  %v5018_v9 = vld [vmem:[%s6249_s25 + $0x1dc] sm:$0x1]  ;;  %v6107_v14 = vld [vmem:[%s6249_s25 + $0x150] sm:$0xff]  }
  0x21   : > { %v2392_v26 = vshll.u32 %v5009_v7, 16  ;;  %v2397_v31 = vshrl.u32 %v5010_v22, 16  ;;  %v2400_v32 = vshll.u32 %v5010_v22, 16  ;;  %v2416_v49 = vshll.u32 %v5012_v30, 16 }
  0x22   : > { %v2371_v34 = vsel %vm6312_vm5, %v2366_v23, %v2370_v2  ;;  %v2421_v53 = vshrl.u32 %v5013_v38, 16  ;;  %v2424_v54 = vshll.u32 %v5013_v38, 16  ;;  %v2430_v59 = vshll.u32 %v5014_v45, 16  ;;  %v5017_v2 = vld [vmem:[%s6249_s25 + $0x1d8] sm:$0xf] }
  0x23   : > { %5525 = vmatmul.mubr.msk.bf16.gmra.mrb[8].mxu1 %vm320_vm2, %v6098_v25  ;;  %5661 = vmatmul.mubr.msk.bf16.gmra.mrb[8].mxu0 %vm320_vm2, %v6099_v27  ;;  %v2388_v25 = vrot.slane %v2386_v15, 4  ;;  %v5011_v27 = vld [vmem:[%s6249_s25 + $0x1c0] sm:$0xf]  ;;  %v2394_v36 = vrot.slane %v2392_v26, 5  ;;  %v2399_v43 = vrot.slane %v2397_v31, 4  ;;  %v2402_v44 = vrot.slane %v2400_v32, 5 }
  0x24   : > { %5528 = vmatprep.mubr.msk.bf16.mxu1 %vm320_vm2, %v6100_v28  ;;  %5664 = vmatprep.mubr.msk.bf16.mxu0 %vm320_vm2, %v6101_v29  ;;  %v2361_v28 = vsel %vm6312_vm5, %v2356_v18, %v2360_v60  ;;  %v2379_v29 = vor.u32 %v2378_v21, %v2375_v20  ;;  %v2406_v37 = vshll.u32 %v5011_v27, 16  ;;  %v2410_v48 = vshrl.u32 %v5011_v27, 16  ;;  %v5016_v60 = vld [vmem:[%s6249_s25 + $0x1d4] sm:$0xf]  ;;  %v6108_v31 = vld [vmem:[%s6249_s25 + $0x15c] sm:$0xff]  }
  0x25   : > { %v2389_v35 = vor.u32 %v2388_v25, %v2384_v24  ;;  %v5051_v39 = vcombine.low %v2361_v28, %v2371_v34  ;;  %v2403_v52 = vor.u32 %v2402_v44, %v2399_v43  ;;  %v2418_v58 = vrot.slane %v2416_v49, 5  ;;  %v5019_v25 = vld [vmem:[%s6249_s25 + $0x1e0] sm:$0xf] }
  0x26   : > { %v2380_v42 = vrot.slane %v2379_v29, 4  ;;  %v2408_v47 = vrot.slane %v2406_v37, 5  ;;  %v2423_v0 = vrot.slane %v2421_v53, 4  ;;  %v2426_v1 = vrot.slane %v2424_v54, 5  ;;  %v5020_v29 = vld [vmem:[%s6249_s25 + $0x1e4] sm:$0xf] }
  0x27   : > { %v2390_v46 = vrot.slane %v2389_v35, 4  ;;  %v2404_v63 = vrot.slane %v2403_v52, 4  ;;  %v2434_v6 = vshrl.u32 %v5014_v45, 16  ;;  %v2440_v7 = vshll.u32 %v5015_v50, 16  ;;  %v5021_v35 = vld [vmem:[%s6249_s25 + $0x1e8] sm:$0x1] }
  0x28   : > { %v2427_v11 = vor.u32 %v2426_v1, %v2423_v0  ;;  %v2445_v12 = vshrl.u32 %v5016_v60, 16  ;;  %v2448_v13 = vshll.u32 %v5016_v60, 16  ;;  %v2454_v20 = vshll.u32 %v5017_v2, 16  ;;  %v6110_v1 = vld [vmem:[%s6249_s25 + $0x174] sm:$0xff]  }
  0x29   : > { %v2395_v55 = vsel %vm6312_vm5, %v2390_v46, %v2394_v36  ;;  %v2409_v10 = vsel %vm6312_vm5, %v2404_v63, %v2408_v47  ;;  %v2442_v18 = vrot.slane %v2440_v7, 5  ;;  %v2464_v28 = vshll.u32 %v5018_v9, 16  ;;  %v5023_v46 = vld [vmem:[%s6249_s25 + $0x1f0] sm:$0xf]  ;;  %v5025_v63 = vld [vmem:[%s6249_s25 + $0x1f8] sm:$0xf] }
  0x2a   : > { %v2428_v21 = vrot.slane %v2427_v11, 4  ;;  %v2447_v22 = vrot.slane %v2445_v12, 4  ;;  %v2450_v23 = vrot.slane %v2448_v13, 5  ;;  %v2456_v27 = vrot.slane %v2454_v20, 5 }
  0x2b   : > { %5529 = vmatmul.mubr.msk.bf16.gmra.mrb[12].mxu1 %vm320_vm2, %v6102_v51  ;;  %5665 = vmatmul.mubr.msk.bf16.gmra.mrb[12].mxu0 %vm320_vm2, %v6103_v56  ;;  %v2385_v51 = vsel %vm6312_vm5, %v2380_v42, %v2384_v24  ;;  %v2412_v56 = vrot.slane %v2410_v48, 4  ;;  %v2458_v24 = vshrl.u32 %v5017_v2, 16  ;;  %v2466_v37 = vrot.slane %v2464_v28, 5 }
  0x2c   : > { %5532 = vmatprep.mubr.msk.bf16.mxu1 %vm320_vm2, %v6104_v4  ;;  %5686 = vmatprep.mubr.msk.bf16.mxu0 %vm320_vm2, %v5050_v16  ;;  %v5052_v61 = vcombine.low %v2385_v51, %v2395_v55  ;;  %v2432_v4 = vrot.slane %v2430_v59, 5  ;;  %v2436_v16 = vrot.slane %v2434_v6, 4  ;;  %v2469_v38 = vshrl.u32 %v5019_v25, 16  ;;  %v5024_v55 = vld [vmem:[%s6249_s25 + $0x1f4] sm:$0x1] }
  0x2d   : > { %v2413_v3 = vor.u32 %v2412_v56, %v2408_v47  ;;  %v2460_v34 = vrot.slane %v2458_v24, 4  ;;  %v2478_v44 = vshll.u32 %v5020_v29, 16  ;;  %v2482_v45 = vshrl.u32 %v5020_v29, 16  ;;  %v6109_v56 = vld [vmem:[%s6249_s25 + $0x168] sm:$0xff]   ;;  %v5026_v6 = vld [vmem:[%s6249_s25 + $0x1fc] sm:$0xf] }
  0x2e   : > { %v2437_v26 = vor.u32 %v2436_v16, %v2432_v4  ;;  %v2433_v32 = vsel %vm6312_vm5, %v2428_v21, %v2432_v4  ;;  %v2471_v48 = vrot.slane %v2469_v38, 4  ;;  %v2488_v50 = vshll.u32 %v5021_v35, 16  ;;  %v5027_v16 = vld [vmem:[%s6249_s25 + $0x200] sm:$0x1] }
  0x2f   : > { %v2414_v15 = vrot.slane %v2413_v3, 4  ;;  %v2461_v43 = vor.u32 %v2460_v34, %v2456_v27  ;;  %v2480_v54 = vrot.slane %v2478_v44, 5  ;;  %v2484_v59 = vrot.slane %v2482_v45, 4  ;;  %v6112_v45 = vld [vmem:[%s6249_s25] sm:$0xff]  }
  0x30   : > { %v2438_v36 = vrot.slane %v2437_v26, 4  ;;  %v2490_v60 = vrot.slane %v2488_v50, 5  ;;  %v2502_v3 = vshll.u32 %v5023_v46, 16  ;;  %v2506_v4 = vshrl.u32 %v5023_v46, 16 }
  0x31   : > { %v2462_v53 = vrot.slane %v2461_v43, 4  ;;  %v2517_v21 = vshrl.u32 %v5025_v63, 16  ;;  %v2526_v26 = vshll.u32 %v5026_v6, 16 }
  0x32   : > { %v2443_v47 = vsel %vm6312_vm5, %v2438_v36, %v2442_v18  ;;  %v2504_v13 = vrot.slane %v2502_v3, 5  ;;  %v6111_v36 = vld [vmem:[%s6249_s25 + $0x180] sm:$0xff]  }
  0x33   : > { %5533 = vmatmul.mubr.msk.bf16.gmra.mrb[16].mxu1 %vm320_vm2, %v6105_v33  ;;  %5687 = vmatmul.mubr.msk.bf16.vlgmr.msra.gmra.mrb[0].mxu0 %vm320_vm2, %v5051_v39  ;;  %v2451_v33 = vor.u32 %v2450_v23, %v2447_v22  ;;  %v2472_v39 = vshll.u32 %v5019_v25, 16  ;;  %v5054_v51 = vcombine.low %v2433_v32, %v2443_v47  ;;  %v2467_v0 = vsel %vm6312_vm5, %v2462_v53, %v2466_v37  ;;  %v5028_v23 = vld [vmem:[%s6249_s25 + $0x204] sm:$0xf]  ;;  %v5032_v53 = vld [vmem:[%s6249_s25 + $0x214] sm:$0xf] }
  0x34   : > { %5536 = vmatprep.mubr.msk.bf16.mxu1 %vm320_vm2, %v6106_v41  ;;  %5719 = vmatpush3.bf16.msra.mxu0 %v6264_v17  ;;  %v2419_v17 = vsel %vm6312_vm5, %v2414_v15, %v2418_v58  ;;  %v5022_v41 = vld [vmem:[%s6249_s25 + $0x1ec] sm:$0xf]  ;;  %v2512_v15 = vshll.u32 %v5024_v55, 16  ;;  %v2520_v22 = vshll.u32 %v5025_v63, 16  ;;  %v2519_v29 = vrot.slane %v2517_v21, 4 }
  0x35   : > { %5690 = vmatprep.mubr.msk.bf16.mxu0 %vm320_vm2, %v5052_v61  ;;  %5752 = vmatprep.subr.bf16.mxu0 %v6300_v40  ;;  %v5053_v30 = vcombine.low %v2409_v10, %v2419_v17  ;;  %v2452_v42 = vrot.slane %v2451_v33, 4  ;;  %v2474_v49 = vrot.slane %v2472_v39, 5  ;;  %v2493_v61 = vshrl.u32 %v5022_v41, 16 }
  0x36   : > { %v2496_v2 = vshll.u32 %v5022_v41, 16  ;;  %v2485_v10 = vor.u32 %v2484_v59, %v2480_v54  ;;  %v2514_v17 = vrot.slane %v2512_v15, 5  ;;  %v2528_v35 = vrot.slane %v2526_v26, 5  ;;  %v5030_v41 = vld [vmem:[%s6249_s25 + $0x20c] sm:$0x1] }
  0x37   : > { %v2457_v52 = vsel %vm6312_vm5, %v2452_v42, %v2456_v27  ;;  %v2475_v58 = vor.u32 %v2474_v49, %v2471_v48  ;;  %v2495_v11 = vrot.slane %v2493_v61, 4  ;;  %v5029_v27 = vld [vmem:[%s6249_s25 + $0x208] sm:$0xf]  ;;  %v2536_v39 = vshll.u32 %v5027_v16, 16  ;;  %v5031_v48 = vld [vmem:[%s6249_s25 + $0x210] sm:$0xf] }
  0x38   : > { %v5055_v7 = vcombine.low %v2457_v52, %v2467_v0  ;;  %v2498_v12 = vrot.slane %v2496_v2, 5  ;;  %v2486_v20 = vrot.slane %v2485_v10, 4  ;;  %v2541_v42 = vshrl.u32 %v5028_v23, 16  ;;  %v5033_v59 = vld [vmem:[%s6249_s25 + $0x218] sm:$0x1] }
  0x39   : > { %v2476_v9 = vrot.slane %v2475_v58, 4  ;;  %v2544_v46 = vshll.u32 %v5028_v23, 16  ;;  %v2550_v47 = vshll.u32 %v5029_v27, 16  ;;  %v2538_v52 = vrot.slane %v2536_v39, 5  ;;  %v5035_v16 = vld [vmem:[%s6249_s25 + $0x220] sm:$0xf] }
  0x3a   : > { %v2499_v24 = vor.u32 %v2498_v12, %v2495_v11  ;;  %v2491_v28 = vsel %vm6312_vm5, %v2486_v20, %v2490_v60  ;;  %v2554_v58 = vshrl.u32 %v5029_v27, 16  ;;  %v2560_v63 = vshll.u32 %v5030_v41, 16  ;;  %v6113_v27 = vld [vmem:[%s6249_s25 + $0xc] sm:$0xff]   ;;  %v6114_v39 = vld [vmem:[%s6249_s25 + $0x18] sm:$0xff]  }
  0x3b   : > { %5537 = vmatmul.mubr.msk.bf16.gmra.mrb[20].mxu1 %vm320_vm2, %v6107_v14  ;;  %5691 = vmatmul.mubr.msk.bf16.gmra.mrb[4].mxu0 %vm320_vm2, %v5053_v30  ;;  %v2508_v14 = vrot.slane %v2506_v4, 4  ;;  %v2481_v18 = vsel %vm6312_vm5, %v2476_v9, %v2480_v54  ;;  %v2522_v30 = vrot.slane %v2520_v22, 5  ;;  %v2543_v54 = vrot.slane %v2541_v42, 4  ;;  %v5036_v22 = vld [vmem:[%s6249_s25 + $0x224] sm:$0x1] }
  0x3c   : > { %5540 = vmatprep.mubr.msk.bf16.mxu1 %vm320_vm2, %v6108_v31  ;;  %5694 = vmatprep.mubr.msk.bf16.mxu0 %vm320_vm2, %v5054_v51  ;;  %v2530_v31 = vshrl.u32 %v5026_v6, 16  ;;  %v5056_v32 = vcombine.low %v2481_v18, %v2491_v28  ;;  %v2500_v33 = vrot.slane %v2499_v24, 4  ;;  %v2546_v55 = vrot.slane %v2544_v46, 5 }
  0x3d   : > { %v2509_v25 = vor.u32 %v2508_v14, %v2504_v13  ;;  %v2523_v37 = vor.u32 %v2522_v30, %v2519_v29  ;;  %v2565_v0 = vshrl.u32 %v5031_v48, 16  ;;  %v2556_v3 = vrot.slane %v2554_v58, 4 }
  0x3e   : > { %v2532_v38 = vrot.slane %v2530_v31, 4  ;;  %v2505_v43 = vsel %vm6312_vm5, %v2500_v33, %v2504_v13  ;;  %v2547_v2 = vor.u32 %v2546_v55, %v2543_v54  ;;  %v2568_v4 = vshll.u32 %v5031_v48, 16 }
  0x3f   : > { %v2510_v34 = vrot.slane %v2509_v25, 4  ;;  %v2524_v50 = vrot.slane %v2523_v37, 4  ;;  %v2574_v6 = vshll.u32 %v5032_v53, 16  ;;  %v2562_v9 = vrot.slane %v2560_v63, 5  ;;  %v5038_v37 = vld [vmem:[%s6249_s25 + $0x22c] sm:$0xf] }
  0x40   : > { %v2533_v51 = vor.u32 %v2532_v38, %v2528_v35  ;;  %v2567_v10 = vrot.slane %v2565_v0, 4  ;;  %v2578_v11 = vshrl.u32 %v5032_v53, 16  ;;  %v2548_v13 = vrot.slane %v2547_v2, 4  ;;  %v5040_v53 = vld [vmem:[%s6249_s25 + $0x234] sm:$0xf] }
  0x41   : > { %v2515_v44 = vsel %vm6312_vm5, %v2510_v34, %v2514_v17  ;;  %v2529_v60 = vsel %vm6312_vm5, %v2524_v50, %v2528_v35  ;;  %v2570_v15 = vrot.slane %v2568_v4, 5  ;;  %v2576_v18 = vrot.slane %v2574_v6, 5  ;;  %v6115_v6 = vld [vmem:[%s6249_s25 + $0x24] sm:$0xff]  }
  0x42   : > { %v5057_v49 = vcombine.low %v2505_v43, %v2515_v44  ;;  %v2534_v61 = vrot.slane %v2533_v51, 4  ;;  %v2580_v20 = vrot.slane %v2578_v11, 4  ;;  %v2584_v21 = vshll.u32 %v5033_v59, 16  ;;  %v5039_v44 = vld [vmem:[%s6249_s25 + $0x230] sm:$0x1] }
  0x43   : > { %5541 = vmatmul.mubr.msk.bf16.gmra.mrb[24].mxu1 %vm320_vm2, %v6109_v56  ;;  %5695 = vmatmul.mubr.msk.bf16.gmra.mrb[8].mxu0 %vm320_vm2, %v5055_v7  ;;  %v2552_v56 = vrot.slane %v2550_v47, 5  ;;  %v2571_v17 = vor.u32 %v2570_v15, %v2567_v10  ;;  %v2598_v31 = vshll.u32 %v5035_v16, 16  ;;  %v2608_v43 = vshll.u32 %v5036_v22, 16  ;;  %v5041_v59 = vld [vmem:[%s6249_s25 + $0x238] sm:$0xf] }
  0x44   : > { %5544 = vmatprep.mubr.msk.bf16.mxu1 %vm320_vm2, %v6110_v1  ;;  %5698 = vmatprep.mubr.msk.bf16.mxu0 %vm320_vm2, %v5056_v32  ;;  %v5034_v1 = vld [vmem:[%s6249_s25 + $0x21c] sm:$0xf]  ;;  %v2539_v7 = vsel %vm6312_vm5, %v2534_v61, %v2538_v52  ;;  %v2581_v28 = vor.u32 %v2580_v20, %v2576_v18  ;;  %v2586_v29 = vrot.slane %v2584_v21, 5  ;;  %v5037_v32 = vld [vmem:[%s6249_s25 + $0x228] sm:$0xf]  ;;  %v2622_v52 = vshll.u32 %v5038_v37, 16 }
  0x45   : > { %v5058_v12 = vcombine.low %v2529_v60, %v2539_v7  ;;  %v2557_v14 = vor.u32 %v2556_v3, %v2552_v56  ;;  %v2589_v23 = vshrl.u32 %v5034_v1, 16  ;;  %v2553_v24 = vsel %vm6312_vm5, %v2548_v13, %v2552_v56  ;;  %v5044_v20 = vld [vmem:[%s6249_s25 + $0x244] sm:$0xf] }
  0x46   : > { %v2592_v26 = vshll.u32 %v5034_v1, 16  ;;  %v2572_v34 = vrot.slane %v2571_v17, 4  ;;  %v2582_v41 = vrot.slane %v2581_v28, 4  ;;  %v2600_v42 = vrot.slane %v2598_v31, 5  ;;  %v5042_v1 = vld [vmem:[%s6249_s25 + $0x23c] sm:$0x1] }
  0x47   : > { %v2558_v25 = vrot.slane %v2557_v14, 4  ;;  %v2591_v30 = vrot.slane %v2589_v23, 4  ;;  %v2613_v48 = vshrl.u32 %v5037_v32, 16  ;;  %v2610_v50 = vrot.slane %v2608_v43, 5  ;;  %v6116_v14 = vld [vmem:[%s6249_s25 + $0x30] sm:$0xff]  }
  0x48   : > { %v2594_v35 = vrot.slane %v2592_v26, 5  ;;  %v2616_v51 = vshll.u32 %v5037_v32, 16  ;;  %v2624_v61 = vrot.slane %v2622_v52, 5  ;;  %v2626_v63 = vshrl.u32 %v5038_v37, 16 }
  0x49   : > { %v2563_v33 = vsel %vm6312_vm5, %v2558_v25, %v2562_v9  ;;  %v2615_v58 = vrot.slane %v2613_v48, 4  ;;  %v2632_v0 = vshll.u32 %v5039_v44, 16  ;;  %v2637_v3 = vshrl.u32 %v5040_v53, 16  ;;  %v5045_v25 = vld [vmem:[%s6249_s25 + $0x248] sm:$0x1] }
  0x4a   : > { %v5059_v38 = vcombine.low %v2553_v24, %v2563_v33  ;;  %v2595_v46 = vor.u32 %v2594_v35, %v2591_v30  ;;  %v2618_v60 = vrot.slane %v2616_v51, 5  ;;  %v2640_v4 = vshll.u32 %v5040_v53, 16  ;;  %v5048_v44 = vld [vmem:[%s6249_s25 + $0x254] sm:$0x1] }
  0x4b   : > { %5545 = vmatmul.mubr.msk.bf16.gmra.mrb[28].mxu1 %vm320_vm2, %v6111_v36  ;;  %5699 = vmatmul.mubr.msk.bf16.gmra.mrb[12].mxu0 %vm320_vm2, %v5057_v49  ;;  %v2602_v36 = vshrl.u32 %v5035_v16, 16  ;;  %v2587_v49 = vsel %vm6312_vm5, %v2582_v41, %v2586_v29  ;;  %v2628_v9 = vrot.slane %v2626_v63, 4  ;;  %v2634_v10 = vrot.slane %v2632_v0, 5  ;;  %v5046_v29 = vld [vmem:[%s6249_s25 + $0x24c] sm:$0xf] }
  0x4c   : > { %5550 = vmatprep.mubr.msk.bf16.mxu1 %vm320_vm2, %v6112_v45  ;;  %5702 = vmatprep.mubr.msk.bf16.mxu0 %vm320_vm2, %v5058_v12  ;;  %v2577_v45 = vsel %vm6312_vm5, %v2572_v34, %v2576_v18  ;;  %v2596_v55 = vrot.slane %v2595_v46, 4  ;;  %v2619_v7 = vor.u32 %v2618_v60, %v2615_v58  ;;  %v2646_v11 = vshll.u32 %v5041_v59, 16  ;;  %v5043_v12 = vld [vmem:[%s6249_s25 + $0x240] sm:$0xf]  ;;  %v5047_v34 = vld [vmem:[%s6249_s25 + $0x250] sm:$0xf] }
  0x4d   : > { %v2604_v47 = vrot.slane %v2602_v36, 4  ;;  %v5060_v54 = vcombine.low %v2577_v45, %v2587_v49  ;;  %v2639_v15 = vrot.slane %v2637_v3, 4  ;;  %v2642_v16 = vrot.slane %v2640_v4, 5  ;;  %v6117_v49 = vld [vmem:[%s6249_s25 + $0x3c] sm:$0xff]  }
  0x4e   : > { %v2650_v18 = vshrl.u32 %v5041_v59, 16  ;;  %v2620_v22 = vrot.slane %v2619_v7, 4  ;;  %v2629_v23 = vor.u32 %v2628_v9, %v2624_v61  ;;  %v2648_v24 = vrot.slane %v2646_v11, 5 }
  0x4f   : > { %v2605_v56 = vor.u32 %v2604_v47, %v2600_v42  ;;  %v2643_v17 = vor.u32 %v2642_v16, %v2639_v15  ;;  %v2661_v28 = vshrl.u32 %v5043_v12, 16  ;;  %v2664_v32 = vshll.u32 %v5043_v12, 16  ;;  %v6119_v12 = vld [vmem:[%s6249_s25 + $0x54] sm:$0xff]   ;;  %v6120_v16 = vld [vmem:[%s6249_s25 + $0x60] sm:$0xff]  }
  0x50   : > { %v2652_v26 = vrot.slane %v2650_v18, 4  ;;  %v2625_v30 = vsel %vm6312_vm5, %v2620_v22, %v2624_v61  ;;  %v2630_v31 = vrot.slane %v2629_v23, 4  ;;  %v2670_v33 = vshll.u32 %v5044_v20, 16  ;;  %v6121_v18 = vld [vmem:[%s6249_s25 + $0xc] sm:$0xff]   ;;  %v829_v23 = vld [vmem:[%s6249_s25] sm:$0xf] }
  0x51   : > { %v2606_v2 = vrot.slane %v2605_v56, 4  ;;  %v2644_v35 = vrot.slane %v2643_v17, 4  ;;  %v2666_v41 = vrot.slane %v2664_v32, 5  ;;  %v2674_v43 = vshrl.u32 %v5044_v20, 16  ;;  %v6124_v32 = vld [vmem:[%s6249_s25 + $0x78] sm:$0xff]  }
  0x52   : > { %v2653_v36 = vor.u32 %v2652_v26, %v2648_v24  ;;  %v2680_v48 = vshll.u32 %v5045_v25, 16  ;;  %v2685_v52 = vshrl.u32 %v5046_v29, 16  ;;  %v2688_v53 = vshll.u32 %v5046_v29, 16 }
  0x53   : > { %5551 = vmatmul.mubr.msk.bf16.vlgmr.msra.gmra.mrb[0].mxu1 %vm320_vm2, %v6113_v27  ;;  %5703 = vmatmul.mubr.msk.bf16.gmra.mrb[16].mxu0 %vm320_vm2, %v5059_v38  ;;  %v2611_v13 = vsel %vm6312_vm5, %v2606_v2, %v2610_v50  ;;  %v2656_v27 = vshll.u32 %v5042_v1, 16  ;;  %v2663_v38 = vrot.slane %v2661_v28, 4  ;;  %v2649_v46 = vsel %vm6312_vm5, %v2644_v35, %v2648_v24  ;;  %v830_v24 = vld [vmem:[%s6249_s25 + $0x4] sm:$0xf]  ;;  %v6122_v28 = vld [vmem:[%s6249_s25 + $0x6c] sm:$0xff]  }
  0x54   : > { %5583 = vmatpush3.bf16.msra.mxu1 %v6269_v19  ;;  %5554 = vmatprep.mubr.msk.bf16.mxu1 %vm320_vm2, %v6114_v39  ;;  %v2601_v19 = vsel %vm6312_vm5, %v2596_v55, %v2600_v42  ;;  %v2635_v39 = vsel %vm6312_vm5, %v2630_v31, %v2634_v10  ;;  %v2672_v42 = vrot.slane %v2670_v33, 5  ;;  %v2654_v47 = vrot.slane %v2653_v36, 4  ;;  %v6118_v55 = vld [vmem:[%s6249_s25 + $0x48] sm:$0xff]   ;;  %v6123_v31 = vld [vmem:[%s6249_s25 + $0x18] sm:$0xff]  }
  0x55   : > { %5616 = vmatprep.subr.bf16.mxu1 %v6318_v62  ;;  %5706 = vmatprep.mubr.msk.bf16.mxu0 %vm320_vm2, %v5060_v54  ;;  %v5061_v21 = vcombine.low %v2601_v19, %v2611_v13  ;;  %v2658_v37 = vrot.slane %v2656_v27, 5  ;;  %v5062_v45 = vcombine.low %v2625_v30, %v2635_v39  ;;  %v2667_v50 = vor.u32 %v2666_v41, %v2663_v38  ;;  %v832_v33 = vld [vmem:[%s6249_s25 + $0xc] sm:$0xf]  ;;  %v6125_v35 = vld [vmem:[%s6249_s25 + $0x24] sm:$0xff]   ;;  %v834_v41 = vld [vmem:[%s6249_s25 + $0x14] sm:$0x1] }
  0x56   : > { %v2676_v51 = vrot.slane %v2674_v43, 4  ;;  %v2682_v56 = vrot.slane %v2680_v48, 5  ;;  %v2694_v58 = vshll.u32 %v5047_v34, 16  ;;  %v2698_v59 = vshrl.u32 %v5047_v34, 16  ;;  %v833_v34 = vld [vmem:[%s6249_s25 + $0x10] sm:$0xf] }
  0x57   : > { %v2659_v54 = vsel %vm6312_vm5, %v2654_v47, %v2658_v37  ;;  %v2668_v61 = vrot.slane %v2667_v50, 4  ;;  %v2687_v0 = vrot.slane %v2685_v52, 4  ;;  %v2690_v1 = vrot.slane %v2688_v53, 5  ;;  %v831_v38 = vld [vmem:[%s6249_s25 + $0x8] sm:$0x1] }
  0x58   : > { %v5063_v60 = vcombine.low %v2649_v46, %v2659_v54  ;;  %v2677_v63 = vor.u32 %v2676_v51, %v2672_v42  ;;  %v2696_v19 = vrot.slane %v2694_v58, 5  ;;  %v2700_v2 = vrot.slane %v2698_v59, 4  ;;  %v6126_v46 = vld [vmem:[%s6249_s25 + $0x84] sm:$0xff]   ;;  %v836_v54 = vld [vmem:[%s6249_s25 + $0x1c] sm:$0xf]  ;;  %v6128_v58 = vld [vmem:[%s6249_s25 + $0x90] sm:$0xff]  }
  0x59   : > { %v2704_v3 = vshll.u32 %v5048_v44, 16  ;;  %v2673_v4 = vsel %vm6312_vm5, %v2668_v61, %v2672_v42  ;;  %v2691_v7 = vor.u32 %v2690_v1, %v2687_v0  ;;  %v881_v25 = vshrl.u32 %v829_v23, 16  ;;  %v838_v61 = vld [vmem:[%s6249_s25 + $0x24] sm:$0xf] }
  0x5a   : > { %v2701_v9 = vor.u32 %v2700_v2, %v2696_v19  ;;  %v884_v17 = vshll.u32 %v829_v23, 16  ;;  %v890_v26 = vshll.u32 %v830_v24, 16  ;;  %v894_v27 = vshrl.u32 %v830_v24, 16  ;;  %v839_v2 = vld [vmem:[%s6249_s25 + $0x28] sm:$0xf] }
  0x5b   : > { %5555 = vmatmul.mubr.msk.bf16.gmra.mrb[4].mxu1 %vm320_vm2, %v6115_v6  ;;  %5707 = vmatmul.mubr.msk.bf16.gmra.mrb[20].mxu0 %vm320_vm2, %v5061_v21  ;;  %v2678_v6 = vrot.slane %v2677_v63, 4  ;;  %v2706_v10 = vrot.slane %v2704_v3, 5  ;;  %v883_v29 = vrot.slane %v881_v25, 4  ;;  %v905_v42 = vshrl.u32 %v832_v33, 16  ;;  %v6129_v63 = vld [vmem:[%s6249_s25 + $0x3c] sm:$0xff]  }
  0x5c   : > { %5558 = vmatprep.mubr.msk.bf16.mxu1 %vm320_vm2, %v6116_v14  ;;  %5710 = vmatprep.mubr.msk.bf16.mxu0 %vm320_vm2, %v5062_v45  ;;  %v2692_v14 = vrot.slane %v2691_v7, 4  ;;  %v2702_v15 = vrot.slane %v2701_v9, 4  ;;  %v886_v30 = vrot.slane %v884_v17, 5  ;;  %v6491_v36 = vrot.slane %v890_v26, 5  ;;  %v841_v7 = vld [vmem:[%s6249_s25 + $0x30] sm:$0xf] }
  0x5d   : > { %v2683_v11 = vsel %vm6312_vm5, %v2678_v6, %v2682_v56  ;;  %v896_v37 = vrot.slane %v894_v27, 4  ;;  %v908_v43 = vshll.u32 %v832_v33, 16  ;;  %v914_v44 = vshll.u32 %v833_v34, 16  ;;  %v6131_v17 = vld [vmem:[%s6249_s25 + $0x48] sm:$0xff]  }
  0x5e   : > { %v5064_v13 = vcombine.low %v2673_v4, %v2683_v11  ;;  %v2697_v20 = vsel %vm6312_vm5, %v2692_v14, %v2696_v19  ;;  %v2707_v21 = vsel %vm6312_vm5, %v2702_v15, %v2706_v10  ;;  %v887_v39 = vor.u32 %v886_v30, %v883_v29  ;;  %v837_v14 = vld [vmem:[%s6249_s25 + $0x20] sm:$0x1]  ;;  %v6132_v26 = vld [vmem:[%s6249_s25 + $0xa8] sm:$0xff]  }
  0x5f   : > { %v5065_v22 = vcombine.low %v2697_v20, %v2707_v21  ;;  %v918_v45 = vshrl.u32 %v833_v34, 16  ;;  %v897_v47 = vor.u32 %v896_v37, %v6491_v36  ;;  %v900_v48 = vshll.u32 %v831_v38, 16  ;;  %v6130_v21 = vld [vmem:[%s6249_s25 + $0x9c] sm:$0xff]   ;;  %v840_v33 = vld [vmem:[%s6249_s25 + $0x2c] sm:$0x1] }
  0x60   : > { %v888_v50 = vrot.slane %v887_v39, 4  ;;  %v907_v51 = vrot.slane %v905_v42, 4  ;;  %v910_v52 = vrot.slane %v908_v43, 5  ;;  %v924_v53 = vshll.u32 %v834_v41, 16  ;;  %v843_v38 = vld [vmem:[%s6249_s25 + $0x38] sm:$0x1] }
  0x61   : > { %v920_v56 = vrot.slane %v918_v45, 4  ;;  %v902_v0 = vrot.slane %v900_v48, 5  ;;  %v938_v1 = vshll.u32 %v836_v54, 16  ;;  %v942_v19 = vshrl.u32 %v836_v54, 16  ;;  %v844_v39 = vld [vmem:[%s6249_s25 + $0x3c] sm:$0xf] }
  0x62   : > { %v898_v3 = vrot.slane %v897_v47, 4  ;;  %v911_v4 = vor.u32 %v910_v52, %v907_v51  ;;  %v6511_v6 = vrot.slane %v924_v53, 5  ;;  %v893_v9 = vsel %vm6312_vm5, %v888_v50, %v6491_v36  ;;  %v6133_v41 = vld [vmem:[%s6249_s25 + $0x54] sm:$0xff]   ;;  %v845_v53 = vld [vmem:[%s6249_s25 + $0x40] sm:$0xf] }
  0x63   : > { %5559 = vmatmul.mubr.msk.bf16.gmra.mrb[8].mxu1 %vm320_vm2, %v6117_v49  ;;  %5711 = vmatmul.mubr.msk.bf16.gmra.mrb[24].mxu0 %vm320_vm2, %v5063_v60  ;;  %v835_v49 = vld [vmem:[%s6249_s25 + $0x18] sm:$0xf]  ;;  %v953_v11 = vshrl.u32 %v838_v61, 16  ;;  %v966_v20 = vshrl.u32 %v839_v2, 16  ;;  %v944_v23 = vrot.slane %v942_v19, 4  ;;  %v977_v24 = vshrl.u32 %v841_v7, 16 }
  0x64   : > { %5562 = vmatprep.mubr.msk.bf16.mxu1 %vm320_vm2, %v6118_v55  ;;  %5714 = vmatprep.mubr.msk.bf16.mxu0 %vm320_vm2, %v5064_v13  ;;  %v6504_v55 = vrot.slane %v914_v44, 5  ;;  %v929_v59 = vshrl.u32 %v835_v49, 16  ;;  %v932_v60 = vshll.u32 %v835_v49, 16  ;;  %v842_v13 = vld [vmem:[%s6249_s25 + $0x34] sm:$0xf]  ;;  %v980_v25 = vshll.u32 %v841_v7, 16 }
  0x65   : > { %v903_v27 = vsel %vm6312_vm5, %v898_v3, %v902_v0  ;;  %v986_v29 = vshll.u32 %v842_v13, 16  ;;  %v990_v30 = vshrl.u32 %v842_v13, 16  ;;  %v955_v34 = vrot.slane %v953_v11, 4  ;;  %v6135_v19 = vld [vmem:[%s6249_s25 + $0x60] sm:$0xff]  }
  0x66   : > { %v921_v10 = vor.u32 %v920_v56, %v6504_v55  ;;  %v931_v15 = vrot.slane %v929_v59, 4  ;;  %v968_v37 = vrot.slane %v966_v20, 4  ;;  %v979_v44 = vrot.slane %v977_v24, 4  ;;  %v848_v59 = vld [vmem:[%s6249_s25 + $0x4c] sm:$0xf] }
  0x67   : > { %v982_v45 = vrot.slane %v980_v25, 5  ;;  %v972_v47 = vshll.u32 %v840_v33, 16  ;;  %v6542_v48 = vrot.slane %v986_v29, 5  ;;  %v992_v49 = vrot.slane %v990_v30, 4  ;;  %v850_v25 = vld [vmem:[%s6249_s25 + $0x54] sm:$0xf] }
  0x68   : > { %v996_v52 = vshll.u32 %v843_v38, 16  ;;  %v1001_v54 = vshrl.u32 %v844_v39, 16  ;;  %v1014_v7 = vshrl.u32 %v845_v53, 16  ;;  %v1038_v13 = vshrl.u32 %v848_v59, 16  ;;  %v849_v33 = vld [vmem:[%s6249_s25 + $0x50] sm:$0x1] }
  0x69   : > { %v983_v0 = vor.u32 %v982_v45, %v979_v44  ;;  %v993_v3 = vor.u32 %v992_v49, %v6542_v48  ;;  %v853_v49 = vld [vmem:[%s6249_s25 + $0x60] sm:$0xf] }
  0x6b   : > { %5563 = vmatmul.mubr.msk.bf16.gmra.mrb[12].mxu1 %vm320_vm2, %v6119_v12  ;;  %5715 = vmatmul.mubr.msk.bf16.gmra.mrb[28].mxu0 %vm320_vm2, %v5065_v22  ;;  %v956_v12 = vshll.u32 %v838_v61, 16  ;;  %v6525_v22 = vrot.slane %v938_v1, 5  ;;  %v1004_v1 = vshll.u32 %v844_v39, 16 }
  0x6c   : > { %5566 = vmatprep.mubr.msk.bf16.mxu1 %vm320_vm2, %v6120_v16  ;;  %5720 = vmatprep.mubr.msk.bf16.mxu0 %vm320_vm2, %v6121_v18  ;;  %v934_v16 = vrot.slane %v932_v60, 5  ;;  %v962_v18 = vshll.u32 %v839_v2, 16  ;;  %v6134_v60 = vld [vmem:[%s6249_s25 + $0xb4] sm:$0xff]   ;;  %v6562_v2 = vrot.slane %v972_v47, 5 }
  0x6d   : > { %v945_v43 = vor.u32 %v944_v23, %v6525_v22  ;;  %v984_v23 = vrot.slane %v983_v0, 4  ;;  %v1006_v24 = vrot.slane %v1004_v1, 5  ;;  %v1076_v0 = vshll.u32 %v853_v49, 16 }
  0x6e   : > { %v6536_v36 = vrot.slane %v962_v18, 5  ;;  %v935_v42 = vor.u32 %v934_v16, %v931_v15  ;;  %v6571_v16 = vrot.slane %v996_v52, 5  ;;  %v1003_v18 = vrot.slane %v1001_v54, 4 }
  0x6f   : > { %v989_v45 = vsel %vm6312_vm5, %v984_v23, %v6542_v48  ;;  %v1044_v54 = vshll.u32 %v849_v33, 16 }
  0x70   : > { %v936_v61 = vrot.slane %v935_v42, 4 }
  0x72   : > { %v941_v20 = vsel %vm6312_vm5, %v936_v61, %v6525_v22  ;;  %v1040_v22 = vrot.slane %v1038_v13, 4 }
  0x73   : > { %5567 = vmatmul.mubr.msk.bf16.gmra.mrb[16].mxu1 %vm320_vm2, %v6122_v28  ;;  %5721 = vmatmul.mubr.msk.bf16.vlgmr.msra.gmra.mrb[0].mxu0 %vm320_vm2, %v6123_v31  ;;  %v6531_v28 = vrot.slane %v911_v4, 4  ;;  %v6533_v31 = vrot.slane %v921_v10, 4  ;;  %v846_v4 = vld [vmem:[%s6249_s25 + $0x44] sm:$0x1] }
  0x74   : > { %5570 = vmatprep.mubr.msk.bf16.mxu1 %vm320_vm2, %v6124_v32  ;;  %5753 = vmatpush3.bf16.msra.mxu0 %v6300_v40  ;;  %v6127_v40 = vld [vmem:[%s6249_s25 + $0x30] sm:$0xff]   ;;  %v948_v32 = vshll.u32 %v837_v14, 16  ;;  %v1020_v29 = vshll.u32 %v846_v4, 16 }
  0x75   : > { %5724 = vmatprep.mubr.msk.bf16.mxu0 %vm320_vm2, %v6125_v35  ;;  %v958_v35 = vrot.slane %v956_v12, 5  ;;  %v917_v50 = vsel %vm6312_vm5, %v6531_v28, %v6504_v55  ;;  %v927_v56 = vsel %vm6312_vm5, %v6533_v31, %v6511_v6  ;;  %v847_v55 = vld [vmem:[%s6249_s25 + $0x48] sm:$0xf]  ;;  %v1010_v6 = vshll.u32 %v845_v53, 16 }
  0x76   : > { %v950_v51 = vrot.slane %v948_v32, 5  ;;  %v1025_v10 = vshrl.u32 %v847_v55, 16  ;;  %v1028_v11 = vshll.u32 %v847_v55, 16  ;;  %v1034_v12 = vshll.u32 %v848_v59, 16 }
  0x77   : > { %v1016_v28 = vrot.slane %v1014_v7, 4  ;;  %v4840_v39 = vcombine.low %v917_v50, %v927_v56  ;;  %v6137_v50 = vld [vmem:[%s6249_s25 + $0x78] sm:$0xff]   ;;  %v6610_v52 = vrot.slane %v1020_v29, 5  ;;  %v854_v56 = vld [vmem:[%s6249_s25 + $0x64] sm:$0xf] }
  0x78   : > { %v1027_v30 = vrot.slane %v1025_v10, 4  ;;  %v1030_v31 = vrot.slane %v1028_v11, 5  ;;  %v6583_v32 = vrot.slane %v1034_v12, 5  ;;  %v857_v12 = vld [vmem:[%s6249_s25 + $0x70] sm:$0xf] }
  0x79   : > { %v1110_v29 = vshrl.u32 %v857_v12, 16 }
  0x7a   : > { %v1031_v53 = vor.u32 %v1030_v31, %v1027_v30  ;;  %v6139_v30 = vld [vmem:[%s6249_s25 + $0x90] sm:$0xff]   ;;  %v6140_v31 = vld [vmem:[%s6249_s25 + $0x9c] sm:$0xff]  }
  0x7b   : > { %5571 = vmatmul.mubr.msk.bf16.gmra.mrb[20].mxu1 %vm320_vm2, %v6126_v46  ;;  %5725 = vmatmul.mubr.msk.bf16.gmra.mrb[4].mxu0 %vm320_vm2, %v6127_v40  ;;  %v4839_v46 = vcombine.low %v893_v9, %v903_v27  ;;  %v959_v40 = vor.u32 %v958_v35, %v955_v34  ;;  %v6136_v9 = vld [vmem:[%s6249_s25 + $0x6c] sm:$0xff]   ;;  %v6580_v27 = vrot.slane %v1010_v6, 5  ;;  %v1049_v34 = vshrl.u32 %v850_v25, 16 }
  0x7c   : > { %5574 = vmatprep.mubr.msk.bf16.mxu1 %vm320_vm2, %v6128_v58  ;;  %5728 = vmatprep.mubr.msk.bf16.mxu0 %vm320_vm2, %v6129_v63  ;;  %v969_v58 = vor.u32 %v968_v37, %v6536_v36  ;;  %v946_v63 = vrot.slane %v945_v43, 4  ;;  %v1052_v35 = vshll.u32 %v850_v25, 16  ;;  %v5260_v43 = vld [vmem:[%s7162_s1 + $0x10] sm:$0x3]  ;;  %v1032_v4 = vrot.slane %v1031_v53, 4 }
  0x7d   : > { %v6567_v14 = vrot.slane %v959_v40, 4  ;;  %v1017_v47 = vor.u32 %v1016_v28, %v6580_v27  ;;  %v1041_v40 = vor.u32 %v1040_v22, %v6583_v32  ;;  %v1051_v48 = vrot.slane %v1049_v34, 4  ;;  %v860_v25 = vld [vmem:[%s6249_s25 + $0x7c] sm:$0xf] }
  0x7e   : > { %v6569_v15 = vrot.slane %v969_v58, 4  ;;  %v852_v58 = vld [vmem:[%s6249_s25 + $0x5c] sm:$0x1]  ;;  %v1054_v55 = vrot.slane %v1052_v35, 5  ;;  %v6616_v59 = vand.u32 %v5260_v43, %v6230_v5  ;;  %v1046_v6 = vrot.slane %v1044_v54, 5 }
  0x7f   : > { %v965_v42 = vsel %vm6312_vm5, %v6567_v14, %v6536_v36  ;;  %v856_v5 = vld [vmem:[%s6249_s25 + $0x6c] sm:$0xf]  ;;  %v1042_v10 = vrot.slane %v1041_v40, 4  ;;  %v1068_v11 = vshll.u32 %v852_v58, 16  ;;  %v1106_v28 = vshll.u32 %v857_v12, 16 }
  0x80   : > { %v975_v44 = vsel %vm6312_vm5, %v6569_v15, %v6562_v2  ;;  %v1082_v2 = vshll.u32 %v854_v56, 16  ;;  %5786 = vmatprep.subr.bf16.mxu0 %v6616_v59  ;;  %v1055_v13 = vor.u32 %v1054_v55, %v1051_v48  ;;  %v855_v15 = vld [vmem:[%s6249_s25 + $0x68] sm:$0x1]  ;;  %v1097_v23 = vshrl.u32 %v856_v5, 16  ;;  %v865_v40 = vld [vmem:[%s6249_s25 + $0x90] sm:$0xf] }
  0x81   : > { %v4842_v7 = vcombine.low %v965_v42, %v975_v44  ;;  %v1037_v22 = vsel %vm6312_vm5, %v1032_v4, %v6583_v32  ;;  %v1047_v33 = vsel %vm6312_vm5, %v1042_v10, %v1046_v6  ;;  %v6648_v34 = vrot.slane %v1068_v11, 5  ;;  %v862_v42 = vld [vmem:[%s6249_s25 + $0x84] sm:$0xf]  ;;  %v866_v58 = vld [vmem:[%s6249_s25 + $0x94] sm:$0xf] }
  0x82   : > { %v1092_v35 = vshll.u32 %v855_v15, 16  ;;  %v4845_v53 = vcombine.low %v1037_v22, %v1047_v33  ;;  %v864_v11 = vld [vmem:[%s6249_s25 + $0x8c] sm:$0x1]  ;;  %v1169_v12 = vshrl.u32 %v865_v40, 16 }
  0x83   : > { %5575 = vmatmul.mubr.msk.bf16.gmra.mrb[24].mxu1 %vm320_vm2, %v6130_v21  ;;  %5729 = vmatmul.mubr.msk.bf16.gmra.mrb[8].mxu0 %vm320_vm2, %v6131_v17  ;;  %v951_v21 = vsel %vm6312_vm5, %v946_v63, %v950_v51  ;;  %v851_v17 = vld [vmem:[%s6249_s25 + $0x58] sm:$0xf]  ;;  %v6138_v51 = vld [vmem:[%s6249_s25 + $0x84] sm:$0xff]   ;;  %v1073_v63 = vshrl.u32 %v853_v49, 16 }
  0x84   : > { %5578 = vmatprep.mubr.msk.bf16.mxu1 %vm320_vm2, %v6132_v26  ;;  %5732 = vmatprep.mubr.msk.bf16.mxu0 %vm320_vm2, %v6133_v41  ;;  %v994_v26 = vrot.slane %v993_v3, 4  ;;  %v1058_v37 = vshll.u32 %v851_v17, 16  ;;  %v1062_v38 = vshrl.u32 %v851_v17, 16  ;;  %v4841_v41 = vcombine.low %v941_v20, %v951_v21 }
  0x85   : > { %v1086_v3 = vshrl.u32 %v854_v56, 16  ;;  %v6631_v20 = vrot.slane %v1082_v2, 5  ;;  %v1094_v54 = vrot.slane %v1092_v35, 5  ;;  %v1171_v33 = vrot.slane %v1169_v12, 4 }
  0x86   : > { %v999_v36 = vsel %vm6312_vm5, %v994_v26, %v6571_v16  ;;  %v1064_v61 = vrot.slane %v1062_v38, 4  ;;  %v1075_v16 = vrot.slane %v1073_v63, 4  ;;  %v1145_v63 = vshrl.u32 %v862_v42, 16 }
  0x87   : > { %v1088_v21 = vrot.slane %v1086_v3, 4  ;;  %v6141_v3 = vld [vmem:[%s6249_s25 + $0xa8] sm:$0xff]  }
  0x89   : > { %v1089_v32 = vor.u32 %v1088_v21, %v6631_v20 }
  0x8b   : > { %5579 = vmatmul.mubr.msk.bf16.gmra.mrb[28].mxu1 %vm320_vm2, %v6134_v60  ;;  %5733 = vmatmul.mubr.msk.bf16.gmra.mrb[12].mxu0 %vm320_vm2, %v6135_v19  ;;  %v6618_v60 = vrot.slane %v1058_v37, 5  ;;  %v1018_v19 = vrot.slane %v1017_v47, 4  ;;  %v6651_v37 = vrot.slane %v1055_v13, 4  ;;  %v1099_v47 = vrot.slane %v1097_v23, 4 }
  0x8c   : > { %5584 = vmatprep.mubr.msk.bf16.mxu1 %vm320_vm2, %v4839_v46  ;;  %5736 = vmatprep.mubr.msk.bf16.mxu0 %vm320_vm2, %v6136_v9  ;;  %v1007_v46 = vor.u32 %v1006_v24, %v1003_v18  ;;  %v4843_v9 = vcombine.low %v989_v45, %v999_v36  ;;  %v859_v18 = vld [vmem:[%s6249_s25 + $0x78] sm:$0xf]  ;;  %v1100_v24 = vshll.u32 %v856_v5, 16  ;;  %v1134_v45 = vshrl.u32 %v860_v25, 16  ;;  %v861_v36 = vld [vmem:[%s6249_s25 + $0x80] sm:$0x1] }
  0x8d   : > { %v1065_v14 = vor.u32 %v1064_v61, %v6618_v60  ;;  %v1023_v26 = vsel %vm6312_vm5, %v1018_v19, %v6610_v52  ;;  %v1121_v38 = vshrl.u32 %v859_v18, 16  ;;  %v1090_v6 = vrot.slane %v1089_v32, 4 }
  0x8e   : > { %v1008_v1 = vrot.slane %v1007_v46, 4  ;;  %v863_v46 = vld [vmem:[%s6249_s25 + $0x88] sm:$0xf]  ;;  %v1102_v49 = vrot.slane %v1100_v24, 5  ;;  %v1140_v10 = vshll.u32 %v861_v36, 16  ;;  %v1172_v13 = vshll.u32 %v865_v40, 16 }
  0x8f   : > { %v6654_v43 = vrot.slane %v1065_v14, 4  ;;  %v1123_v48 = vrot.slane %v1121_v38, 4  ;;  %v1154_v19 = vshll.u32 %v863_v46, 16  ;;  %v1158_v2 = vshrl.u32 %v863_v46, 16  ;;  %v6142_v14 = vld [vmem:[%s6249_s25 + $0xb4] sm:$0xff]  }
  0x90   : > { %v1013_v17 = vsel %vm6312_vm5, %v1008_v1, %v6580_v27  ;;  %v858_v27 = vld [vmem:[%s6249_s25 + $0x74] sm:$0x1]  ;;  %v1148_v1 = vshll.u32 %v862_v42, 16  ;;  %v1103_v5 = vor.u32 %v1102_v49, %v1099_v47  ;;  %v1174_v35 = vrot.slane %v1172_v13, 5  ;;  %v6144_v40 = vld [vmem:[%s6249_s25 + $0xd8] sm:$0xff]  }
  0x91   : > { %v4844_v52 = vcombine.low %v1013_v17, %v1023_v26  ;;  %v1116_v56 = vshll.u32 %v858_v27, 16  ;;  %v6676_v24 = vrot.slane %v1154_v19, 5  ;;  %v867_v17 = vld [vmem:[%s6249_s25 + $0x98] sm:$0x1]  ;;  %v1061_v26 = vsel %vm6312_vm5, %v6651_v37, %v6618_v60  ;;  %v869_v27 = vld [vmem:[%s6249_s25 + $0xa0] sm:$0xf] }
  0x92   : > { %v1150_v23 = vrot.slane %v1148_v1, 5  ;;  %v1095_v60 = vsel %vm6312_vm5, %v1090_v6, %v1094_v54  ;;  %v1164_v37 = vshll.u32 %v864_v11, 16  ;;  %v1188_v49 = vshll.u32 %v867_v17, 16 }
  0x93   : > { %5585 = vmatmul.mubr.msk.bf16.vlgmr.msra.gmra.mrb[0].mxu1 %vm320_vm2, %v4840_v39  ;;  %5737 = vmatmul.mubr.msk.bf16.gmra.mrb[16].mxu0 %vm320_vm2, %v6137_v50  ;;  %v1124_v39 = vshll.u32 %v859_v18, 16  ;;  %v6659_v50 = vrot.slane %v1106_v28, 5  ;;  %v1182_v18 = vshrl.u32 %v866_v58, 16  ;;  %v1071_v28 = vsel %vm6312_vm5, %v6654_v43, %v6648_v34 }
  0x94   : > { %5617 = vmatpush3.bf16.msra.mxu1 %v6318_v62  ;;  %5588 = vmatprep.mubr.msk.bf16.mxu1 %vm320_vm2, %v4841_v41  ;;  %v1078_v62 = vrot.slane %v1076_v0, 5  ;;  %v1130_v41 = vshll.u32 %v860_v25, 16  ;;  %v1136_v0 = vrot.slane %v1134_v45, 4  ;;  %v1160_v25 = vrot.slane %v1158_v2, 4  ;;  %v6143_v45 = vld [vmem:[%s6249_s25 + $0xc0] sm:$0xff]  }
  0x95   : > { %5740 = vmatprep.mubr.msk.bf16.mxu0 %vm320_vm2, %v6138_v51  ;;  %5820 = vmatprep.subr.bf16.mxu1 %v6239_v8  ;;  %v1112_v51 = vrot.slane %v1110_v29, 4  ;;  %v1126_v55 = vrot.slane %v1124_v39, 5  ;;  %v1104_v29 = vrot.slane %v1103_v5, 4  ;;  %v1142_v34 = vrot.slane %v1140_v10, 5  ;;  %v874_v2 = vld [vmem:[%s6249_s25 + $0xb4] sm:$0xf] }
  0x96   : > { %v1079_v44 = vor.u32 %v1078_v62, %v1075_v16  ;;  %v6667_v61 = vrot.slane %v1130_v41, 5  ;;  %v1147_v16 = vrot.slane %v1145_v63, 4  ;;  %v1178_v62 = vshll.u32 %v866_v58, 16 }
  0x97   : > { %v1127_v15 = vor.u32 %v1126_v55, %v1123_v48  ;;  %v1184_v39 = vrot.slane %v1182_v18, 4  ;;  %v1161_v43 = vor.u32 %v1160_v25, %v6676_v24  ;;  %v4846_v32 = vcombine.low %v1061_v26, %v1071_v28  ;;  %v6146_v18 = vld [vmem:[%s6249_s25 + $0xf0] sm:$0xff]  }
  0x98   : > { %v1080_v4 = vrot.slane %v1079_v44, 4  ;;  %v1137_v21 = vor.u32 %v1136_v0, %v6667_v61  ;;  %v6698_v38 = vrot.slane %v1178_v62, 5  ;;  %v871_v44 = vld [vmem:[%s6249_s25 + $0xa8] sm:$0xf]  ;;  %v1109_v47 = vsel %vm6312_vm5, %v1104_v29, %v6659_v50  ;;  %v875_v62 = vld [vmem:[%s6249_s25 + $0xb8] sm:$0xf] }
  0x99   : > { %v1128_v41 = vrot.slane %v1127_v15, 4  ;;  %v1175_v36 = vor.u32 %v1174_v35, %v1171_v33  ;;  %v1166_v58 = vrot.slane %v1164_v37, 5  ;;  %v1202_v55 = vshll.u32 %v869_v27, 16  ;;  %v873_v28 = vld [vmem:[%s6249_s25 + $0xb0] sm:$0x1] }
  0x9a   : > { %v1085_v22 = vsel %vm6312_vm5, %v1080_v4, %v6631_v20  ;;  %v1138_v42 = vrot.slane %v1137_v21, 4  ;;  %v1151_v20 = vor.u32 %v1150_v23, %v1147_v16  ;;  %v1185_v48 = vor.u32 %v1184_v39, %v6698_v38  ;;  %v6145_v16 = vld [vmem:[%s6249_s25 + $0xe4] sm:$0xff]  }
  0x9b   : > { %5589 = vmatmul.mubr.msk.bf16.gmra.mrb[4].mxu1 %vm320_vm2, %v4842_v7  ;;  %5741 = vmatmul.mubr.msk.bf16.gmra.mrb[20].mxu0 %vm320_vm2, %v6139_v30  ;;  %v1113_v7 = vor.u32 %v1112_v51, %v6659_v50  ;;  %v4847_v46 = vcombine.low %v1085_v22, %v1095_v60  ;;  %v1206_v63 = vshrl.u32 %v869_v27, 16  ;;  %v1133_v50 = vsel %vm6312_vm5, %v1128_v41, %v6667_v61 }
  0x9c   : > { %5592 = vmatprep.mubr.msk.bf16.mxu1 %vm320_vm2, %v4843_v9  ;;  %5744 = vmatprep.mubr.msk.bf16.mxu0 %vm320_vm2, %v6140_v31  ;;  %v6671_v9 = vrot.slane %v1116_v56, 5  ;;  %v868_v31 = vld [vmem:[%s6249_s25 + $0x9c] sm:$0xf]  ;;  %v872_v56 = vld [vmem:[%s6249_s25 + $0xac] sm:$0xf]  ;;  %v1143_v0 = vsel %vm6312_vm5, %v1138_v42, %v1142_v34  ;;  %v1152_v1 = vrot.slane %v1151_v20, 4 }
  0x9d   : > { %v1114_v30 = vrot.slane %v1113_v7, 4  ;;  %v1196_v54 = vshll.u32 %v868_v31, 16  ;;  %v1162_v19 = vrot.slane %v1161_v43, 4  ;;  %v1217_v4 = vshrl.u32 %v871_v44, 16  ;;  %v6147_v20 = vld [vmem:[%s6249_s25 + $0xfc] sm:$0xff]  }
  0x9e   : > { %v1220_v6 = vshll.u32 %v871_v44, 16  ;;  %v1226_v5 = vshll.u32 %v872_v56, 16  ;;  %v1176_v61 = vrot.slane %v1175_v36, 4  ;;  %v1230_v10 = vshrl.u32 %v872_v56, 16 }
  0x9f   : > { %v1119_v51 = vsel %vm6312_vm5, %v1114_v30, %v6671_v9  ;;  %v1198_v9 = vrot.slane %v1196_v54, 5  ;;  %v1186_v11 = vrot.slane %v1185_v48, 4  ;;  %v1204_v12 = vrot.slane %v1202_v55, 5 }
  0xa0   : > { %v1208_v13 = vrot.slane %v1206_v63, 4  ;;  %v4848_v15 = vcombine.low %v1109_v47, %v1119_v51  ;;  %v1219_v21 = vrot.slane %v1217_v4, 4  ;;  %v1222_v23 = vrot.slane %v1220_v6, 5  ;;  %v6148_v51 = vld [vmem:[%s6249_s25 + $0x108] sm:$0xff]   ;;  %v6150_v4 = vld [vmem:[%s6249_s25 + $0x120] sm:$0xff]  }
  0xa1   : > { %v1228_v25 = vrot.slane %v1226_v5, 5  ;;  %v1241_v17 = vshrl.u32 %v874_v2, 16  ;;  %v4849_v26 = vcombine.low %v1133_v50, %v1143_v0  ;;  %v1232_v29 = vrot.slane %v1230_v10, 4  ;;  %v6149_v0 = vld [vmem:[%s6249_s25 + $0x114] sm:$0xff]  }
  0xa2   : > { %v1244_v30 = vshll.u32 %v874_v2, 16  ;;  %v1167_v22 = vsel %vm6312_vm5, %v1162_v19, %v1166_v58  ;;  %v1209_v33 = vor.u32 %v1208_v13, %v1204_v12  ;;  %v1250_v35 = vshll.u32 %v875_v62, 16  ;;  %v6153_v10 = vld [vmem:[%s6249_s25 + $0x138] sm:$0xff]   ;;  %v6154_v13 = vld [vmem:[%s6249_s25 + $0x1a4] sm:$0xff]  }
  0xa3   : > { %5593 = vmatmul.mubr.msk.bf16.gmra.mrb[8].mxu1 %vm320_vm2, %v4844_v52  ;;  %5745 = vmatmul.mubr.msk.bf16.gmra.mrb[24].mxu0 %vm320_vm2, %v6141_v3  ;;  %v6710_v52 = vld [vmem:[%s6249_s25 + $0xa4] sm:$0x1]  ;;  %v1190_v3 = vrot.slane %v1188_v49, 5  ;;  %v1254_v27 = vshrl.u32 %v875_v62, 16  ;;  %v1181_v34 = vsel %vm6312_vm5, %v1176_v61, %v6698_v38  ;;  %v1223_v37 = vor.u32 %v1222_v23, %v1219_v21  ;;  %v6157_v62 = vld [vmem:[%s6249_s25 + $0x150] sm:$0xff]  }
  0xa4   : > { %5596 = vmatprep.mubr.msk.bf16.mxu1 %vm320_vm2, %v4845_v53  ;;  %5748 = vmatprep.mubr.msk.bf16.mxu0 %vm320_vm2, %v6142_v14  ;;  %v1193_v53 = vshrl.u32 %v868_v31, 16  ;;  %v1212_v14 = vshll.u32 %v6710_v52, 16  ;;  %v1157_v31 = vsel %vm6312_vm5, %v1152_v1, %v6676_v24  ;;  %v1233_v39 = vor.u32 %v1232_v29, %v1228_v25  ;;  %v6158_v29 = vld [vmem:[%s6249_s25 + $0x1bc] sm:$0xff]  }
  0xa5   : > { %v1191_v24 = vsel %vm6312_vm5, %v1186_v11, %v1190_v3  ;;  %v1236_v41 = vshll.u32 %v873_v28, 16  ;;  %v4850_v42 = vcombine.low %v1157_v31, %v1167_v22  ;;  %v1246_v38 = vrot.slane %v1244_v30, 5  ;;  %v5212_v11 = vld [vmem:[%s6249_s25 + $0xc] sm:$0xf]  ;;  %v5216_v28 = vld [vmem:[%s6249_s25 + $0x1c] sm:$0xf] }
  0xa6   : > { %v1195_v7 = vrot.slane %v1193_v53, 4  ;;  %v4851_v43 = vcombine.low %v1181_v34, %v1191_v24  ;;  %v1252_v47 = vrot.slane %v1250_v35, 5  ;;  %v1256_v49 = vrot.slane %v1254_v27, 4  ;;  %v876_v53 = vld [vmem:[%s6249_s25 + $0xbc] sm:$0x1] }
  0xa7   : > { %v1224_v36 = vrot.slane %v1223_v37, 4  ;;  %v1238_v52 = vrot.slane %v1236_v41, 5  ;;  %v1260_v48 = vshll.u32 %v876_v53, 16  ;;  %v3772_v21 = vshll.u32 %v5212_v11, 16  ;;  %v6160_v37 = vld [vmem:[%s6249_s25 + $0x1c8] sm:$0xff]  }
  0xa8   : > { %v1199_v60 = vor.u32 %v1198_v9, %v1195_v7  ;;  %v1257_v58 = vor.u32 %v1256_v49, %v1252_v47  ;;  %v6151_v7 = vld [vmem:[%s6249_s25 + $0x12c] sm:$0xff]   ;;  %v6152_v9 = vld [vmem:[%s6249_s25 + $0x198] sm:$0xff]   ;;  %v3802_v34 = vshll.u32 %v5216_v28, 16  ;;  %v3806_v24 = vshrl.u32 %v5216_v28, 16  ;;  %v5218_v41 = vld [vmem:[%s6249_s25 + $0x24] sm:$0xf] }
  0xa9   : > { %v1229_v55 = vsel %vm6312_vm5, %v1224_v36, %v1228_v25  ;;  %v1262_v3 = vrot.slane %v1260_v48, 5  ;;  %v3774_v31 = vrot.slane %v3772_v21, 5  ;;  %v3817_v36 = vshrl.u32 %v5218_v41, 16  ;;  %v6162_v48 = vld [vmem:[%s6249_s25 + $0x1d4] sm:$0xff]   ;;  %v5227_v21 = vld [vmem:[%s6249_s25 + $0x48] sm:$0xf] }
  0xaa   : > { %v1200_v44 = vrot.slane %v1199_v60, 4  ;;  %v1258_v2 = vrot.slane %v1257_v58, 4  ;;  %v3808_v49 = vrot.slane %v3806_v24, 4  ;;  %v5228_v24 = vld [vmem:[%s6249_s25 + $0x4c] sm:$0xf] }
  0xab   : > { %5597 = vmatmul.mubr.msk.bf16.gmra.mrb[12].mxu1 %vm320_vm2, %v4846_v32  ;;  %5749 = vmatmul.mubr.msk.bf16.gmra.mrb[28].mxu0 %vm320_vm2, %v6143_v45  ;;  %v1210_v32 = vrot.slane %v1209_v33, 4  ;;  %v1214_v45 = vrot.slane %v1212_v14, 5  ;;  %v5215_v14 = vld [vmem:[%s6249_s25 + $0x18] sm:$0xf]  ;;  %v6159_v33 = vld [vmem:[%s6249_s25 + $0x15c] sm:$0xff]  }
  0xac   : > { %5600 = vmatprep.mubr.msk.bf16.mxu1 %vm320_vm2, %v4847_v46  ;;  %5754 = vmatprep.mubr.msk.bf16.mxu0 %vm320_vm2, %v6144_v40  ;;  %v1243_v46 = vrot.slane %v1241_v17, 4  ;;  %v1205_v54 = vsel %vm6312_vm5, %v1200_v44, %v1204_v12  ;;  %v1263_v5 = vsel %vm6312_vm5, %v1258_v2, %v1262_v3  ;;  %v5213_v12 = vld [vmem:[%s6249_s25 + $0x10] sm:$0xf]  ;;  %v3793_v17 = vshrl.u32 %v5215_v14, 16 }
  0xad   : > { %v1215_v56 = vsel %vm6312_vm5, %v1210_v32, %v1214_v45  ;;  %v3778_v23 = vshll.u32 %v5213_v12, 16  ;;  %v3782_v25 = vshrl.u32 %v5213_v12, 16  ;;  %v5221_v45 = vld [vmem:[%s6249_s25 + $0x30] sm:$0xf] }
  0xae   : > { %v1247_v40 = vor.u32 %v1246_v38, %v1243_v46  ;;  %v4852_v50 = vcombine.low %v1205_v54, %v1215_v56  ;;  %v3795_v35 = vrot.slane %v3793_v17, 4  ;;  %v5222_v46 = vld [vmem:[%s6249_s25 + $0x34] sm:$0xf]  ;;  %v3841_v54 = vshrl.u32 %v5221_v45, 16 }
  0xaf   : > { %v6791_v22 = vrot.slane %v3778_v23, 5  ;;  %v3784_v60 = vrot.slane %v3782_v25, 4  ;;  %v3844_v56 = vshll.u32 %v5221_v45, 16  ;;  %v3854_v58 = vshrl.u32 %v5222_v46, 16  ;;  %v6168_v45 = vld [vmem:[%s6249_s25 + $0x1f8] sm:$0xff]  }
  0xb0   : > { %v1248_v19 = vrot.slane %v1247_v40, 4  ;;  %v3850_v40 = vshll.u32 %v5222_v46, 16  ;;  %v3843_v12 = vrot.slane %v3841_v54, 4  ;;  %v5231_v54 = vld [vmem:[%s6249_s25 + $0x58] sm:$0xf] }
  0xb1   : > { %v3785_v44 = vor.u32 %v3784_v60, %v6791_v22 }
  0xb2   : > { %v1253_v6 = vsel %vm6312_vm5, %v1248_v19, %v1252_v47  ;;  %v6803_v47 = vrot.slane %v3802_v34, 5 }
  0xb3   : > { %5601 = vmatmul.mubr.msk.bf16.gmra.mrb[16].mxu1 %vm320_vm2, %v4848_v15  ;;  %5755 = vmatmul.mubr.msk.bf16.vlgmr.msra.gmra.mrb[0].mxu0 %vm320_vm2, %v6145_v16  ;;  %v4854_v61 = vcombine.low %v1253_v6, %v1263_v5  ;;  %v6155_v15 = vld [vmem:[%s6249_s25 + $0x144] sm:$0xff]   ;;  %v6156_v16 = vld [vmem:[%s6249_s25 + $0x1b0] sm:$0xff]   ;;  %v3819_v5 = vrot.slane %v3817_v36, 4 }
  0xb4   : > { %5604 = vmatprep.mubr.msk.bf16.mxu1 %vm320_vm2, %v4849_v26  ;;  %5787 = vmatpush3.bf16.msra.mxu0 %v6616_v59  ;;  %v1234_v59 = vrot.slane %v1233_v39, 4  ;;  %v3796_v26 = vshll.u32 %v5215_v14, 16  ;;  %v5217_v39 = vld [vmem:[%s6249_s25 + $0x20] sm:$0x1]  ;;  %v3809_v2 = vor.u32 %v3808_v49, %v6803_v47  ;;  %v6823_v14 = vrot.slane %v3850_v40, 5 }
  0xb5   : > { %5758 = vmatprep.mubr.msk.bf16.mxu0 %vm320_vm2, %v6146_v18  ;;  %v3769_v18 = vshrl.u32 %v5212_v11, 16  ;;  %v6165_v6 = vld [vmem:[%s6249_s25 + $0x180] sm:$0xff]   ;;  %v5220_v11 = vld [vmem:[%s6249_s25 + $0x2c] sm:$0x1] }
  0xb6   : > { %v1239_v63 = vsel %vm6312_vm5, %v1234_v59, %v1238_v52  ;;  %v3798_v27 = vrot.slane %v3796_v26, 5  ;;  %v3820_v59 = vshll.u32 %v5218_v41, 16  ;;  %v3810_v28 = vrot.slane %v3809_v2, 4  ;;  %v6167_v41 = vld [vmem:[%s6249_s25 + $0x18c] sm:$0xff]  }
  0xb7   : > { %v4853_v1 = vcombine.low %v1229_v55, %v1239_v63  ;;  %v3771_v30 = vrot.slane %v3769_v18, 4  ;;  %v3786_v63 = vrot.slane %v3785_v44, 4  ;;  %v3922_v2 = vshll.u32 %v5231_v54, 16 }
  0xb8   : > { %v3799_v38 = vor.u32 %v3798_v27, %v3795_v35  ;;  %v6166_v35 = vld [vmem:[%s6249_s25 + $0x1ec] sm:$0xff]  }
  0xba   : > { %v6812_v19 = vrot.slane %v3799_v38, 4 }
  0xbb   : > { %5605 = vmatmul.mubr.msk.bf16.gmra.mrb[20].mxu1 %vm320_vm2, %v4850_v42  ;;  %5759 = vmatmul.mubr.msk.bf16.gmra.mrb[4].mxu0 %vm320_vm2, %v6147_v20  ;;  %v5219_v42 = vld [vmem:[%s6249_s25 + $0x28] sm:$0xf] }
  0xbc   : > { %5608 = vmatprep.mubr.msk.bf16.mxu1 %vm320_vm2, %v4851_v43  ;;  %5762 = vmatprep.mubr.msk.bf16.mxu0 %vm320_vm2, %v6148_v51  ;;  %v6161_v20 = vld [vmem:[%s6249_s25 + $0x168] sm:$0xff]   ;;  %v3775_v43 = vor.u32 %v3774_v31, %v3771_v30  ;;  %v3812_v51 = vshll.u32 %v5217_v39, 16  ;;  %v3826_v52 = vshll.u32 %v5219_v42, 16  ;;  %v3830_v53 = vshrl.u32 %v5219_v42, 16 }
  0xbd   : > { %v3836_v31 = vshll.u32 %v5220_v11, 16  ;;  %v3892_v39 = vshll.u32 %v5227_v21, 16 }
  0xbe   : > { %v3776_v55 = vrot.slane %v3775_v43, 4  ;;  %v6815_v3 = vrot.slane %v3812_v51, 5 }
  0xbf   : > { %v3838_v51 = vrot.slane %v3836_v31, 5 }
  0xc0   : > { %v3781_v23 = vsel %vm6312_vm5, %v3776_v55, %v6791_v22  ;;  %v3815_v46 = vsel %vm6312_vm5, %v3810_v28, %v6815_v3  ;;  %v3926_v3 = vshrl.u32 %v5231_v54, 16 }
  0xc3   : > { %5609 = vmatmul.mubr.msk.bf16.gmra.mrb[24].mxu1 %vm320_vm2, %v4852_v50  ;;  %5763 = vmatmul.mubr.msk.bf16.gmra.mrb[8].mxu0 %vm320_vm2, %v6149_v0  ;;  %v6163_v0 = vld [vmem:[%s6249_s25 + $0x174] sm:$0xff]  }
  0xc4   : > { %5612 = vmatprep.mubr.msk.bf16.mxu1 %vm320_vm2, %v4853_v1  ;;  %5766 = vmatprep.mubr.msk.bf16.mxu0 %vm320_vm2, %v6150_v4  ;;  %v6164_v1 = vld [vmem:[%s6249_s25 + $0x1e0] sm:$0xff]   ;;  %v5224_v4 = vld [vmem:[%s6249_s25 + $0x3c] sm:$0xf] }
  0xc5   : > { %v3868_v18 = vshll.u32 %v5224_v4, 16 }
  0xc7   : > { %v3870_v34 = vrot.slane %v3868_v18, 5 }
  0xcb   : > { %5613 = vmatmul.mubr.msk.bf16.gmra.mrb[28].mxu1 %vm320_vm2, %v4854_v61  ;;  %5767 = vmatmul.mubr.msk.bf16.gmra.mrb[12].mxu0 %vm320_vm2, %v6151_v7  ;;  %v3822_v61 = vrot.slane %v3820_v59, 5  ;;  %v6819_v7 = vrot.slane %v3826_v52, 5 }
  0xcc   : > { %5618 = vmatprep.mubr.msk.bf16.mxu1 %vm320_vm2, %v6152_v9  ;;  %5770 = vmatprep.mubr.msk.bf16.mxu0 %vm320_vm2, %v6153_v10  ;;  %v3832_v9 = vrot.slane %v3830_v53, 4  ;;  %v5225_v10 = vld [vmem:[%s6249_s25 + $0x40] sm:$0xf] }
  0xcd   : > { %v3874_v17 = vshll.u32 %v5225_v10, 16  ;;  %v3878_v26 = vshrl.u32 %v5225_v10, 16 }
  0xce   : > { %v3833_v30 = vor.u32 %v3832_v9, %v6819_v7 }
  0xcf   : > { %v6846_v43 = vrot.slane %v3874_v17, 5  ;;  %v3880_v44 = vrot.slane %v3878_v26, 4  ;;  %v3928_v17 = vrot.slane %v3926_v3, 4  ;;  %v5238_v3 = vld [vmem:[%s6249_s25 + $0x74] sm:$0x1] }
  0xd0   : > { %v3834_v49 = vrot.slane %v3833_v30, 4 }
  0xd1   : > { %v3881_v55 = vor.u32 %v3880_v44, %v6846_v43 }
  0xd3   : > { %5619 = vmatmul.mubr.msk.bf16.vlgmr.msra.gmra.mrb[0].mxu1 %vm320_vm2, %v6154_v13  ;;  %5771 = vmatmul.mubr.msk.bf16.gmra.mrb[16].mxu0 %vm320_vm2, %v6155_v15  ;;  %v3846_v13 = vrot.slane %v3844_v56, 5  ;;  %v3856_v15 = vrot.slane %v3854_v58, 4  ;;  %v3898_v56 = vshll.u32 %v5228_v24, 16 }
  0xd4   : > { %5821 = vmatpush3.bf16.msra.mxu1 %v6239_v8  ;;  %5622 = vmatprep.mubr.msk.bf16.mxu1 %vm320_vm2, %v6156_v16  ;;  %v5214_v8 = vld [vmem:[%s6249_s25 + $0x14] sm:$0x1]  ;;  %v5223_v16 = vld [vmem:[%s6249_s25 + $0x38] sm:$0x1] }
  0xd5   : > { %5774 = vmatprep.mubr.msk.bf16.mxu0 %vm320_vm2, %v6157_v62  ;;  %v3788_v32 = vshll.u32 %v5214_v8, 16  ;;  %v3865_v62 = vshrl.u32 %v5224_v4, 16  ;;  %v3847_v22 = vor.u32 %v3846_v13, %v3843_v12  ;;  %v3857_v60 = vor.u32 %v3856_v15, %v6823_v14  ;;  %v5226_v8 = vld [vmem:[%s6249_s25 + $0x44] sm:$0x1] }
  0xd6   : > { %v3884_v53 = vshll.u32 %v5226_v8, 16  ;;  %v3839_v4 = vsel %vm6312_vm5, %v3834_v49, %v3838_v51  ;;  %v6873_v9 = vrot.slane %v3898_v56, 5  ;;  %v5234_v13 = vld [vmem:[%s6249_s25 + $0x64] sm:$0xf] }
  0xd7   : > { %v3790_v50 = vrot.slane %v3788_v32, 5  ;;  %v3867_v27 = vrot.slane %v3865_v62, 4  ;;  %v5230_v32 = vld [vmem:[%s6249_s25 + $0x54] sm:$0xf]  ;;  %v3848_v36 = vrot.slane %v3847_v22, 4  ;;  %v3858_v59 = vrot.slane %v3857_v60, 4 }
  0xd8   : > { %v3913_v40 = vshrl.u32 %v5230_v32, 16  ;;  %v3916_v58 = vshll.u32 %v5230_v32, 16  ;;  %v6169_v15 = vld [vmem:[%s6249_s25 + $0x204] sm:$0xff]   ;;  %v3882_v62 = vrot.slane %v3881_v55, 4  ;;  %v3946_v22 = vshll.u32 %v5234_v13, 16 }
  0xd9   : > { %v3791_v25 = vsel %vm6312_vm5, %v3786_v63, %v3790_v50  ;;  %v3894_v50 = vrot.slane %v3892_v39, 5  ;;  %v3950_v60 = vshrl.u32 %v5234_v13, 16 }
  0xda   : > { %v5261_v42 = vcombine.low %v3781_v23, %v3791_v25  ;;  %v3915_v11 = vrot.slane %v3913_v40, 4  ;;  %v3918_v12 = vrot.slane %v3916_v58, 5  ;;  %v5232_v23 = vld [vmem:[%s6249_s25 + $0x5c] sm:$0x1]  ;;  %v6879_v25 = vrot.slane %v3922_v2, 5 }
  0xdb   : > { %5623 = vmatmul.mubr.msk.bf16.gmra.mrb[4].mxu1 %vm320_vm2, %v6158_v29  ;;  %5775 = vmatmul.mubr.msk.bf16.gmra.mrb[20].mxu0 %vm320_vm2, %v6159_v33  ;;  %v3823_v29 = vor.u32 %v3822_v61, %v3819_v5  ;;  %v3860_v33 = vshll.u32 %v5223_v16, 16  ;;  %v6869_v61 = vrot.slane %v3884_v53, 5  ;;  %v3952_v49 = vrot.slane %v3950_v60, 4 }
  0xdc   : > { %5626 = vmatprep.mubr.msk.bf16.mxu1 %vm320_vm2, %v6160_v37  ;;  %5778 = vmatprep.mubr.msk.bf16.mxu0 %vm320_vm2, %v6161_v20  ;;  %v3889_v37 = vshrl.u32 %v5227_v21, 16  ;;  %v3805_v20 = vsel %vm6312_vm5, %v6812_v19, %v6803_v47  ;;  %v3902_v47 = vshrl.u32 %v5228_v24, 16  ;;  %v5229_v19 = vld [vmem:[%s6249_s25 + $0x50] sm:$0x1]  ;;  %v5236_v21 = vld [vmem:[%s6249_s25 + $0x6c] sm:$0xf]  ;;  %v3919_v8 = vor.u32 %v3918_v12, %v3915_v11 }
  0xdd   : > { %v3824_v38 = vrot.slane %v3823_v29, 4  ;;  %v3862_v52 = vrot.slane %v3860_v33, 5  ;;  %v3908_v18 = vshll.u32 %v5229_v19, 16  ;;  %v6170_v29 = vld [vmem:[%s6249_s25 + $0x210] sm:$0xff]   ;;  %v5242_v11 = vld [vmem:[%s6249_s25 + $0x84] sm:$0xf] }
  0xde   : > { %v3891_v63 = vrot.slane %v3889_v37, 4  ;;  %v3904_v10 = vrot.slane %v3902_v47, 4 }
  0xdf   : > { %v3863_v5 = vsel %vm6312_vm5, %v3858_v59, %v3862_v52  ;;  %v6889_v39 = vrot.slane %v3908_v18, 5  ;;  %v3920_v52 = vrot.slane %v3919_v8, 4  ;;  %v5245_v8 = vld [vmem:[%s6249_s25 + $0x90] sm:$0xf] }
  0xe0   : > { %v3905_v33 = vor.u32 %v3904_v10, %v6873_v9 }
  0xe2   : > { %v3906_v59 = vrot.slane %v3905_v33, 4 }
  0xe3   : > { %5627 = vmatmul.mubr.msk.bf16.gmra.mrb[8].mxu1 %vm320_vm2, %v6162_v48  ;;  %5779 = vmatmul.mubr.msk.bf16.gmra.mrb[24].mxu0 %vm320_vm2, %v6163_v0  ;;  %v3871_v48 = vor.u32 %v3870_v34, %v3867_v27  ;;  %v5262_v0 = vcombine.low %v3805_v20, %v3815_v46  ;;  %v3961_v27 = vshrl.u32 %v5236_v21, 16  ;;  %v3964_v34 = vshll.u32 %v5236_v21, 16  ;;  %v5240_v46 = vld [vmem:[%s6249_s25 + $0x7c] sm:$0xf] }
  0xe4   : > { %5630 = vmatprep.mubr.msk.bf16.mxu1 %vm320_vm2, %v6164_v1  ;;  %5782 = vmatprep.mubr.msk.bf16.mxu0 %vm320_vm2, %v6165_v6  ;;  %v3829_v1 = vsel %vm6312_vm5, %v3824_v38, %v6819_v7  ;;  %v3853_v6 = vsel %vm6312_vm5, %v3848_v36, %v6823_v14  ;;  %v5233_v7 = vld [vmem:[%s6249_s25 + $0x60] sm:$0xf]  ;;  %v3895_v14 = vor.u32 %v3894_v50, %v3891_v63  ;;  %v6901_v38 = vrot.slane %v3946_v22, 5 }
  0xe5   : > { %v3872_v16 = vrot.slane %v3871_v48, 4  ;;  %v3937_v26 = vshrl.u32 %v5233_v7, 16  ;;  %v3940_v28 = vshll.u32 %v5233_v7, 16  ;;  %v5263_v30 = vcombine.low %v3829_v1, %v3839_v4  ;;  %v6171_v48 = vld [vmem:[%s6249_s25 + $0x21c] sm:$0xff]   ;;  %v6172_v1 = vld [vmem:[%s6249_s25 + $0x228] sm:$0xff]  }
  0xe6   : > { %v5264_v31 = vcombine.low %v3853_v6, %v3863_v5  ;;  %v6887_v37 = vrot.slane %v3895_v14, 4  ;;  %v3929_v20 = vor.u32 %v3928_v17, %v6879_v25  ;;  %v3963_v53 = vrot.slane %v3961_v27, 4 }
  0xe7   : > { %v3877_v24 = vsel %vm6312_vm5, %v3872_v16, %v6846_v43  ;;  %v3939_v44 = vrot.slane %v3937_v26, 4  ;;  %v3942_v32 = vrot.slane %v3940_v28, 5  ;;  %v5235_v43 = vld [vmem:[%s6249_s25 + $0x68] sm:$0x1]  ;;  %v3966_v54 = vrot.slane %v3964_v34, 5 }
  0xe8   : > { %v3994_v40 = vshll.u32 %v5240_v46, 16  ;;  %v3998_v58 = vshrl.u32 %v5240_v46, 16  ;;  %v3930_v55 = vrot.slane %v3929_v20, 4  ;;  %v3953_v2 = vor.u32 %v3952_v49, %v6901_v38  ;;  %v5248_v46 = vld [vmem:[%s6249_s25 + $0x9c] sm:$0xf] }
  0xe9   : > { %v3943_v50 = vor.u32 %v3942_v32, %v3939_v44  ;;  %v3901_v5 = vsel %vm6312_vm5, %v6887_v37, %v6873_v9  ;;  %v3925_v7 = vsel %vm6312_vm5, %v3920_v52, %v6879_v25  ;;  %v3967_v10 = vor.u32 %v3966_v54, %v3963_v53 }
  0xea   : > { %v4000_v16 = vrot.slane %v3998_v58, 4  ;;  %v3980_v21 = vshll.u32 %v5238_v3, 16  ;;  %v3954_v25 = vrot.slane %v3953_v2, 4  ;;  %v4009_v26 = vshrl.u32 %v5242_v11, 16  ;;  %v6175_v3 = vld [vmem:[%s6249_s25 + $0x24c] sm:$0xff]  }
  0xeb   : > { %5631 = vmatmul.mubr.msk.bf16.gmra.mrb[12].mxu1 %vm320_vm2, %v6166_v35  ;;  %5783 = vmatmul.mubr.msk.bf16.gmra.mrb[28].mxu0 %vm320_vm2, %v6167_v41  ;;  %v5237_v35 = vld [vmem:[%s6249_s25 + $0x70] sm:$0xf]  ;;  %v3932_v41 = vshll.u32 %v5232_v23, 16  ;;  %v3944_v14 = vrot.slane %v3943_v50, 4  ;;  %v5241_v23 = vld [vmem:[%s6249_s25 + $0x80] sm:$0x1] }
  0xec   : > { %5634 = vmatprep.mubr.msk.bf16.mxu1 %vm320_vm2, %v6168_v45  ;;  %5788 = vmatprep.mubr.msk.bf16.mxu0 %vm320_vm2, %v5261_v42  ;;  %v3887_v42 = vsel %vm6312_vm5, %v3882_v62, %v6869_v61  ;;  %v5239_v45 = vld [vmem:[%s6249_s25 + $0x78] sm:$0xf]  ;;  %v3970_v51 = vshll.u32 %v5237_v35, 16  ;;  %v3974_v36 = vshrl.u32 %v5237_v35, 16  ;;  %v3911_v61 = vsel %vm6312_vm5, %v3906_v59, %v6889_v39  ;;  %v5243_v62 = vld [vmem:[%s6249_s25 + $0x88] sm:$0xf] }
  0xed   : > { %v3985_v56 = vshrl.u32 %v5239_v45, 16  ;;  %v3988_v47 = vshll.u32 %v5239_v45, 16  ;;  %v3934_v63 = vrot.slane %v3932_v41, 5  ;;  %v5265_v19 = vcombine.low %v3877_v24, %v3887_v42  ;;  %v6173_v35 = vld [vmem:[%s6249_s25 + $0x234] sm:$0xff]   ;;  %v5244_v39 = vld [vmem:[%s6249_s25 + $0x8c] sm:$0x1] }
  0xee   : > { %v6908_v4 = vrot.slane %v3970_v51, 5  ;;  %v3976_v6 = vrot.slane %v3974_v36, 4  ;;  %v4012_v28 = vshll.u32 %v5242_v11, 16  ;;  %v3968_v22 = vrot.slane %v3967_v10, 4  ;;  %v5246_v41 = vld [vmem:[%s6249_s25 + $0x94] sm:$0xf] }
  0xef   : > { %v3987_v12 = vrot.slane %v3985_v56, 4  ;;  %v3990_v13 = vrot.slane %v3988_v47, 5  ;;  %v3935_v9 = vsel %vm6312_vm5, %v3930_v55, %v3934_v63  ;;  %v5266_v27 = vcombine.low %v3901_v5, %v3911_v61  ;;  %v6174_v42 = vld [vmem:[%s6249_s25 + $0x240] sm:$0xff]   ;;  %v5247_v61 = vld [vmem:[%s6249_s25 + $0x98] sm:$0x1] }
  0xf0   : > { %v3977_v17 = vor.u32 %v3976_v6, %v6908_v4  ;;  %v5267_v34 = vcombine.low %v3925_v7, %v3935_v9  ;;  %v3949_v24 = vsel %vm6312_vm5, %v3944_v14, %v6901_v38  ;;  %v3982_v37 = vrot.slane %v3980_v21, 5  ;;  %v5249_v59 = vld [vmem:[%s6249_s25 + $0xa0] sm:$0xf]  ;;  %v5250_v11 = vld [vmem:[%s6249_s25 + $0xa4] sm:$0x1] }
  0xf1   : > { %v3991_v60 = vor.u32 %v3990_v13, %v3987_v12  ;;  %v4011_v32 = vrot.slane %v4009_v26, 4  ;;  %v4014_v45 = vrot.slane %v4012_v28, 5  ;;  %v4033_v51 = vshrl.u32 %v5245_v8, 16  ;;  %v5252_v26 = vld [vmem:[%s6249_s25 + $0xac] sm:$0xf] }
  0xf2   : > { %v3978_v44 = vrot.slane %v3977_v17, 4  ;;  %v4036_v36 = vshll.u32 %v5245_v8, 16  ;;  %v3973_v38 = vsel %vm6312_vm5, %v3968_v22, %v6908_v4  ;;  %v4042_v56 = vshll.u32 %v5246_v41, 16 }
  0xf3   : > { %5635 = vmatmul.mubr.msk.bf16.gmra.mrb[16].mxu1 %vm320_vm2, %v6169_v15  ;;  %5789 = vmatmul.mubr.msk.bf16.vlgmr.msra.gmra.mrb[0].mxu0 %vm320_vm2, %v5262_v0  ;;  %v3956_v0 = vshll.u32 %v5235_v43, 16  ;;  %v6921_v15 = vrot.slane %v3994_v40, 5  ;;  %v3992_v52 = vrot.slane %v3991_v60, 4  ;;  %v4046_v47 = vshrl.u32 %v5246_v41, 16 }
  0xf4   : > { %5638 = vmatprep.mubr.msk.bf16.mxu1 %vm320_vm2, %v6170_v29  ;;  %5792 = vmatprep.mubr.msk.bf16.mxu0 %vm320_vm2, %v5263_v30  ;;  %v4018_v29 = vshll.u32 %v5243_v62, 16  ;;  %v4022_v30 = vshrl.u32 %v5243_v62, 16  ;;  %v4057_v40 = vshrl.u32 %v5248_v46, 16  ;;  %v4060_v58 = vshll.u32 %v5248_v46, 16 }
  0xf5   : > { %v3958_v18 = vrot.slane %v3956_v0, 5  ;;  %v4001_v33 = vor.u32 %v4000_v16, %v6921_v15  ;;  %v4028_v55 = vshll.u32 %v5244_v39, 16  ;;  %v4066_v63 = vshll.u32 %v5249_v59, 16  ;;  %v6176_v16 = vld [vmem:[%s6249_s25 + $0x2c4] sm:$0xff]  }
  0xf6   : > { %v6944_v43 = vrot.slane %v4018_v29, 5  ;;  %v4024_v49 = vrot.slane %v4022_v30, 4  ;;  %v4070_v50 = vshrl.u32 %v5249_v59, 16  ;;  %v4015_v0 = vor.u32 %v4014_v45, %v4011_v32  ;;  %v6177_v45 = vld [vmem:[%s6249_s25 + $0x2d0] sm:$0xff]   ;;  %v6178_v59 = vld [vmem:[%s6249_s25 + $0x2dc] sm:$0xff]  }
  0xf7   : > { %v3959_v20 = vsel %vm6312_vm5, %v3954_v25, %v3958_v18  ;;  %v4002_v53 = vrot.slane %v4001_v33, 4  ;;  %v4038_v2 = vrot.slane %v4036_v36, 5  ;;  %v3997_v6 = vsel %vm6312_vm5, %v3992_v52, %v6921_v15  ;;  %v5251_v15 = vld [vmem:[%s6249_s25 + $0xa8] sm:$0xf]  ;;  %v5254_v33 = vld [vmem:[%s6249_s25 + $0xb4] sm:$0xf] }
  0xf8   : > { %v5268_v4 = vcombine.low %v3949_v24, %v3959_v20  ;;  %v6964_v7 = vrot.slane %v4042_v56, 5  ;;  %v4048_v10 = vrot.slane %v4046_v47, 4  ;;  %v4059_v12 = vrot.slane %v4057_v40, 4  ;;  %v5253_v56 = vld [vmem:[%s6249_s25 + $0xb0] sm:$0x1] }
  0xf9   : > { %v4062_v13 = vrot.slane %v4060_v58, 5  ;;  %v4030_v9 = vrot.slane %v4028_v55, 5  ;;  %v6968_v14 = vrot.slane %v4066_v63, 5  ;;  %v4072_v18 = vrot.slane %v4070_v50, 4  ;;  %v5257_v47 = vld [vmem:[%s6249_s25 + $0xc0] sm:$0xf] }
  0xfa   : > { %v4016_v21 = vrot.slane %v4015_v0, 4  ;;  %v4052_v17 = vshll.u32 %v5247_v61, 16  ;;  %v4049_v29 = vor.u32 %v4048_v10, %v6964_v7  ;;  %v4076_v22 = vshll.u32 %v5250_v11, 16  ;;  %v5258_v63 = vld [vmem:[%s6249_s25 + $0xc4] sm:$0xf] }
  0xfb   : > { %5639 = vmatmul.mubr.msk.bf16.gmra.mrb[20].mxu1 %vm320_vm2, %v6171_v48  ;;  %5793 = vmatmul.mubr.msk.bf16.gmra.mrb[4].mxu0 %vm320_vm2, %v5264_v31  ;;  %v4004_v31 = vshll.u32 %v5241_v23, 16  ;;  %v3983_v48 = vsel %vm6312_vm5, %v3978_v44, %v3982_v37  ;;  %v4063_v30 = vor.u32 %v4062_v13, %v4059_v12  ;;  %v4081_v60 = vshrl.u32 %v5251_v15, 16 }
  0xfc   : > { %5642 = vmatprep.mubr.msk.bf16.mxu1 %vm320_vm2, %v6172_v1  ;;  %5796 = vmatprep.mubr.msk.bf16.mxu0 %vm320_vm2, %v5265_v19  ;;  %v4025_v1 = vor.u32 %v4024_v49, %v6944_v43  ;;  %v4035_v19 = vrot.slane %v4033_v51, 4  ;;  %v5269_v62 = vcombine.low %v3973_v38, %v3983_v48  ;;  %v4073_v8 = vor.u32 %v4072_v18, %v6968_v14 }
  0xfd   : > { %v4006_v54 = vrot.slane %v4004_v31, 5  ;;  %v5255_v31 = vld [vmem:[%s6249_s25 + $0xb8] sm:$0xf]  ;;  %v4021_v24 = vsel %vm6312_vm5, %v4016_v21, %v6944_v43  ;;  %v4054_v41 = vrot.slane %v4052_v17, 5  ;;  %v4108_v20 = vshll.u32 %v5254_v33, 16 }
  0xfe   : > { %v4026_v23 = vrot.slane %v4025_v1, 4  ;;  %v4039_v25 = vor.u32 %v4038_v2, %v4035_v19  ;;  %v4114_v44 = vshll.u32 %v5255_v31, 16  ;;  %v4118_v32 = vshrl.u32 %v5255_v31, 16  ;;  %v5256_v19 = vld [vmem:[%s6249_s25 + $0xbc] sm:$0x1] }
  0xff   : > { %v4007_v5 = vsel %vm6312_vm5, %v4002_v53, %v4006_v54  ;;  %v4050_v46 = vrot.slane %v4049_v29, 4  ;;  %v4064_v49 = vrot.slane %v4063_v30, 4  ;;  %v4078_v51 = vrot.slane %v4076_v22, 5  ;;  %v5259_v22 = vld [vmem:[%s6249_s25 + $0xc8] sm:$0x1] }
 0x100   : > { %v5270_v28 = vcombine.low %v3997_v6, %v4007_v5  ;;  %v4031_v37 = vsel %vm6312_vm5, %v4026_v23, %v4030_v9  ;;  %v4040_v39 = vrot.slane %v4039_v25, 4  ;;  %v4083_v36 = vrot.slane %v4081_v60, 4  ;;  %v6180_v9 = vld [vmem:[%s6249_s25 + $0x2f4] sm:$0xff]  }
 0x101   : > { %v4074_v38 = vrot.slane %v4073_v8, 4  ;;  %v5271_v54 = vcombine.low %v4021_v24, %v4031_v37  ;;  %v4110_v58 = vrot.slane %v4108_v20, 5  ;;  %v4116_v48 = vrot.slane %v4114_v44, 5  ;;  %v6181_v24 = vld [vmem:[%s6249_s25 + $0x300] sm:$0xff]  }
 0x102   : > { %v4120_v55 = vrot.slane %v4118_v32, 4  ;;  %v4045_v50 = vsel %vm6312_vm5, %v4040_v39, %v6964_v7  ;;  %v4055_v0 = vsel %vm6312_vm5, %v4050_v46, %v4054_v41  ;;  %v4069_v1 = vsel %vm6312_vm5, %v4064_v49, %v6968_v14  ;;  %v6182_v39 = vld [vmem:[%s6249_s25 + $0x30c] sm:$0xff]   ;;  %v6183_v46 = vld [vmem:[%s6249_s25 + $0x318] sm:$0xff]  }
 0x103   : > { %5643 = vmatmul.mubr.msk.bf16.gmra.mrb[24].mxu1 %vm320_vm2, %v6173_v35  ;;  %5797 = vmatmul.mubr.msk.bf16.gmra.mrb[8].mxu0 %vm320_vm2, %v5266_v27  ;;  %v4084_v35 = vshll.u32 %v5251_v15, 16  ;;  %v4090_v27 = vshll.u32 %v5252_v26, 16  ;;  %v4079_v2 = vsel %vm6312_vm5, %v4074_v38, %v4078_v51  ;;  %v4100_v6 = vshll.u32 %v5253_v56, 16 }
 0x104   : > { %5646 = vmatprep.mubr.msk.bf16.mxu1 %vm320_vm2, %v6174_v42  ;;  %5800 = vmatprep.mubr.msk.bf16.mxu0 %vm320_vm2, %v5267_v34  ;;  %v4094_v34 = vshrl.u32 %v5252_v26, 16  ;;  %v4105_v42 = vshrl.u32 %v5254_v33, 16  ;;  %v4129_v5 = vshrl.u32 %v5257_v47, 16  ;;  %v4132_v61 = vshll.u32 %v5257_v47, 16 }
 0x105   : > { %v4086_v43 = vrot.slane %v4084_v35, 5  ;;  %v4092_v52 = vrot.slane %v4090_v27, 5  ;;  %v4138_v7 = vshll.u32 %v5258_v63, 16  ;;  %v4142_v10 = vshrl.u32 %v5258_v63, 16 }
 0x106   : > { %v4096_v53 = vrot.slane %v4094_v34, 4  ;;  %v4107_v40 = vrot.slane %v4105_v42, 4  ;;  %v4121_v12 = vor.u32 %v4120_v55, %v4116_v48  ;;  %v4124_v13 = vshll.u32 %v5256_v19, 16 }
 0x107   : > { %v5273_v14 = vcombine.low %v4069_v1, %v4079_v2  ;;  %v4102_v21 = vrot.slane %v4100_v6, 5  ;;  %v4131_v23 = vrot.slane %v4129_v5, 4  ;;  %v4134_v25 = vrot.slane %v4132_v61, 5 }
 0x108   : > { %v4111_v11 = vor.u32 %v4110_v58, %v4107_v40  ;;  %v4140_v17 = vrot.slane %v4138_v7, 5  ;;  %v4144_v26 = vrot.slane %v4142_v10, 4  ;;  %v4122_v29 = vrot.slane %v4121_v12, 4 }
 0x109   : > { %v4126_v30 = vrot.slane %v4124_v13, 5  ;;  %v4135_v31 = vor.u32 %v4134_v25, %v4131_v23  ;;  %v4148_v35 = vshll.u32 %v5259_v22, 16 }
 0x10a   : > { %v4145_v8 = vor.u32 %v4144_v26, %v4140_v17 }
 0x10b   : > { %5647 = vmatmul.mubr.msk.bf16.gmra.mrb[28].mxu1 %vm320_vm2, %v6175_v3  ;;  %5801 = vmatmul.mubr.msk.bf16.gmra.mrb[12].mxu0 %vm320_vm2, %v5268_v4  ;;  %v4087_v3 = vor.u32 %v4086_v43, %v4083_v36  ;;  %v4097_v4 = vor.u32 %v4096_v53, %v4092_v52  ;;  %v4127_v34 = vsel %vm6312_vm5, %v4122_v29, %v4126_v30  ;;  %v4136_v42 = vrot.slane %v4135_v31, 4 }
 0x10c   : > { %5668 = vmatprep.mubr.msk.bf16.mxu1 %vm320_vm2, %v6176_v16  ;;  %5804 = vmatprep.mubr.msk.bf16.mxu0 %vm320_vm2, %v5269_v62  ;;  %v6179_v16 = vld [vmem:[%s6249_s25 + $0x2e8] sm:$0xff]   ;;  %v5272_v62 = vcombine.low %v4045_v50, %v4055_v0  ;;  %v4146_v20 = vrot.slane %v4145_v8, 4  ;;  %v4150_v44 = vrot.slane %v4148_v35, 5  ;;  %v7048_v0 = vld [vmem:[%s7163_s2] ss:$0 sm:$0xff] }
 0x10d   : > { %v4088_v18 = vrot.slane %v4087_v3, 4  ;;  %v4098_v15 = vrot.slane %v4097_v4, 4  ;;  %v4141_v32 = vsel %vm6312_vm5, %v4136_v42, %v4140_v17 }
 0x10f   : > { %v4093_v60 = vsel %vm6312_vm5, %v4088_v18, %v4092_v52  ;;  %v4103_v33 = vsel %vm6312_vm5, %v4098_v15, %v4102_v21 }
 0x110   : > { %v5274_v37 = vcombine.low %v4093_v60, %v4103_v33 }
 0x113   : > { %5669 = vmatmul.mubr.msk.bf16.vlgmr.msra.gmra.mrb[16].mxu1 %vm320_vm2, %v6177_v45  ;;  %5805 = vmatmul.mubr.msk.bf16.gmra.mrb[16].mxu0 %vm320_vm2, %v5270_v28  ;;  %v4112_v28 = vrot.slane %v4111_v11, 4  ;;  %v4151_v45 = vsel %vm6312_vm5, %v4146_v20, %v4150_v44 }
 0x114   : > { %5672 = vmatprep.mubr.msk.bf16.mxu1 %vm320_vm2, %v6178_v59  ;;  %5808 = vmatprep.mubr.msk.bf16.mxu0 %vm320_vm2, %v5271_v54  ;;  %v5276_v49 = vcombine.low %v4141_v32, %v4151_v45 }
 0x115   : > { %v4117_v27 = vsel %vm6312_vm5, %v4112_v28, %v4116_v48 }
 0x116   : > { %v5275_v41 = vcombine.low %v4117_v27, %v4127_v34 }
 0x11b   : > { %5673 = vmatmul.mubr.msk.bf16.gmra.mrb[20].mxu1 %vm320_vm2, %v6179_v16  ;;  %5809 = vmatmul.mubr.msk.bf16.gmra.mrb[20].mxu0 %vm320_vm2, %v5272_v62 }
 0x11c   : > { %5676 = vmatprep.mubr.msk.bf16.mxu1 %vm320_vm2, %v6180_v9  ;;  %5812 = vmatprep.mubr.msk.bf16.mxu0 %vm320_vm2, %v5273_v14 }
 0x123   : > { %5677 = vmatmul.mubr.msk.bf16.gmra.mrb[24].mxu1 %vm320_vm2, %v6181_v24  ;;  %5813 = vmatmul.mubr.msk.bf16.gmra.mrb[24].mxu0 %vm320_vm2, %v5274_v37 }
 0x124   : > { %5680 = vmatprep.mubr.msk.bf16.mxu1 %vm320_vm2, %v6182_v39  ;;  %5816 = vmatprep.mubr.msk.bf16.mxu0 %vm320_vm2, %v5275_v41 }
 0x12b   : > { %5681 = vmatmul.mubr.msk.bf16.gmra.mrb[28].mxu1 %vm320_vm2, %v6183_v46  ;;  %5817 = vmatmul.mubr.msk.bf16.gmra.mrb[28].mxu0 %vm320_vm2, %v5276_v49 }
 0x1a6   : > { %v5620_v51 = vpop.f32.mrb[0].mxu1 }
 0x1a7   : > { %v1758_v36 = vpop.f32.mrb[1].mxu1 }
 0x1a8   : > { %v5621_v59 = vpop.f32.mrb[2].mxu1 }
 0x1a9   : > { %v1761_v38 = vpop.f32.mrb[3].mxu1 }
 0x1ae   : > { %v5624_v43 = vpop.f32.mrb[4].mxu1 }
 0x1af   : > { %v1774_v52 = vpop.f32.mrb[5].mxu1 }
 0x1b0   : > { %v5625_v53 = vpop.f32.mrb[6].mxu1 }
 0x1b1   : > { %v1777_v54 = vpop.f32.mrb[7].mxu1 }
 0x1b6   : > { %v5628_v56 = vpop.f32.mrb[8].mxu1 }
 0x1b7   : > { %v1790_v47 = vpop.f32.mrb[9].mxu1 }
 0x1b8   : > { %v7033_v40 = vpop.f32.mrb[10].mxu1 }
 0x1b9   : > { %v7035_v57 = vpop.f32.mrb[11].mxu1 }
 0x1be   : > { %v7037_v58 = vpop.f32.mrb[12].mxu1 }
 0x1bf   : > { %v7039_v48 = vpop.f32.mrb[13].mxu1 }
 0x1c0   : > { %v7041_v55 = vpop.f32.mrb[14].mxu1 }
 0x1c1   : > { %v7043_v63 = vpop.f32.mrb[15].mxu1 }
 0x1c6   : > { %v5790_v50 = vpop.f32.mrb[0].mxu0 }
 0x1c7   : > { %v5822_v1 = vadd.f32 %v5790_v50, %v5620_v51  ;;  %v4287_v19 = vpop.f32.mrb[1].mxu0 }
 0x1c8   : > { %v5823_v2 = vadd.f32 %v4287_v19, %v1758_v36  ;;  %v5791_v3 = vpop.f32.mrb[2].mxu0 }
 0x1c9   : > { %v4455_v4 = vadd.f32 %v5822_v1, %v7048_v0  ;;  %v5824_v6 = vadd.f32 %v5791_v3, %v5621_v59  ;;  %v4290_v5 = vpop.f32.mrb[3].mxu0 }
 0x1ca   : > { %v4453_v61 = vadd.f32 %v5823_v2, %v7048_v0  ;;  %v5825_v7 = vadd.f32 %v4290_v5, %v1761_v38 }
 0x1cb   : > { %v4487_v10 = vmax.f32 %v4455_v4, 0.0  ;;  %v4456_v11 = vadd.f32 %v5824_v6, %v7048_v0 }
 0x1cc   : > { %v4485_v12 = vmax.f32 %v4453_v61, 0.0  ;;  %v4454_v13 = vadd.f32 %v5825_v7, %v7048_v0 }
 0x1cd   : > { %v5331_v16 = vpack.c.bf16 %v4487_v10, %v4487_v10  ;;  %v4488_v62 = vmax.f32 %v4456_v11, 0.0 }
 0x1ce   : > { %v5329_v9 = vpack.c.bf16 %v4485_v12, %v4485_v12  ;;  %v4486_v14 = vmax.f32 %v4454_v13, 0.0  ;;  %v5794_v18 = vpop.f32.mrb[4].mxu0 }
 0x1cf   : > { %4648 = vst.msk [vmem:[%s7057_s16 + $0x8] sm:$0xf] %vm4645_vm6, %v5331_v16  ;;  %v5332_v15 = vpack.c.bf16 %v4488_v62, %v4488_v62  ;;  %v5826_v21 = vadd.f32 %v5794_v18, %v5624_v43  ;;  %v4303_v23 = vpop.f32.mrb[5].mxu0 }
 0x1d0   : > { %4646 = vst.msk [vmem:[%s7057_s16] sm:$0xf] %vm4645_vm6, %v5329_v9  ;;  %v5330_v25 = vpack.c.bf16 %v4486_v14, %v4486_v14  ;;  %v5827_v17 = vadd.f32 %v4303_v23, %v1774_v52  ;;  %v5795_v26 = vpop.f32.mrb[6].mxu0 }
 0x1d1   : > { %4649 = vst.msk [vmem:[%s7057_s16 + $0xc] sm:$0xf] %vm4645_vm6, %v5332_v15  ;;  %v4459_v28 = vadd.f32 %v5826_v21, %v7048_v0  ;;  %v5828_v29 = vadd.f32 %v5795_v26, %v5625_v53  ;;  %v4306_v30 = vpop.f32.mrb[7].mxu0 }
 0x1d2   : > { %4647 = vst.msk [vmem:[%s7057_s16 + $0x4] sm:$0xf] %vm4645_vm6, %v5330_v25  ;;  %v4457_v22 = vadd.f32 %v5827_v17, %v7048_v0  ;;  %v5829_v60 = vadd.f32 %v4306_v30, %v1777_v54 }
 0x1d3   : > { %v4491_v33 = vmax.f32 %v4459_v28, 0.0  ;;  %v4460_v31 = vadd.f32 %v5828_v29, %v7048_v0 }
 0x1d4   : > { %v4489_v8 = vmax.f32 %v4457_v22, 0.0  ;;  %v4458_v35 = vadd.f32 %v5829_v60, %v7048_v0 }
 0x1d5   : > { %v5335_v27 = vpack.c.bf16 %v4491_v33, %v4491_v33  ;;  %v4492_v34 = vmax.f32 %v4460_v31, 0.0 }
 0x1d6   : > { %v5333_v24 = vpack.c.bf16 %v4489_v8, %v4489_v8  ;;  %v4490_v37 = vmax.f32 %v4458_v35, 0.0  ;;  %v5798_v39 = vpop.f32.mrb[8].mxu0 }
 0x1d7   : > { %4652 = vst.msk [vmem:[%s7057_s16 + $0x18] sm:$0xf] %vm4645_vm6, %v5335_v27  ;;  %v5336_v41 = vpack.c.bf16 %v4492_v34, %v4492_v34  ;;  %v5830_v42 = vadd.f32 %v5798_v39, %v5628_v56  ;;  %v4319_v20 = vpop.f32.mrb[9].mxu0 }
 0x1d8   : > { %4650 = vst.msk [vmem:[%s7057_s16 + $0x10] sm:$0xf] %vm4645_vm6, %v5333_v24  ;;  %v5334_v44 = vpack.c.bf16 %v4490_v37, %v4490_v37  ;;  %v5831_v32 = vadd.f32 %v4319_v20, %v1790_v47  ;;  %v5799_v45 = vpop.f32.mrb[10].mxu0 }
 0x1d9   : > { %4653 = vst.msk [vmem:[%s7057_s16 + $0x1c] sm:$0xf] %vm4645_vm6, %v5336_v41  ;;  %v4463_v46 = vadd.f32 %v5830_v42, %v7048_v0  ;;  %v5832_v49 = vadd.f32 %v5799_v45, %v7033_v40  ;;  %v4322_v51 = vpop.f32.mrb[11].mxu0 }
 0x1da   : > { %4651 = vst.msk [vmem:[%s7057_s16 + $0x14] sm:$0xf] %vm4645_vm6, %v5334_v44  ;;  %v4461_v36 = vadd.f32 %v5831_v32, %v7048_v0  ;;  %v5833_v59 = vadd.f32 %v4322_v51, %v7035_v57 }
 0x1db   : > { %v4495_v38 = vmax.f32 %v4463_v46, 0.0  ;;  %v4464_v43 = vadd.f32 %v5832_v49, %v7048_v0 }
 0x1dc   : > { %v4493_v52 = vmax.f32 %v4461_v36, 0.0  ;;  %v4462_v53 = vadd.f32 %v5833_v59, %v7048_v0 }
 0x1dd   : > { %v5339_v54 = vpack.c.bf16 %v4495_v38, %v4495_v38  ;;  %v4496_v56 = vmax.f32 %v4464_v43, 0.0 }
 0x1de   : > { %v5337_v47 = vpack.c.bf16 %v4493_v52, %v4493_v52  ;;  %v4494_v40 = vmax.f32 %v4462_v53, 0.0  ;;  %v5802_v50 = vpop.f32.mrb[12].mxu0 }
 0x1df   : > { %4656 = vst.msk [vmem:[%s7057_s16 + $0x28] sm:$0xf] %vm4645_vm6, %v5339_v54  ;;  %v5340_v1 = vpack.c.bf16 %v4496_v56, %v4496_v56  ;;  %v5834_v19 = vadd.f32 %v5802_v50, %v7037_v58  ;;  %v4335_v2 = vpop.f32.mrb[13].mxu0 }
 0x1e0   : > { %4654 = vst.msk [vmem:[%s7057_s16 + $0x20] sm:$0xf] %vm4645_vm6, %v5337_v47  ;;  %v5338_v57 = vpack.c.bf16 %v4494_v40, %v4494_v40  ;;  %v5835_v3 = vadd.f32 %v4335_v2, %v7039_v48  ;;  %v5803_v4 = vpop.f32.mrb[14].mxu0 }
 0x1e1   : > { %4657 = vst.msk [vmem:[%s7057_s16 + $0x2c] sm:$0xf] %vm4645_vm6, %v5340_v1  ;;  %v4467_v6 = vadd.f32 %v5834_v19, %v7048_v0  ;;  %v5836_v5 = vadd.f32 %v5803_v4, %v7041_v55  ;;  %v4338_v61 = vpop.f32.mrb[15].mxu0 }
 0x1e2   : > { %4655 = vst.msk [vmem:[%s7057_s16 + $0x24] sm:$0xf] %vm4645_vm6, %v5338_v57  ;;  %v4465_v7 = vadd.f32 %v5835_v3, %v7048_v0  ;;  %v5837_v58 = vadd.f32 %v4338_v61, %v7043_v63 }
 0x1e3   : > { %v4499_v10 = vmax.f32 %v4467_v6, 0.0  ;;  %v4468_v11 = vadd.f32 %v5836_v5, %v7048_v0 }
 0x1e4   : > { %v4497_v48 = vmax.f32 %v4465_v7, 0.0  ;;  %v4466_v12 = vadd.f32 %v5837_v58, %v7048_v0 }
 0x1e5   : > { %v5343_v13 = vpack.c.bf16 %v4499_v10, %v4499_v10  ;;  %v4500_v16 = vmax.f32 %v4468_v11, 0.0 }
 0x1e6   : > { %v5670_v62 = vpop.f32.mrb[16].mxu1  ;;  %v5341_v55 = vpack.c.bf16 %v4497_v48, %v4497_v48  ;;  %v4498_v9 = vmax.f32 %v4466_v12, 0.0  ;;  %v5806_v14 = vpop.f32.mrb[16].mxu0 }
 0x1e7   : > { %v2181_v18 = vpop.f32.mrb[17].mxu1  ;;  %4660 = vst.msk [vmem:[%s7057_s16 + $0x38] sm:$0xf] %vm4645_vm6, %v5343_v13  ;;  %v5344_v15 = vpack.c.bf16 %v4500_v16, %v4500_v16  ;;  %v5838_v63 = vadd.f32 %v5806_v14, %v5670_v62  ;;  %v4351_v21 = vpop.f32.mrb[17].mxu0 }
 0x1e8   : > { %v5671_v23 = vpop.f32.mrb[18].mxu1  ;;  %4658 = vst.msk [vmem:[%s7057_s16 + $0x30] sm:$0xf] %vm4645_vm6, %v5341_v55  ;;  %v5342_v25 = vpack.c.bf16 %v4498_v9, %v4498_v9  ;;  %v5839_v17 = vadd.f32 %v4351_v21, %v2181_v18  ;;  %v5807_v26 = vpop.f32.mrb[18].mxu0 }
 0x1e9   : > { %v2184_v28 = vpop.f32.mrb[19].mxu1  ;;  %4661 = vst.msk [vmem:[%s7057_s16 + $0x3c] sm:$0xf] %vm4645_vm6, %v5344_v15  ;;  %v4471_v29 = vadd.f32 %v5838_v63, %v7048_v0  ;;  %v5840_v30 = vadd.f32 %v5807_v26, %v5671_v23  ;;  %v4354_v22 = vpop.f32.mrb[19].mxu0 }
 0x1ea   : > { %4659 = vst.msk [vmem:[%s7057_s16 + $0x34] sm:$0xf] %vm4645_vm6, %v5342_v25  ;;  %v4469_v60 = vadd.f32 %v5839_v17, %v7048_v0  ;;  %v5841_v33 = vadd.f32 %v4354_v22, %v2184_v28 }
 0x1eb   : > { %v4503_v31 = vmax.f32 %v4471_v29, 0.0  ;;  %v4472_v8 = vadd.f32 %v5840_v30, %v7048_v0 }
 0x1ec   : > { %v4501_v35 = vmax.f32 %v4469_v60, 0.0  ;;  %v4470_v27 = vadd.f32 %v5841_v33, %v7048_v0 }
 0x1ed   : > { %v5347_v34 = vpack.c.bf16 %v4503_v31, %v4503_v31  ;;  %v4504_v24 = vmax.f32 %v4472_v8, 0.0 }
 0x1ee   : > { %v5674_v37 = vpop.f32.mrb[20].mxu1  ;;  %v5345_v39 = vpack.c.bf16 %v4501_v35, %v4501_v35  ;;  %v4502_v41 = vmax.f32 %v4470_v27, 0.0  ;;  %v5810_v42 = vpop.f32.mrb[20].mxu0 }
 0x1ef   : > { %v2197_v20 = vpop.f32.mrb[21].mxu1  ;;  %4664 = vst.msk [vmem:[%s7057_s16 + $0x48] sm:$0xf] %vm4645_vm6, %v5347_v34  ;;  %v5348_v44 = vpack.c.bf16 %v4504_v24, %v4504_v24  ;;  %v5842_v32 = vadd.f32 %v5810_v42, %v5674_v37  ;;  %v4367_v45 = vpop.f32.mrb[21].mxu0 }
 0x1f0   : > { %v5675_v46 = vpop.f32.mrb[22].mxu1  ;;  %4662 = vst.msk [vmem:[%s7057_s16 + $0x40] sm:$0xf] %vm4645_vm6, %v5345_v39  ;;  %v5346_v49 = vpack.c.bf16 %v4502_v41, %v4502_v41  ;;  %v5843_v51 = vadd.f32 %v4367_v45, %v2197_v20  ;;  %v5811_v36 = vpop.f32.mrb[22].mxu0 }
 0x1f1   : > { %v2200_v59 = vpop.f32.mrb[23].mxu1  ;;  %4665 = vst.msk [vmem:[%s7057_s16 + $0x4c] sm:$0xf] %vm4645_vm6, %v5348_v44  ;;  %v4475_v38 = vadd.f32 %v5842_v32, %v7048_v0  ;;  %v5844_v43 = vadd.f32 %v5811_v36, %v5675_v46  ;;  %v4370_v52 = vpop.f32.mrb[23].mxu0 }
 0x1f2   : > { %4663 = vst.msk [vmem:[%s7057_s16 + $0x44] sm:$0xf] %vm4645_vm6, %v5346_v49  ;;  %v4473_v53 = vadd.f32 %v5843_v51, %v7048_v0  ;;  %v5845_v54 = vadd.f32 %v4370_v52, %v2200_v59 }
 0x1f3   : > { %v4507_v56 = vmax.f32 %v4475_v38, 0.0  ;;  %v4476_v47 = vadd.f32 %v5844_v43, %v7048_v0 }
 0x1f4   : > { %v4505_v40 = vmax.f32 %v4473_v53, 0.0  ;;  %v4474_v50 = vadd.f32 %v5845_v54, %v7048_v0 }
 0x1f5   : > { %v5351_v1 = vpack.c.bf16 %v4507_v56, %v4507_v56  ;;  %v4508_v19 = vmax.f32 %v4476_v47, 0.0 }
 0x1f6   : > { %v5678_v2 = vpop.f32.mrb[24].mxu1  ;;  %v5349_v57 = vpack.c.bf16 %v4505_v40, %v4505_v40  ;;  %v4506_v3 = vmax.f32 %v4474_v50, 0.0  ;;  %v5814_v4 = vpop.f32.mrb[24].mxu0 }
 0x1f7   : > { %v2213_v6 = vpop.f32.mrb[25].mxu1  ;;  %4668 = vst.msk [vmem:[%s7057_s16 + $0x58] sm:$0xf] %vm4645_vm6, %v5351_v1  ;;  %v5352_v5 = vpack.c.bf16 %v4508_v19, %v4508_v19  ;;  %v5846_v61 = vadd.f32 %v5814_v4, %v5678_v2  ;;  %v4383_v7 = vpop.f32.mrb[25].mxu0 }
 0x1f8   : > { %v5679_v58 = vpop.f32.mrb[26].mxu1  ;;  %4666 = vst.msk [vmem:[%s7057_s16 + $0x50] sm:$0xf] %vm4645_vm6, %v5349_v57  ;;  %v5350_v10 = vpack.c.bf16 %v4506_v3, %v4506_v3  ;;  %v5847_v11 = vadd.f32 %v4383_v7, %v2213_v6  ;;  %v5815_v48 = vpop.f32.mrb[26].mxu0 }
 0x1f9   : > { %v2216_v12 = vpop.f32.mrb[27].mxu1  ;;  %4669 = vst.msk [vmem:[%s7057_s16 + $0x5c] sm:$0xf] %vm4645_vm6, %v5352_v5  ;;  %v4479_v13 = vadd.f32 %v5846_v61, %v7048_v0  ;;  %v5848_v16 = vadd.f32 %v5815_v48, %v5679_v58  ;;  %v4386_v62 = vpop.f32.mrb[27].mxu0 }
 0x1fa   : > { %4667 = vst.msk [vmem:[%s7057_s16 + $0x54] sm:$0xf] %vm4645_vm6, %v5350_v10  ;;  %v4477_v55 = vadd.f32 %v5847_v11, %v7048_v0  ;;  %v5849_v9 = vadd.f32 %v4386_v62, %v2216_v12 }
 0x1fb   : > { %v4511_v14 = vmax.f32 %v4479_v13, 0.0  ;;  %v4480_v18 = vadd.f32 %v5848_v16, %v7048_v0 }
 0x1fc   : > { %v4509_v15 = vmax.f32 %v4477_v55, 0.0  ;;  %v4478_v63 = vadd.f32 %v5849_v9, %v7048_v0 }
 0x1fd   : > { %v5355_v21 = vpack.c.bf16 %v4511_v14, %v4511_v14  ;;  %v4512_v23 = vmax.f32 %v4480_v18, 0.0 }
 0x1fe   : > { %v5682_v25 = vpop.f32.mrb[28].mxu1  ;;  %v5353_v17 = vpack.c.bf16 %v4509_v15, %v4509_v15  ;;  %v4510_v26 = vmax.f32 %v4478_v63, 0.0  ;;  %v5818_v28 = vpop.f32.mrb[28].mxu0 }
 0x1ff   : > { %v2229_v29 = vpop.f32.mrb[29].mxu1  ;;  %4672 = vst.msk [vmem:[%s7057_s16 + $0x68] sm:$0xf] %vm4645_vm6, %v5355_v21  ;;  %v5356_v30 = vpack.c.bf16 %v4512_v23, %v4512_v23  ;;  %v5850_v22 = vadd.f32 %v5818_v28, %v5682_v25  ;;  %v4399_v60 = vpop.f32.mrb[29].mxu0 }
 0x200   : > { %v5683_v33 = vpop.f32.mrb[30].mxu1  ;;  %4670 = vst.msk [vmem:[%s7057_s16 + $0x60] sm:$0xf] %vm4645_vm6, %v5353_v17  ;;  %v5354_v31 = vpack.c.bf16 %v4510_v26, %v4510_v26  ;;  %v5851_v8 = vadd.f32 %v4399_v60, %v2229_v29  ;;  %v5819_v35 = vpop.f32.mrb[30].mxu0 }
 0x201   : > { %v2232_v27 = vpop.f32.mrb[31].mxu1  ;;  %4673 = vst.msk [vmem:[%s7057_s16 + $0x6c] sm:$0xf] %vm4645_vm6, %v5356_v30  ;;  %v4483_v34 = vadd.f32 %v5850_v22, %v7048_v0  ;;  %v5852_v24 = vadd.f32 %v5819_v35, %v5683_v33  ;;  %v4402_v37 = vpop.f32.mrb[31].mxu0 }
 0x202   : > { %4671 = vst.msk [vmem:[%s7057_s16 + $0x64] sm:$0xf] %vm4645_vm6, %v5354_v31  ;;  %v4481_v39 = vadd.f32 %v5851_v8, %v7048_v0  ;;  %v5853_v41 = vadd.f32 %v4402_v37, %v2232_v27 }
 0x203   : > { %v4515_v42 = vmax.f32 %v4483_v34, 0.0  ;;  %v4484_v20 = vadd.f32 %v5852_v24, %v7048_v0 }
 0x204   : > { %v4513_v44 = vmax.f32 %v4481_v39, 0.0  ;;  %v4482_v32 = vadd.f32 %v5853_v41, %v7048_v0 }
 0x205   : > { %v5359_v45 = vpack.c.bf16 %v4515_v42, %v4515_v42  ;;  %v4516_v46 = vmax.f32 %v4484_v20, 0.0 }
 0x206   : > { %v5357_v49 = vpack.c.bf16 %v4513_v44, %v4513_v44  ;;  %v4514_v51 = vmax.f32 %v4482_v32, 0.0 }
 0x207   : > { %4676 = vst.msk [vmem:[%s7057_s16 + $0x78] sm:$0xf] %vm4645_vm6, %v5359_v45  ;;  %v5360_v36 = vpack.c.bf16 %v4516_v46, %v4516_v46 }
 0x208   : > { %4674 = vst.msk [vmem:[%s7057_s16 + $0x70] sm:$0xf] %vm4645_vm6, %v5357_v49  ;;  %v5358_v59 = vpack.c.bf16 %v4514_v51, %v4514_v51 }
 0x209   : > { %4677 = vst.msk [vmem:[%s7057_s16 + $0x7c] sm:$0xf] %vm4645_vm6, %v5360_v36 }
 0x20a   : > { %4675 = vst.msk [vmem:[%s7057_s16 + $0x74] sm:$0xf] %vm4645_vm6, %v5358_v59 }
 0x20b PF: > { %s13_s12 = sadd.s32 1, %s6190_s12  }
 0x20c   : > { %p10_p4 = scmp.ge.s32.totalorder %s13_s12, 4  }
 0x20e   :  { %12 = sbr.rel (!%p10_p4) target bundleno = 1 (0x1), region = 75 }

// kernel: db_model_forward.17
= control target key start
LH: loop header
LB: loop body
LE: loop exit
PB: predicated region body
PF: predicated region fallthrough
CT: control target
= control target key end

     0   :  { %s1314_s12 = smov 0   ;;  %s1503_s0 = inlined_call_operand.vmem [shape: bf16[2,4,3,3,24], index: 0, kind: input, shape index: {}]   ;;  %s1504_s1 = inlined_call_operand.vmem [shape: bf16[9,24,32], index: 1, kind: input, shape index: {}]   ;;  %s1505_s2 = inlined_call_operand.vmem [shape: f32[1,32], index: 2, kind: input, shape index: {}]   ;;  %s1506_s3 = inlined_call_operand.vmem [shape: bf16[2,4,32], index: 3, kind: output, shape index: {}]  }
   0x1 LB: > { %s1067_s13 = sadd.s32 4294967295, %s1289_s12   ;;  %p1071_p0 = scmp.ge.s32.totalorder %s1289_s12, 1  ;;  %s1289_s12 = sphi %s1314_s12, %s13_s12  }
   0x2   : > { %p137_p1 = scmp.lt.s32.totalorder %s1289_s12, 3 }
   0x4   : > { %p138_p2 = pnand %p1071_p0, %p137_p1 }
   0x5   : > { %v1265_v0 = vld [vmem:[%s1504_s1 + $0xc] sm:$0xff] (!%p138_p2)   ;;  %v188_v1 = vlaneseq (!%p138_p2)  ;;  %v1291_v2 = vmov (!%p138_p2), 0.0   ;;  %v1266_v3 = vld [vmem:[%s1504_s1] sm:$0xff] (!%p138_p2)   ;;  %vm212_vm0 = vcmask (!%p138_p2), 1043456   ;;  %v1267_v4 = vld [vmem:[%s1504_s1 + $0x14] ss:$0 sps:$4 sm:$0xff] (!%p138_p2)  }
   0x6   : > { %141 = sbr.rel (%p138_p2) target bundleno = 277 (0x115), region = 32  ;;  %1181 = vmatprep.subr.bf16.mxu0 (!%p138_p2), %v1291_v2  ;;  %1189 = vmatprep.subr.bf16.mxu1 (!%p138_p2), %v1291_v2  ;;  %v1268_v5 = vld [vmem:[%s1504_s1 + $0x8] ss:$0 sps:$4 sm:$0xff] (!%p138_p2)   ;;  %p160_p3 = scmp.lt.s32.totalorder (!%p138_p2), %s1067_s13, 1  ;;  %v214_v6 = vsel (!%p138_p2), %vm212_vm0, %v1267_v4, 0  ;;  %vm1292_vm1 = vmmov (!%p138_p2), 0  }
   0x7   : > { %1182 = vmatpush3.bf16.msra.mxu0 (!%p138_p2), %v1265_v0  ;;  %1190 = vmatpush3.bf16.msra.mxu1 (!%p138_p2), %v1266_v3  ;;  %v1293_v7 = vmov (!%p138_p2), 1966171168   ;;  %v189_v9 = vshrl.u32 (!%p138_p2), %v188_v1, 7  ;;  %v286_v10 = vsel (!%p138_p2), %vm212_vm0, %v1268_v5, 0  ;;  %vm348_vm2 = vsmask.f32 (!%p138_p2), 256 }
   0x8   : > { %1183 = vmatprep.subr.bf16.mxu0 (!%p138_p2), %v1291_v2  ;;  %1191 = vmatprep.subr.bf16.mxu1 (!%p138_p2), %v1291_v2  ;;  %v186_v8 = vunpack.c.l.s4 (!%p138_p2), %v1293_v7  ;;  %vm349_vm3 = vsmask.f32 (!%p138_p2), 1284  ;;  %vm351_vm5 = vsmask.f32 (!%p138_p2), 2312  ;;  %vm353_vm6 = vsmask.f32 (!%p138_p2), 3340 }
   0x9   : > { %1185 = vmatprep.mubr.msk.bf16.mxu0 (!%p138_p2), %vm1292_vm1, %v1291_v2  ;;  %1193 = vmatprep.mubr.msk.bf16.mxu1 (!%p138_p2), %vm1292_vm1, %v1291_v2  ;;  %vm350_vm4 = vmor (!%p138_p2), %vm348_vm2, %vm349_vm3  ;;  %vm208_vm7 = vcmask (!%p138_p2), 195584   ;;  %vm355_vm9 = vsmask.f32 (!%p138_p2), 4368  ;;  %v1269_v19 = vld [vmem:[%s1504_s1 + $0x18] sm:$0xff] (!%p138_p2)   ;;  %vm357_vm11 = vsmask.f32 (!%p138_p2), 5396 }
   0xa   : > { %v187_v11 = vunpack.c.0.s8 (!%p138_p2), %v186_v8  ;;  %vm352_vm8 = vmor (!%p138_p2), %vm350_vm4, %vm351_vm5  ;;  %v1271_v22 = vld [vmem:[%s1504_s1 + $0x20] ss:$0 sps:$4 sm:$0xff] (!%p138_p2)   ;;  %v1272_v23 = vld [vmem:[%s1504_s1 + $0x2c] ss:$0 sps:$4 sm:$0xff] (!%p138_p2)   ;;  %vm359_vm13 = vsmask.f32 (!%p138_p2), 6424 }
   0xb   : > { %1184 = vmatpush3.bf16.msra.mxu0 (!%p138_p2), %v214_v6  ;;  %1192 = vmatpush3.bf16.msra.mxu1 (!%p138_p2), %v286_v10  ;;  %vm354_vm10 = vmor (!%p138_p2), %vm352_vm8, %vm353_vm6  ;;  %v1270_v27 = vld [vmem:[%s1504_s1 + $0x24] sm:$0xff] (!%p138_p2)   ;;  %vm361_vm15 = vsmask.f32 (!%p138_p2), 7452  ;;  %v413_v42 = vsel (!%p138_p2), %vm212_vm0, %v1271_v22, 0  ;;  %v493_v43 = vsel (!%p138_p2), %vm212_vm0, %v1272_v23, 0  ;;  %v1273_v51 = vld [vmem:[%s1504_s1 + $0x30] sm:$0xff] (!%p138_p2)  }
   0xc   : > { %1197 = vmatprep.subr.bf16.mxu0 (!%p138_p2), %v1291_v2  ;;  %1205 = vmatprep.subr.bf16.mxu1 (!%p138_p2), %v1291_v2  ;;  %v1354_v12 = vsub.s32 (!%p138_p2), %v187_v11, %v189_v9  ;;  %vm356_vm12 = vmor (!%p138_p2), %vm354_vm10, %vm355_vm9  ;;  %v1275_v47 = vld [vmem:[%s1504_s1 + $0x38] ss:$0 sps:$4 sm:$0xff] (!%p138_p2)   ;;  %v1274_v57 = vld [vmem:[%s1504_s1 + $0x3c] sm:$0xff] (!%p138_p2)  }
   0xd   : > { %s1510_s13 = smov (!%p160_p3, %s1067_s13), 1  ;;  %vm358_vm14 = vmor %vm356_vm12, %vm357_vm11  ;;  %v1276_v60 = vld [vmem:[%s1504_s1 + $0x44] ss:$0 sps:$4 sm:$0xff]   ;;  %v573_v62 = vsel %vm212_vm0, %v1275_v47, 0  ;;  %v1280_v23 = vld [vmem:[%s1504_s1 + $0x5c] ss:$0 sps:$4 sm:$0xff]  }
   0xe   : > { %s1253_s22 = smul.u32 24, %s1510_s13  ;;  %vm360_vm2 = vmor %vm358_vm14, %vm359_vm13  ;;  %v686_v8 = vsel %vm212_vm0, %v1276_v60, 0  ;;  %s1073_s4 = sshll.u32 %s1510_s13, 1 }
   0xf   : > { %vm1379_vm3 = vmor %vm360_vm2, %vm361_vm15  ;;  %s168_s7 = scalar_lea.vmem %s1506_s3, %s1073_s4 }
  0x10   : > { %s1352_s25 = scalar_lea.vmem %s1503_s0, %s1253_s22 }
  0x11   : > { %v1074_v13 = vld [vmem:[%s1352_s25 + $0x6] sm:$0x1]  ;;  %v1075_v14 = vld [vmem:[%s1352_s25 + $0x8] sm:$0x1]  ;;  %v170_v15 = vld [vmem:[%s1352_s25] sm:$0x1] }
  0x12   : > { %v184_v16 = vcombine.low %v1074_v13, %v1075_v14  ;;  %v171_v17 = vld [vmem:[%s1352_s25 + $0x2] sm:$0x1]  ;;  %v1085_v20 = vld.sshfl [vmem:[%s1352_s25] sm:$0x11 pattern:$0x75316420] }
  0x13   : > { %v258_v18 = vcombine.low %v170_v15, %v171_v17  ;;  %v1086_v24 = vld.sshfl [vmem:[%s1352_s25 + $0x2] sm:$0x11 pattern:$0x75316420]  ;;  %v339_v25 = vcombine.high %v1085_v20, %v1085_v20  ;;  %v364_v29 = vshrl.u32 %v1085_v20, 16  ;;  %v1277_v15 = vld [vmem:[%s1504_s1 + $0x48] sm:$0xff]  }
  0x14   : > { %v191_v21 = vrot.slane %v184_v16, %v1354_v12  ;;  %v347_v28 = vcombine.high %v1086_v24, %v1086_v24  ;;  %v373_v32 = vshrl.u32 %v1086_v24, 16  ;;  %v1095_v33 = vld [vmem:[%s1352_s25 + $0xc] sm:$0x1]  ;;  %v1096_v37 = vld [vmem:[%s1352_s25 + $0xe] sm:$0x1] }
  0x15   : > { %v265_v26 = vrot.slane %v258_v18, %v1354_v12  ;;  %v369_v31 = vshll.u32 %v339_v25, 16  ;;  %v465_v39 = vcombine.low %v1095_v33, %v1096_v37  ;;  %v1103_v41 = vld [vmem:[%s1352_s25 + $0x12] sm:$0x1]  ;;  %v1104_v46 = vld [vmem:[%s1352_s25 + $0x14] sm:$0x1] }
  0x16   : > { %v198_v30 = vrot.slane %v191_v21, %v1354_v12  ;;  %v378_v36 = vshll.u32 %v347_v28, 16  ;;  %v545_v49 = vcombine.low %v1103_v41, %v1104_v46  ;;  %v1113_v50 = vld.sshfl [vmem:[%s1352_s25 + $0xc] sm:$0x11 pattern:$0x75316420]  ;;  %v846_v28 = vsel %vm212_vm0, %v1280_v23, 0 }
  0x17   : > { %v272_v34 = vrot.slane %v265_v26, %v1354_v12  ;;  %v371_v38 = vsel %vm1379_vm3, %v364_v29, %v369_v31  ;;  %v472_v45 = vrot.slane %v465_v39, %v1354_v12  ;;  %v1114_v53 = vld.sshfl [vmem:[%s1352_s25 + $0xe] sm:$0x11 pattern:$0x75316420]  ;;  %v627_v54 = vcombine.high %v1113_v50, %v1113_v50  ;;  %v1123_v1 = vld [vmem:[%s1352_s25 + $0x2] sm:$0x1] }
  0x18   : > { %1186 = vmatmul.mubr.msk.bf16.vlgmr.msra.gmra.mrb[0].mxu0 %vm208_vm7, %v198_v30  ;;  %v1390_v40 = vsel %vm1379_vm3, %v373_v32, %v378_v36  ;;  %v637_v55 = vshrl.u32 %v1113_v50, 16  ;;  %v635_v58 = vcombine.high %v1114_v53, %v1114_v53  ;;  %v646_v59 = vshrl.u32 %v1114_v53, 16  ;;  %v1124_v4 = vld [vmem:[%s1352_s25 + $0x4] sm:$0x1]  ;;  %v1131_v6 = vld [vmem:[%s1352_s25 + $0x8] sm:$0x1] }
  0x19   : > { %1194 = vmatmul.mubr.msk.bf16.vlgmr.msra.gmra.mrb[0].mxu1 %vm208_vm7, %v272_v34  ;;  %1198 = vmatpush3.bf16.msra.mxu0 %v1269_v19  ;;  %v385_v44 = vcombine.low %v371_v38, %v1390_v40  ;;  %v479_v52 = vrot.slane %v472_v45, %v1354_v12  ;;  %v642_v61 = vshll.u32 %v627_v54, 16  ;;  %v552_v63 = vrot.slane %v545_v49, %v1354_v12  ;;  %v1132_v7 = vld [vmem:[%s1352_s25 + $0xa] sm:$0x1]  ;;  %v1278_v19 = vld [vmem:[%s1504_s1 + $0x54] sm:$0xff]   ;;  %v1279_v20 = vld [vmem:[%s1504_s1 + $0x50] ss:$0 sps:$4 sm:$0xff]  }
  0x1a   : > { %1199 = vmatprep.subr.bf16.mxu0 %v1291_v2  ;;  %1206 = vmatpush3.bf16.msra.mxu1 %v1270_v27  ;;  %v651_v0 = vshll.u32 %v635_v58, 16  ;;  %v1142_v10 = vld.sshfl [vmem:[%s1352_s25 + $0x4] sm:$0x11 pattern:$0x75316420]  ;;  %v738_v13 = vcombine.low %v1123_v1, %v1124_v4  ;;  %v818_v17 = vcombine.low %v1131_v6, %v1132_v7  ;;  %v766_v27 = vsel %vm212_vm0, %v1279_v20, 0 }
  0x1b   : > { %1207 = vmatprep.subr.bf16.mxu1 %v1291_v2  ;;  %1201 = vmatprep.mubr.msk.bf16.mxu0 %vm1292_vm1, %v1291_v2  ;;  %v392_v48 = vrot.slane %v385_v44, %v1354_v12  ;;  %v644_v3 = vsel %vm1379_vm3, %v637_v55, %v642_v61  ;;  %v559_v11 = vrot.slane %v552_v63, %v1354_v12  ;;  %v919_v18 = vshrl.u32 %v1142_v10, 16  ;;  %v1281_v31 = vld [vmem:[%s1504_s1 + $0x60] sm:$0xff]   ;;  %v1282_v33 = vld [vmem:[%s1504_s1 + $0x68] ss:$0 sps:$4 sm:$0xff]  }
  0x1c   : > { %1209 = vmatprep.mubr.msk.bf16.mxu1 %vm1292_vm1, %v1291_v2  ;;  %v653_v5 = vsel %vm1379_vm3, %v646_v59, %v651_v0  ;;  %v908_v14 = vcombine.high %v1142_v10, %v1142_v10  ;;  %v745_v24 = vrot.slane %v738_v13, %v1354_v12  ;;  %v825_v25 = vrot.slane %v818_v17, %v1354_v12  ;;  %v1151_v13 = vld [vmem:[%s1505_s2] ss:$0 sm:$0xff] }
  0x1d   : > { %1200 = vmatpush3.bf16.msra.mxu0 %v413_v42  ;;  %v399_v56 = vrot.slane %v392_v48, %v1354_v12  ;;  %v658_v9 = vcombine.low %v644_v3, %v653_v5  ;;  %v959_v35 = vsel %vm212_vm0, %v1282_v33, 0  ;;  %vm1012_vm0 = vcmask 254976  }
  0x1e   : > { %1208 = vmatpush3.bf16.msra.mxu1 %v493_v43  ;;  %1213 = vmatprep.subr.bf16.mxu0 %v1291_v2  ;;  %v924_v21 = vshll.u32 %v908_v14, 16  ;;  %v752_v29 = vrot.slane %v745_v24, %v1354_v12  ;;  %v832_v32 = vrot.slane %v825_v25, %v1354_v12 }
  0x1f   : > { %1221 = vmatprep.subr.bf16.mxu1 %v1291_v2  ;;  %v665_v16 = vrot.slane %v658_v9, %v1354_v12 }
  0x20   : > { %1202 = vmatmul.mubr.msk.bf16.vlgmr.msra.gmra.mrb[4].mxu0 %vm208_vm7, %v399_v56  ;;  %v926_v26 = vsel %vm1379_vm3, %v919_v18, %v924_v21 }
  0x21   : > { %1214 = vmatpush3.bf16.msra.mxu0 %v1273_v51  ;;  %1210 = vmatmul.mubr.msk.bf16.vlgmr.msra.gmra.mrb[4].mxu1 %vm208_vm7, %v479_v52  ;;  %v672_v22 = vrot.slane %v665_v16, %v1354_v12  ;;  %v931_v30 = vcombine.low %v1390_v40, %v926_v26 }
  0x22   : > { %1215 = vmatprep.subr.bf16.mxu0 %v1291_v2  ;;  %1222 = vmatpush3.bf16.msra.mxu1 %v1274_v57 }
  0x23   : > { %1223 = vmatprep.subr.bf16.mxu1 %v1291_v2  ;;  %1217 = vmatprep.mubr.msk.bf16.mxu0 %vm1292_vm1, %v1291_v2  ;;  %v938_v34 = vrot.slane %v931_v30, %v1354_v12 }
  0x24   : > { %1225 = vmatprep.mubr.msk.bf16.mxu1 %vm1292_vm1, %v1291_v2 }
  0x25   : > { %1216 = vmatpush3.bf16.msra.mxu0 %v573_v62  ;;  %v945_v36 = vrot.slane %v938_v34, %v1354_v12 }
  0x26   : > { %1224 = vmatpush3.bf16.msra.mxu1 %v686_v8  ;;  %1229 = vmatprep.subr.bf16.mxu0 %v1291_v2 }
  0x27   : > { %1237 = vmatprep.subr.bf16.mxu1 %v1291_v2 }
  0x28   : > { %1218 = vmatmul.mubr.msk.bf16.vlgmr.msra.gmra.mrb[8].mxu0 %vm208_vm7, %v559_v11 }
  0x29   : > { %1230 = vmatpush3.bf16.msra.mxu0 %v1277_v15  ;;  %1226 = vmatmul.mubr.msk.bf16.vlgmr.msra.gmra.mrb[8].mxu1 %vm208_vm7, %v672_v22 }
  0x2a   : > { %1231 = vmatprep.subr.bf16.mxu0 %v1291_v2  ;;  %1238 = vmatpush3.bf16.msra.mxu1 %v1278_v19 }
  0x2b   : > { %1239 = vmatprep.subr.bf16.mxu1 %v1291_v2  ;;  %1233 = vmatprep.mubr.msk.bf16.mxu0 %vm1292_vm1, %v1291_v2 }
  0x2c   : > { %1241 = vmatprep.mubr.msk.bf16.mxu1 %vm1292_vm1, %v1291_v2 }
  0x2d   : > { %1232 = vmatpush3.bf16.msra.mxu0 %v766_v27 }
  0x2e   : > { %1240 = vmatpush3.bf16.msra.mxu1 %v846_v28  ;;  %1245 = vmatprep.subr.bf16.mxu0 %v1291_v2 }
  0x30   : > { %1234 = vmatmul.mubr.msk.bf16.vlgmr.msra.gmra.mrb[12].mxu0 %vm208_vm7, %v752_v29 }
  0x31   : > { %1246 = vmatpush3.bf16.msra.mxu0 %v1281_v31  ;;  %1242 = vmatmul.mubr.msk.bf16.vlgmr.msra.gmra.mrb[12].mxu1 %vm208_vm7, %v832_v32 }
  0x32   : > { %1247 = vmatprep.subr.bf16.mxu0 %v1291_v2  ;;  %1249 = vmatprep.mubr.msk.bf16.mxu0 %vm1292_vm1, %v1291_v2 }
  0x35   : > { %1248 = vmatpush3.bf16.msra.mxu0 %v959_v35 }
  0x38   : > { %1250 = vmatmul.mubr.msk.bf16.vlgmr.msra.gmra.mrb[16].mxu0 %vm208_vm7, %v945_v36 }
  0xeb   : > { %v250_v37 = vpop.f32.mrb[0].mxu0 }
  0xec   : > { %v322_v38 = vpop.f32.mrb[0].mxu1  ;;  %v1187_v39 = vpop.f32.mrb[1].mxu0 }
  0xed   : > { %v323_v40 = vadd.f32 %v322_v38, %v250_v37  ;;  %v253_v41 = vpop.f32.mrb[2].mxu0  ;;  %v1195_v42 = vpop.f32.mrb[1].mxu1 }
  0xee   : > { %v1188_v43 = vpop.f32.mrb[3].mxu0  ;;  %v325_v44 = vpop.f32.mrb[2].mxu1 }
  0xef   : > { %v1196_v45 = vpop.f32.mrb[3].mxu1 }
  0xf3   : > { %v449_v46 = vpop.f32.mrb[4].mxu0 }
  0xf4   : > { %v455_v47 = vadd.f32 %v449_v46, %v323_v40  ;;  %v1203_v48 = vpop.f32.mrb[5].mxu0  ;;  %v529_v49 = vpop.f32.mrb[4].mxu1 }
  0xf5   : > { %v452_v50 = vpop.f32.mrb[6].mxu0  ;;  %v1211_v2 = vpop.f32.mrb[5].mxu1 }
  0xf6   : > { %v535_v51 = vadd.f32 %v529_v49, %v455_v47  ;;  %v1204_v12 = vpop.f32.mrb[7].mxu0  ;;  %v532_v52 = vpop.f32.mrb[6].mxu1 }
  0xf7   : > { %v1212_v53 = vpop.f32.mrb[7].mxu1 }
  0xfb   : > { %v609_v54 = vpop.f32.mrb[8].mxu0 }
  0xfc   : > { %v615_v55 = vadd.f32 %v609_v54, %v535_v51  ;;  %v1219_v56 = vpop.f32.mrb[9].mxu0  ;;  %v722_v57 = vpop.f32.mrb[8].mxu1 }
  0xfd   : > { %v612_v58 = vpop.f32.mrb[10].mxu0  ;;  %v1227_v59 = vpop.f32.mrb[9].mxu1 }
  0xfe   : > { %v728_v60 = vadd.f32 %v722_v57, %v615_v55  ;;  %v1220_v61 = vpop.f32.mrb[11].mxu0  ;;  %v725_v62 = vpop.f32.mrb[10].mxu1 }
  0xff   : > { %v1228_v63 = vpop.f32.mrb[11].mxu1 }
 0x103   : > { %v802_v0 = vpop.f32.mrb[12].mxu0 }
 0x104   : > { %v808_v1 = vadd.f32 %v802_v0, %v728_v60  ;;  %v1235_v3 = vpop.f32.mrb[13].mxu0  ;;  %v882_v4 = vpop.f32.mrb[12].mxu1 }
 0x105   : > { %v805_v5 = vpop.f32.mrb[14].mxu0  ;;  %v1243_v6 = vpop.f32.mrb[13].mxu1 }
 0x106   : > { %v888_v7 = vadd.f32 %v882_v4, %v808_v1  ;;  %v1236_v8 = vpop.f32.mrb[15].mxu0  ;;  %v885_v9 = vpop.f32.mrb[14].mxu1 }
 0x107   : > { %v1244_v10 = vpop.f32.mrb[15].mxu1 }
 0x10b   : > { %v995_v11 = vpop.f32.mrb[16].mxu0 }
 0x10c   : > { %v1001_v14 = vadd.f32 %v995_v11, %v888_v7  ;;  %v1251_v15 = vpop.f32.mrb[17].mxu0 }
 0x10d   : > { %v998_v16 = vpop.f32.mrb[18].mxu0 }
 0x10e   : > { %v1009_v17 = vadd.f32 %v1151_v13, %v1001_v14  ;;  %v1252_v18 = vpop.f32.mrb[19].mxu0 }
 0x110   : > { %v1010_v19 = vmax.f32 %v1009_v17, 0.0 }
 0x112   : > { %v1011_v20 = vpack.c.bf16 %v1010_v19, %v1010_v19 }
 0x114   : > { %1013 = vst.msk [vmem:[%s168_s7] sm:$0x3] %vm1012_vm0, %v1011_v20 }
 0x115 PF: > { %s13_s12 = sadd.s32 1, %s1289_s12  }
 0x116   : > { %p10_p4 = scmp.ge.s32.totalorder %s13_s12, 4  }
 0x118   :  { %12 = sbr.rel (!%p10_p4) target bundleno = 1 (0x1), region = 75 }

// kernel: db_model_forward.19
= control target key start
LH: loop header
LB: loop body
LE: loop exit
PB: predicated region body
PF: predicated region fallthrough
CT: control target
= control target key end

     0   :  { %s351_s12 = smov 0   ;;  %s380_s0 = inlined_call_operand.vmem [shape: bf16[2,1,1,1,48], index: 0, kind: input, shape index: {}]   ;;  %s381_s1 = inlined_call_operand.vmem [shape: bf16[1,48,32], index: 1, kind: input, shape index: {}]   ;;  %s382_s2 = inlined_call_operand.vmem [shape: f32[1,32], index: 2, kind: input, shape index: {}]   ;;  %s383_s3 = inlined_call_operand.vmem [shape: bf16[2,1,32], index: 3, kind: output, shape index: {}]  }
   0x1 LB: > { %s283_s13 = sadd.s32 4294967295, %s327_s12   ;;  %p287_p0 = scmp.ge.s32.totalorder %s327_s12, 1  ;;  %s327_s12 = sphi %s351_s12, %s13_s12  }
   0x2   : > { %p135_p1 = scmp.lt.s32.totalorder %s327_s12, 3 }
   0x4   : > { %p136_p2 = pnand %p287_p0, %p135_p1 }
   0x5   : > { %v318_v0 = vld [vmem:[%s381_s1] sm:$0xff] (!%p136_p2)   ;;  %v329_v1 = vmov (!%p136_p2), 0.0   ;;  %v319_v2 = vld [vmem:[%s381_s1 + $0x8] sm:$0xff] (!%p136_p2)   ;;  %vm330_vm0 = vmmov (!%p136_p2), 0   ;;  %p155_p3 = scmp.lt.s32.totalorder (!%p136_p2), %s283_s13, 1  ;;  %v320_v3 = vld [vmem:[%s381_s1 + $0x10] sm:$0xff] (!%p136_p2)  }
   0x6   : > { %139 = sbr.rel (%p136_p2) target bundleno = 236 (0xec), region = 32  ;;  %298 = vmatprep.subr.bf16.mxu0 (!%p136_p2), %v329_v1  ;;  %304 = vmatprep.mubr.msk.bf16.mxu0 (!%p136_p2), %vm330_vm0, %v329_v1  ;;  %vm188_vm1 = vcmask (!%p136_p2), 392192   ;;  %v169_v5 = vld [vmem:[%s382_s2] sm:$0x1] (!%p136_p2)  ;;  %vm233_vm2 = vcmask (!%p136_p2), 253952  }
   0x7   : > { %299 = vmatpush3.bf16.msra.mxu0 (!%p136_p2), %v318_v0  ;;  %vm234_vm3 = vsmask.f32 (!%p136_p2), 256 }
   0x8   : > { %300 = vmatprep.subr.bf16.mxu0 (!%p136_p2), %v329_v1  ;;  %vm235_vm4 = vmand (!%p136_p2), %vm233_vm2, %vm234_vm3 }
   0xb   : > { %301 = vmatpush3.bf16.msra.mxu0 (!%p136_p2), %v319_v2 }
   0xc   : > { %302 = vmatprep.subr.bf16.mxu0 (!%p136_p2), %v329_v1 }
   0xd   : > { %s385_s13 = smov (!%p155_p3, %s283_s13), 1 }
   0xe   : > { %s157_s22 = scalar_lea.vmem %s380_s0, %s385_s13  ;;  %s160_s27 = scalar_lea.vmem %s383_s3, %s385_s13 }
   0xf   : > { %303 = vmatpush3.bf16.msra.mxu0 %v320_v3  ;;  %v162_v4 = vld [vmem:[%s157_s22] sm:$0x1] }
  0x10   : > { %v236_v9 = vld [vmem:[%s160_s27] sm:$0x1] }
  0x12   : > { %305 = vmatmul.mubr.msk.bf16.vlgmr.msra.gmra.mrb[0].mxu0 %vm188_vm1, %v162_v4 }
  0xe5   : > { %v226_v6 = vpop.f32.mrb[0].mxu0 }
  0xe6   : > { %v227_v7 = vadd.f32 %v226_v6, %v169_v5  ;;  %v306_v8 = vpop.f32.mrb[1].mxu0 }
  0xe7   : > { %v229_v10 = vpop.f32.mrb[2].mxu0 }
  0xe8   : > { %v232_v11 = vpack.c.bf16 %v227_v7, %v227_v7  ;;  %v307_v12 = vpop.f32.mrb[3].mxu0 }
  0xea   : > { %v237_v13 = vsel %vm235_vm4, %v232_v11, %v236_v9 }
  0xeb   : > { %238 = vst [vmem:[%s160_s27] sm:$0x1] %v237_v13 }
  0xec PF: > { %s13_s12 = sadd.s32 1, %s327_s12  }
  0xed   : > { %p10_p4 = scmp.ge.s32.totalorder %s13_s12, 4  }
  0xef   :  { %12 = sbr.rel (!%p10_p4) target bundleno = 1 (0x1), region = 62 }

// kernel: db_model_forward.18
= control target key start
LH: loop header
LB: loop body
LE: loop exit
PB: predicated region body
PF: predicated region fallthrough
CT: control target
= control target key end

     0   :  { %s1065_s12 = smov 0   ;;  %s1196_s0 = inlined_call_operand.vmem [shape: bf16[2,4,2,2,32], index: 0, kind: input, shape index: {}]   ;;  %s1197_s1 = inlined_call_operand.vmem [shape: bf16[9,32,48], index: 1, kind: input, shape index: {}]   ;;  %s1198_s2 = inlined_call_operand.vmem [shape: f32[1,48], index: 2, kind: input, shape index: {}]   ;;  %s1199_s3 = inlined_call_operand.vmem [shape: bf16[2,1,48], index: 3, kind: output, shape index: {}]  }
   0x1 LB: > { %s834_s13 = sadd.s32 4294967295, %s1040_s12   ;;  %p838_p0 = scmp.ge.s32.totalorder %s1040_s12, 1  ;;  %s1040_s12 = sphi %s1065_s12, %s13_s12  }
   0x2   : > { %p136_p1 = scmp.lt.s32.totalorder %s1040_s12, 3 }
   0x4   : > { %p137_p2 = pnand %p838_p0, %p136_p1 }
   0x5   : > { %v1016_v0 = vld [vmem:[%s1197_s1 + $0x10] sm:$0xff] (!%p137_p2)   ;;  %v1042_v1 = vmov (!%p137_p2), 0.0   ;;  %v1017_v2 = vld [vmem:[%s1197_s1] sm:$0xff] (!%p137_p2)   ;;  %v297_v3 = vlaneseq (!%p137_p2)  ;;  %v1018_v4 = vld [vmem:[%s1197_s1 + $0x18] sm:$0xff] (!%p137_p2)   ;;  %vm1043_vm0 = vmmov (!%p137_p2), 0   ;;  %p157_p3 = scmp.lt.s32.totalorder (!%p137_p2), %s834_s13, 1 }
   0x6   : > { %140 = sbr.rel (%p137_p2) target bundleno = 271 (0x10f), region = 32  ;;  %933 = vmatprep.subr.bf16.mxu0 (!%p137_p2), %v1042_v1  ;;  %941 = vmatprep.subr.bf16.mxu1 (!%p137_p2), %v1042_v1  ;;  %v1019_v5 = vld [vmem:[%s1197_s1 + $0x8] sm:$0xff] (!%p137_p2)   ;;  %vm189_vm1 = vcmask (!%p137_p2), 261120   ;;  %v1044_v6 = vmov (!%p137_p2), 1966171168   ;;  %v1020_v9 = vld [vmem:[%s1197_s1 + $0x20] sm:$0xff] (!%p137_p2)  }
   0x7   : > { %934 = vmatpush3.bf16.msra.mxu0 (!%p137_p2), %v1016_v0  ;;  %937 = vmatprep.mubr.msk.bf16.mxu0 (!%p137_p2), %vm1043_vm0, %v1042_v1  ;;  %v295_v7 = vunpack.c.l.s4 (!%p137_p2), %v1044_v6  ;;  %v298_v8 = vshrl.u32 (!%p137_p2), %v297_v3, 7  ;;  %v1021_v11 = vld [vmem:[%s1197_s1 + $0x30] sm:$0xff] (!%p137_p2)   ;;  %v1022_v15 = vld [vmem:[%s1197_s1 + $0x28] sm:$0xff] (!%p137_p2)   ;;  %v1023_v17 = vld [vmem:[%s1197_s1 + $0x38] sm:$0xff] (!%p137_p2)   ;;  %vm781_vm2 = vcmask (!%p137_p2), 385024  }
   0x8   : > { %942 = vmatpush3.bf16.msra.mxu1 (!%p137_p2), %v1017_v2  ;;  %935 = vmatprep.subr.bf16.mxu0 (!%p137_p2), %v1042_v1  ;;  %v1024_v20 = vld [vmem:[%s1197_s1 + $0x40] sm:$0xff] (!%p137_p2)   ;;  %v1025_v23 = vld [vmem:[%s1197_s1 + $0x50] sm:$0xff] (!%p137_p2)   ;;  %v1026_v25 = vld [vmem:[%s1197_s1 + $0x48] sm:$0xff] (!%p137_p2)   ;;  %vm782_vm3 = vsmask.f32 (!%p137_p2), 256 }
   0x9   : > { %943 = vmatprep.subr.bf16.mxu1 (!%p137_p2), %v1042_v1  ;;  %945 = vmatprep.mubr.msk.bf16.mxu1 (!%p137_p2), %vm1043_vm0, %v1042_v1  ;;  %v296_v10 = vunpack.c.0.s8 (!%p137_p2), %v295_v7  ;;  %v1027_v26 = vld [vmem:[%s1197_s1 + $0x58] sm:$0xff] (!%p137_p2)   ;;  %v1028_v29 = vld [vmem:[%s1197_s1 + $0x60] sm:$0xff] (!%p137_p2)   ;;  %v1029_v30 = vld [vmem:[%s1197_s1 + $0x70] sm:$0xff] (!%p137_p2)  }
   0xa   : > { %v1030_v31 = vld [vmem:[%s1197_s1 + $0x68] sm:$0xff] (!%p137_p2)   ;;  %v1031_v32 = vld [vmem:[%s1197_s1 + $0x78] sm:$0xff] (!%p137_p2)   ;;  %v1032_v35 = vld [vmem:[%s1197_s1 + $0x80] sm:$0xff] (!%p137_p2)  }
   0xb   : > { %936 = vmatpush3.bf16.msra.mxu0 (!%p137_p2), %v1018_v4  ;;  %v299_v14 = vsub.s32 (!%p137_p2), %v296_v10, %v298_v8  ;;  %v1033_v38 = vld [vmem:[%s1197_s1 + $0x88] sm:$0xff] (!%p137_p2)   ;;  %vm783_vm4 = vmand (!%p137_p2), %vm781_vm2, %vm782_vm3 }
   0xc   : > { %944 = vmatpush3.bf16.msra.mxu1 (!%p137_p2), %v1019_v5  ;;  %949 = vmatprep.subr.bf16.mxu0 (!%p137_p2), %v1042_v1 }
   0xd   : > { %s1201_s13 = smov (!%p157_p3, %s834_s13), 1  ;;  %957 = vmatprep.subr.bf16.mxu1 %v1042_v1 }
   0xe   : > { %s839_s22 = sshll.u32 %s1201_s13, 3  ;;  %s163_s6 = scalar_lea.vmem %s1199_s3, %s1201_s13 }
   0xf   : > { %s1102_s27 = scalar_lea.vmem %s1196_s0, %s839_s22 }
  0x10   : > { %v840_v12 = vld [vmem:[%s1102_s27 + $0x2] sm:$0x1]  ;;  %v165_v13 = vld [vmem:[%s1102_s27] sm:$0x1]  ;;  %v858_v19 = vld [vmem:[%s1102_s27 + $0x4] sm:$0x1] }
  0x11   : > { %938 = vmatmul.mubr.msk.bf16.vlgmr.msra.gmra.mrb[0].mxu0 %vm189_vm1, %v840_v12  ;;  %946 = vmatmul.mubr.msk.bf16.vlgmr.msra.gmra.mrb[0].mxu1 %vm189_vm1, %v165_v13  ;;  %v300_v16 = vrot.slane %v165_v13, %v299_v14  ;;  %v505_v21 = vrot.slane %v858_v19, %v299_v14  ;;  %v866_v28 = vld [vmem:[%s1102_s27 + $0x6] sm:$0x1]  ;;  %v881_v33 = vld [vmem:[%s1102_s27 + $0x1] sm:$0x1]  ;;  %v889_v36 = vld [vmem:[%s1102_s27 + $0x3] sm:$0x1] }
  0x12   : > { %950 = vmatpush3.bf16.msra.mxu0 %v1020_v9  ;;  %958 = vmatpush3.bf16.msra.mxu1 %v1021_v11  ;;  %v710_v34 = vrot.slane %v881_v33, %v299_v14 }
  0x13   : > { %951 = vmatprep.subr.bf16.mxu0 %v1042_v1  ;;  %959 = vmatprep.subr.bf16.mxu1 %v1042_v1  ;;  %v307_v18 = vrot.slane %v300_v16, %v299_v14  ;;  %v512_v24 = vrot.slane %v505_v21, %v299_v14  ;;  %v777_v16 = vld [vmem:[%s1198_s2] sm:$0x1] }
  0x14   : > { %953 = vmatprep.mubr.msk.bf16.mxu0 %vm1043_vm0, %v1042_v1  ;;  %961 = vmatprep.mubr.msk.bf16.mxu1 %vm1043_vm0, %v1042_v1  ;;  %v717_v37 = vrot.slane %v710_v34, %v299_v14 }
  0x15   : > { %v309_v22 = vshrl.u32 %v307_v18, 16  ;;  %v514_v27 = vshrl.u32 %v512_v24, 16 }
  0x16   : > { %952 = vmatpush3.bf16.msra.mxu0 %v1022_v15  ;;  %960 = vmatpush3.bf16.msra.mxu1 %v1023_v17  ;;  %v719_v39 = vshrl.u32 %v717_v37, 16 }
  0x17   : > { %965 = vmatprep.subr.bf16.mxu0 %v1042_v1  ;;  %973 = vmatprep.subr.bf16.mxu1 %v1042_v1 }
  0x19   : > { %954 = vmatmul.mubr.msk.bf16.vlgmr.msra.gmra.mrb[4].mxu0 %vm189_vm1, %v309_v22  ;;  %962 = vmatmul.mubr.msk.bf16.vlgmr.msra.gmra.mrb[4].mxu1 %vm189_vm1, %v858_v19 }
  0x1a   : > { %966 = vmatpush3.bf16.msra.mxu0 %v1024_v20  ;;  %974 = vmatpush3.bf16.msra.mxu1 %v1025_v23  ;;  %v784_v23 = vld [vmem:[%s163_s6] sm:$0x1] }
  0x1b   : > { %967 = vmatprep.subr.bf16.mxu0 %v1042_v1  ;;  %975 = vmatprep.subr.bf16.mxu1 %v1042_v1 }
  0x1c   : > { %969 = vmatprep.mubr.msk.bf16.mxu0 %vm1043_vm0, %v1042_v1  ;;  %977 = vmatprep.mubr.msk.bf16.mxu1 %vm1043_vm0, %v1042_v1 }
  0x1e   : > { %968 = vmatpush3.bf16.msra.mxu0 %v1026_v25  ;;  %976 = vmatpush3.bf16.msra.mxu1 %v1027_v26 }
  0x1f   : > { %981 = vmatprep.subr.bf16.mxu0 %v1042_v1  ;;  %989 = vmatprep.subr.bf16.mxu1 %v1042_v1 }
  0x21   : > { %970 = vmatmul.mubr.msk.bf16.vlgmr.msra.gmra.mrb[8].mxu0 %vm189_vm1, %v866_v28  ;;  %978 = vmatmul.mubr.msk.bf16.vlgmr.msra.gmra.mrb[8].mxu1 %vm189_vm1, %v514_v27 }
  0x22   : > { %982 = vmatpush3.bf16.msra.mxu0 %v1028_v29  ;;  %990 = vmatpush3.bf16.msra.mxu1 %v1029_v30 }
  0x23   : > { %983 = vmatprep.subr.bf16.mxu0 %v1042_v1  ;;  %991 = vmatprep.subr.bf16.mxu1 %v1042_v1 }
  0x24   : > { %985 = vmatprep.mubr.msk.bf16.mxu0 %vm1043_vm0, %v1042_v1  ;;  %993 = vmatprep.mubr.msk.bf16.mxu1 %vm1043_vm0, %v1042_v1 }
  0x26   : > { %984 = vmatpush3.bf16.msra.mxu0 %v1030_v31  ;;  %992 = vmatpush3.bf16.msra.mxu1 %v1031_v32 }
  0x27   : > { %997 = vmatprep.subr.bf16.mxu0 %v1042_v1 }
  0x29   : > { %986 = vmatmul.mubr.msk.bf16.vlgmr.msra.gmra.mrb[12].mxu0 %vm189_vm1, %v881_v33  ;;  %994 = vmatmul.mubr.msk.bf16.vlgmr.msra.gmra.mrb[12].mxu1 %vm189_vm1, %v889_v36 }
  0x2a   : > { %998 = vmatpush3.bf16.msra.mxu0 %v1032_v35  ;;  %1001 = vmatprep.mubr.msk.bf16.mxu0 %vm1043_vm0, %v1042_v1 }
  0x2b   : > { %999 = vmatprep.subr.bf16.mxu0 %v1042_v1 }
  0x2e   : > { %1000 = vmatpush3.bf16.msra.mxu0 %v1033_v38 }
  0x31   : > { %1002 = vmatmul.mubr.msk.bf16.vlgmr.msra.gmra.mrb[16].mxu0 %vm189_vm1, %v719_v39 }
  0xe4   : > { %v227_v40 = vpop.f32.mrb[0].mxu0  ;;  %v282_v42 = vpop.f32.mrb[0].mxu1 }
  0xe5   : > { %v939_v41 = vpop.f32.mrb[1].mxu0  ;;  %v283_v43 = vadd.f32 %v282_v42, %v227_v40  ;;  %v947_v45 = vpop.f32.mrb[1].mxu1 }
  0xe6   : > { %v230_v44 = vpop.f32.mrb[2].mxu0  ;;  %v285_v47 = vpop.f32.mrb[2].mxu1 }
  0xe7   : > { %v940_v46 = vpop.f32.mrb[3].mxu0  ;;  %v948_v48 = vpop.f32.mrb[3].mxu1 }
  0xec   : > { %v360_v49 = vpop.f32.mrb[4].mxu0  ;;  %v423_v52 = vpop.f32.mrb[4].mxu1 }
  0xed   : > { %v366_v50 = vadd.f32 %v360_v49, %v283_v43  ;;  %v955_v51 = vpop.f32.mrb[5].mxu0  ;;  %v963_v54 = vpop.f32.mrb[5].mxu1 }
  0xee   : > { %v363_v53 = vpop.f32.mrb[6].mxu0  ;;  %v426_v57 = vpop.f32.mrb[6].mxu1 }
  0xef   : > { %v429_v55 = vadd.f32 %v423_v52, %v366_v50  ;;  %v956_v56 = vpop.f32.mrb[7].mxu0  ;;  %v964_v58 = vpop.f32.mrb[7].mxu1 }
  0xf4   : > { %v486_v59 = vpop.f32.mrb[8].mxu0  ;;  %v565_v62 = vpop.f32.mrb[8].mxu1 }
  0xf5   : > { %v492_v60 = vadd.f32 %v486_v59, %v429_v55  ;;  %v971_v61 = vpop.f32.mrb[9].mxu0  ;;  %v979_v0 = vpop.f32.mrb[9].mxu1 }
  0xf6   : > { %v489_v63 = vpop.f32.mrb[10].mxu0  ;;  %v568_v3 = vpop.f32.mrb[10].mxu1 }
  0xf7   : > { %v571_v1 = vadd.f32 %v565_v62, %v492_v60  ;;  %v972_v2 = vpop.f32.mrb[11].mxu0  ;;  %v980_v4 = vpop.f32.mrb[11].mxu1 }
  0xfc   : > { %v628_v5 = vpop.f32.mrb[12].mxu0  ;;  %v691_v8 = vpop.f32.mrb[12].mxu1 }
  0xfd   : > { %v634_v6 = vadd.f32 %v628_v5, %v571_v1  ;;  %v987_v7 = vpop.f32.mrb[13].mxu0  ;;  %v995_v10 = vpop.f32.mrb[13].mxu1 }
  0xfe   : > { %v631_v9 = vpop.f32.mrb[14].mxu0  ;;  %v694_v13 = vpop.f32.mrb[14].mxu1 }
  0xff   : > { %v697_v11 = vadd.f32 %v691_v8, %v634_v6  ;;  %v988_v12 = vpop.f32.mrb[15].mxu0  ;;  %v996_v14 = vpop.f32.mrb[15].mxu1 }
 0x104   : > { %v770_v15 = vpop.f32.mrb[16].mxu0 }
 0x105   : > { %v776_v17 = vadd.f32 %v770_v15, %v697_v11  ;;  %v1003_v18 = vpop.f32.mrb[17].mxu0 }
 0x106   : > { %v773_v19 = vpop.f32.mrb[18].mxu0 }
 0x107   : > { %v778_v20 = vadd.f32 %v777_v16, %v776_v17  ;;  %v1004_v21 = vpop.f32.mrb[19].mxu0 }
 0x109   : > { %v779_v22 = vmax.f32 %v778_v20, 0.0 }
 0x10b   : > { %v780_v24 = vpack.c.bf16 %v779_v22, %v779_v22 }
 0x10d   : > { %v785_v25 = vsel %vm783_vm4, %v780_v24, %v784_v23 }
 0x10e   : > { %786 = vst [vmem:[%s163_s6] sm:$0x1] %v785_v25 }
 0x10f PF: > { %s13_s12 = sadd.s32 1, %s1040_s12  }
 0x110   : > { %p10_p4 = scmp.ge.s32.totalorder %s13_s12, 4  }
 0x112   :  { %12 = sbr.rel (!%p10_p4) target bundleno = 1 (0x1), region = 75 }

// kernel: db_model_forward.20
= control target key start
LH: loop header
LB: loop body
LE: loop exit
PB: predicated region body
PF: predicated region fallthrough
CT: control target
= control target key end

     0   :  { %s442_s15 = smov 0   ;;  %s471_s0 = inlined_call_operand.vmem [shape: bf16[2,1,2,2,32], index: 0, kind: input, shape index: {}]   ;;  %s472_s1 = inlined_call_operand.vmem [shape: bf16[1,32,32], index: 1, kind: input, shape index: {}]   ;;  %s473_s2 = inlined_call_operand.vmem [shape: f32[1,32], index: 2, kind: input, shape index: {}]   ;;  %s474_s3 = inlined_call_operand.vmem [shape: bf16[2,4,32], index: 3, kind: input, shape index: {}]   ;;  %s475_s4 = inlined_call_operand.vmem [shape: bf16[2,4,32], index: 4, kind: output, shape index: {}]  }
   0x1 LB: > { %s368_s16 = sadd.s32 4294967295, %s412_s15   ;;  %p372_p0 = scmp.ge.s32.totalorder %s412_s15, 1  ;;  %s412_s15 = sphi %s442_s15, %s14_s15  }
   0x2   : > { %p170_p1 = scmp.lt.s32.totalorder %s412_s15, 3 }
   0x4   : > { %p171_p2 = pnand %p372_p0, %p170_p1 }
   0x5   : > { %v404_v0 = vld [vmem:[%s472_s1] sm:$0xff] (!%p171_p2)   ;;  %v230_v1 = vlaneseq (!%p171_p2)  ;;  %v414_v2 = vmov (!%p171_p2), 0.0   ;;  %v405_v3 = vld [vmem:[%s472_s1 + $0x8] sm:$0xff] (!%p171_p2)   ;;  %vm415_vm0 = vmmov (!%p171_p2), 0   ;;  %p198_p3 = scmp.lt.s32.totalorder (!%p171_p2), %s368_s16, 1  ;;  %vm253_vm1 = vcmask (!%p171_p2), 261120  }
   0x6   : > { %174 = sbr.rel (%p171_p2) target bundleno = 242 (0xf2), region = 36  ;;  %385 = vmatprep.subr.bf16.mxu0 (!%p171_p2), %v414_v2  ;;  %389 = vmatprep.mubr.msk.bf16.mxu0 (!%p171_p2), %vm415_vm0, %v414_v2  ;;  %v416_v4 = vmov (!%p171_p2), 1966171168   ;;  %v376_v15 = vld [vmem:[%s473_s2] ss:$0 sm:$0xff] (!%p171_p2)  ;;  %vm301_vm2 = vcmask (!%p171_p2), 254976  }
   0x7   : > { %386 = vmatpush3.bf16.msra.mxu0 (!%p171_p2), %v404_v0  ;;  %v228_v5 = vunpack.c.l.s4 (!%p171_p2), %v416_v4  ;;  %v231_v6 = vshrl.u32 (!%p171_p2), %v230_v1, 7 }
   0x8   : > { %387 = vmatprep.subr.bf16.mxu0 (!%p171_p2), %v414_v2 }
   0x9   : > { %v229_v7 = vunpack.c.0.s8 (!%p171_p2), %v228_v5 }
   0xb   : > { %388 = vmatpush3.bf16.msra.mxu0 (!%p171_p2), %v405_v3  ;;  %v232_v8 = vsub.s32 (!%p171_p2), %v229_v7, %v231_v6 }
   0xd   : > { %s477_s16 = smov (!%p198_p3, %s368_s16), 1 }
   0xe   : > { %s373_s21 = sshll.u32 %s477_s16, 1 }
   0xf   : > { %s201_s24 = scalar_lea.vmem %s471_s0, %s373_s21  ;;  %s205_s27 = scalar_lea.vmem %s474_s3, %s373_s21 }
  0x10   : > { %v211_v9 = vld [vmem:[%s201_s24] sm:$0x1]  ;;  %v212_v10 = vld [vmem:[%s201_s24 + $0x1] sm:$0x1]  ;;  %s209_s6 = scalar_lea.vmem %s475_s4, %s373_s21 }
  0x11   : > { %v226_v11 = vcombine.low %v211_v9, %v212_v10  ;;  %v297_v14 = vld [vmem:[%s205_s27] sm:$0x3] }
  0x12   : > { %v298_v16 = vunpack.c.l.bf16 %v297_v14 }
  0x13   : > { %v233_v12 = vrot.slane %v226_v11, %v232_v8 }
  0x15   : > { %v240_v13 = vrot.slane %v233_v12, %v232_v8 }
  0x17   : > { %390 = vmatmul.mubr.msk.bf16.vlgmr.msra.gmra.mrb[0].mxu0 %vm253_vm1, %v240_v13 }
  0xea   : > { %v291_v17 = vpop.f32.mrb[0].mxu0 }
  0xeb   : > { %v292_v18 = vadd.f32 %v376_v15, %v291_v17  ;;  %v391_v19 = vpop.f32.mrb[1].mxu0 }
  0xec   : > { %v294_v20 = vpop.f32.mrb[2].mxu0 }
  0xed   : > { %v299_v21 = vadd.f32 %v298_v16, %v292_v18  ;;  %v392_v22 = vpop.f32.mrb[3].mxu0 }
  0xef   : > { %v300_v23 = vpack.c.bf16 %v299_v21, %v299_v21 }
  0xf1   : > { %302 = vst.msk [vmem:[%s209_s6] sm:$0x3] %vm301_vm2, %v300_v23 }
  0xf2 PF: > { %s14_s15 = sadd.s32 1, %s412_s15  }
  0xf3   : > { %p11_p4 = scmp.ge.s32.totalorder %s14_s15, 4  }
  0xf5   :  { %13 = sbr.rel (!%p11_p4) target bundleno = 1 (0x1), region = 69 }

// kernel: db_model_forward.21
= control target key start
LH: loop header
LB: loop body
LE: loop exit
PB: predicated region body
PF: predicated region fallthrough
CT: control target
= control target key end

     0   :  { %s484_s15 = smov 0   ;;  %s513_s0 = inlined_call_operand.vmem [shape: bf16[2,1,4,4,24], index: 0, kind: input, shape index: {}]   ;;  %s514_s1 = inlined_call_operand.vmem [shape: bf16[1,24,32], index: 1, kind: input, shape index: {}]   ;;  %s515_s2 = inlined_call_operand.vmem [shape: f32[1,32], index: 2, kind: input, shape index: {}]   ;;  %s516_s3 = inlined_call_operand.vmem [shape: bf16[2,16,32], index: 3, kind: input, shape index: {}]   ;;  %s517_s4 = inlined_call_operand.vmem [shape: bf16[2,16,32], index: 4, kind: output, shape index: {}]  }
   0x1 LB: > { %s396_s16 = sadd.s32 4294967295, %s454_s15   ;;  %p400_p0 = scmp.ge.s32.totalorder %s454_s15, 1  ;;  %s454_s15 = sphi %s484_s15, %s14_s15  }
   0x2   : > { %p172_p1 = scmp.lt.s32.totalorder %s454_s15, 3 }
   0x4   : > { %p173_p2 = pnand %p400_p0, %p172_p1 }
   0x5   : > { %v446_v0 = vld [vmem:[%s514_s1] sm:$0xff] (!%p173_p2)   ;;  %v242_v1 = vlaneseq (!%p173_p2)  ;;  %v456_v2 = vmov (!%p173_p2), 0.0   ;;  %v447_v3 = vld [vmem:[%s514_s1 + $0x8] ss:$0 sps:$4 sm:$0xff] (!%p173_p2)   ;;  %vm267_vm0 = vcmask (!%p173_p2), 1043456   ;;  %vm457_vm1 = vmmov (!%p173_p2), 0  }
   0x6   : > { %176 = sbr.rel (%p173_p2) target bundleno = 245 (0xf5), region = 36  ;;  %427 = vmatprep.subr.bf16.mxu0 (!%p173_p2), %v456_v2  ;;  %431 = vmatprep.mubr.msk.bf16.mxu0 (!%p173_p2), %vm457_vm1, %v456_v2  ;;  %p203_p3 = scmp.lt.s32.totalorder (!%p173_p2), %s396_s16, 1  ;;  %v269_v4 = vsel (!%p173_p2), %vm267_vm0, %v447_v3, 0  ;;  %v458_v5 = vmov (!%p173_p2), 1983009808   ;;  %vm263_vm2 = vcmask (!%p173_p2), 195584  }
   0x7   : > { %428 = vmatpush3.bf16.msra.mxu0 (!%p173_p2), %v446_v0  ;;  %v240_v6 = vunpack.c.l.s4 (!%p173_p2), %v458_v5  ;;  %v243_v7 = vshrl.u32 (!%p173_p2), %v242_v1, 7  ;;  %v407_v20 = vld [vmem:[%s515_s2] ss:$0 sm:$0xff] (!%p173_p2)  ;;  %vm326_vm3 = vcmask (!%p173_p2), 257024  }
   0x8   : > { %429 = vmatprep.subr.bf16.mxu0 (!%p173_p2), %v456_v2 }
   0x9   : > { %v241_v8 = vunpack.c.0.s8 (!%p173_p2), %v240_v6 }
   0xb   : > { %430 = vmatpush3.bf16.msra.mxu0 (!%p173_p2), %v269_v4  ;;  %v244_v9 = vsub.s32 (!%p173_p2), %v241_v8, %v243_v7 }
   0xd   : > { %s519_s16 = smov (!%p203_p3, %s396_s16), 1 }
   0xe   : > { %s415_s21 = sshll.u32 %s519_s16, 3 }
   0xf   : > { %s207_s24 = scalar_lea.vmem %s513_s0, %s415_s21  ;;  %s212_s27 = scalar_lea.vmem %s516_s3, %s415_s21 }
  0x10   : > { %v219_v10 = vld [vmem:[%s207_s24] sm:$0x3]  ;;  %v220_v11 = vld [vmem:[%s207_s24 + $0x2] sm:$0x3]  ;;  %v221_v12 = vld [vmem:[%s207_s24 + $0x4] sm:$0x3]  ;;  %s217_s6 = scalar_lea.vmem %s517_s4, %s415_s21 }
  0x11   : > { %v222_v13 = vld [vmem:[%s207_s24 + $0x6] sm:$0x3]  ;;  %v237_v14 = vcombine.low %v219_v10, %v220_v11 }
  0x12   : > { %v238_v15 = vcombine.low %v221_v12, %v222_v13  ;;  %v421_v19 = vld [vmem:[%s212_s27] sm:$0xff]  }
  0x13   : > { %v245_v16 = vrot.slane %v237_v14, %v244_v9  ;;  %v422_v21 = vunpack.c.l.bf16 %v421_v19  ;;  %v423_v25 = vunpack.c.h.bf16 %v421_v19 }
  0x14   : > { %v252_v17 = vrot.slane %v238_v15, %v244_v9 }
  0x16   : > { %v253_v18 = vcombine.low %v245_v16, %v252_v17 }
  0x18   : > { %432 = vmatmul.mubr.msk.bf16.vlgmr.msra.gmra.mrb[0].mxu0 %vm263_vm2, %v253_v18 }
  0xeb   : > { %v305_v22 = vpop.f32.mrb[0].mxu0 }
  0xec   : > { %v306_v23 = vadd.f32 %v407_v20, %v305_v22  ;;  %v433_v24 = vpop.f32.mrb[1].mxu0 }
  0xed   : > { %v308_v26 = vpop.f32.mrb[2].mxu0 }
  0xee   : > { %v316_v27 = vadd.f32 %v422_v21, %v306_v23  ;;  %v309_v28 = vadd.f32 %v407_v20, %v308_v26  ;;  %v434_v29 = vpop.f32.mrb[3].mxu0 }
  0xf0   : > { %v418_v30 = vpack.c.bf16 %v316_v27, %v316_v27  ;;  %v317_v31 = vadd.f32 %v423_v25, %v309_v28 }
  0xf2   : > { %327 = vst.msk [vmem:[%s217_s6] sm:$0xf] %vm326_vm3, %v418_v30  ;;  %v419_v32 = vpack.c.bf16 %v317_v31, %v317_v31 }
  0xf4   : > { %328 = vst.msk [vmem:[%s217_s6 + $0x4] sm:$0xf] %vm326_vm3, %v419_v32 }
  0xf5 PF: > { %s14_s15 = sadd.s32 1, %s454_s15  }
  0xf6   : > { %p11_p4 = scmp.ge.s32.totalorder %s14_s15, 4  }
  0xf8   :  { %13 = sbr.rel (!%p11_p4) target bundleno = 1 (0x1), region = 69 }

// kernel: db_model_forward.22
= control target key start
LH: loop header
LB: loop body
LE: loop exit
PB: predicated region body
PF: predicated region fallthrough
CT: control target
= control target key end

     0   :  { %s596_s15 = smov 0   ;;  %s635_s0 = inlined_call_operand.vmem [shape: bf16[2,1,8,8,16], index: 0, kind: input, shape index: {}]   ;;  %s636_s1 = inlined_call_operand.vmem [shape: bf16[1,16,32], index: 1, kind: input, shape index: {}]   ;;  %s637_s2 = inlined_call_operand.vmem [shape: f32[1,32], index: 2, kind: input, shape index: {}]   ;;  %s638_s3 = inlined_call_operand.vmem [shape: bf16[2,64,32], index: 3, kind: input, shape index: {}]   ;;  %s639_s4 = inlined_call_operand.vmem [shape: bf16[2,64,32], index: 4, kind: output, shape index: {}]  }
   0x1 LB: > { %s472_s16 = sadd.s32 4294967295, %s569_s15   ;;  %p476_p0 = scmp.ge.s32.totalorder %s569_s15, 1  ;;  %s569_s15 = sphi %s596_s15, %s14_s15  }
   0x2   : > { %p172_p1 = scmp.lt.s32.totalorder %s569_s15, 3 }
   0x4   : > { %p173_p2 = pnand %p476_p0, %p172_p1 }
   0x5   : > { %v558_v0 = vld [vmem:[%s636_s1] sm:$0xff] (!%p173_p2)   ;;  %p203_p3 = scmp.lt.s32.totalorder (!%p173_p2), %s472_s16, 1  ;;  %vm262_vm0 = vcmask (!%p173_p2), 130048   ;;  %vm396_vm1 = vcmask (!%p173_p2), 257024  }
   0x6   : > { %176 = sbr.rel (%p173_p2) target bundleno = 240 (0xf0), region = 36  ;;  %538 = vmatprep.subr.bf16.mxu0 (!%p173_p2), %v558_v0  ;;  %548 = vmatprep.subr.bf16.mxu1 (!%p173_p2), %v558_v0  ;;  %v483_v8 = vld [vmem:[%s637_s2] ss:$0 sm:$0xff] (!%p173_p2) }
   0x7   : > { %539 = vmatpush3.bf16.msra.mxu0 (!%p173_p2), %v558_v0  ;;  %549 = vmatpush3.bf16.msra.mxu1 (!%p173_p2), %v558_v0 }
   0xd   : > { %s641_s16 = smov (!%p203_p3, %s472_s16), 1 }
   0xe   : > { %s607_s19 = sshll.u32 %s641_s16, 5 }
   0xf   : > { %s207_s22 = scalar_lea.vmem %s635_s0, %s607_s19  ;;  %s212_s25 = scalar_lea.vmem %s638_s3, %s607_s19 }
  0x10   : > { %v559_v1 = vld [vmem:[%s207_s22] sm:$0xff]   ;;  %v560_v2 = vld [vmem:[%s207_s22 + $0x10] sm:$0xff]   ;;  %v561_v3 = vld [vmem:[%s207_s22 + $0x8] sm:$0xff]   ;;  %s217_s30 = scalar_lea.vmem %s639_s4, %s607_s19 }
  0x11   : > { %540 = vmatprep.mubr.msk.bf16.mxu0 %vm262_vm0, %v559_v1  ;;  %544 = vmatprep.mubr.msk.bf16.mxu1 %vm262_vm0, %v560_v2  ;;  %v562_v4 = vld [vmem:[%s207_s22 + $0x18] sm:$0xff]   ;;  %v530_v5 = vld [vmem:[%s212_s25 + $0x8] sm:$0xff]   ;;  %v515_v7 = vld [vmem:[%s212_s25] sm:$0xff]  }
  0x12   : > { %541 = vmatmul.mubr.msk.bf16.vlgmr.msra.gmra.mrb[0].mxu0 %vm262_vm0, %v561_v3  ;;  %545 = vmatmul.mubr.msk.bf16.vlgmr.msra.gmra.mrb[0].mxu1 %vm262_vm0, %v562_v4  ;;  %v532_v6 = vld [vmem:[%s212_s25 + $0x18] sm:$0xff]   ;;  %v531_v9 = vld [vmem:[%s212_s25 + $0x10] sm:$0xff]   ;;  %v520_v10 = vunpack.c.l.bf16 %v530_v5  ;;  %v516_v13 = vunpack.c.l.bf16 %v515_v7  ;;  %v521_v18 = vunpack.c.h.bf16 %v530_v5  ;;  %v517_v24 = vunpack.c.h.bf16 %v515_v7 }
  0x13   : > { %v528_v12 = vunpack.c.l.bf16 %v532_v6  ;;  %v524_v17 = vunpack.c.l.bf16 %v531_v9  ;;  %v529_v19 = vunpack.c.h.bf16 %v532_v6  ;;  %v525_v30 = vunpack.c.h.bf16 %v531_v9 }
  0xe5   : > { %v542_v11 = vpop.f32.mrb[0].mxu0  ;;  %v546_v15 = vpop.f32.mrb[0].mxu1 }
  0xe6   : > { %v318_v14 = vadd.f32 %v542_v11, %v483_v8  ;;  %v309_v16 = vpop.f32.mrb[1].mxu0  ;;  %v334_v20 = vadd.f32 %v546_v15, %v483_v8  ;;  %v325_v22 = vpop.f32.mrb[1].mxu1 }
  0xe7   : > { %v310_v21 = vadd.f32 %v483_v8, %v309_v16  ;;  %v543_v23 = vpop.f32.mrb[2].mxu0  ;;  %v326_v26 = vadd.f32 %v483_v8, %v325_v22  ;;  %v547_v28 = vpop.f32.mrb[2].mxu1 }
  0xe8   : > { %v358_v25 = vadd.f32 %v520_v10, %v318_v14  ;;  %v321_v27 = vadd.f32 %v543_v23, %v483_v8  ;;  %v312_v29 = vpop.f32.mrb[3].mxu0  ;;  %v362_v31 = vadd.f32 %v528_v12, %v334_v20  ;;  %v337_v33 = vadd.f32 %v547_v28, %v483_v8  ;;  %v328_v35 = vpop.f32.mrb[3].mxu1 }
  0xe9   : > { %v356_v32 = vadd.f32 %v516_v13, %v310_v21  ;;  %v313_v34 = vadd.f32 %v483_v8, %v312_v29  ;;  %v360_v37 = vadd.f32 %v524_v17, %v326_v26  ;;  %v329_v39 = vadd.f32 %v483_v8, %v328_v35 }
  0xea   : > { %v508_v36 = vpack.c.bf16 %v358_v25, %v358_v25  ;;  %v359_v38 = vadd.f32 %v521_v18, %v321_v27  ;;  %v512_v40 = vpack.c.bf16 %v362_v31, %v362_v31  ;;  %v363_v42 = vadd.f32 %v529_v19, %v337_v33 }
  0xeb   : > { %v506_v41 = vpack.c.bf16 %v356_v32, %v356_v32  ;;  %v357_v43 = vadd.f32 %v517_v24, %v313_v34  ;;  %v510_v44 = vpack.c.bf16 %v360_v37, %v360_v37  ;;  %v361_v46 = vadd.f32 %v525_v30, %v329_v39 }
  0xec   : > { %399 = vst.msk [vmem:[%s217_s30 + $0x8] sm:$0xf] %vm396_vm1, %v508_v36  ;;  %v509_v45 = vpack.c.bf16 %v359_v38, %v359_v38  ;;  %403 = vst.msk [vmem:[%s217_s30 + $0x18] sm:$0xf] %vm396_vm1, %v512_v40  ;;  %v513_v47 = vpack.c.bf16 %v363_v42, %v363_v42 }
  0xed   : > { %397 = vst.msk [vmem:[%s217_s30] sm:$0xf] %vm396_vm1, %v506_v41  ;;  %v507_v48 = vpack.c.bf16 %v357_v43, %v357_v43  ;;  %401 = vst.msk [vmem:[%s217_s30 + $0x10] sm:$0xf] %vm396_vm1, %v510_v44  ;;  %v511_v49 = vpack.c.bf16 %v361_v46, %v361_v46 }
  0xee   : > { %400 = vst.msk [vmem:[%s217_s30 + $0xc] sm:$0xf] %vm396_vm1, %v509_v45  ;;  %404 = vst.msk [vmem:[%s217_s30 + $0x1c] sm:$0xf] %vm396_vm1, %v513_v47 }
  0xef   : > { %398 = vst.msk [vmem:[%s217_s30 + $0x4] sm:$0xf] %vm396_vm1, %v507_v48  ;;  %402 = vst.msk [vmem:[%s217_s30 + $0x14] sm:$0xf] %vm396_vm1, %v511_v49 }
  0xf0 PF: > { %s14_s15 = sadd.s32 1, %s569_s15  }
  0xf1   : > { %p11_p4 = scmp.ge.s32.totalorder %s14_s15, 4  }
  0xf3   :  { %13 = sbr.rel (!%p11_p4) target bundleno = 1 (0x1), region = 69 }

// kernel: db_model_forward.25
= control target key start
LH: loop header
LB: loop body
LE: loop exit
PB: predicated region body
PF: predicated region fallthrough
CT: control target
= control target key end

     0   :  { %s1766_s12 = smov 0   ;;  %s1985_s0 = inlined_call_operand.vmem [shape: bf16[2,1,6,6,32], index: 0, kind: input, shape index: {}]   ;;  %s1986_s1 = inlined_call_operand.vmem [shape: bf16[9,32,8], index: 1, kind: input, shape index: {}]   ;;  %s1987_s2 = inlined_call_operand.vmem [shape: f32[1,8], index: 2, kind: input, shape index: {}]   ;;  %s1988_s3 = inlined_call_operand.vmem [shape: bf16[2,16,8], index: 3, kind: output, shape index: {}]  }
   0x1 LB: > { %s1459_s13 = sadd.s32 4294967295, %s1741_s12   ;;  %p1463_p0 = scmp.ge.s32.totalorder %s1741_s12, 1  ;;  %s1741_s12 = sphi %s1766_s12, %s13_s12  }
   0x2   : > { %p137_p1 = scmp.lt.s32.totalorder %s1741_s12, 3 }
   0x4   : > { %p138_p2 = pnand %p1463_p0, %p137_p1 }
   0x5   : > { %v1705_v0 = vld [vmem:[%s1986_s1 + $0x10] sm:$0xff] (!%p138_p2)   ;;  %v1743_v1 = vmov (!%p138_p2), 0.0   ;;  %v1706_v2 = vld [vmem:[%s1986_s1] sm:$0xff] (!%p138_p2)   ;;  %v1707_v3 = vld [vmem:[%s1986_s1 + $0x18] sm:$0xff] (!%p138_p2)   ;;  %vm1744_vm0 = vmmov (!%p138_p2), 0   ;;  %p161_p3 = scmp.lt.s32.totalorder (!%p138_p2), %s1459_s13, 1  ;;  %v293_v5 = vlaneseq (!%p138_p2) }
   0x6   : > { %141 = sbr.rel (%p138_p2) target bundleno = 294 (0x126), region = 32  ;;  %1621 = vmatprep.subr.bf16.mxu0 (!%p138_p2), %v1743_v1  ;;  %1629 = vmatprep.subr.bf16.mxu1 (!%p138_p2), %v1743_v1  ;;  %v1708_v4 = vld [vmem:[%s1986_s1 + $0x8] sm:$0xff] (!%p138_p2)   ;;  %vm220_vm1 = vsmask.f32 (!%p138_p2), 1280  ;;  %vm221_vm2 = vsmask.f32 (!%p138_p2), 3336 }
   0x7   : > { %1622 = vmatpush3.bf16.msra.mxu0 (!%p138_p2), %v1705_v0  ;;  %1625 = vmatprep.mubr.msk.bf16.mxu0 (!%p138_p2), %vm1744_vm0, %v1743_v1  ;;  %vm223_vm3 = vsmask.f32 (!%p138_p2), 5392  ;;  %v1745_v6 = vmov (!%p138_p2), 1983009808   ;;  %vm225_vm4 = vsmask.f32 (!%p138_p2), 7448  ;;  %vm222_vm8 = vmor (!%p138_p2), %vm220_vm1, %vm221_vm2 }
   0x8   : > { %1630 = vmatpush3.bf16.msra.mxu1 (!%p138_p2), %v1706_v2  ;;  %1623 = vmatprep.subr.bf16.mxu0 (!%p138_p2), %v1743_v1  ;;  %v291_v7 = vunpack.c.l.s4 (!%p138_p2), %v1745_v6  ;;  %v294_v8 = vshrl.u32 (!%p138_p2), %v293_v5, 7  ;;  %vm479_vm5 = vcmask (!%p138_p2), 1040384   ;;  %vm480_vm6 = vcmask (!%p138_p2), 1042434   ;;  %vm224_vm9 = vmor (!%p138_p2), %vm222_vm8, %vm223_vm3  ;;  %v1712_v49 = vld [vmem:[%s1986_s1 + $0x30] sm:$0xff] (!%p138_p2)  }
   0x9   : > { %1631 = vmatprep.subr.bf16.mxu1 (!%p138_p2), %v1743_v1  ;;  %1633 = vmatprep.mubr.msk.bf16.mxu1 (!%p138_p2), %vm1744_vm0, %v1743_v1  ;;  %vm482_vm7 = vcmask (!%p138_p2), 1044484   ;;  %vm317_vm10 = vcmask (!%p138_p2), 261120   ;;  %vm1814_vm11 = vmor (!%p138_p2), %vm224_vm9, %vm225_vm4  ;;  %vm484_vm13 = vcmask (!%p138_p2), 1046534  }
   0xa   : > { %v292_v9 = vunpack.c.0.s8 (!%p138_p2), %v291_v7  ;;  %vm481_vm12 = vmor (!%p138_p2), %vm479_vm5, %vm480_vm6 }
   0xb   : > { %1624 = vmatpush3.bf16.msra.mxu0 (!%p138_p2), %v1707_v3  ;;  %vm483_vm14 = vmor (!%p138_p2), %vm481_vm12, %vm482_vm7 }
   0xc   : > { %1632 = vmatpush3.bf16.msra.mxu1 (!%p138_p2), %v1708_v4  ;;  %1637 = vmatprep.subr.bf16.mxu0 (!%p138_p2), %v1743_v1  ;;  %v1811_v23 = vsub.s32 (!%p138_p2), %v292_v9, %v294_v8  ;;  %vm1837_vm15 = vmor (!%p138_p2), %vm483_vm14, %vm484_vm13  ;;  %v1714_v8 = vld [vmem:[%s1986_s1 + $0x38] sm:$0xff] (!%p138_p2)  }
   0xd   : > { %s1994_s13 = smov (!%p161_p3, %s1459_s13), 1  ;;  %1645 = vmatprep.subr.bf16.mxu1 %v1743_v1 }
   0xe   : > { %s1693_s22 = smul.u32 24, %s1994_s13  ;;  %s1591_s4 = sshll.u32 %s1994_s13, 3 }
   0xf   : > { %s170_s7 = scalar_lea.vmem %s1988_s3, %s1591_s4 }
  0x10   : > { %s1801_s25 = scalar_lea.vmem %s1985_s0, %s1693_s22 }
  0x11   : > { %v1467_v10 = vld.sshfl [vmem:[%s1801_s25] sm:$0x13 pattern:$0x76325410] }
  0x12   : > { %v1468_v11 = vld.sshfl [vmem:[%s1801_s25 + $0x4] sm:$0x13 pattern:$0x76325410]  ;;  %v195_v12 = vcombine.high %v1467_v10, %v1467_v10  ;;  %v228_v13 = vshrl.u32 %v1467_v10, 16  ;;  %v231_v14 = vshll.u32 %v1467_v10, 16 }
  0x13   : > { %v1469_v15 = vld.sshfl [vmem:[%s1801_s25 + $0x8] sm:$0x13 pattern:$0x76325410]  ;;  %v203_v16 = vcombine.high %v1468_v11, %v1468_v11  ;;  %v242_v17 = vshrl.u32 %v1468_v11, 16  ;;  %v245_v18 = vshll.u32 %v1468_v11, 16 }
  0x14   : > { %v1470_v19 = vld.sshfl [vmem:[%s1801_s25 + $0xc] sm:$0x13 pattern:$0x76325410]  ;;  %v211_v20 = vcombine.high %v1469_v15, %v1469_v15  ;;  %v230_v21 = vrot.slane %v228_v13, 6  ;;  %v233_v22 = vrot.slane %v231_v14, 7 }
  0x15   : > { %v219_v24 = vcombine.high %v1470_v19, %v1470_v19  ;;  %v237_v25 = vshll.u32 %v195_v12, 16  ;;  %v244_v26 = vrot.slane %v242_v17, 6  ;;  %v247_v27 = vrot.slane %v245_v18, 7 }
  0x16   : > { %v234_v28 = vor.u32 %v233_v22, %v230_v21  ;;  %v251_v29 = vshll.u32 %v203_v16, 16  ;;  %v256_v30 = vshrl.u32 %v1469_v15, 16  ;;  %v259_v31 = vshll.u32 %v1469_v15, 16 }
  0x17   : > { %v239_v33 = vrot.slane %v237_v25, 7  ;;  %v248_v34 = vor.u32 %v247_v27, %v244_v26  ;;  %v265_v35 = vshll.u32 %v211_v20, 16  ;;  %v270_v36 = vshrl.u32 %v1470_v19, 16  ;;  %v1711_v20 = vld [vmem:[%s1986_s1 + $0x20] sm:$0xff]  }
  0x18   : > { %v235_v37 = vrot.slane %v234_v28, 2  ;;  %v253_v38 = vrot.slane %v251_v29, 7  ;;  %v258_v39 = vrot.slane %v256_v30, 6  ;;  %v261_v40 = vrot.slane %v259_v31, 7  ;;  %v1713_v31 = vld [vmem:[%s1986_s1 + $0x28] sm:$0xff]  }
  0x19   : > { %v1729_v41 = vld.sshfl [vmem:[%s1801_s25] sm:$0xf pattern:$0x76325410]  ;;  %v249_v42 = vrot.slane %v248_v34, 2  ;;  %v272_v43 = vrot.slane %v270_v36, 6 }
  0x1a   : > { %v273_v44 = vshll.u32 %v1470_v19, 16  ;;  %v1730_v45 = vld.sshfl [vmem:[%s1801_s25 + $0x8] sm:$0xf pattern:$0x76325410]  ;;  %v262_v46 = vor.u32 %v261_v40, %v258_v39  ;;  %v267_v47 = vrot.slane %v265_v35, 7  ;;  %v240_v50 = vsel %vm1814_vm11, %v235_v37, %v239_v33 }
  0x1b   : > { %v279_v48 = vshll.u32 %v219_v24, 16  ;;  %v1829_v51 = vsel %vm1814_vm11, %v249_v42, %v253_v38  ;;  %v1481_v55 = vld.sshfl [vmem:[%s1801_s25] sm:$0x12 pattern:$0x76325410]  ;;  %v382_v57 = vcombine.low %v1729_v41, %v1730_v45  ;;  %v1718_v35 = vld [vmem:[%s1986_s1 + $0x50] sm:$0xff]  }
  0x1c   : > { %v275_v52 = vrot.slane %v273_v44, 7  ;;  %v263_v53 = vrot.slane %v262_v46, 2  ;;  %v1482_v58 = vld.sshfl [vmem:[%s1801_s25 + $0x4] sm:$0x12 pattern:$0x76325410]  ;;  %v454_v59 = vcombine.high %v1481_v55, %v1481_v55  ;;  %v288_v61 = vcombine.low %v240_v50, %v1829_v51 }
  0x1d   : > { %v281_v54 = vrot.slane %v279_v48, 7  ;;  %v1485_v60 = vrot.slane %v1481_v55, 9  ;;  %v1483_v62 = vld.sshfl [vmem:[%s1801_s25 + $0x8] sm:$0x12 pattern:$0x76325410]  ;;  %v462_v63 = vcombine.high %v1482_v58, %v1482_v58  ;;  %1634 = vmatmul.mubr.msk.bf16.vlgmr.msra.gmra.mrb[0].mxu1 %vm317_vm10, %v382_v57 }
  0x1e   : > { %v276_v56 = vor.u32 %v275_v52, %v272_v43  ;;  %v1486_v2 = vrot.slane %v1482_v58, 9  ;;  %v1843_v3 = vsel %vm1814_vm11, %v263_v53, %v267_v47  ;;  %v1484_v5 = vld.sshfl [vmem:[%s1801_s25 + $0xc] sm:$0x12 pattern:$0x76325410]  ;;  %v470_v6 = vcombine.high %v1483_v62, %v1483_v62  ;;  %1646 = vmatpush3.bf16.msra.mxu1 %v1712_v49  ;;  %1649 = vmatprep.mubr.msk.bf16.mxu1 %vm1744_vm0, %v1743_v1  ;;  %v1720_v48 = vld [vmem:[%s1986_s1 + $0x58] sm:$0xff]  }
  0x1f   : > { %v488_v7 = vrot.slane %v454_v59, 7  ;;  %v478_v9 = vcombine.high %v1484_v5, %v1484_v5  ;;  %v492_v10 = vrot.slane %v462_v63, 7  ;;  %v1487_v11 = vrot.slane %v1483_v62, 9  ;;  %1647 = vmatprep.subr.bf16.mxu1 %v1743_v1 }
  0x20   : > { %v277_v4 = vrot.slane %v276_v56, 2  ;;  %v1488_v12 = vrot.slane %v1484_v5, 9  ;;  %v496_v15 = vrot.slane %v470_v6, 7  ;;  %v296_v17 = vrot.slane %v288_v61, %v1811_v23 }
  0x21   : > { %v489_v14 = vsel %vm1837_vm15, %v1485_v60, %v488_v7  ;;  %v493_v18 = vsel %vm1837_vm15, %v1486_v2, %v492_v10  ;;  %v500_v19 = vrot.slane %v478_v9, 7  ;;  %v1731_v24 = vld.sshfl [vmem:[%s1801_s25 + $0x4] sm:$0xf pattern:$0x76325410]  ;;  %v772_v55 = vcombine.low %v1829_v51, %v1843_v3  ;;  %v1722_v51 = vld [vmem:[%s1986_s1 + $0x70] sm:$0xff]  }
  0x22   : > { %v1854_v13 = vsel %vm1814_vm11, %v277_v4, %v281_v54  ;;  %v497_v21 = vsel %vm1837_vm15, %v1487_v11, %v496_v15  ;;  %v507_v22 = vcombine.low %v489_v14, %v493_v18  ;;  %v1732_v25 = vld.sshfl [vmem:[%s1801_s25 + $0xc] sm:$0xf pattern:$0x76325410]  ;;  %1648 = vmatpush3.bf16.msra.mxu1 %v1714_v8  ;;  %v1715_v54 = vld [vmem:[%s1986_s1 + $0x40] sm:$0xff]   ;;  %v1724_v14 = vld [vmem:[%s1986_s1 + $0x78] sm:$0xff]  }
  0x23   : > { %v289_v16 = vcombine.low %v1843_v3, %v1854_v13  ;;  %v501_v27 = vsel %vm1837_vm15, %v1488_v12, %v500_v19  ;;  %1661 = vmatprep.subr.bf16.mxu1 %v1743_v1  ;;  %v1514_v30 = vld.sshfl [vmem:[%s1801_s25 + $0x10] sm:$0x13 pattern:$0x76325410]  ;;  %v612_v34 = vcombine.low %v1731_v24, %v1732_v25  ;;  %v908_v45 = vcombine.low %v493_v18, %v497_v21  ;;  %v1719_v4 = vld [vmem:[%s1986_s1 + $0x48] sm:$0xff]   ;;  %v1721_v19 = vld [vmem:[%s1986_s1 + $0x60] sm:$0xff]  }
  0x24   : > { %v508_v28 = vcombine.low %v497_v21, %v501_v27  ;;  %v515_v33 = vrot.slane %v507_v22, %v1811_v23  ;;  %v710_v36 = vcombine.high %v1514_v30, %v1514_v30  ;;  %v754_v37 = vshrl.u32 %v1514_v30, 16  ;;  %v1529_v38 = vld.sshfl [vmem:[%s1801_s25 + $0x10] sm:$0x12 pattern:$0x76325410]  ;;  %v1723_v25 = vld [vmem:[%s1986_s1 + $0x68] sm:$0xff]  }
  0x25   : > { %v1872_v26 = vrot.slane %v289_v16, %v1811_v23  ;;  %v757_v40 = vshll.u32 %v1514_v30, 16  ;;  %v886_v41 = vcombine.high %v1529_v38, %v1529_v38  ;;  %v1533_v42 = vrot.slane %v1529_v38, 9  ;;  %1650 = vmatmul.mubr.msk.bf16.vlgmr.msra.gmra.mrb[4].mxu1 %vm317_vm10, %v612_v34  ;;  %v1559_v59 = vld.sshfl [vmem:[%s1801_s25 + $0x14] sm:$0x13 pattern:$0x76325410] }
  0x26   : > { %v1889_v39 = vrot.slane %v508_v28, %v1811_v23  ;;  %v756_v43 = vrot.slane %v754_v37, 6  ;;  %v763_v44 = vshll.u32 %v710_v36, 16  ;;  %1662 = vmatpush3.bf16.msra.mxu1 %v1718_v35  ;;  %1665 = vmatprep.mubr.msk.bf16.mxu1 %vm1744_vm0, %v1743_v1  ;;  %v916_v57 = vrot.slane %v908_v45, %v1811_v23  ;;  %v1574_v3 = vld.sshfl [vmem:[%s1801_s25 + $0x14] sm:$0x12 pattern:$0x76325410] }
  0x27   : > { %v304_v29 = vcombine.low %v296_v17, %v1872_v26  ;;  %v759_v46 = vrot.slane %v757_v40, 7  ;;  %v901_v47 = vrot.slane %v886_v41, 7  ;;  %1663 = vmatprep.subr.bf16.mxu1 %v1743_v1  ;;  %v1111_v61 = vcombine.high %v1559_v59, %v1559_v59  ;;  %v1733_v15 = vld.sshfl [vmem:[%s1801_s25 + $0x8] sm:$0xf pattern:$0x76325410] }
  0x28   : > { %v523_v49 = vcombine.low %v515_v33, %v1889_v39  ;;  %v765_v52 = vrot.slane %v763_v44, 7  ;;  %v1155_v62 = vshrl.u32 %v1559_v59, 16  ;;  %v1158_v2 = vshll.u32 %v1559_v59, 16  ;;  %v1728_v34 = vld [vmem:[%s1986_s1 + $0x88] sm:$0xff]  }
  0x29   : > { %1626 = vmatmul.mubr.msk.bf16.vlgmr.msra.gmra.mrb[0].mxu0 %vm317_vm10, %v304_v29  ;;  %v760_v50 = vor.u32 %v759_v46, %v756_v43  ;;  %v1904_v53 = vsel %vm1837_vm15, %v1533_v42, %v901_v47  ;;  %v780_v6 = vrot.slane %v772_v55, %v1811_v23  ;;  %v1164_v10 = vshll.u32 %v1111_v61, 16 }
  0x2a   : > { %1638 = vmatpush3.bf16.msra.mxu0 %v1711_v20  ;;  %1641 = vmatprep.mubr.msk.bf16.mxu0 %vm1744_vm0, %v1743_v1  ;;  %v909_v56 = vcombine.low %v501_v27, %v1904_v53  ;;  %v1157_v8 = vrot.slane %v1155_v62, 6  ;;  %v1160_v9 = vrot.slane %v1158_v2, 7  ;;  %v1287_v11 = vcombine.high %v1574_v3, %v1574_v3 }
  0x2b   : > { %1639 = vmatprep.subr.bf16.mxu0 %v1743_v1  ;;  %v761_v58 = vrot.slane %v760_v50, 2  ;;  %1664 = vmatpush3.bf16.msra.mxu1 %v1720_v48  ;;  %v1166_v17 = vrot.slane %v1164_v10, 7  ;;  %v1578_v20 = vrot.slane %v1574_v3, 9 }
  0x2c   : > { %v923_v60 = vrot.slane %v909_v56, %v1811_v23  ;;  %1677 = vmatprep.subr.bf16.mxu1 %v1743_v1  ;;  %v1161_v16 = vor.u32 %v1160_v9, %v1157_v8  ;;  %v1302_v21 = vrot.slane %v1287_v11, 7 }
  0x2d   : > { %v766_v63 = vsel %vm1814_vm11, %v761_v58, %v765_v52 }
  0x2e   : > { %1640 = vmatpush3.bf16.msra.mxu0 %v1713_v31  ;;  %v773_v5 = vcombine.low %v1854_v13, %v766_v63  ;;  %v924_v7 = vcombine.low %v916_v57, %v923_v60  ;;  %v1734_v13 = vld.sshfl [vmem:[%s1801_s25 + $0x10] sm:$0xf pattern:$0x76325410]  ;;  %v1162_v22 = vrot.slane %v1161_v16, 2  ;;  %v1303_v28 = vsel %vm1837_vm15, %v1578_v20, %v1302_v21  ;;  %v1727_v31 = vld [vmem:[%s1986_s1 + $0x80] sm:$0xff]  }
  0x2f   : > { %1653 = vmatprep.subr.bf16.mxu0 %v1743_v1  ;;  %v1013_v30 = vcombine.low %v1733_v15, %v1734_v13  ;;  %v1310_v32 = vcombine.low %v1904_v53, %v1303_v28 }
  0x30   : > { %v787_v12 = vrot.slane %v773_v5, %v1811_v23  ;;  %1666 = vmatmul.mubr.msk.bf16.vlgmr.msra.gmra.mrb[8].mxu1 %vm317_vm10, %v924_v7  ;;  %v1167_v24 = vsel %vm1814_vm11, %v1162_v22, %v1166_v17 }
  0x31   : > { %1642 = vmatmul.mubr.msk.bf16.vlgmr.msra.gmra.mrb[4].mxu0 %vm317_vm10, %v523_v49  ;;  %1678 = vmatpush3.bf16.msra.mxu1 %v1722_v51  ;;  %v1174_v27 = vcombine.low %v766_v63, %v1167_v24  ;;  %v1324_v0 = vrot.slane %v1310_v32, %v1811_v23 }
  0x32   : > { %1654 = vmatpush3.bf16.msra.mxu0 %v1715_v54  ;;  %1657 = vmatprep.mubr.msk.bf16.mxu0 %vm1744_vm0, %v1743_v1  ;;  %v788_v18 = vcombine.low %v780_v6, %v787_v12 }
  0x33   : > { %1655 = vmatprep.subr.bf16.mxu0 %v1743_v1  ;;  %1681 = vmatprep.mubr.msk.bf16.mxu1 %vm1744_vm0, %v1743_v1  ;;  %v1188_v29 = vrot.slane %v1174_v27, %v1811_v23 }
  0x34   : > { %1679 = vmatprep.subr.bf16.mxu1 %v1743_v1 }
  0x35   : > { %1680 = vmatpush3.bf16.msra.mxu1 %v1724_v14  ;;  %v1189_v33 = vcombine.low %v1872_v26, %v1188_v29  ;;  %v1325_v26 = vcombine.low %v1889_v39, %v1324_v0 }
  0x36   : > { %1656 = vmatpush3.bf16.msra.mxu0 %v1719_v4 }
  0x37   : > { %1669 = vmatprep.subr.bf16.mxu0 %v1743_v1 }
  0x38   : > { %1682 = vmatmul.mubr.msk.bf16.vlgmr.msra.gmra.mrb[12].mxu1 %vm317_vm10, %v1189_v33 }
  0x39   : > { %1658 = vmatmul.mubr.msk.bf16.vlgmr.msra.gmra.mrb[8].mxu0 %vm317_vm10, %v788_v18  ;;  %v1586_v18 = vld [vmem:[%s1987_s2] ss:$0 sm:$0xff] }
  0x3a   : > { %1670 = vmatpush3.bf16.msra.mxu0 %v1721_v19  ;;  %1673 = vmatprep.mubr.msk.bf16.mxu0 %vm1744_vm0, %v1743_v1 }
  0x3b   : > { %1671 = vmatprep.subr.bf16.mxu0 %v1743_v1 }
  0x3e   : > { %1672 = vmatpush3.bf16.msra.mxu0 %v1723_v25 }
  0x3f   : > { %1685 = vmatprep.subr.bf16.mxu0 %v1743_v1 }
  0x41   : > { %1674 = vmatmul.mubr.msk.bf16.vlgmr.msra.gmra.mrb[12].mxu0 %vm317_vm10, %v1013_v30 }
  0x42   : > { %1686 = vmatpush3.bf16.msra.mxu0 %v1727_v31  ;;  %1689 = vmatprep.mubr.msk.bf16.mxu0 %vm1744_vm0, %v1743_v1  ;;  %vm1401_vm0 = vcmask 60416  }
  0x43   : > { %1687 = vmatprep.subr.bf16.mxu0 %v1743_v1 }
  0x46   : > { %1688 = vmatpush3.bf16.msra.mxu0 %v1728_v34 }
  0x49   : > { %1690 = vmatmul.mubr.msk.bf16.vlgmr.msra.gmra.mrb[16].mxu0 %vm317_vm10, %v1325_v26 }
  0xf0   : > { %v432_v35 = vpop.f32.mrb[0].mxu1 }
  0xf1   : > { %v1635_v36 = vpop.f32.mrb[1].mxu1 }
  0xf2   : > { %v435_v37 = vpop.f32.mrb[2].mxu1 }
  0xf3   : > { %v1636_v38 = vpop.f32.mrb[3].mxu1 }
  0xf8   : > { %v662_v43 = vpop.f32.mrb[4].mxu1 }
  0xf9   : > { %v1651_v46 = vpop.f32.mrb[5].mxu1 }
  0xfa   : > { %v665_v47 = vpop.f32.mrb[6].mxu1 }
  0xfb   : > { %v1652_v48 = vpop.f32.mrb[7].mxu1 }
  0xfc   : > { %v355_v23 = vpop.f32.mrb[0].mxu0 }
  0xfd   : > { %v433_v40 = vadd.f32 %v432_v35, %v355_v23  ;;  %v1627_v41 = vpop.f32.mrb[1].mxu0 }
  0xfe   : > { %v358_v42 = vpop.f32.mrb[2].mxu0 }
  0xff   : > { %v436_v44 = vadd.f32 %v435_v37, %v358_v42  ;;  %v1628_v45 = vpop.f32.mrb[3].mxu0 }
 0x103   : > { %v974_v55 = vpop.f32.mrb[8].mxu1 }
 0x104   : > { %v573_v1 = vpop.f32.mrb[4].mxu0  ;;  %v1667_v56 = vpop.f32.mrb[9].mxu1 }
 0x105   : > { %v580_v49 = vadd.f32 %v573_v1, %v433_v40  ;;  %v1643_v39 = vpop.f32.mrb[5].mxu0  ;;  %v977_v58 = vpop.f32.mrb[10].mxu1 }
 0x106   : > { %v576_v50 = vpop.f32.mrb[6].mxu0  ;;  %v1668_v59 = vpop.f32.mrb[11].mxu1 }
 0x107   : > { %v581_v52 = vadd.f32 %v576_v50, %v436_v44  ;;  %v669_v53 = vadd.f32 %v662_v43, %v580_v49  ;;  %v1644_v54 = vpop.f32.mrb[7].mxu0 }
 0x109   : > { %v670_v57 = vadd.f32 %v665_v47, %v581_v52 }
 0x10b   : > { %v1239_v5 = vpop.f32.mrb[12].mxu1 }
 0x10c   : > { %v838_v60 = vpop.f32.mrb[8].mxu0  ;;  %v1683_v7 = vpop.f32.mrb[13].mxu1 }
 0x10d   : > { %v845_v61 = vadd.f32 %v838_v60, %v669_v53  ;;  %v1659_v62 = vpop.f32.mrb[9].mxu0  ;;  %v1242_v10 = vpop.f32.mrb[14].mxu1 }
 0x10e   : > { %v841_v63 = vpop.f32.mrb[10].mxu0  ;;  %v1684_v12 = vpop.f32.mrb[15].mxu1 }
 0x10f   : > { %v846_v51 = vadd.f32 %v841_v63, %v670_v57  ;;  %v981_v2 = vadd.f32 %v974_v55, %v845_v61  ;;  %v1660_v3 = vpop.f32.mrb[11].mxu0 }
 0x111   : > { %v982_v4 = vadd.f32 %v977_v58, %v846_v51 }
 0x114   : > { %v1063_v6 = vpop.f32.mrb[12].mxu0 }
 0x115   : > { %v1070_v8 = vadd.f32 %v1063_v6, %v981_v2  ;;  %v1675_v9 = vpop.f32.mrb[13].mxu0 }
 0x116   : > { %v1066_v11 = vpop.f32.mrb[14].mxu0 }
 0x117   : > { %v1071_v14 = vadd.f32 %v1066_v11, %v982_v4  ;;  %v1246_v15 = vadd.f32 %v1239_v5, %v1070_v8  ;;  %v1676_v13 = vpop.f32.mrb[15].mxu0 }
 0x119   : > { %v1247_v16 = vadd.f32 %v1242_v10, %v1071_v14 }
 0x11c   : > { %v1375_v17 = vpop.f32.mrb[16].mxu0 }
 0x11d   : > { %v1382_v19 = vadd.f32 %v1375_v17, %v1246_v15  ;;  %v1691_v20 = vpop.f32.mrb[17].mxu0 }
 0x11e   : > { %v1378_v21 = vpop.f32.mrb[18].mxu0 }
 0x11f   : > { %v1391_v22 = vadd.f32 %v1586_v18, %v1382_v19  ;;  %v1383_v24 = vadd.f32 %v1378_v21, %v1247_v16  ;;  %v1692_v25 = vpop.f32.mrb[19].mxu0 }
 0x121   : > { %v1592_v27 = vpack.c.bf16 %v1391_v22, %v1391_v22  ;;  %v1392_v28 = vadd.f32 %v1586_v18, %v1383_v24 }
 0x123   : > { %1402 = vst.msk [vmem:[%s170_s7] sm:$0xf] %vm1401_vm0, %v1592_v27  ;;  %v1593_v29 = vpack.c.bf16 %v1392_v28, %v1392_v28 }
 0x125   : > { %1403 = vst.msk [vmem:[%s170_s7 + $0x4] sm:$0xf] %vm1401_vm0, %v1593_v29 }
 0x126 PF: > { %s13_s12 = sadd.s32 1, %s1741_s12  }
 0x127   : > { %p10_p4 = scmp.ge.s32.totalorder %s13_s12, 4  }
 0x129   :  { %12 = sbr.rel (!%p10_p4) target bundleno = 1 (0x1), region = 72 }

// kernel: db_model_forward.26
= control target key start
LH: loop header
LB: loop body
LE: loop exit
PB: predicated region body
PF: predicated region fallthrough
CT: control target
= control target key end

     0   :  { %s2428_s12 = smov 0   ;;  %s2955_s0 = inlined_call_operand.vmem [shape: bf16[2,1,10,10,32], index: 0, kind: input, shape index: {}]   ;;  %s2956_s1 = inlined_call_operand.vmem [shape: bf16[9,32,8], index: 1, kind: input, shape index: {}]   ;;  %s2957_s2 = inlined_call_operand.vmem [shape: f32[1,8], index: 2, kind: input, shape index: {}]   ;;  %s2958_s3 = inlined_call_operand.vmem [shape: bf16[2,64,8], index: 3, kind: output, shape index: {}]  }
   0x1 LB: > { %s1893_s13 = sadd.s32 4294967295, %s2406_s12   ;;  %p1897_p0 = scmp.ge.s32.totalorder %s2406_s12, 1  ;;  %s2406_s12 = sphi %s2428_s12, %s13_s12  }
   0x2   : > { %p137_p1 = scmp.lt.s32.totalorder %s2406_s12, 3 }
   0x4   : > { %p138_p2 = pnand %p1897_p0, %p137_p1 }
   0x5   : > { %v2370_v0 = vld [vmem:[%s2956_s1 + $0x10] sm:$0xff] (!%p138_p2)   ;;  %p161_p3 = scmp.lt.s32.totalorder (!%p138_p2), %s1893_s13, 1  ;;  %v2442_v1 = vld [vmem:[%s2956_s1 + $0x40] sm:$0xff] (!%p138_p2)   ;;  %v2372_v2 = vld [vmem:[%s2956_s1 + $0x18] sm:$0xff] (!%p138_p2)   ;;  %vm192_vm0 = vsmask.f32 (!%p138_p2), 3328 }
   0x6   : > { %141 = sbr.rel (%p138_p2) target bundleno = 336 (0x150), region = 32  ;;  %2185 = vmatprep.subr.bf16.mxu1 (!%p138_p2), %v2370_v0  ;;  %2233 = vmatprep.subr.bf16.mxu0 (!%p138_p2), %v2442_v1  ;;  %v2453_v3 = vld [vmem:[%s2956_s1 + $0x48] sm:$0xff] (!%p138_p2)   ;;  %v2460_v4 = vld [vmem:[%s2956_s1] sm:$0xff] (!%p138_p2)   ;;  %v2471_v5 = vld [vmem:[%s2956_s1 + $0x50] sm:$0xff] (!%p138_p2)   ;;  %vm193_vm1 = vsmask.f32 (!%p138_p2), 7440 }
   0x7   : > { %2186 = vmatpush3.bf16.msra.mxu1 (!%p138_p2), %v2370_v0  ;;  %2234 = vmatpush3.bf16.msra.mxu0 (!%p138_p2), %v2442_v1  ;;  %vm2505_vm2 = vmor (!%p138_p2), %vm192_vm0, %vm193_vm1  ;;  %vm336_vm3 = vcmask (!%p138_p2), 261120   ;;  %vm547_vm4 = vcmask (!%p138_p2), 1042432   ;;  %vm548_vm5 = vcmask (!%p138_p2), 1046532   ;;  %vm1829_vm7 = vcmask (!%p138_p2), 60416  }
   0x8   : > { %2187 = vmatprep.subr.bf16.mxu1 (!%p138_p2), %v2372_v2  ;;  %2235 = vmatprep.subr.bf16.mxu0 (!%p138_p2), %v2453_v3  ;;  %vm2612_vm6 = vmor (!%p138_p2), %vm547_vm4, %vm548_vm5 }
   0xb   : > { %2188 = vmatpush3.bf16.msra.mxu1 (!%p138_p2), %v2372_v2  ;;  %2236 = vmatpush3.bf16.msra.mxu0 (!%p138_p2), %v2453_v3 }
   0xc   : > { %2197 = vmatprep.subr.bf16.mxu1 (!%p138_p2), %v2460_v4  ;;  %2245 = vmatprep.subr.bf16.mxu0 (!%p138_p2), %v2471_v5 }
   0xd   : > { %s2964_s13 = smov (!%p161_p3, %s1893_s13), 1 }
   0xe   : > { %s2361_s22 = smul.u32 80, %s2964_s13  ;;  %s2122_s4 = sshll.u32 %s2964_s13, 5 }
   0xf   : > { %s2934_s7 = scalar_lea.vmem %s2958_s3, %s2122_s4 }
  0x10   : > { %s2466_s27 = scalar_lea.vmem %s2955_s0, %s2361_s22 }
  0x11   : > { %v2474_v6 = vld [vmem:[%s2466_s27] sm:$0xf]  ;;  %v2477_v7 = vld [vmem:[%s2466_s27 + $0x8] sm:$0xf]  ;;  %v2480_v8 = vld [vmem:[%s2466_s27 + $0x4] sm:$0x1] }
  0x12   : > { %v2484_v9 = vld [vmem:[%s2466_s27 + $0xc] sm:$0x1]  ;;  %v196_v10 = vshrl.u32 %v2474_v6, 16  ;;  %v199_v11 = vshll.u32 %v2474_v6, 16  ;;  %v205_v12 = vshll.u32 %v2480_v8, 16  ;;  %v210_v13 = vshrl.u32 %v2477_v7, 16 }
  0x13   : > { %v213_v14 = vshll.u32 %v2477_v7, 16  ;;  %v219_v15 = vshll.u32 %v2484_v9, 16  ;;  %v1969_v16 = vld [vmem:[%s2466_s27 + $0x8] sm:$0xf]  ;;  %v2496_v21 = vld [vmem:[%s2466_s27 + $0xc] sm:$0x1] }
  0x14   : > { %v198_v17 = vrot.slane %v196_v10, 4  ;;  %v201_v18 = vrot.slane %v199_v11, 5  ;;  %v207_v19 = vrot.slane %v205_v12, 5  ;;  %v212_v20 = vrot.slane %v210_v13, 4  ;;  %v1971_v24 = vld [vmem:[%s2466_s27 + $0x10] sm:$0xf] }
  0x15   : > { %v215_v22 = vrot.slane %v213_v14, 5  ;;  %v221_v23 = vrot.slane %v219_v15, 5  ;;  %v2500_v25 = vld [vmem:[%s2466_s27 + $0x14] sm:$0x1]  ;;  %v844_v27 = vshrl.u32 %v1969_v16, 16  ;;  %v847_v28 = vshll.u32 %v1969_v16, 16 }
  0x16   : > { %v202_v26 = vor.u32 %v201_v18, %v198_v17  ;;  %v853_v29 = vshll.u32 %v2496_v21, 16  ;;  %v858_v32 = vshrl.u32 %v1971_v24, 16  ;;  %v861_v33 = vshll.u32 %v1971_v24, 16  ;;  %v2511_v35 = vld [vmem:[%s2466_s27 + $0x10] sm:$0xf] }
  0x17   : > { %v216_v31 = vor.u32 %v215_v22, %v212_v20  ;;  %v867_v34 = vshll.u32 %v2500_v25, 16  ;;  %v846_v37 = vrot.slane %v844_v27, 4  ;;  %v849_v38 = vrot.slane %v847_v28, 5  ;;  %v2514_v39 = vld [vmem:[%s2466_s27 + $0x18] sm:$0xf] }
  0x18   : > { %v203_v36 = vrot.slane %v202_v26, 4  ;;  %v860_v41 = vrot.slane %v858_v32, 4  ;;  %v863_v42 = vrot.slane %v861_v33, 5  ;;  %v2517_v43 = vld [vmem:[%s2466_s27 + $0x14] sm:$0x1]  ;;  %v855_v46 = vrot.slane %v853_v29, 5 }
  0x19   : > { %v217_v40 = vrot.slane %v216_v31, 4  ;;  %v850_v45 = vor.u32 %v849_v38, %v846_v37  ;;  %v869_v47 = vrot.slane %v867_v34, 5  ;;  %v2524_v50 = vld [vmem:[%s2466_s27 + $0x1c] sm:$0x1]  ;;  %v224_v51 = vshrl.u32 %v2511_v35, 16 }
  0x1a   : > { %v208_v44 = vsel %vm2505_vm2, %v203_v36, %v207_v19  ;;  %v864_v49 = vor.u32 %v863_v42, %v860_v41  ;;  %v227_v52 = vshll.u32 %v2511_v35, 16  ;;  %v1973_v53 = vld [vmem:[%s2466_s27 + $0x18] sm:$0xf]  ;;  %v233_v56 = vshll.u32 %v2517_v43, 16  ;;  %v2538_v10 = vld [vmem:[%s2466_s27 + $0x1c] sm:$0x1] }
  0x1b   : > { %v222_v48 = vsel %vm2505_vm2, %v217_v40, %v221_v23  ;;  %v851_v55 = vrot.slane %v850_v45, 4  ;;  %v238_v57 = vshrl.u32 %v2514_v39, 16  ;;  %v226_v59 = vrot.slane %v224_v51, 4  ;;  %v1975_v15 = vld [vmem:[%s2466_s27 + $0x20] sm:$0xf] }
  0x1c   : > { %v1905_v54 = vcombine.low %v208_v44, %v222_v48  ;;  %v865_v58 = vrot.slane %v864_v49, 4  ;;  %v229_v60 = vrot.slane %v227_v52, 5  ;;  %v241_v61 = vshll.u32 %v2514_v39, 16  ;;  %v2544_v16 = vld [vmem:[%s2466_s27 + $0x24] sm:$0x1]  ;;  %v2377_v52 = vld [vmem:[%s2956_s1 + $0x8] sm:$0xff]  }
  0x1d   : > { %v856_v62 = vsel %vm2505_vm2, %v851_v55, %v855_v46  ;;  %v1095_v63 = vrot.slane %v2496_v21, 5  ;;  %v240_v0 = vrot.slane %v238_v57, 4  ;;  %v247_v2 = vshll.u32 %v2524_v50, 16  ;;  %v2548_v22 = vld [vmem:[%s2466_s27 + $0x20] sm:$0xf] }
  0x1e   : > { %2189 = vmatprep.mubr.msk.bf16.mxu1 %vm336_vm3, %v1905_v54  ;;  %v870_v11 = vsel %vm2505_vm2, %v865_v58, %v869_v47  ;;  %v230_v12 = vor.u32 %v229_v60, %v226_v59  ;;  %v235_v13 = vrot.slane %v233_v56, 5  ;;  %v243_v14 = vrot.slane %v241_v61, 5  ;;  %v2556_v38 = vld [vmem:[%s2466_s27 + $0x24] sm:$0x1]  ;;  %v2560_v45 = vld [vmem:[%s2466_s27 + $0x28] sm:$0xf] }
  0x1f   : > { %v1989_v17 = vcombine.low %v856_v62, %v870_v11  ;;  %v1099_v18 = vrot.slane %v2500_v25, 5  ;;  %v249_v19 = vrot.slane %v247_v2, 5  ;;  %v872_v20 = vshrl.u32 %v1973_v53, 16  ;;  %v2566_v49 = vld [vmem:[%s2466_s27 + $0x2c] sm:$0x1] }
  0x20   : > { %v231_v23 = vrot.slane %v230_v12, 4  ;;  %v244_v24 = vor.u32 %v243_v14, %v240_v0  ;;  %v875_v26 = vshll.u32 %v1973_v53, 16  ;;  %v881_v27 = vshll.u32 %v2538_v10, 16  ;;  %v2575_v57 = vld [vmem:[%s2466_s27 + $0x30] sm:$0xf] }
  0x21   : > { %2237 = vmatprep.mubr.msk.bf16.mxu0 %vm336_vm3, %v1989_v17  ;;  %v874_v28 = vrot.slane %v872_v20, 4  ;;  %v886_v29 = vshrl.u32 %v1975_v15, 16  ;;  %v889_v31 = vshll.u32 %v1975_v15, 16  ;;  %v895_v32 = vshll.u32 %v2544_v16, 16  ;;  %v2578_v58 = vld [vmem:[%s2466_s27 + $0x34] sm:$0x1] }
  0x22   : > { %v236_v33 = vsel %vm2505_vm2, %v231_v23, %v235_v13  ;;  %v245_v34 = vrot.slane %v244_v24, 4  ;;  %v877_v36 = vrot.slane %v875_v26, 5  ;;  %v883_v37 = vrot.slane %v881_v27, 5  ;;  %v2583_v0 = vld [vmem:[%s2466_s27 + $0x38] sm:$0xf]  ;;  %v2600_v24 = vld [vmem:[%s2956_s1 + $0x20] sm:$0xff]  }
  0x23   : > { %v888_v40 = vrot.slane %v886_v29, 4  ;;  %v891_v41 = vrot.slane %v889_v31, 5  ;;  %v897_v42 = vrot.slane %v895_v32, 5  ;;  %v1103_v44 = vrot.slane %v2538_v10, 5  ;;  %v2376_v15 = vld [vmem:[%s2956_s1 + $0x58] sm:$0xff]  }
  0x24   : > { %v250_v46 = vsel %vm2505_vm2, %v245_v34, %v249_v19  ;;  %v878_v47 = vor.u32 %v877_v36, %v874_v28  ;;  %v1107_v48 = vrot.slane %v2544_v16, 5  ;;  %v252_v51 = vshrl.u32 %v2548_v22, 16  ;;  %v2594_v20 = vld [vmem:[%s2466_s27 + $0x3c] sm:$0x1]  ;;  %v1999_v29 = vld [vmem:[%s2466_s27 + $0x8] sm:$0xe] }
  0x25   : > { %v1906_v53 = vcombine.low %v236_v33, %v250_v46  ;;  %v892_v54 = vor.u32 %v891_v41, %v888_v40  ;;  %v255_v55 = vshll.u32 %v2548_v22, 16  ;;  %v261_v56 = vshll.u32 %v2556_v38, 16  ;;  %v2000_v36 = vld [vmem:[%s2466_s27 + $0x10] sm:$0xe]  ;;  %v2006_v16 = vld [vmem:[%s2466_s27 + $0x40] sm:$0xe] }
  0x26   : > { %v879_v59 = vrot.slane %v878_v47, 4  ;;  %v254_v60 = vrot.slane %v252_v51, 4  ;;  %v266_v61 = vshrl.u32 %v2560_v45, 16  ;;  %v269_v62 = vshll.u32 %v2560_v45, 16  ;;  %v2001_v47 = vld [vmem:[%s2466_s27 + $0x18] sm:$0xe] }
  0x27   : > { %2190 = vmatmul.mubr.msk.bf16.vlgmr.msra.gmra.mrb[0].mxu1 %vm336_vm3, %v1906_v53  ;;  %v893_v2 = vrot.slane %v892_v54, 4  ;;  %v257_v11 = vrot.slane %v255_v55, 5  ;;  %v263_v12 = vrot.slane %v261_v56, 5  ;;  %v275_v13 = vshll.u32 %v2566_v49, 16  ;;  %v2378_v56 = vld [vmem:[%s2956_s1 + $0x60] sm:$0xff]  }
  0x28   : > { %2198 = vmatpush3.bf16.msra.mxu1 %v2460_v4  ;;  %v884_v14 = vsel %vm2505_vm2, %v879_v59, %v883_v37  ;;  %v268_v17 = vrot.slane %v266_v61, 4  ;;  %v271_v19 = vrot.slane %v269_v62, 5  ;;  %v280_v23 = vshrl.u32 %v2575_v57, 16  ;;  %v2002_v59 = vld [vmem:[%s2466_s27 + $0x20] sm:$0xe] }
  0x29   : > { %v898_v4 = vsel %vm2505_vm2, %v893_v2, %v897_v42  ;;  %v258_v26 = vor.u32 %v257_v11, %v254_v60  ;;  %v277_v27 = vrot.slane %v275_v13, 5  ;;  %2199 = vmatprep.subr.bf16.mxu1 %v2377_v52  ;;  %v283_v28 = vshll.u32 %v2575_v57, 16  ;;  %v2111_v46 = vld [vmem:[%s2957_s2] ss:$0 sm:$0xff] }
  0x2a   : > { %v1990_v31 = vcombine.low %v884_v14, %v898_v4  ;;  %v272_v32 = vor.u32 %v271_v19, %v268_v17  ;;  %v282_v33 = vrot.slane %v280_v23, 4  ;;  %v289_v34 = vshll.u32 %v2578_v58, 16  ;;  %v2635_v14 = vld [vmem:[%s2466_s27 + $0x2c] sm:$0x1] }
  0x2b   : > { %v259_v37 = vrot.slane %v258_v26, 4  ;;  %v285_v40 = vrot.slane %v283_v28, 5  ;;  %v294_v41 = vshrl.u32 %v2583_v0, 16  ;;  %v297_v42 = vshll.u32 %v2583_v0, 16  ;;  %v2638_v26 = vld [vmem:[%s2466_s27 + $0x34] sm:$0x1] }
  0x2c   : > { %2238 = vmatmul.mubr.msk.bf16.vlgmr.msra.gmra.mrb[0].mxu0 %vm336_vm3, %v1990_v31  ;;  %v273_v51 = vrot.slane %v272_v32, 4  ;;  %v291_v53 = vrot.slane %v289_v34, 5  ;;  %v303_v54 = vshll.u32 %v2594_v20, 16  ;;  %2200 = vmatpush3.bf16.msra.mxu1 %v2377_v52  ;;  %v2007_v55 = vrot.slane %v1999_v29, 9  ;;  %v2003_v52 = vld [vmem:[%s2466_s27 + $0x28] sm:$0xe] }
  0x2d   : > { %2246 = vmatpush3.bf16.msra.mxu0 %v2471_v5  ;;  %v264_v60 = vsel %vm2505_vm2, %v259_v37, %v263_v12  ;;  %v286_v61 = vor.u32 %v285_v40, %v282_v33  ;;  %v296_v62 = vrot.slane %v294_v41, 4  ;;  %v299_v2 = vrot.slane %v297_v42, 5  ;;  %2209 = vmatprep.subr.bf16.mxu1 %v2600_v24  ;;  %v2004_v28 = vld [vmem:[%s2466_s27 + $0x30] sm:$0xe]  ;;  %v2646_v31 = vld [vmem:[%s2466_s27 + $0x3c] sm:$0x1] }
  0x2e   : > { %2247 = vmatprep.subr.bf16.mxu0 %v2376_v15  ;;  %v278_v11 = vsel %vm2505_vm2, %v273_v51, %v277_v27  ;;  %v305_v13 = vrot.slane %v303_v54, 5  ;;  %v1096_v5 = vsel %vm2612_vm6, %v2007_v55, %v1095_v63  ;;  %v2008_v12 = vrot.slane %v2000_v36, 9  ;;  %v2005_v63 = vld [vmem:[%s2466_s27 + $0x38] sm:$0xe] }
  0x2f   : > { %v1907_v17 = vcombine.low %v264_v60, %v278_v11  ;;  %v287_v19 = vrot.slane %v286_v61, 4  ;;  %v300_v23 = vor.u32 %v299_v2, %v296_v62  ;;  %v2009_v4 = vrot.slane %v2001_v47, 9  ;;  %v524_v60 = vld [vmem:[%s2466_s27 + $0x8] sm:$0xe] }
  0x30   : > { %v1100_v27 = vsel %vm2612_vm6, %v2008_v12, %v1099_v18  ;;  %v2010_v29 = vrot.slane %v2002_v59, 9  ;;  %v2011_v21 = vrot.slane %v2003_v52, 9  ;;  %v2012_v36 = vrot.slane %v2004_v28, 9  ;;  %v523_v59 = vld [vmem:[%s2466_s27] sm:$0xe] }
  0x31   : > { %2248 = vmatpush3.bf16.msra.mxu0 %v2376_v15  ;;  %2193 = vmatprep.mubr.msk.bf16.mxu1 %vm336_vm3, %v1907_v17  ;;  %v292_v32 = vsel %vm2505_vm2, %v287_v19, %v291_v53  ;;  %v301_v33 = vrot.slane %v300_v23, 4  ;;  %v2019_v34 = vcombine.low %v1096_v5, %v1100_v27  ;;  %v1104_v25 = vsel %vm2612_vm6, %v2009_v4, %v1103_v44  ;;  %v2668_v44 = vld [vmem:[%s2466_s27 + $0x44] sm:$0x1]  ;;  %v525_v12 = vld [vmem:[%s2466_s27 + $0x10] sm:$0xe] }
  0x32   : > { %2257 = vmatprep.subr.bf16.mxu0 %v2378_v56  ;;  %v1108_v18 = vsel %vm2612_vm6, %v2010_v29, %v1107_v48  ;;  %v1111_v15 = vrot.slane %v2635_v14, 5  ;;  %v1115_v37 = vrot.slane %v2638_v26, 5  ;;  %v1915_v10 = vcombine.low %v2474_v6, %v2477_v7  ;;  %v2382_v6 = vld [vmem:[%s2956_s1 + $0x68] sm:$0xff]   ;;  %v526_v17 = vld [vmem:[%s2466_s27 + $0x18] sm:$0xe] }
  0x33   : > { %v306_v40 = vsel %vm2505_vm2, %v301_v33, %v305_v13  ;;  %2249 = vmatprep.mubr.msk.bf16.mxu0 %vm336_vm3, %v2019_v34  ;;  %v2020_v48 = vcombine.low %v1104_v25, %v1108_v18  ;;  %v2013_v53 = vrot.slane %v2005_v63, 9  ;;  %v1119_v54 = vrot.slane %v2646_v31, 5  ;;  %v2386_v28 = vld [vmem:[%s2466_s27 + $0x10] ss:$8 sps:$4 sm:$0xff]   ;;  %v527_v29 = vld [vmem:[%s2466_s27 + $0x20] sm:$0xe] }
  0x34   : > { %v1908_v41 = vcombine.low %v292_v32, %v306_v40  ;;  %v1112_v42 = vsel %vm2612_vm6, %v2011_v21, %v1111_v15  ;;  %v1116_v47 = vsel %vm2612_vm6, %v2012_v36, %v1115_v37  ;;  %v2014_v7 = vrot.slane %v2006_v16, 9  ;;  %v528_v33 = vld [vmem:[%s2466_s27 + $0x28] sm:$0xe]  ;;  %v2730_v34 = vld [vmem:[%s2466_s27 + $0x30] sm:$0xe] }
  0x35   : > { %v2021_v51 = vcombine.low %v1112_v42, %v1116_v47  ;;  %v1123_v55 = vrot.slane %v2668_v44, 5  ;;  %v552_v61 = vrot.slane %v2480_v8, 5  ;;  %v556_v62 = vrot.slane %v2484_v9, 5  ;;  %v2697_v8 = vld [vmem:[%s2956_s1 + $0x70] sm:$0xff]   ;;  %v2053_v37 = vld [vmem:[%s2466_s27 + $0x18] sm:$0xf] }
  0x36   : > { %2194 = vmatmul.mubr.msk.bf16.gmra.mrb[4].mxu1 %vm336_vm3, %v1908_v41  ;;  %v560_v2 = vrot.slane %v2517_v43, 5  ;;  %v564_v52 = vrot.slane %v2524_v50, 5  ;;  %v1120_v11 = vsel %vm2612_vm6, %v2013_v53, %v1119_v54  ;;  %v1925_v9 = vrot.slane %v523_v59, 9  ;;  %v2051_v25 = vld [vmem:[%s2466_s27 + $0x10] sm:$0xf]  ;;  %v2391_v50 = vld [vmem:[%s2956_s1 + $0x78] sm:$0xff]  }
  0x37   : > { %2201 = vmatprep.mubr.msk.bf16.mxu1 %vm336_vm3, %v1915_v10  ;;  %v1124_v13 = vsel %vm2612_vm6, %v2014_v7, %v1123_v55  ;;  %v1926_v43 = vrot.slane %v524_v60, 9  ;;  %v1916_v5 = vcombine.low %v2511_v35, %v2514_v39  ;;  %v1917_v19 = vcombine.low %v2548_v22, %v2560_v45  ;;  %v2737_v36 = vld [vmem:[%s2466_s27 + $0x14] sm:$0x1]  ;;  %v2746_v16 = vld [vmem:[%s2466_s27 + $0x1c] sm:$0x1] }
  0x38   : > { %2250 = vmatmul.mubr.msk.bf16.vlgmr.msra.gmra.mrb[0].mxu0 %vm336_vm3, %v2020_v48  ;;  %v937_v23 = vshll.u32 %v2646_v31, 16  ;;  %v2022_v4 = vcombine.low %v1120_v11, %v1124_v13  ;;  %v568_v27 = vrot.slane %v2556_v38, 5  ;;  %v553_v35 = vsel %vm2612_vm6, %v1925_v9, %v552_v61  ;;  %v2722_v38 = vld [vmem:[%s2956_s1 + $0x30] sm:$0xff]   ;;  %v2055_v59 = vld [vmem:[%s2466_s27 + $0x20] sm:$0xf] }
  0x39   : > { %2258 = vmatpush3.bf16.msra.mxu0 %v2378_v56  ;;  %2253 = vmatprep.mubr.msk.bf16.mxu0 %vm336_vm3, %v2021_v51  ;;  %v2384_v56 = vld [vmem:[%s2956_s1 + $0x28] sm:$0xff]   ;;  %v1927_v39 = vrot.slane %v525_v12, 9  ;;  %v572_v21 = vrot.slane %v2566_v49, 5  ;;  %v557_v22 = vsel %vm2612_vm6, %v1926_v43, %v556_v62  ;;  %v1928_v45 = vrot.slane %v526_v17, 9  ;;  %v2390_v53 = vld [vmem:[%s2466_s27 + $0x30] ss:$8 sps:$4 sm:$0xff]  }
  0x3a   : > { %2259 = vmatprep.subr.bf16.mxu0 %v2382_v6  ;;  %v576_v63 = vrot.slane %v2578_v58, 5  ;;  %v580_v32 = vrot.slane %v2594_v20, 5  ;;  %v1918_v18 = vcombine.low %v2575_v57, %v2583_v0  ;;  %v1929_v15 = vrot.slane %v527_v29, 9  ;;  %v2388_v57 = vld [vmem:[%s2466_s27 + $0x20] ss:$8 sps:$4 sm:$0xff]  }
  0x3b   : > { %v1387_v40 = vshrl.u32 %v2051_v25, 16  ;;  %v2743_v10 = vsel %vm2612_vm6, %v1927_v39, %v560_v2  ;;  %v1390_v41 = vshll.u32 %v2051_v25, 16  ;;  %v1396_v48 = vshll.u32 %v2737_v36, 16  ;;  %v530_v62 = vld [vmem:[%s2466_s27 + $0x38] sm:$0xe] }
  0x3c   : > { %v1930_v0 = vrot.slane %v528_v33, 9  ;;  %v1401_v47 = vshrl.u32 %v2053_v37, 16  ;;  %v1404_v51 = vshll.u32 %v2053_v37, 16  ;;  %v1931_v54 = vrot.slane %v2730_v34, 9  ;;  %v2765_v13 = vld [vmem:[%s2466_s27 + $0x24] sm:$0x1] }
  0x3d   : > { %2260 = vmatpush3.bf16.msra.mxu0 %v2382_v6  ;;  %v1389_v42 = vrot.slane %v1387_v40, 4  ;;  %v1392_v6 = vrot.slane %v1390_v41, 5  ;;  %v1398_v7 = vrot.slane %v1396_v48, 5  ;;  %v1410_v55 = vshll.u32 %v2746_v16, 16  ;;  %v2057_v9 = vld [vmem:[%s2466_s27 + $0x28] sm:$0xf] }
  0x3e   : > { %2202 = vmatmul.mubr.msk.bf16.vlgmr.msra.gmra.mrb[0].mxu1 %vm336_vm3, %v1916_v5  ;;  %2269 = vmatprep.subr.bf16.mxu0 %v2697_v8  ;;  %v565_v60 = vsel %vm2612_vm6, %v1928_v45, %v564_v52  ;;  %v2761_v61 = vsel %vm2612_vm6, %v1929_v15, %v568_v27  ;;  %v1403_v2 = vrot.slane %v1401_v47, 4  ;;  %v1406_v11 = vrot.slane %v1404_v51, 5  ;;  %v2392_v49 = vld [vmem:[%s2466_s27 + $0x40] ss:$8 sps:$4 sm:$0xff]   ;;  %v2059_v48 = vld [vmem:[%s2466_s27 + $0x30] sm:$0xf] }
  0x3f   : > { %2210 = vmatpush3.bf16.msra.mxu1 %v2600_v24  ;;  %2205 = vmatprep.mubr.msk.bf16.mxu1 %vm336_vm3, %v1917_v19  ;;  %v1937_v24 = vcombine.low %v553_v35, %v557_v22  ;;  %v1393_v43 = vor.u32 %v1392_v6, %v1389_v42  ;;  %v1412_v5 = vrot.slane %v1410_v55, 5  ;;  %v1415_v12 = vshrl.u32 %v2055_v59, 16  ;;  %v2061_v51 = vld [vmem:[%s2466_s27 + $0x38] sm:$0xf] }
  0x40   : > { %2254 = vmatmul.mubr.msk.bf16.gmra.mrb[4].mxu0 %vm336_vm3, %v2022_v4  ;;  %2211 = vmatprep.subr.bf16.mxu1 %v2384_v56  ;;  %v1418_v17 = vshll.u32 %v2055_v59, 16  ;;  %v1407_v52 = vor.u32 %v1406_v11, %v1403_v2  ;;  %v1424_v19 = vshll.u32 %v2765_v13, 16  ;;  %v1429_v4 = vshrl.u32 %v2057_v9, 16 }
  0x41   : > { %2261 = vmatprep.mubr.msk.bf16.mxu0 %vm336_vm3, %v2386_v28  ;;  %v1432_v28 = vshll.u32 %v2057_v9, 16  ;;  %v1394_v27 = vrot.slane %v1393_v43, 4  ;;  %v1417_v35 = vrot.slane %v1415_v12, 4  ;;  %v573_v22 = vsel %vm2612_vm6, %v1930_v0, %v572_v21  ;;  %v2393_v21 = vld [vmem:[%s2956_s1 + $0x38] sm:$0xff]   ;;  %v2063_v43 = vld [vmem:[%s2466_s27 + $0x40] sm:$0xf] }
  0x42   : > { %v1420_v39 = vrot.slane %v1418_v17, 5  ;;  %v1408_v45 = vrot.slane %v1407_v52, 4  ;;  %v1431_v33 = vrot.slane %v1429_v4, 4  ;;  %v1938_v25 = vcombine.low %v2743_v10, %v565_v60  ;;  %v2833_v17 = vld [vmem:[%s2466_s27 + $0x44] sm:$0x1] }
  0x43   : > { %2212 = vmatpush3.bf16.msra.mxu1 %v2384_v56  ;;  %v2769_v56 = vld [vmem:[%s2466_s27 + $0x2c] sm:$0x1]  ;;  %v1434_v34 = vrot.slane %v1432_v28, 5  ;;  %v2786_v37 = vrot.slane %v1424_v19, 5  ;;  %v1399_v40 = vsel %vm2505_vm2, %v1394_v27, %v1398_v7  ;;  %v1939_v0 = vcombine.low %v2761_v61, %v573_v22 }
  0x44   : > { %2221 = vmatprep.subr.bf16.mxu1 %v2722_v38  ;;  %v1438_v29 = vshll.u32 %v2769_v56, 16  ;;  %v1421_v15 = vor.u32 %v1420_v39, %v1417_v35  ;;  %v2810_v42 = vsel %vm2612_vm6, %v1931_v54, %v576_v63  ;;  %v1443_v6 = vshrl.u32 %v2059_v48, 16 }
  0x45   : > { %v1435_v10 = vor.u32 %v1434_v34, %v1431_v33  ;;  %v1446_v55 = vshll.u32 %v2059_v48, 16  ;;  %v1457_v60 = vshrl.u32 %v2061_v51, 16  ;;  %v1460_v58 = vshll.u32 %v2061_v51, 16 }
  0x46   : > { %2206 = vmatmul.mubr.msk.bf16.gmra.mrb[4].mxu1 %vm336_vm3, %v1918_v18  ;;  %v1932_v18 = vrot.slane %v530_v62, 9  ;;  %v1440_v41 = vrot.slane %v1438_v29, 5  ;;  %v1422_v47 = vrot.slane %v1421_v15, 4  ;;  %v1445_v61 = vrot.slane %v1443_v6, 4  ;;  %v2397_v6 = vld [vmem:[%s2956_s1 + $0x88] sm:$0xff]  }
  0x47   : > { %2213 = vmatprep.mubr.msk.bf16.mxu1 %vm336_vm3, %v1937_v24  ;;  %v2799_v24 = vld [vmem:[%s2956_s1 + $0x80] sm:$0xff]   ;;  %v1436_v7 = vrot.slane %v1435_v10, 4  ;;  %v1448_v2 = vrot.slane %v1446_v55, 5  ;;  %v1459_v9 = vrot.slane %v1457_v60, 4  ;;  %v1462_v12 = vrot.slane %v1460_v58, 5 }
  0x48   : > { %2262 = vmatmul.mubr.msk.bf16.vlgmr.msra.gmra.mrb[0].mxu0 %vm336_vm3, %v2388_v57  ;;  %v2803_v57 = vld [vmem:[%s2466_s27 + $0x34] sm:$0x1]  ;;  %v581_v54 = vsel %vm2612_vm6, %v1932_v18, %v580_v32  ;;  %v1471_v19 = vshrl.u32 %v2063_v43, 16  ;;  %v1474_v4 = vshll.u32 %v2063_v43, 16  ;;  %v1480_v28 = vshll.u32 %v2833_v17, 16 }
  0x49   : > { %2270 = vmatpush3.bf16.msra.mxu0 %v2697_v8  ;;  %2265 = vmatprep.mubr.msk.bf16.mxu0 %vm336_vm3, %v2390_v53  ;;  %v1413_v8 = vsel %vm2505_vm2, %v1408_v45, %v1412_v5  ;;  %v2814_v53 = vld [vmem:[%s2466_s27 + $0x3c] sm:$0x1]  ;;  %v1452_v59 = vshll.u32 %v2803_v57, 16  ;;  %v1427_v5 = vsel %vm2505_vm2, %v1422_v47, %v2786_v37  ;;  %v1441_v20 = vsel %vm2505_vm2, %v1436_v7, %v1440_v41  ;;  %v2082_v47 = vld [vmem:[%s2466_s27 + $0x18] sm:$0xe] }
  0x4a   : > { %2271 = vmatprep.subr.bf16.mxu0 %v2391_v50  ;;  %v2071_v62 = vcombine.low %v1399_v40, %v1413_v8  ;;  %v1466_v63 = vshll.u32 %v2814_v53, 16  ;;  %v1449_v52 = vor.u32 %v1448_v2, %v1445_v61  ;;  %v1463_v27 = vor.u32 %v1462_v12, %v1459_v9  ;;  %v2083_v60 = vld [vmem:[%s2466_s27 + $0x20] sm:$0xe]  ;;  %v2084_v61 = vld [vmem:[%s2466_s27 + $0x28] sm:$0xe] }
  0x4b   : > { %v1454_v11 = vrot.slane %v1452_v59, 5  ;;  %v1940_v22 = vcombine.low %v2810_v42, %v581_v54  ;;  %v1473_v33 = vrot.slane %v1471_v19, 4  ;;  %v1476_v34 = vrot.slane %v1474_v4, 5  ;;  %v2081_v42 = vld [vmem:[%s2466_s27 + $0x10] sm:$0xe] }
  0x4c   : > { %v1468_v32 = vrot.slane %v1466_v63, 5  ;;  %v1450_v45 = vrot.slane %v1449_v52, 4  ;;  %v1464_v18 = vrot.slane %v1463_v27, 4  ;;  %v2072_v40 = vcombine.low %v1427_v5, %v1441_v20  ;;  %v2396_v54 = vld [vmem:[%s2466_s27 + $0x18] ss:$8 sps:$4 sm:$0xff]  }
  0x4d   : > { %2272 = vmatpush3.bf16.msra.mxu0 %v2391_v50  ;;  %v2065_v50 = vld [vmem:[%s2466_s27 + $0x48] sm:$0xf]  ;;  %v1477_v10 = vor.u32 %v1476_v34, %v1473_v33  ;;  %v1482_v41 = vrot.slane %v1480_v28, 5  ;;  %v2089_v55 = vrot.slane %v2081_v42, 9  ;;  %v2090_v59 = vrot.slane %v2082_v47, 9 }
  0x4e   : > { %2214 = vmatmul.mubr.msk.bf16.vlgmr.msra.gmra.mrb[0].mxu1 %vm336_vm3, %v1938_v25  ;;  %2281 = vmatprep.subr.bf16.mxu0 %v2799_v24  ;;  %v1485_v35 = vshrl.u32 %v2065_v50, 16  ;;  %v1488_v39 = vshll.u32 %v2065_v50, 16  ;;  %v2395_v25 = vld [vmem:[%s2466_s27 + $0x8] ss:$8 sps:$4 sm:$0xff]   ;;  %v1455_v8 = vsel %vm2505_vm2, %v1450_v45, %v1454_v11  ;;  %v1469_v48 = vsel %vm2505_vm2, %v1464_v18, %v1468_v32  ;;  %v2086_v50 = vld [vmem:[%s2466_s27 + $0x38] sm:$0xe] }
  0x4f   : > { %2222 = vmatpush3.bf16.msra.mxu1 %v2722_v38  ;;  %2217 = vmatprep.mubr.msk.bf16.mxu1 %vm336_vm3, %v1939_v0  ;;  %v2838_v38 = vld [vmem:[%s2466_s27 + $0x4c] sm:$0x1]  ;;  %v2073_v51 = vcombine.low %v1455_v8, %v1469_v48  ;;  %v1478_v7 = vrot.slane %v1477_v10, 4  ;;  %v909_v58 = vshll.u32 %v2635_v14, 16  ;;  %v923_v63 = vshll.u32 %v2638_v26, 16 }
  0x50   : > { %2266 = vmatmul.mubr.msk.bf16.gmra.mrb[4].mxu0 %vm336_vm3, %v2392_v49  ;;  %2223 = vmatprep.subr.bf16.mxu1 %v2393_v21  ;;  %v1494_v29 = vshll.u32 %v2838_v38, 16  ;;  %v1487_v15 = vrot.slane %v1485_v35, 4  ;;  %v1490_v37 = vrot.slane %v1488_v39, 5  ;;  %v1638_v49 = vrot.slane %v2737_v36, 5  ;;  %v1979_v14 = vld [vmem:[%s2466_s27 + $0x30] sm:$0xf] }
  0x51   : > { %2273 = vmatprep.mubr.msk.bf16.mxu0 %vm336_vm3, %v2071_v62  ;;  %v1642_v36 = vrot.slane %v2746_v16, 5  ;;  %v1646_v16 = vrot.slane %v2765_v13, 5  ;;  %v1483_v2 = vsel %vm2505_vm2, %v1478_v7, %v1482_v41  ;;  %v2091_v43 = vrot.slane %v2083_v60, 9  ;;  %v1977_v13 = vld [vmem:[%s2466_s27 + $0x28] sm:$0xf] }
  0x52   : > { %v1496_v0 = vrot.slane %v1494_v29, 5  ;;  %v1639_v11 = vsel %vm2612_vm6, %v2089_v55, %v1638_v49  ;;  %v2398_v5 = vld [vmem:[%s2466_s27 + $0x28] ss:$8 sps:$4 sm:$0xff]   ;;  %v1650_v20 = vrot.slane %v2769_v56, 5  ;;  %v900_v12 = vshrl.u32 %v1977_v13, 16 }
  0x53   : > { %2224 = vmatpush3.bf16.msra.mxu1 %v2393_v21  ;;  %v1491_v21 = vor.u32 %v1490_v37, %v1487_v15  ;;  %v1643_v9 = vsel %vm2612_vm6, %v2090_v59, %v1642_v36  ;;  %v2085_v32 = vld [vmem:[%s2466_s27 + $0x30] sm:$0xe]  ;;  %v2092_v19 = vrot.slane %v2084_v61, 9  ;;  %v903_v4 = vshll.u32 %v1977_v13, 16  ;;  %v1981_v27 = vld [vmem:[%s2466_s27 + $0x38] sm:$0xf] }
  0x54   : > { %2293 = vmatprep.subr.bf16.mxu1 %v2442_v1  ;;  %v2101_v52 = vcombine.low %v1639_v11, %v1643_v9  ;;  %v914_v28 = vshrl.u32 %v1979_v14, 16  ;;  %v917_v39 = vshll.u32 %v1979_v14, 16  ;;  %v2093_v29 = vrot.slane %v2085_v32, 9  ;;  %v2399_v7 = vld [vmem:[%s2466_s27 + $0x38] ss:$8 sps:$4 sm:$0xff]  }
  0x55   : > { %v1492_v62 = vrot.slane %v1491_v21, 4  ;;  %v905_v45 = vrot.slane %v903_v4, 5  ;;  %v1654_v34 = vrot.slane %v2803_v57, 5  ;;  %v1658_v18 = vrot.slane %v2814_v53, 5  ;;  %v2087_v59 = vld [vmem:[%s2466_s27 + $0x40] sm:$0xe] }
  0x56   : > { %2218 = vmatmul.mubr.msk.bf16.gmra.mrb[4].mxu1 %vm336_vm3, %v1940_v22  ;;  %v1983_v22 = vld [vmem:[%s2466_s27 + $0x40] sm:$0xf]  ;;  %v916_v33 = vrot.slane %v914_v28, 4  ;;  %v919_v56 = vrot.slane %v917_v39, 5  ;;  %v928_v15 = vshrl.u32 %v1981_v27, 16  ;;  %v931_v37 = vshll.u32 %v1981_v27, 16 }
  0x57   : > { %2225 = vmatprep.mubr.msk.bf16.mxu1 %vm336_vm3, %v2395_v25  ;;  %v1497_v26 = vsel %vm2505_vm2, %v1492_v62, %v1496_v0  ;;  %v2094_v25 = vrot.slane %v2086_v50, 9  ;;  %v942_v8 = vshrl.u32 %v1983_v22, 16  ;;  %v945_v10 = vshll.u32 %v1983_v22, 16  ;;  %v2088_v60 = vld [vmem:[%s2466_s27 + $0x48] sm:$0xe] }
  0x58   : > { %2274 = vmatmul.mubr.msk.bf16.vlgmr.msra.gmra.mrb[0].mxu0 %vm336_vm3, %v2072_v40  ;;  %v2074_v35 = vcombine.low %v1483_v2, %v1497_v26  ;;  %v911_v40 = vrot.slane %v909_v58, 5  ;;  %v920_v41 = vor.u32 %v919_v56, %v916_v33  ;;  %v925_v57 = vrot.slane %v923_v63, 5 }
  0x59   : > { %2282 = vmatpush3.bf16.msra.mxu0 %v2799_v24  ;;  %2277 = vmatprep.mubr.msk.bf16.mxu0 %vm336_vm3, %v2073_v51  ;;  %v902_v24 = vrot.slane %v900_v12, 4  ;;  %v930_v48 = vrot.slane %v928_v15, 4  ;;  %v933_v21 = vrot.slane %v931_v37, 5  ;;  %v1647_v53 = vsel %vm2612_vm6, %v2091_v43, %v1646_v16 }
  0x5a   : > { %2283 = vmatprep.subr.bf16.mxu0 %v2397_v6  ;;  %v944_v42 = vrot.slane %v942_v8, 4  ;;  %v947_v47 = vrot.slane %v945_v10, 5  ;;  %v921_v36 = vrot.slane %v920_v41, 4  ;;  %v1655_v51 = vsel %vm2612_vm6, %v2093_v29, %v1654_v34 }
  0x5b   : > { %v906_v49 = vor.u32 %v905_v45, %v902_v24  ;;  %v951_v62 = vshll.u32 %v2668_v44, 16  ;;  %v934_v16 = vor.u32 %v933_v21, %v930_v48  ;;  %v2095_v11 = vrot.slane %v2087_v59, 9 }
  0x5c   : > { %v926_v61 = vsel %vm2505_vm2, %v921_v36, %v925_v57  ;;  %v948_v58 = vor.u32 %v947_v47, %v944_v42  ;;  %v1662_v9 = vrot.slane %v2833_v17, 5  ;;  %v2096_v43 = vrot.slane %v2088_v60, 9 }
  0x5d   : > { %2284 = vmatpush3.bf16.msra.mxu0 %v2397_v6  ;;  %v907_v0 = vrot.slane %v906_v49, 4  ;;  %v1659_v6 = vsel %vm2612_vm6, %v2094_v25, %v1658_v18  ;;  %v1666_v13 = vrot.slane %v2838_v38, 5  ;;  %v939_v44 = vrot.slane %v937_v23, 5 }
  0x5e   : > { %2226 = vmatmul.mubr.msk.bf16.vlgmr.msra.gmra.mrb[0].mxu1 %vm336_vm3, %v2396_v54  ;;  %v2103_v2 = vcombine.low %v1655_v51, %v1659_v6  ;;  %v935_v14 = vrot.slane %v934_v16, 4  ;;  %v949_v26 = vrot.slane %v948_v58, 4  ;;  %v1663_v17 = vsel %vm2612_vm6, %v2095_v11, %v1662_v9 }
  0x5f   : > { %2295 = vmatpush3.bf16.msra.mxu1 %v2442_v1  ;;  %2229 = vmatprep.mubr.msk.bf16.mxu1 %vm336_vm3, %v2398_v5  ;;  %v1651_v1 = vsel %vm2612_vm6, %v2092_v19, %v1650_v20  ;;  %v912_v55 = vsel %vm2505_vm2, %v907_v0, %v911_v40  ;;  %v1667_v38 = vsel %vm2612_vm6, %v2096_v43, %v1666_v13 }
  0x60   : > { %2278 = vmatmul.mubr.msk.bf16.gmra.mrb[4].mxu0 %vm336_vm3, %v2074_v35  ;;  %2294 = vmatprep.subr.bf16.mxu1 %v2453_v3  ;;  %v2102_v63 = vcombine.low %v1647_v53, %v1651_v1  ;;  %v1991_v54 = vcombine.low %v912_v55, %v926_v61  ;;  %v940_v31 = vsel %vm2505_vm2, %v935_v14, %v939_v44 }
  0x61   : > { %2285 = vmatprep.mubr.msk.bf16.mxu0 %vm336_vm3, %v2101_v52  ;;  %v2104_v5 = vcombine.low %v1663_v17, %v1667_v38 }
  0x63   : > { %2296 = vmatpush3.bf16.msra.mxu1 %v2453_v3  ;;  %v953_v3 = vrot.slane %v951_v62, 5 }
  0x65   : > { %v954_v23 = vsel %vm2505_vm2, %v949_v26, %v953_v3 }
  0x66   : > { %2230 = vmatmul.mubr.msk.bf16.gmra.mrb[4].mxu1 %vm336_vm3, %v2399_v7  ;;  %v1992_v20 = vcombine.low %v940_v31, %v954_v23 }
  0x67   : > { %2241 = vmatprep.mubr.msk.bf16.mxu1 %vm336_vm3, %v1991_v54 }
  0x68   : > { %2286 = vmatmul.mubr.msk.bf16.vlgmr.msra.gmra.mrb[0].mxu0 %vm336_vm3, %v2102_v63 }
  0x69   : > { %2289 = vmatprep.mubr.msk.bf16.mxu0 %vm336_vm3, %v2103_v2 }
  0x70   : > { %2290 = vmatmul.mubr.msk.bf16.gmra.mrb[4].mxu0 %vm336_vm3, %v2104_v5 }
  0x72   : > { %2242 = vmatmul.mubr.msk.bf16.vlgmr.msra.gmra.mrb[4].mxu1 %vm336_vm3, %v1992_v20 }
 0x131   : > { %v2227_v12 = vpop.f32.mrb[0].mxu1 }
 0x132   : > { %v788_v32 = vpop.f32.mrb[1].mxu1 }
 0x133   : > { %v2228_v50 = vpop.f32.mrb[2].mxu1 }
 0x134   : > { %v791_v52 = vpop.f32.mrb[3].mxu1 }
 0x13b   : > { %v2287_v19 = vpop.f32.mrb[0].mxu0 }
 0x13c   : > { %v2297_v4 = vadd.f32 %v2287_v19, %v2227_v12  ;;  %v1743_v28 = vpop.f32.mrb[1].mxu0 }
 0x13d   : > { %v2298_v30 = vadd.f32 %v1743_v28, %v788_v32  ;;  %v2288_v27 = vpop.f32.mrb[2].mxu0 }
 0x13e   : > { %v1791_v35 = vadd.f32 %v2297_v4, %v2111_v46  ;;  %v2299_v24 = vadd.f32 %v2288_v27, %v2228_v50  ;;  %v1746_v39 = vpop.f32.mrb[3].mxu0 }
 0x13f   : > { %v1789_v29 = vadd.f32 %v2298_v30, %v2111_v46  ;;  %v2300_v22 = vadd.f32 %v1746_v39, %v791_v52 }
 0x140   : > { %v2125_v45 = vpack.c.bf16 %v1791_v35, %v1791_v35  ;;  %v1792_v33 = vadd.f32 %v2299_v24, %v2111_v46 }
 0x141   : > { %v2123_v34 = vpack.c.bf16 %v1789_v29, %v1789_v29  ;;  %v1790_v25 = vadd.f32 %v2300_v22, %v2111_v46 }
 0x142   : > { %1832 = vst.msk [vmem:[%s2934_s7 + $0x8] sm:$0xf] %vm1829_vm7, %v2125_v45  ;;  %v2126_v56 = vpack.c.bf16 %v1792_v33, %v1792_v33 }
 0x143   : > { %1830 = vst.msk [vmem:[%s2934_s7] sm:$0xf] %vm1829_vm7, %v2123_v34  ;;  %v2124_v18 = vpack.c.bf16 %v1790_v25, %v1790_v25  ;;  %v2291_v15 = vpop.f32.mrb[4].mxu0 }
 0x144   : > { %1833 = vst.msk [vmem:[%s2934_s7 + $0xc] sm:$0xf] %vm1829_vm7, %v2126_v56  ;;  %v1759_v37 = vpop.f32.mrb[5].mxu0 }
 0x145   : > { %1831 = vst.msk [vmem:[%s2934_s7 + $0x4] sm:$0xf] %vm1829_vm7, %v2124_v18  ;;  %v2243_v49 = vpop.f32.mrb[4].mxu1  ;;  %v2292_v40 = vpop.f32.mrb[6].mxu0 }
 0x146   : > { %v2301_v8 = vadd.f32 %v2291_v15, %v2243_v49  ;;  %v1046_v10 = vpop.f32.mrb[5].mxu1  ;;  %v1762_v41 = vpop.f32.mrb[7].mxu0 }
 0x147   : > { %v2302_v57 = vadd.f32 %v1759_v37, %v1046_v10  ;;  %v2244_v48 = vpop.f32.mrb[6].mxu1 }
 0x148   : > { %v1795_v21 = vadd.f32 %v2301_v8, %v2111_v46  ;;  %v2303_v53 = vadd.f32 %v2292_v40, %v2244_v48  ;;  %v1049_v0 = vpop.f32.mrb[7].mxu1 }
 0x149   : > { %v1793_v42 = vadd.f32 %v2302_v57, %v2111_v46  ;;  %v2304_v47 = vadd.f32 %v1762_v41, %v1049_v0 }
 0x14a   : > { %v2129_v1 = vpack.c.bf16 %v1795_v21, %v1795_v21  ;;  %v1796_v36 = vadd.f32 %v2303_v53, %v2111_v46 }
 0x14b   : > { %v2127_v51 = vpack.c.bf16 %v1793_v42, %v1793_v42  ;;  %v1794_v6 = vadd.f32 %v2304_v47, %v2111_v46 }
 0x14c   : > { %1836 = vst.msk [vmem:[%s2934_s7 + $0x18] sm:$0xf] %vm1829_vm7, %v2129_v1  ;;  %v2130_v7 = vpack.c.bf16 %v1796_v36, %v1796_v36 }
 0x14d   : > { %1834 = vst.msk [vmem:[%s2934_s7 + $0x10] sm:$0xf] %vm1829_vm7, %v2127_v51  ;;  %v2128_v55 = vpack.c.bf16 %v1794_v6, %v1794_v6 }
 0x14e   : > { %1837 = vst.msk [vmem:[%s2934_s7 + $0x1c] sm:$0xf] %vm1829_vm7, %v2130_v7 }
 0x14f   : > { %1835 = vst.msk [vmem:[%s2934_s7 + $0x14] sm:$0xf] %vm1829_vm7, %v2128_v55 }
 0x150 PF: > { %s13_s12 = sadd.s32 1, %s2406_s12  }
 0x151   : > { %p10_p4 = scmp.ge.s32.totalorder %s13_s12, 4  }
 0x153   :  { %12 = sbr.rel (!%p10_p4) target bundleno = 1 (0x1), region = 72 }

// kernel: db_model_forward.23
= control target key start
LH: loop header
LB: loop body
LE: loop exit
PB: predicated region body
PF: predicated region fallthrough
CT: control target
= control target key end

     0   :  { %s1073_s12 = smov 0   ;;  %s1204_s0 = inlined_call_operand.vmem [shape: bf16[2,1,3,3,32], index: 0, kind: input, shape index: {}]   ;;  %s1205_s1 = inlined_call_operand.vmem [shape: bf16[9,32,8], index: 1, kind: input, shape index: {}]   ;;  %s1206_s2 = inlined_call_operand.vmem [shape: f32[1,8], index: 2, kind: input, shape index: {}]   ;;  %s1207_s3 = inlined_call_operand.vmem [shape: bf16[2,1,8], index: 3, kind: output, shape index: {}]  }
   0x1 LB: > { %s839_s13 = sadd.s32 4294967295, %s1048_s12   ;;  %p843_p0 = scmp.ge.s32.totalorder %s1048_s12, 1  ;;  %s1048_s12 = sphi %s1073_s12, %s13_s12  }
   0x2   : > { %p137_p1 = scmp.lt.s32.totalorder %s1048_s12, 3 }
   0x4   : > { %p138_p2 = pnand %p843_p0, %p137_p1 }
   0x5   : > { %v1024_v0 = vld [vmem:[%s1205_s1 + $0x10] sm:$0xff] (!%p138_p2)   ;;  %v1050_v1 = vmov (!%p138_p2), 0.0   ;;  %v1025_v2 = vld [vmem:[%s1205_s1] sm:$0xff] (!%p138_p2)   ;;  %v182_v3 = vlaneseq (!%p138_p2)  ;;  %v1026_v4 = vld [vmem:[%s1205_s1 + $0x18] sm:$0xff] (!%p138_p2)   ;;  %vm1051_vm0 = vmmov (!%p138_p2), 0   ;;  %p159_p3 = scmp.lt.s32.totalorder (!%p138_p2), %s839_s13, 1 }
   0x6   : > { %141 = sbr.rel (%p138_p2) target bundleno = 275 (0x113), region = 32  ;;  %940 = vmatprep.subr.bf16.mxu0 (!%p138_p2), %v1050_v1  ;;  %948 = vmatprep.subr.bf16.mxu1 (!%p138_p2), %v1050_v1  ;;  %v1027_v5 = vld [vmem:[%s1205_s1 + $0x8] sm:$0xff] (!%p138_p2)   ;;  %v1052_v6 = vmov (!%p138_p2), 1983009808   ;;  %vm201_vm1 = vcmask (!%p138_p2), 261120   ;;  %v1029_v10 = vld [vmem:[%s1205_s1 + $0x30] sm:$0xff] (!%p138_p2)  }
   0x7   : > { %941 = vmatpush3.bf16.msra.mxu0 (!%p138_p2), %v1024_v0  ;;  %944 = vmatprep.mubr.msk.bf16.mxu0 (!%p138_p2), %vm1051_vm0, %v1050_v1  ;;  %v180_v7 = vunpack.c.l.s4 (!%p138_p2), %v1052_v6  ;;  %v183_v8 = vshrl.u32 (!%p138_p2), %v182_v3, 7  ;;  %v1031_v14 = vld [vmem:[%s1205_s1 + $0x38] sm:$0xff] (!%p138_p2)   ;;  %v1028_v15 = vld [vmem:[%s1205_s1 + $0x20] sm:$0xff] (!%p138_p2)   ;;  %v1033_v19 = vld [vmem:[%s1205_s1 + $0x50] sm:$0xff] (!%p138_p2)   ;;  %vm786_vm2 = vcmask (!%p138_p2), 57344  }
   0x8   : > { %949 = vmatpush3.bf16.msra.mxu1 (!%p138_p2), %v1025_v2  ;;  %942 = vmatprep.subr.bf16.mxu0 (!%p138_p2), %v1050_v1  ;;  %v1030_v20 = vld [vmem:[%s1205_s1 + $0x28] sm:$0xff] (!%p138_p2)   ;;  %v1035_v23 = vld [vmem:[%s1205_s1 + $0x58] sm:$0xff] (!%p138_p2)   ;;  %v1032_v24 = vld [vmem:[%s1205_s1 + $0x40] sm:$0xff] (!%p138_p2)   ;;  %vm787_vm3 = vsmask.f32 (!%p138_p2), 256 }
   0x9   : > { %950 = vmatprep.subr.bf16.mxu1 (!%p138_p2), %v1050_v1  ;;  %952 = vmatprep.mubr.msk.bf16.mxu1 (!%p138_p2), %vm1051_vm0, %v1050_v1  ;;  %v181_v9 = vunpack.c.0.s8 (!%p138_p2), %v180_v7  ;;  %v1037_v27 = vld [vmem:[%s1205_s1 + $0x70] sm:$0xff] (!%p138_p2)   ;;  %v1034_v29 = vld [vmem:[%s1205_s1 + $0x48] sm:$0xff] (!%p138_p2)   ;;  %v1039_v32 = vld [vmem:[%s1205_s1 + $0x78] sm:$0xff] (!%p138_p2)  }
   0xa   : > { %v1036_v33 = vld [vmem:[%s1205_s1 + $0x60] sm:$0xff] (!%p138_p2)   ;;  %v1038_v35 = vld [vmem:[%s1205_s1 + $0x68] sm:$0xff] (!%p138_p2)   ;;  %vm788_vm4 = vmand (!%p138_p2), %vm786_vm2, %vm787_vm3 }
   0xb   : > { %943 = vmatpush3.bf16.msra.mxu0 (!%p138_p2), %v1026_v4  ;;  %v184_v12 = vsub.s32 (!%p138_p2), %v181_v9, %v183_v8  ;;  %v1040_v36 = vld [vmem:[%s1205_s1 + $0x80] sm:$0xff] (!%p138_p2)   ;;  %v1041_v37 = vld [vmem:[%s1205_s1 + $0x88] sm:$0xff] (!%p138_p2)  }
   0xc   : > { %951 = vmatpush3.bf16.msra.mxu1 (!%p138_p2), %v1027_v5  ;;  %956 = vmatprep.subr.bf16.mxu0 (!%p138_p2), %v1050_v1 }
   0xd   : > { %s1209_s13 = smov (!%p159_p3, %s839_s13), 1  ;;  %964 = vmatprep.subr.bf16.mxu1 %v1050_v1 }
   0xe   : > { %s1012_s22 = smul.u32 6, %s1209_s13  ;;  %s166_s6 = scalar_lea.vmem %s1207_s3, %s1209_s13 }
  0x10   : > { %s1111_s27 = scalar_lea.vmem %s1204_s0, %s1012_s22 }
  0x11   : > { %v168_v11 = vld [vmem:[%s1111_s27] sm:$0x1]  ;;  %v859_v17 = vld.sshfl [vmem:[%s1111_s27] sm:$0x2 pattern:$0x76325410] }
  0x12   : > { %953 = vmatmul.mubr.msk.bf16.vlgmr.msra.gmra.mrb[0].mxu1 %vm201_vm1, %v168_v11  ;;  %v185_v13 = vrot.slane %v168_v11, %v184_v12  ;;  %v863_v18 = vld [vmem:[%s1111_s27 + $0x2] sm:$0x1]  ;;  %v883_v21 = vld.sshfl [vmem:[%s1111_s27 + $0x2] sm:$0x2 pattern:$0x76325410] }
  0x13   : > { %965 = vmatpush3.bf16.msra.mxu1 %v1029_v10  ;;  %968 = vmatprep.mubr.msk.bf16.mxu1 %vm1051_vm0, %v1050_v1  ;;  %v314_v22 = vrot.slane %v859_v17, 1  ;;  %v520_v25 = vrot.slane %v883_v21, 1  ;;  %v446_v26 = vrot.slane %v863_v18, %v184_v12  ;;  %v887_v28 = vld [vmem:[%s1111_s27 + $0x4] sm:$0x1] }
  0x14   : > { %966 = vmatprep.subr.bf16.mxu1 %v1050_v1  ;;  %v187_v16 = vshrl.u32 %v185_v13, 16  ;;  %v652_v30 = vrot.slane %v887_v28, %v184_v12  ;;  %v907_v38 = vld.sshfl [vmem:[%s1111_s27 + $0x4] sm:$0x2 pattern:$0x76325410] }
  0x15   : > { %v448_v31 = vshrl.u32 %v446_v26, 16  ;;  %v726_v39 = vrot.slane %v907_v38, 1 }
  0x16   : > { %945 = vmatmul.mubr.msk.bf16.vlgmr.msra.gmra.mrb[0].mxu0 %vm201_vm1, %v187_v16  ;;  %v654_v34 = vshrl.u32 %v652_v30, 16  ;;  %v783_v16 = vld [vmem:[%s1206_s2] sm:$0x1] }
  0x17   : > { %967 = vmatpush3.bf16.msra.mxu1 %v1031_v14  ;;  %957 = vmatpush3.bf16.msra.mxu0 %v1028_v15 }
  0x18   : > { %960 = vmatprep.mubr.msk.bf16.mxu0 %vm1051_vm0, %v1050_v1  ;;  %958 = vmatprep.subr.bf16.mxu0 %v1050_v1 }
  0x19   : > { %980 = vmatprep.subr.bf16.mxu1 %v1050_v1 }
  0x1a   : > { %969 = vmatmul.mubr.msk.bf16.vlgmr.msra.gmra.mrb[4].mxu1 %vm201_vm1, %v863_v18 }
  0x1b   : > { %981 = vmatpush3.bf16.msra.mxu1 %v1033_v19  ;;  %984 = vmatprep.mubr.msk.bf16.mxu1 %vm1051_vm0, %v1050_v1 }
  0x1c   : > { %959 = vmatpush3.bf16.msra.mxu0 %v1030_v20  ;;  %982 = vmatprep.subr.bf16.mxu1 %v1050_v1 }
  0x1d   : > { %972 = vmatprep.subr.bf16.mxu0 %v1050_v1 }
  0x1f   : > { %961 = vmatmul.mubr.msk.bf16.vlgmr.msra.gmra.mrb[4].mxu0 %vm201_vm1, %v314_v22  ;;  %983 = vmatpush3.bf16.msra.mxu1 %v1035_v23  ;;  %v789_v22 = vld [vmem:[%s166_s6] sm:$0x1] }
  0x20   : > { %973 = vmatpush3.bf16.msra.mxu0 %v1032_v24  ;;  %976 = vmatprep.mubr.msk.bf16.mxu0 %vm1051_vm0, %v1050_v1 }
  0x21   : > { %974 = vmatprep.subr.bf16.mxu0 %v1050_v1  ;;  %996 = vmatprep.subr.bf16.mxu1 %v1050_v1 }
  0x22   : > { %985 = vmatmul.mubr.msk.bf16.vlgmr.msra.gmra.mrb[8].mxu1 %vm201_vm1, %v520_v25 }
  0x23   : > { %997 = vmatpush3.bf16.msra.mxu1 %v1037_v27  ;;  %1000 = vmatprep.mubr.msk.bf16.mxu1 %vm1051_vm0, %v1050_v1 }
  0x24   : > { %975 = vmatpush3.bf16.msra.mxu0 %v1034_v29  ;;  %998 = vmatprep.subr.bf16.mxu1 %v1050_v1 }
  0x25   : > { %988 = vmatprep.subr.bf16.mxu0 %v1050_v1 }
  0x27   : > { %977 = vmatmul.mubr.msk.bf16.vlgmr.msra.gmra.mrb[8].mxu0 %vm201_vm1, %v448_v31  ;;  %999 = vmatpush3.bf16.msra.mxu1 %v1039_v32 }
  0x28   : > { %989 = vmatpush3.bf16.msra.mxu0 %v1036_v33  ;;  %992 = vmatprep.mubr.msk.bf16.mxu0 %vm1051_vm0, %v1050_v1 }
  0x29   : > { %990 = vmatprep.subr.bf16.mxu0 %v1050_v1 }
  0x2a   : > { %1001 = vmatmul.mubr.msk.bf16.vlgmr.msra.gmra.mrb[12].mxu1 %vm201_vm1, %v654_v34 }
  0x2c   : > { %991 = vmatpush3.bf16.msra.mxu0 %v1038_v35 }
  0x2d   : > { %1004 = vmatprep.subr.bf16.mxu0 %v1050_v1 }
  0x2f   : > { %993 = vmatmul.mubr.msk.bf16.vlgmr.msra.gmra.mrb[12].mxu0 %vm201_vm1, %v887_v28 }
  0x30   : > { %1005 = vmatpush3.bf16.msra.mxu0 %v1040_v36  ;;  %1008 = vmatprep.mubr.msk.bf16.mxu0 %vm1051_vm0, %v1050_v1 }
  0x31   : > { %1006 = vmatprep.subr.bf16.mxu0 %v1050_v1 }
  0x34   : > { %1007 = vmatpush3.bf16.msra.mxu0 %v1041_v37 }
  0x37   : > { %1009 = vmatmul.mubr.msk.bf16.vlgmr.msra.gmra.mrb[16].mxu0 %vm201_vm1, %v726_v39 }
  0xe5   : > { %v294_v40 = vpop.f32.mrb[0].mxu1 }
  0xe6   : > { %v954_v41 = vpop.f32.mrb[1].mxu1 }
  0xe7   : > { %v297_v42 = vpop.f32.mrb[2].mxu1 }
  0xe8   : > { %v955_v43 = vpop.f32.mrb[3].mxu1 }
  0xe9   : > { %v239_v44 = vpop.f32.mrb[0].mxu0 }
  0xea   : > { %v295_v45 = vadd.f32 %v294_v40, %v239_v44  ;;  %v946_v46 = vpop.f32.mrb[1].mxu0 }
  0xeb   : > { %v242_v47 = vpop.f32.mrb[2].mxu0 }
  0xec   : > { %v947_v48 = vpop.f32.mrb[3].mxu0 }
  0xed   : > { %v427_v49 = vpop.f32.mrb[4].mxu1 }
  0xee   : > { %v970_v50 = vpop.f32.mrb[5].mxu1 }
  0xef   : > { %v430_v51 = vpop.f32.mrb[6].mxu1 }
  0xf0   : > { %v971_v52 = vpop.f32.mrb[7].mxu1 }
  0xf2   : > { %v364_v53 = vpop.f32.mrb[4].mxu0 }
  0xf3   : > { %v370_v54 = vadd.f32 %v364_v53, %v295_v45  ;;  %v962_v55 = vpop.f32.mrb[5].mxu0 }
  0xf4   : > { %v367_v56 = vpop.f32.mrb[6].mxu0 }
  0xf5   : > { %v433_v57 = vadd.f32 %v427_v49, %v370_v54  ;;  %v963_v58 = vpop.f32.mrb[7].mxu0  ;;  %v570_v59 = vpop.f32.mrb[8].mxu1 }
  0xf6   : > { %v986_v60 = vpop.f32.mrb[9].mxu1 }
  0xf7   : > { %v573_v61 = vpop.f32.mrb[10].mxu1 }
  0xf8   : > { %v987_v62 = vpop.f32.mrb[11].mxu1 }
  0xfa   : > { %v499_v63 = vpop.f32.mrb[8].mxu0 }
  0xfb   : > { %v505_v0 = vadd.f32 %v499_v63, %v433_v57  ;;  %v978_v1 = vpop.f32.mrb[9].mxu0 }
  0xfc   : > { %v502_v2 = vpop.f32.mrb[10].mxu0 }
  0xfd   : > { %v576_v3 = vadd.f32 %v570_v59, %v505_v0  ;;  %v979_v4 = vpop.f32.mrb[11].mxu0  ;;  %v705_v5 = vpop.f32.mrb[12].mxu1 }
  0xfe   : > { %v1002_v6 = vpop.f32.mrb[13].mxu1 }
  0xff   : > { %v708_v7 = vpop.f32.mrb[14].mxu1 }
 0x100   : > { %v1003_v8 = vpop.f32.mrb[15].mxu1 }
 0x102   : > { %v633_v9 = vpop.f32.mrb[12].mxu0 }
 0x103   : > { %v639_v10 = vadd.f32 %v633_v9, %v576_v3  ;;  %v994_v11 = vpop.f32.mrb[13].mxu0 }
 0x104   : > { %v636_v12 = vpop.f32.mrb[14].mxu0 }
 0x105   : > { %v711_v13 = vadd.f32 %v705_v5, %v639_v10  ;;  %v995_v14 = vpop.f32.mrb[15].mxu0 }
 0x10a   : > { %v776_v15 = vpop.f32.mrb[16].mxu0 }
 0x10b   : > { %v782_v17 = vadd.f32 %v776_v15, %v711_v13  ;;  %v1010_v18 = vpop.f32.mrb[17].mxu0 }
 0x10c   : > { %v779_v19 = vpop.f32.mrb[18].mxu0 }
 0x10d   : > { %v784_v20 = vadd.f32 %v783_v16, %v782_v17  ;;  %v1011_v21 = vpop.f32.mrb[19].mxu0 }
 0x10f   : > { %v785_v23 = vpack.c.bf16 %v784_v20, %v784_v20 }
 0x111   : > { %v790_v24 = vsel %vm788_vm4, %v785_v23, %v789_v22 }
 0x112   : > { %791 = vst [vmem:[%s166_s6] sm:$0x1] %v790_v24 }
 0x113 PF: > { %s13_s12 = sadd.s32 1, %s1048_s12  }
 0x114   : > { %p10_p4 = scmp.ge.s32.totalorder %s13_s12, 4  }
 0x116   :  { %12 = sbr.rel (!%p10_p4) target bundleno = 1 (0x1), region = 72 }

// kernel: db_model_forward.24
= control target key start
LH: loop header
LB: loop body
LE: loop exit
PB: predicated region body
PF: predicated region fallthrough
CT: control target
= control target key end

     0   :  { %s1382_s12 = smov 0   ;;  %s1560_s0 = inlined_call_operand.vmem [shape: bf16[2,1,4,4,32], index: 0, kind: input, shape index: {}]   ;;  %s1561_s1 = inlined_call_operand.vmem [shape: bf16[9,32,8], index: 1, kind: input, shape index: {}]   ;;  %s1562_s2 = inlined_call_operand.vmem [shape: f32[1,8], index: 2, kind: input, shape index: {}]   ;;  %s1563_s3 = inlined_call_operand.vmem [shape: bf16[2,4,8], index: 3, kind: output, shape index: {}]  }
   0x1 LB: > { %s1119_s13 = sadd.s32 4294967295, %s1357_s12   ;;  %p1123_p0 = scmp.ge.s32.totalorder %s1357_s12, 1  ;;  %s1357_s12 = sphi %s1382_s12, %s13_s12  }
   0x2   : > { %p137_p1 = scmp.lt.s32.totalorder %s1357_s12, 3 }
   0x4   : > { %p138_p2 = pnand %p1123_p0, %p137_p1 }
   0x5   : > { %v1333_v0 = vld [vmem:[%s1561_s1 + $0x10] sm:$0xff] (!%p138_p2)   ;;  %v1359_v1 = vmov (!%p138_p2), 0.0   ;;  %v1334_v2 = vld [vmem:[%s1561_s1] sm:$0xff] (!%p138_p2)   ;;  %v1335_v3 = vld [vmem:[%s1561_s1 + $0x18] sm:$0xff] (!%p138_p2)   ;;  %vm1360_vm0 = vmmov (!%p138_p2), 0   ;;  %p160_p3 = scmp.lt.s32.totalorder (!%p138_p2), %s1119_s13, 1  ;;  %v238_v4 = vlaneseq (!%p138_p2) }
   0x6   : > { %141 = sbr.rel (%p138_p2) target bundleno = 280 (0x118), region = 32  ;;  %1250 = vmatprep.subr.bf16.mxu0 (!%p138_p2), %v1359_v1  ;;  %1258 = vmatprep.subr.bf16.mxu1 (!%p138_p2), %v1359_v1  ;;  %v1336_v5 = vld [vmem:[%s1561_s1 + $0x8] sm:$0xff] (!%p138_p2)   ;;  %vm196_vm1 = vsmask.f32 (!%p138_p2), 256  ;;  %vm197_vm2 = vsmask.f32 (!%p138_p2), 1284 }
   0x7   : > { %1251 = vmatpush3.bf16.msra.mxu0 (!%p138_p2), %v1333_v0  ;;  %1254 = vmatprep.mubr.msk.bf16.mxu0 (!%p138_p2), %vm1360_vm0, %v1359_v1  ;;  %vm198_vm3 = vmor (!%p138_p2), %vm196_vm1, %vm197_vm2  ;;  %vm199_vm4 = vsmask.f32 (!%p138_p2), 2312  ;;  %vm201_vm5 = vsmask.f32 (!%p138_p2), 3340  ;;  %vm203_vm6 = vsmask.f32 (!%p138_p2), 4368 }
   0x8   : > { %1259 = vmatpush3.bf16.msra.mxu1 (!%p138_p2), %v1334_v2  ;;  %1252 = vmatprep.subr.bf16.mxu0 (!%p138_p2), %v1359_v1  ;;  %vm200_vm7 = vmor (!%p138_p2), %vm198_vm3, %vm199_vm4  ;;  %vm205_vm8 = vsmask.f32 (!%p138_p2), 5396  ;;  %vm207_vm9 = vsmask.f32 (!%p138_p2), 6424  ;;  %v239_v6 = vshrl.u32 (!%p138_p2), %v238_v4, 7  ;;  %vm261_vm1 = vcmask (!%p138_p2), 261120  }
   0x9   : > { %1260 = vmatprep.subr.bf16.mxu1 (!%p138_p2), %v1359_v1  ;;  %1262 = vmatprep.mubr.msk.bf16.mxu1 (!%p138_p2), %vm1360_vm0, %v1359_v1  ;;  %vm202_vm10 = vmor (!%p138_p2), %vm200_vm7, %vm201_vm5  ;;  %vm209_vm11 = vsmask.f32 (!%p138_p2), 7452  ;;  %v1361_v8 = vmov (!%p138_p2), 1966171168   ;;  %v1338_v24 = vld [vmem:[%s1561_s1 + $0x30] sm:$0xff] (!%p138_p2)   ;;  %v1337_v36 = vld [vmem:[%s1561_s1 + $0x20] sm:$0xff] (!%p138_p2)  }
   0xa   : > { %vm204_vm12 = vmor (!%p138_p2), %vm202_vm10, %vm203_vm6  ;;  %v236_v9 = vunpack.c.l.s4 (!%p138_p2), %v1361_v8  ;;  %v1340_v38 = vld [vmem:[%s1561_s1 + $0x38] sm:$0xff] (!%p138_p2)   ;;  %v1339_v41 = vld [vmem:[%s1561_s1 + $0x28] sm:$0xff] (!%p138_p2)  }
   0xb   : > { %1253 = vmatpush3.bf16.msra.mxu0 (!%p138_p2), %v1335_v3  ;;  %vm206_vm13 = vmor (!%p138_p2), %vm204_vm12, %vm205_vm8  ;;  %v1342_v47 = vld [vmem:[%s1561_s1 + $0x50] sm:$0xff] (!%p138_p2)   ;;  %v1341_v51 = vld [vmem:[%s1561_s1 + $0x40] sm:$0xff] (!%p138_p2)  }
   0xc   : > { %1261 = vmatpush3.bf16.msra.mxu1 (!%p138_p2), %v1336_v5  ;;  %1266 = vmatprep.subr.bf16.mxu0 (!%p138_p2), %v1359_v1  ;;  %vm208_vm14 = vmor (!%p138_p2), %vm206_vm13, %vm207_vm9  ;;  %v237_v16 = vunpack.c.0.s8 (!%p138_p2), %v236_v9  ;;  %v1344_v53 = vld [vmem:[%s1561_s1 + $0x58] sm:$0xff] (!%p138_p2)   ;;  %v1343_v60 = vld [vmem:[%s1561_s1 + $0x48] sm:$0xff] (!%p138_p2)  }
   0xd   : > { %s1567_s13 = smov (!%p160_p3, %s1119_s13), 1  ;;  %1274 = vmatprep.subr.bf16.mxu1 %v1359_v1  ;;  %vm1427_vm15 = vmor %vm208_vm14, %vm209_vm11  ;;  %v1346_v2 = vld [vmem:[%s1561_s1 + $0x70] sm:$0xff]   ;;  %v1348_v8 = vld [vmem:[%s1561_s1 + $0x78] sm:$0xff]  }
   0xe   : > { %s1222_s22 = sshll.u32 %s1567_s13, 3  ;;  %v1431_v22 = vsub.s32 %v237_v16, %v239_v6  ;;  %v1349_v16 = vld [vmem:[%s1561_s1 + $0x80] sm:$0xff]   ;;  %v1350_v18 = vld [vmem:[%s1561_s1 + $0x88] sm:$0xff]   ;;  %s1126_s4 = sshll.u32 %s1567_s13, 1 }
   0xf   : > { %s1417_s25 = scalar_lea.vmem %s1560_s0, %s1222_s22  ;;  %s168_s7 = scalar_lea.vmem %s1563_s3, %s1126_s4 }
  0x10   : > { %v1127_v7 = vld.sshfl [vmem:[%s1417_s25] sm:$0x11 pattern:$0x75316420]  ;;  %v171_v17 = vld [vmem:[%s1417_s25 + $0x2] sm:$0x1] }
  0x11   : > { %v170_v10 = vld [vmem:[%s1417_s25] sm:$0x1]  ;;  %v1128_v11 = vld.sshfl [vmem:[%s1417_s25 + $0x2] sm:$0x11 pattern:$0x75316420]  ;;  %v187_v12 = vcombine.high %v1127_v7, %v1127_v7 }
  0x12   : > { %v212_v13 = vshrl.u32 %v1127_v7, 16  ;;  %v195_v14 = vcombine.high %v1128_v11, %v1128_v11  ;;  %v221_v15 = vshrl.u32 %v1128_v11, 16  ;;  %v307_v20 = vcombine.low %v170_v10, %v171_v17  ;;  %v1141_v27 = vld.sshfl [vmem:[%s1417_s25] sm:$0x10 pattern:$0x75316420] }
  0x13   : > { %v217_v19 = vshll.u32 %v187_v12, 16  ;;  %v1142_v29 = vld.sshfl [vmem:[%s1417_s25 + $0x2] sm:$0x10 pattern:$0x75316420]  ;;  %v1347_v11 = vld [vmem:[%s1561_s1 + $0x68] sm:$0xff]  }
  0x14   : > { %v226_v21 = vshll.u32 %v195_v14, 16  ;;  %v314_v26 = vrot.slane %v307_v20, %v1431_v22  ;;  %v1151_v31 = vld [vmem:[%s1417_s25 + $0x2] sm:$0x1]  ;;  %v1152_v32 = vld [vmem:[%s1417_s25 + $0x4] sm:$0x1]  ;;  %v1147_v34 = vcombine.high %v1141_v27, %v1142_v29 }
  0x15   : > { %v219_v23 = vsel %vm1427_vm15, %v212_v13, %v217_v19  ;;  %v483_v35 = vcombine.low %v1151_v31, %v1152_v32  ;;  %v1163_v40 = vld.sshfl [vmem:[%s1417_s25 + $0x4] sm:$0x11 pattern:$0x75316420]  ;;  %v1186_v63 = vld [vmem:[%s1417_s25 + $0x6] sm:$0x1] }
  0x16   : > { %v228_v25 = vsel %vm1427_vm15, %v221_v15, %v226_v21  ;;  %v321_v30 = vrot.slane %v314_v26, %v1431_v22  ;;  %v409_v42 = vrot.slane %v1147_v34, %v1431_v22  ;;  %v573_v43 = vcombine.high %v1163_v40, %v1163_v40  ;;  %v1469_v46 = vld.sshfl [vmem:[%s1417_s25 + $0x4] sm:$0x10 pattern:$0x75316420]  ;;  %v1185_v62 = vld [vmem:[%s1417_s25 + $0x4] sm:$0x1] }
  0x17   : > { %v234_v28 = vcombine.low %v219_v23, %v228_v25  ;;  %v490_v39 = vrot.slane %v483_v35, %v1431_v22  ;;  %v584_v44 = vshrl.u32 %v1163_v40, 16  ;;  %v1181_v49 = vcombine.high %v1142_v29, %v1469_v46  ;;  %v1197_v56 = vld.sshfl [vmem:[%s1417_s25 + $0x6] sm:$0x11 pattern:$0x75316420] }
  0x18   : > { %1263 = vmatmul.mubr.msk.bf16.vlgmr.msra.gmra.mrb[0].mxu1 %vm261_vm1, %v321_v30  ;;  %v589_v48 = vshll.u32 %v573_v43, 16  ;;  %v416_v50 = vrot.slane %v409_v42, %v1431_v22  ;;  %v864_v57 = vcombine.high %v1197_v56, %v1197_v56  ;;  %v875_v58 = vshrl.u32 %v1197_v56, 16  ;;  %v1345_v7 = vld [vmem:[%s1561_s1 + $0x60] sm:$0xff]  }
  0x19   : > { %v241_v33 = vrot.slane %v234_v28, %v1431_v22  ;;  %1275 = vmatpush3.bf16.msra.mxu1 %v1338_v24  ;;  %1278 = vmatprep.mubr.msk.bf16.mxu1 %vm1360_vm0, %v1359_v1  ;;  %v497_v45 = vrot.slane %v490_v39, %v1431_v22  ;;  %v700_v55 = vrot.slane %v1181_v49, %v1431_v22  ;;  %v1210_v13 = vld.sshfl [vmem:[%s1417_s25 + $0x6] sm:$0x10 pattern:$0x75316420] }
  0x1a   : > { %1276 = vmatprep.subr.bf16.mxu1 %v1359_v1  ;;  %v591_v52 = vsel %vm1427_vm15, %v584_v44, %v589_v48  ;;  %v880_v0 = vshll.u32 %v864_v57, 16  ;;  %v774_v5 = vcombine.low %v1185_v62, %v1186_v63  ;;  %v1215_v15 = vcombine.high %v1469_v46, %v1210_v13 }
  0x1b   : > { %v248_v37 = vrot.slane %v241_v33, %v1431_v22  ;;  %v597_v54 = vcombine.low %v228_v25, %v591_v52  ;;  %v707_v61 = vrot.slane %v700_v55, %v1431_v22 }
  0x1c   : > { %v882_v3 = vsel %vm1427_vm15, %v875_v58, %v880_v0  ;;  %v781_v10 = vrot.slane %v774_v5, %v1431_v22  ;;  %v991_v17 = vrot.slane %v1215_v15, %v1431_v22 }
  0x1d   : > { %1255 = vmatmul.mubr.msk.bf16.vlgmr.msra.gmra.mrb[0].mxu0 %vm261_vm1, %v248_v37  ;;  %1277 = vmatpush3.bf16.msra.mxu1 %v1340_v38  ;;  %v604_v59 = vrot.slane %v597_v54, %v1431_v22  ;;  %v888_v6 = vcombine.low %v591_v52, %v882_v3 }
  0x1e   : > { %1267 = vmatpush3.bf16.msra.mxu0 %v1337_v36  ;;  %1270 = vmatprep.mubr.msk.bf16.mxu0 %vm1360_vm0, %v1359_v1  ;;  %v788_v14 = vrot.slane %v781_v10, %v1431_v22  ;;  %v998_v19 = vrot.slane %v991_v17, %v1431_v22 }
  0x1f   : > { %1268 = vmatprep.subr.bf16.mxu0 %v1359_v1  ;;  %1290 = vmatprep.subr.bf16.mxu1 %v1359_v1  ;;  %v611_v4 = vrot.slane %v604_v59, %v1431_v22  ;;  %v895_v9 = vrot.slane %v888_v6, %v1431_v22  ;;  %v1219_v59 = vld [vmem:[%s1562_s2] ss:$0 sm:$0xff] }
  0x20   : > { %1279 = vmatmul.mubr.msk.bf16.vlgmr.msra.gmra.mrb[4].mxu1 %vm261_vm1, %v497_v45 }
  0x21   : > { %1291 = vmatpush3.bf16.msra.mxu1 %v1342_v47  ;;  %1294 = vmatprep.mubr.msk.bf16.mxu1 %vm1360_vm0, %v1359_v1  ;;  %v902_v12 = vrot.slane %v895_v9, %v1431_v22 }
  0x22   : > { %1269 = vmatpush3.bf16.msra.mxu0 %v1339_v41  ;;  %1292 = vmatprep.subr.bf16.mxu1 %v1359_v1 }
  0x23   : > { %1282 = vmatprep.subr.bf16.mxu0 %v1359_v1 }
  0x25   : > { %1271 = vmatmul.mubr.msk.bf16.vlgmr.msra.gmra.mrb[4].mxu0 %vm261_vm1, %v416_v50  ;;  %1293 = vmatpush3.bf16.msra.mxu1 %v1344_v53 }
  0x26   : > { %1283 = vmatpush3.bf16.msra.mxu0 %v1341_v51  ;;  %1286 = vmatprep.mubr.msk.bf16.mxu0 %vm1360_vm0, %v1359_v1 }
  0x27   : > { %1284 = vmatprep.subr.bf16.mxu0 %v1359_v1  ;;  %1306 = vmatprep.subr.bf16.mxu1 %v1359_v1 }
  0x28   : > { %1295 = vmatmul.mubr.msk.bf16.vlgmr.msra.gmra.mrb[8].mxu1 %vm261_vm1, %v707_v61 }
  0x29   : > { %1307 = vmatpush3.bf16.msra.mxu1 %v1346_v2  ;;  %1310 = vmatprep.mubr.msk.bf16.mxu1 %vm1360_vm0, %v1359_v1 }
  0x2a   : > { %1285 = vmatpush3.bf16.msra.mxu0 %v1343_v60  ;;  %1308 = vmatprep.subr.bf16.mxu1 %v1359_v1 }
  0x2b   : > { %1298 = vmatprep.subr.bf16.mxu0 %v1359_v1 }
  0x2d   : > { %1287 = vmatmul.mubr.msk.bf16.vlgmr.msra.gmra.mrb[8].mxu0 %vm261_vm1, %v611_v4  ;;  %1309 = vmatpush3.bf16.msra.mxu1 %v1348_v8 }
  0x2e   : > { %1299 = vmatpush3.bf16.msra.mxu0 %v1345_v7  ;;  %1302 = vmatprep.mubr.msk.bf16.mxu0 %vm1360_vm0, %v1359_v1 }
  0x2f   : > { %1300 = vmatprep.subr.bf16.mxu0 %v1359_v1 }
  0x30   : > { %1311 = vmatmul.mubr.msk.bf16.vlgmr.msra.gmra.mrb[12].mxu1 %vm261_vm1, %v902_v12 }
  0x32   : > { %1301 = vmatpush3.bf16.msra.mxu0 %v1347_v11 }
  0x33   : > { %1314 = vmatprep.subr.bf16.mxu0 %v1359_v1 }
  0x35   : > { %1303 = vmatmul.mubr.msk.bf16.vlgmr.msra.gmra.mrb[12].mxu0 %vm261_vm1, %v788_v14 }
  0x36   : > { %1315 = vmatpush3.bf16.msra.mxu0 %v1349_v16  ;;  %1318 = vmatprep.mubr.msk.bf16.mxu0 %vm1360_vm0, %v1359_v1  ;;  %vm1064_vm0 = vcmask 58368  }
  0x37   : > { %1316 = vmatprep.subr.bf16.mxu0 %v1359_v1 }
  0x3a   : > { %1317 = vmatpush3.bf16.msra.mxu0 %v1350_v18 }
  0x3d   : > { %1319 = vmatmul.mubr.msk.bf16.vlgmr.msra.gmra.mrb[16].mxu0 %vm261_vm1, %v998_v19 }
  0xeb   : > { %v371_v20 = vpop.f32.mrb[0].mxu1 }
  0xec   : > { %v1264_v21 = vpop.f32.mrb[1].mxu1 }
  0xed   : > { %v374_v23 = vpop.f32.mrb[2].mxu1 }
  0xee   : > { %v1265_v25 = vpop.f32.mrb[3].mxu1 }
  0xf0   : > { %v299_v24 = vpop.f32.mrb[0].mxu0 }
  0xf1   : > { %v372_v26 = vadd.f32 %v371_v20, %v299_v24  ;;  %v1256_v27 = vpop.f32.mrb[1].mxu0 }
  0xf2   : > { %v302_v28 = vpop.f32.mrb[2].mxu0 }
  0xf3   : > { %v1257_v29 = vpop.f32.mrb[3].mxu0  ;;  %v547_v30 = vpop.f32.mrb[4].mxu1 }
  0xf4   : > { %v1280_v31 = vpop.f32.mrb[5].mxu1 }
  0xf5   : > { %v550_v32 = vpop.f32.mrb[6].mxu1 }
  0xf6   : > { %v1281_v34 = vpop.f32.mrb[7].mxu1 }
  0xf8   : > { %v466_v33 = vpop.f32.mrb[4].mxu0 }
  0xf9   : > { %v472_v1 = vadd.f32 %v466_v33, %v372_v26  ;;  %v1272_v35 = vpop.f32.mrb[5].mxu0 }
  0xfa   : > { %v469_v22 = vpop.f32.mrb[6].mxu0 }
  0xfb   : > { %v553_v36 = vadd.f32 %v547_v30, %v472_v1  ;;  %v1273_v37 = vpop.f32.mrb[7].mxu0  ;;  %v757_v38 = vpop.f32.mrb[8].mxu1 }
  0xfc   : > { %v1296_v39 = vpop.f32.mrb[9].mxu1 }
  0xfd   : > { %v760_v40 = vpop.f32.mrb[10].mxu1 }
  0xfe   : > { %v1297_v42 = vpop.f32.mrb[11].mxu1 }
 0x100   : > { %v661_v41 = vpop.f32.mrb[8].mxu0 }
 0x101   : > { %v667_v43 = vadd.f32 %v661_v41, %v553_v36  ;;  %v1288_v44 = vpop.f32.mrb[9].mxu0 }
 0x102   : > { %v664_v45 = vpop.f32.mrb[10].mxu0 }
 0x103   : > { %v763_v46 = vadd.f32 %v757_v38, %v667_v43  ;;  %v1289_v47 = vpop.f32.mrb[11].mxu0  ;;  %v952_v48 = vpop.f32.mrb[12].mxu1 }
 0x104   : > { %v1312_v49 = vpop.f32.mrb[13].mxu1 }
 0x105   : > { %v955_v50 = vpop.f32.mrb[14].mxu1 }
 0x106   : > { %v1313_v52 = vpop.f32.mrb[15].mxu1 }
 0x108   : > { %v838_v51 = vpop.f32.mrb[12].mxu0 }
 0x109   : > { %v844_v53 = vadd.f32 %v838_v51, %v763_v46  ;;  %v1304_v54 = vpop.f32.mrb[13].mxu0 }
 0x10a   : > { %v841_v55 = vpop.f32.mrb[14].mxu0 }
 0x10b   : > { %v958_v56 = vadd.f32 %v952_v48, %v844_v53  ;;  %v1305_v57 = vpop.f32.mrb[15].mxu0 }
 0x110   : > { %v1048_v58 = vpop.f32.mrb[16].mxu0 }
 0x111   : > { %v1054_v60 = vadd.f32 %v1048_v58, %v958_v56  ;;  %v1320_v61 = vpop.f32.mrb[17].mxu0 }
 0x112   : > { %v1051_v62 = vpop.f32.mrb[18].mxu0 }
 0x113   : > { %v1062_v63 = vadd.f32 %v1219_v59, %v1054_v60  ;;  %v1321_v0 = vpop.f32.mrb[19].mxu0 }
 0x115   : > { %v1063_v2 = vpack.c.bf16 %v1062_v63, %v1062_v63 }
 0x117   : > { %1065 = vst.msk [vmem:[%s168_s7] sm:$0x3] %vm1064_vm0, %v1063_v2 }
 0x118 PF: > { %s13_s12 = sadd.s32 1, %s1357_s12  }
 0x119   : > { %p10_p4 = scmp.ge.s32.totalorder %s13_s12, 4  }
 0x11b   :  { %12 = sbr.rel (!%p10_p4) target bundleno = 1 (0x1), region = 72 }

// kernel: db_model_forward.27
= control target key start
LH: loop header
LB: loop body
LE: loop exit
PB: predicated region body
PF: predicated region fallthrough
CT: control target
= control target key end

     0   :  { %s2895_s18 = smov 0   ;;  %s3436_s0 = inlined_call_operand.vmem [shape: bf16[2,10,10,32], index: 0, kind: input, shape index: {}]   ;;  %s3437_s1 = inlined_call_operand.vmem [shape: bf16[9,32,16], index: 1, kind: input, shape index: {}]   ;;  %s3438_s2 = inlined_call_operand.vmem [shape: f32[1,16], index: 2, kind: input, shape index: {}]   ;;  %s3439_s3 = inlined_call_operand.vmem [shape: f32[16,2], index: 3, kind: input, shape index: {}]   ;;  %s3440_s4 = inlined_call_operand.vmem [shape: f32[1,2], index: 4, kind: input, shape index: {}]   ;;  %s3441_s5 = inlined_call_operand.vmem [shape: f32[2,64,3], index: 5, kind: output, shape index: {}]  }
   0x1 LB: > { %s2247_s19 = sadd.s32 4294967295, %s2861_s18   ;;  %p2251_p0 = scmp.ge.s32.totalorder %s2861_s18, 1  ;;  %s2861_s18 = sphi %s2895_s18, %s15_s18  }
   0x2   : > { %p187_p1 = scmp.lt.s32.totalorder %s2861_s18, 3 }
   0x4   : > { %p188_p2 = pnand %p2251_p0, %p187_p1 }
   0x5   : > { %v2761_v0 = vld [vmem:[%s3437_s1 + $0x40] sm:$0xff] (!%p188_p2)   ;;  %p215_p3 = scmp.lt.s32.totalorder (!%p188_p2), %s2247_s19, 1  ;;  %v2762_v1 = vld [vmem:[%s3437_s1 + $0x10] sm:$0xff] (!%p188_p2)   ;;  %v2763_v2 = vld [vmem:[%s3437_s1 + $0x48] sm:$0xff] (!%p188_p2)   ;;  %vm246_vm0 = vsmask.f32 (!%p188_p2), 3328 }
   0x6   : > { %191 = sbr.rel (%p188_p2) target bundleno = 859 (0x35b), region = 40  ;;  %2606 = vmatprep.subr.bf16.mxu0 (!%p188_p2), %v2761_v0  ;;  %2558 = vmatprep.subr.bf16.mxu1 (!%p188_p2), %v2762_v1  ;;  %v2764_v3 = vld [vmem:[%s3437_s1 + $0x18] sm:$0xff] (!%p188_p2)   ;;  %v2921_v4 = vld [vmem:[%s3437_s1 + $0x50] sm:$0xff] (!%p188_p2)   ;;  %vm247_vm1 = vsmask.f32 (!%p188_p2), 7440  ;;  %v2959_v29 = vld [vmem:[%s3437_s1] sm:$0xff] (!%p188_p2)  }
   0x7   : > { %2607 = vmatpush3.bf16.msra.mxu0 (!%p188_p2), %v2761_v0  ;;  %2559 = vmatpush3.bf16.msra.mxu1 (!%p188_p2), %v2762_v1  ;;  %vm2963_vm2 = vmor (!%p188_p2), %vm246_vm0, %vm247_vm1  ;;  %vm390_vm3 = vcmask (!%p188_p2), 261120   ;;  %vm601_vm4 = vcmask (!%p188_p2), 1042432   ;;  %vm602_vm5 = vcmask (!%p188_p2), 1046532   ;;  %vm1868_vm7 = vcmask (!%p188_p2), 130048   ;;  %s2863_s22 = smov (!%p188_p2), 127   ;;  %s2864_s23 = smov (!%p188_p2), 2  }
   0x8   : > { %2608 = vmatprep.subr.bf16.mxu0 (!%p188_p2), %v2763_v2  ;;  %2560 = vmatprep.subr.bf16.mxu1 (!%p188_p2), %v2764_v3  ;;  %vm3111_vm6 = vmor (!%p188_p2), %vm601_vm4, %vm602_vm5  ;;  %vm2174_vm8 = vcmask (!%p188_p2), 15360   ;;  %vm2183_vm9 = vcmask (!%p188_p2), 23552  }
   0xb   : > { %2609 = vmatpush3.bf16.msra.mxu0 (!%p188_p2), %v2763_v2  ;;  %2561 = vmatpush3.bf16.msra.mxu1 (!%p188_p2), %v2764_v3 }
   0xc   : > { %2618 = vmatprep.subr.bf16.mxu0 (!%p188_p2), %v2921_v4  ;;  %2570 = vmatprep.subr.bf16.mxu1 (!%p188_p2), %v2959_v29 }
   0xd   : > { %s3447_s19 = smov (!%p215_p3, %s2247_s19), 1 }
   0xe   : > { %s2750_s28 = smul.u32 80, %s3447_s19  ;;  %s2493_s24 = sshll.u32 %s3447_s19, 6 }
   0xf   : > { %s224_s27 = scalar_lea.vmem %s3441_s5, %s2493_s24 }
  0x10   : > { %s2926_s8 = scalar_lea.vmem %s3436_s0, %s2750_s28 }
  0x11   : > { %v2929_v5 = vld [vmem:[%s2926_s8] sm:$0xf]  ;;  %v2932_v6 = vld [vmem:[%s2926_s8 + $0x8] sm:$0xf]  ;;  %v2935_v7 = vld [vmem:[%s2926_s8 + $0x4] sm:$0x1] }
  0x12   : > { %v2938_v8 = vld [vmem:[%s2926_s8 + $0xc] sm:$0x1]  ;;  %v250_v9 = vshrl.u32 %v2929_v5, 16  ;;  %v253_v10 = vshll.u32 %v2929_v5, 16  ;;  %v259_v11 = vshll.u32 %v2935_v7, 16  ;;  %v264_v12 = vshrl.u32 %v2932_v6, 16 }
  0x13   : > { %v267_v13 = vshll.u32 %v2932_v6, 16  ;;  %v273_v14 = vshll.u32 %v2938_v8, 16  ;;  %v2323_v15 = vld [vmem:[%s2926_s8 + $0x8] sm:$0xf]  ;;  %v2949_v20 = vld [vmem:[%s2926_s8 + $0xc] sm:$0x1] }
  0x14   : > { %v252_v16 = vrot.slane %v250_v9, 4  ;;  %v255_v17 = vrot.slane %v253_v10, 5  ;;  %v261_v18 = vrot.slane %v259_v11, 5  ;;  %v266_v19 = vrot.slane %v264_v12, 4  ;;  %v2325_v23 = vld [vmem:[%s2926_s8 + $0x10] sm:$0xf] }
  0x15   : > { %v269_v21 = vrot.slane %v267_v13, 5  ;;  %v275_v22 = vrot.slane %v273_v14, 5  ;;  %v2953_v24 = vld [vmem:[%s2926_s8 + $0x14] sm:$0x1]  ;;  %v898_v26 = vshrl.u32 %v2323_v15, 16  ;;  %v901_v27 = vshll.u32 %v2323_v15, 16 }
  0x16   : > { %v256_v25 = vor.u32 %v255_v17, %v252_v16  ;;  %v907_v28 = vshll.u32 %v2949_v20, 16  ;;  %v912_v32 = vshrl.u32 %v2325_v23, 16  ;;  %v915_v33 = vshll.u32 %v2325_v23, 16  ;;  %v2969_v35 = vld [vmem:[%s2926_s8 + $0x10] sm:$0xf] }
  0x17   : > { %v270_v31 = vor.u32 %v269_v21, %v266_v19  ;;  %v921_v34 = vshll.u32 %v2953_v24, 16  ;;  %v900_v37 = vrot.slane %v898_v26, 4  ;;  %v903_v38 = vrot.slane %v901_v27, 5  ;;  %v2972_v39 = vld [vmem:[%s2926_s8 + $0x18] sm:$0xf] }
  0x18   : > { %v257_v36 = vrot.slane %v256_v25, 4  ;;  %v914_v41 = vrot.slane %v912_v32, 4  ;;  %v917_v42 = vrot.slane %v915_v33, 5  ;;  %v2976_v43 = vld [vmem:[%s2926_s8 + $0x14] sm:$0x1]  ;;  %v909_v46 = vrot.slane %v907_v28, 5 }
  0x19   : > { %v271_v40 = vrot.slane %v270_v31, 4  ;;  %v904_v45 = vor.u32 %v903_v38, %v900_v37  ;;  %v923_v47 = vrot.slane %v921_v34, 5  ;;  %v2983_v50 = vld [vmem:[%s2926_s8 + $0x1c] sm:$0x1]  ;;  %v278_v51 = vshrl.u32 %v2969_v35, 16 }
  0x1a   : > { %v262_v44 = vsel %vm2963_vm2, %v257_v36, %v261_v18  ;;  %v918_v49 = vor.u32 %v917_v42, %v914_v41  ;;  %v281_v52 = vshll.u32 %v2969_v35, 16  ;;  %v287_v55 = vshll.u32 %v2976_v43, 16  ;;  %v2327_v61 = vld [vmem:[%s2926_s8 + $0x18] sm:$0xf]  ;;  %v2996_v1 = vld [vmem:[%s2926_s8 + $0x1c] sm:$0x1] }
  0x1b   : > { %v276_v48 = vsel %vm2963_vm2, %v271_v40, %v275_v22  ;;  %v905_v54 = vrot.slane %v904_v45, 4  ;;  %v292_v56 = vshrl.u32 %v2972_v39, 16  ;;  %v280_v58 = vrot.slane %v278_v51, 4  ;;  %v2329_v11 = vld [vmem:[%s2926_s8 + $0x20] sm:$0xf]  ;;  %v2768_v40 = vld [vmem:[%s3437_s1 + $0x8] sm:$0xff]  }
  0x1c   : > { %v2259_v53 = vcombine.low %v262_v44, %v276_v48  ;;  %v919_v57 = vrot.slane %v918_v49, 4  ;;  %v283_v59 = vrot.slane %v281_v52, 5  ;;  %v295_v60 = vshll.u32 %v2972_v39, 16  ;;  %v3002_v12 = vld [vmem:[%s2926_s8 + $0x24] sm:$0x1] }
  0x1d   : > { %v910_v62 = vsel %vm2963_vm2, %v905_v54, %v909_v46  ;;  %v294_v63 = vrot.slane %v292_v56, 4  ;;  %v301_v0 = vshll.u32 %v2983_v50, 16  ;;  %v289_v9 = vrot.slane %v287_v55, 5  ;;  %v3008_v26 = vld [vmem:[%s2926_s8 + $0x20] sm:$0xf] }
  0x1e   : > { %2562 = vmatprep.mubr.msk.bf16.mxu1 %vm390_vm3, %v2259_v53  ;;  %v924_v2 = vsel %vm2963_vm2, %v919_v57, %v923_v47  ;;  %v284_v3 = vor.u32 %v283_v59, %v280_v58  ;;  %v297_v10 = vrot.slane %v295_v60, 5  ;;  %v926_v15 = vshrl.u32 %v2327_v61, 16  ;;  %v3013_v32 = vld [vmem:[%s2926_s8 + $0x24] sm:$0x1]  ;;  %v3017_v38 = vld [vmem:[%s2926_s8 + $0x28] sm:$0xf] }
  0x1f   : > { %v2343_v13 = vcombine.low %v910_v62, %v924_v2  ;;  %v303_v14 = vrot.slane %v301_v0, 5  ;;  %v929_v18 = vshll.u32 %v2327_v61, 16  ;;  %v935_v19 = vshll.u32 %v2996_v1, 16  ;;  %v3025_v45 = vld [vmem:[%s2926_s8 + $0x2c] sm:$0x1] }
  0x20   : > { %v285_v16 = vrot.slane %v284_v3, 4  ;;  %v298_v17 = vor.u32 %v297_v10, %v294_v63  ;;  %v928_v21 = vrot.slane %v926_v15, 4  ;;  %v940_v22 = vshrl.u32 %v2329_v11, 16  ;;  %v2331_v47 = vld [vmem:[%s2926_s8 + $0x28] sm:$0xf]  ;;  %v3048_v10 = vld [vmem:[%s3437_s1 + $0x20] sm:$0xff]  }
  0x21   : > { %2610 = vmatprep.mubr.msk.bf16.mxu0 %vm390_vm3, %v2343_v13  ;;  %v943_v23 = vshll.u32 %v2329_v11, 16  ;;  %v949_v25 = vshll.u32 %v3002_v12, 16  ;;  %v931_v31 = vrot.slane %v929_v18, 5  ;;  %v1149_v33 = vrot.slane %v2949_v20, 5  ;;  %v3034_v57 = vld [vmem:[%s2926_s8 + $0x2c] sm:$0x1] }
  0x22   : > { %v290_v27 = vsel %vm2963_vm2, %v285_v16, %v289_v9  ;;  %v299_v28 = vrot.slane %v298_v17, 4  ;;  %v937_v34 = vrot.slane %v935_v19, 5  ;;  %v942_v36 = vrot.slane %v940_v22, 4  ;;  %v2333_v62 = vld [vmem:[%s2926_s8 + $0x30] sm:$0xf] }
  0x23   : > { %v945_v37 = vrot.slane %v943_v23, 5  ;;  %v932_v42 = vor.u32 %v931_v31, %v928_v21  ;;  %v951_v44 = vrot.slane %v949_v25, 5  ;;  %v306_v46 = vshrl.u32 %v3008_v26, 16  ;;  %v3042_v3 = vld [vmem:[%s2926_s8 + $0x34] sm:$0x1]  ;;  %v2766_v21 = vld [vmem:[%s3437_s1 + $0x58] sm:$0xff]  }
  0x24   : > { %v304_v41 = vsel %vm2963_vm2, %v299_v28, %v303_v14  ;;  %v309_v51 = vshll.u32 %v3008_v26, 16  ;;  %v315_v52 = vshll.u32 %v3013_v32, 16  ;;  %v320_v55 = vshrl.u32 %v3017_v38, 16  ;;  %v3053_v16 = vld [vmem:[%s2926_s8 + $0x30] sm:$0xf] }
  0x25   : > { %v2260_v48 = vcombine.low %v290_v27, %v304_v41  ;;  %v946_v49 = vor.u32 %v945_v37, %v942_v36  ;;  %v933_v53 = vrot.slane %v932_v42, 4  ;;  %v308_v54 = vrot.slane %v306_v46, 4  ;;  %v3060_v28 = vld [vmem:[%s2926_s8 + $0x38] sm:$0xf]  ;;  %v3063_v31 = vld [vmem:[%s2926_s8 + $0x34] sm:$0x1] }
  0x26   : > { %v323_v56 = vshll.u32 %v3017_v38, 16  ;;  %v311_v59 = vrot.slane %v309_v51, 5  ;;  %v317_v60 = vrot.slane %v315_v52, 5  ;;  %v329_v61 = vshll.u32 %v3025_v45, 16  ;;  %v2335_v52 = vld [vmem:[%s2926_s8 + $0x38] sm:$0xf] }
  0x27   : > { %2563 = vmatmul.mubr.msk.bf16.vlgmr.msra.gmra.mrb[0].mxu1 %vm390_vm3, %v2260_v48  ;;  %v947_v58 = vrot.slane %v946_v49, 4  ;;  %v938_v63 = vsel %vm2963_vm2, %v933_v53, %v937_v34  ;;  %v322_v0 = vrot.slane %v320_v55, 4  ;;  %v954_v9 = vshrl.u32 %v2331_v47, 16  ;;  %v3072_v48 = vld [vmem:[%s2926_s8 + $0x3c] sm:$0x1]  ;;  %v3082_v53 = vld [vmem:[%s3437_s1 + $0x60] sm:$0xff]  }
  0x28   : > { %v325_v2 = vrot.slane %v323_v56, 5  ;;  %2571 = vmatpush3.bf16.msra.mxu1 %v2959_v29  ;;  %v312_v13 = vor.u32 %v311_v59, %v308_v54  ;;  %v331_v14 = vrot.slane %v329_v61, 5  ;;  %v957_v15 = vshll.u32 %v2331_v47, 16  ;;  %v3086_v59 = vld [vmem:[%s2926_s8 + $0x3c] sm:$0x1] }
  0x29   : > { %v952_v11 = vsel %vm2963_vm2, %v947_v58, %v951_v44  ;;  %2572 = vmatprep.subr.bf16.mxu1 %v2768_v40  ;;  %v956_v19 = vrot.slane %v954_v9, 4  ;;  %v963_v29 = vshll.u32 %v3034_v57, 16  ;;  %v968_v25 = vshrl.u32 %v2333_v62, 16 }
  0x2a   : > { %v2344_v17 = vcombine.low %v938_v63, %v952_v11  ;;  %v326_v18 = vor.u32 %v325_v2, %v322_v0  ;;  %v313_v22 = vrot.slane %v312_v13, 4  ;;  %v959_v23 = vrot.slane %v957_v15, 5  ;;  %v3093_v2 = vld [vmem:[%s2926_s8 + $0x44] sm:$0x1]  ;;  %v2353_v15 = vld [vmem:[%s2926_s8 + $0x8] sm:$0xe] }
  0x2b   : > { %v971_v27 = vshll.u32 %v2333_v62, 16  ;;  %v965_v36 = vrot.slane %v963_v29, 5  ;;  %v977_v37 = vshll.u32 %v3042_v3, 16  ;;  %v334_v41 = vshrl.u32 %v3053_v16, 16 }
  0x2c   : > { %2611 = vmatmul.mubr.msk.bf16.vlgmr.msra.gmra.mrb[0].mxu0 %vm390_vm3, %v2344_v17  ;;  %v327_v34 = vrot.slane %v326_v18, 4  ;;  %2573 = vmatpush3.bf16.msra.mxu1 %v2768_v40  ;;  %v318_v42 = vsel %vm2963_vm2, %v313_v22, %v317_v60  ;;  %v960_v44 = vor.u32 %v959_v23, %v956_v19  ;;  %v970_v46 = vrot.slane %v968_v25, 4  ;;  %v2337_v60 = vld [vmem:[%s2926_s8 + $0x40] sm:$0xf] }
  0x2d   : > { %2619 = vmatpush3.bf16.msra.mxu0 %v2921_v4  ;;  %v973_v47 = vrot.slane %v971_v27, 5  ;;  %2582 = vmatprep.subr.bf16.mxu1 %v3048_v10  ;;  %v979_v40 = vrot.slane %v977_v37, 5  ;;  %v336_v51 = vrot.slane %v334_v41, 4  ;;  %v337_v4 = vshll.u32 %v3053_v16, 16 }
  0x2e   : > { %v332_v49 = vsel %vm2963_vm2, %v327_v34, %v331_v14  ;;  %2620 = vmatprep.subr.bf16.mxu0 %v2766_v21  ;;  %v961_v55 = vrot.slane %v960_v44, 4  ;;  %v343_v58 = vshll.u32 %v3063_v31, 16  ;;  %v348_v62 = vshrl.u32 %v3060_v28, 16 }
  0x2f   : > { %v2261_v54 = vcombine.low %v318_v42, %v332_v49  ;;  %v974_v56 = vor.u32 %v973_v47, %v970_v46  ;;  %v339_v61 = vrot.slane %v337_v4, 5  ;;  %v351_v63 = vshll.u32 %v3060_v28, 16  ;;  %v2354_v42 = vld [vmem:[%s2926_s8 + $0x10] sm:$0xe] }
  0x30   : > { %v357_v0 = vshll.u32 %v3072_v48, 16  ;;  %v966_v9 = vsel %vm2963_vm2, %v961_v55, %v965_v36  ;;  %v345_v13 = vrot.slane %v343_v58, 5  ;;  %v982_v14 = vshrl.u32 %v2335_v52, 16 }
  0x31   : > { %2566 = vmatprep.mubr.msk.bf16.mxu1 %vm390_vm3, %v2261_v54  ;;  %v975_v11 = vrot.slane %v974_v56, 4  ;;  %2621 = vmatpush3.bf16.msra.mxu0 %v2766_v21  ;;  %v340_v17 = vor.u32 %v339_v61, %v336_v51  ;;  %v350_v18 = vrot.slane %v348_v62, 4  ;;  %v353_v19 = vrot.slane %v351_v63, 5  ;;  %v2355_v61 = vld [vmem:[%s2926_s8 + $0x18] sm:$0xe] }
  0x32   : > { %v359_v29 = vrot.slane %v357_v0, 5  ;;  %2630 = vmatprep.subr.bf16.mxu0 %v3082_v53  ;;  %v984_v23 = vrot.slane %v982_v14, 4  ;;  %v985_v25 = vshll.u32 %v2335_v52, 16  ;;  %v991_v27 = vshll.u32 %v3086_v59, 16 }
  0x33   : > { %v980_v22 = vsel %vm2963_vm2, %v975_v11, %v979_v40  ;;  %v341_v36 = vrot.slane %v340_v17, 4  ;;  %v354_v37 = vor.u32 %v353_v19, %v350_v18  ;;  %v996_v41 = vshrl.u32 %v2337_v60, 16  ;;  %v2356_v11 = vld [vmem:[%s2926_s8 + $0x20] sm:$0xe]  ;;  %v2358_v19 = vld [vmem:[%s2926_s8 + $0x30] sm:$0xe] }
  0x34   : > { %v2345_v34 = vcombine.low %v966_v9, %v980_v22  ;;  %v1153_v21 = vrot.slane %v2953_v24, 5  ;;  %v987_v44 = vrot.slane %v985_v25, 5  ;;  %v999_v46 = vshll.u32 %v2337_v60, 16  ;;  %v578_v25 = vld [vmem:[%s2926_s8 + $0x8] sm:$0xe] }
  0x35   : > { %v1005_v47 = vshll.u32 %v3093_v2, 16  ;;  %v346_v49 = vsel %vm2963_vm2, %v341_v36, %v345_v13  ;;  %v355_v40 = vrot.slane %v354_v37, 4  ;;  %v998_v51 = vrot.slane %v996_v41, 4 }
  0x36   : > { %2614 = vmatprep.mubr.msk.bf16.mxu0 %vm390_vm3, %v2345_v34  ;;  %v2361_v4 = vrot.slane %v2353_v15, 9  ;;  %v988_v52 = vor.u32 %v987_v44, %v984_v23  ;;  %v993_v54 = vrot.slane %v991_v27, 5  ;;  %v1001_v55 = vrot.slane %v999_v46, 5  ;;  %v2357_v15 = vld [vmem:[%s2926_s8 + $0x28] sm:$0xe] }
  0x37   : > { %v2362_v56 = vrot.slane %v2354_v42, 9  ;;  %v360_v58 = vsel %vm2963_vm2, %v355_v40, %v359_v29  ;;  %v2269_v60 = vcombine.low %v2929_v5, %v2932_v6  ;;  %v1007_v9 = vrot.slane %v1005_v47, 5  ;;  %v577_v29 = vld [vmem:[%s2926_s8] sm:$0xe] }
  0x38   : > { %v2262_v62 = vcombine.low %v346_v49, %v360_v58  ;;  %v989_v63 = vrot.slane %v988_v52, 4  ;;  %v1002_v0 = vor.u32 %v1001_v55, %v998_v51  ;;  %v1150_v13 = vsel %vm3111_vm6, %v2361_v4, %v1149_v33  ;;  %v2360_v46 = vld [vmem:[%s2926_s8 + $0x40] sm:$0xe]  ;;  %v580_v51 = vld [vmem:[%s2926_s8 + $0x18] sm:$0xe]  ;;  %v2773_v55 = vld [vmem:[%s3437_s1 + $0x68] sm:$0xff]  }
  0x39   : > { %v1154_v14 = vsel %vm3111_vm6, %v2362_v56, %v1153_v21  ;;  %v606_v17 = vrot.slane %v2935_v7, 5  ;;  %v1157_v5 = vrot.slane %v2996_v1, 5  ;;  %v1161_v20 = vrot.slane %v3002_v12, 5  ;;  %v2359_v21 = vld [vmem:[%s2926_s8 + $0x38] sm:$0xe] }
  0x3a   : > { %2567 = vmatmul.mubr.msk.bf16.gmra.mrb[4].mxu1 %vm390_vm3, %v2262_v62  ;;  %v994_v6 = vsel %vm2963_vm2, %v989_v63, %v993_v54  ;;  %v1003_v18 = vrot.slane %v1002_v0, 4  ;;  %v2363_v33 = vrot.slane %v2355_v61, 9  ;;  %v2373_v22 = vcombine.low %v1150_v13, %v1154_v14  ;;  %v581_v58 = vld [vmem:[%s2926_s8 + $0x20] sm:$0xe] }
  0x3b   : > { %2574 = vmatprep.mubr.msk.bf16.mxu1 %vm390_vm3, %v2269_v60  ;;  %v2364_v1 = vrot.slane %v2356_v11, 9  ;;  %v2365_v23 = vrot.slane %v2357_v15, 9  ;;  %v1165_v34 = vrot.slane %v3034_v57, 5  ;;  %v2366_v36 = vrot.slane %v2358_v19, 9  ;;  %v582_v60 = vld [vmem:[%s2926_s8 + $0x28] sm:$0xe] }
  0x3c   : > { %v1008_v7 = vsel %vm2963_vm2, %v1003_v18, %v1007_v9  ;;  %v1169_v12 = vrot.slane %v3042_v3, 5  ;;  %v610_v37 = vrot.slane %v2938_v8, 5  ;;  %v614_v41 = vrot.slane %v2976_v43, 5  ;;  %v579_v3 = vld [vmem:[%s2926_s8 + $0x10] sm:$0xe] }
  0x3d   : > { %v2346_v27 = vcombine.low %v994_v6, %v1008_v7  ;;  %v2270_v42 = vcombine.low %v2969_v35, %v2972_v39  ;;  %v2271_v44 = vcombine.low %v3008_v26, %v3017_v38  ;;  %v2279_v57 = vrot.slane %v577_v29, 9  ;;  %v2776_v39 = vld [vmem:[%s3437_s1 + $0x28] sm:$0xff]   ;;  %v2405_v15 = vld [vmem:[%s2926_s8 + $0x10] sm:$0xf]  ;;  %v584_v19 = vld [vmem:[%s2926_s8 + $0x38] sm:$0xe] }
  0x3e   : > { %v2280_v47 = vrot.slane %v578_v25, 9  ;;  %v618_v49 = vrot.slane %v2983_v50, 5  ;;  %v1158_v8 = vsel %vm3111_vm6, %v2363_v33, %v1157_v5  ;;  %v1162_v35 = vsel %vm3111_vm6, %v2364_v1, %v1161_v20  ;;  %v2407_v5 = vld [vmem:[%s2926_s8 + $0x18] sm:$0xf]  ;;  %v3206_v20 = vld [vmem:[%s2926_s8 + $0x14] sm:$0x1] }
  0x3f   : > { %2615 = vmatmul.mubr.msk.bf16.gmra.mrb[4].mxu0 %vm390_vm3, %v2346_v27  ;;  %v1166_v26 = vsel %vm3111_vm6, %v2365_v23, %v1165_v34  ;;  %v1170_v50 = vsel %vm3111_vm6, %v2366_v36, %v1169_v12  ;;  %v2367_v38 = vrot.slane %v2359_v21, 9  ;;  %v1173_v40 = vrot.slane %v3086_v59, 5  ;;  %v2777_v25 = vld [vmem:[%s2926_s8 + $0x10] ss:$8 sps:$4 sm:$0xff]   ;;  %v2409_v21 = vld [vmem:[%s2926_s8 + $0x20] sm:$0xf] }
  0x40   : > { %2622 = vmatprep.mubr.msk.bf16.mxu0 %vm390_vm3, %v2373_v22  ;;  %v2368_v4 = vrot.slane %v2360_v46, 9  ;;  %v1177_v52 = vrot.slane %v3093_v2, 5  ;;  %v2374_v54 = vcombine.low %v1158_v8, %v1162_v35  ;;  %v607_v56 = vsel %vm3111_vm6, %v2279_v57, %v606_v17  ;;  %v3183_v2 = vld [vmem:[%s3437_s1 + $0x30] sm:$0xff]  }
  0x41   : > { %v611_v59 = vsel %vm3111_vm6, %v2280_v47, %v610_v37  ;;  %v2375_v61 = vcombine.low %v1166_v26, %v1170_v50  ;;  %v2281_v62 = vrot.slane %v579_v3, 9  ;;  %v2282_v63 = vrot.slane %v580_v51, 9  ;;  %v2779_v51 = vld [vmem:[%s2926_s8 + $0x20] ss:$8 sps:$4 sm:$0xff]  }
  0x42   : > { %2575 = vmatmul.mubr.msk.bf16.vlgmr.msra.gmra.mrb[0].mxu1 %vm390_vm3, %v2270_v42  ;;  %v1174_v0 = vsel %vm3111_vm6, %v2367_v38, %v1173_v40  ;;  %v1178_v9 = vsel %vm3111_vm6, %v2368_v4, %v1177_v52  ;;  %v2291_v11 = vcombine.low %v607_v56, %v611_v59  ;;  %v2283_v13 = vrot.slane %v581_v58, 9  ;;  %v2413_v40 = vld [vmem:[%s2926_s8 + $0x30] sm:$0xf] }
  0x43   : > { %2578 = vmatprep.mubr.msk.bf16.mxu1 %vm390_vm3, %v2271_v44  ;;  %2583 = vmatpush3.bf16.msra.mxu1 %v3048_v10  ;;  %v2272_v10 = vcombine.low %v3053_v16, %v3060_v28  ;;  %v622_v14 = vrot.slane %v3013_v32, 5  ;;  %v3197_v16 = vld [vmem:[%s3437_s1 + $0x70] sm:$0xff]   ;;  %v2284_v28 = vrot.slane %v582_v60, 9  ;;  %v626_v17 = vrot.slane %v3025_v45, 5  ;;  %v3210_v45 = vld [vmem:[%s2926_s8 + $0x1c] sm:$0x1] }
  0x44   : > { %2584 = vmatprep.subr.bf16.mxu1 %v2776_v39  ;;  %v1441_v6 = vshrl.u32 %v2405_v15, 16  ;;  %v1444_v18 = vshll.u32 %v2405_v15, 16  ;;  %v583_v32 = vld [vmem:[%s2926_s8 + $0x30] sm:$0xe]  ;;  %v1455_v33 = vshrl.u32 %v2407_v5, 16  ;;  %v1458_v29 = vshll.u32 %v2407_v5, 16 }
  0x45   : > { %v2376_v7 = vcombine.low %v1174_v0, %v1178_v9  ;;  %v615_v27 = vsel %vm3111_vm6, %v2281_v62, %v614_v41  ;;  %v619_v34 = vsel %vm3111_vm6, %v2282_v63, %v618_v49  ;;  %v623_v36 = vsel %vm3111_vm6, %v2283_v13, %v622_v14  ;;  %v2411_v44 = vld [vmem:[%s2926_s8 + $0x28] sm:$0xf]  ;;  %v2780_v58 = vld [vmem:[%s2926_s8 + $0x30] ss:$8 sps:$4 sm:$0xff]   ;;  %v3250_v62 = vld [vmem:[%s2926_s8 + $0x2c] sm:$0x1] }
  0x46   : > { %v1446_v22 = vrot.slane %v1444_v18, 5  ;;  %v1457_v1 = vrot.slane %v1455_v33, 4  ;;  %v1460_v23 = vrot.slane %v1458_v29, 5  ;;  %v627_v12 = vsel %vm3111_vm6, %v2284_v28, %v626_v17  ;;  %v2781_v14 = vld [vmem:[%s3437_s1 + $0x78] sm:$0xff]   ;;  %v3259_v28 = vld [vmem:[%s2926_s8 + $0x34] sm:$0x1] }
  0x47   : > { %2623 = vmatmul.mubr.msk.bf16.vlgmr.msra.gmra.mrb[0].mxu0 %vm390_vm3, %v2374_v54  ;;  %2585 = vmatpush3.bf16.msra.mxu1 %v2776_v39  ;;  %v1450_v37 = vshll.u32 %v3206_v20, 16  ;;  %v1464_v42 = vshll.u32 %v3210_v45, 16  ;;  %v2285_v43 = vrot.slane %v583_v32, 9  ;;  %v630_v41 = vrot.slane %v3063_v31, 5  ;;  %v2784_v31 = vld [vmem:[%s3437_s1 + $0x38] sm:$0xff]  }
  0x48   : > { %2631 = vmatpush3.bf16.msra.mxu0 %v3082_v53  ;;  %2626 = vmatprep.mubr.msk.bf16.mxu0 %vm390_vm3, %v2375_v61  ;;  %v1443_v53 = vrot.slane %v1441_v6, 4  ;;  %v2286_v46 = vrot.slane %v584_v19, 9  ;;  %v634_v57 = vrot.slane %v3072_v48, 5  ;;  %v2292_v47 = vcombine.low %v615_v27, %v619_v34  ;;  %v3244_v54 = vld [vmem:[%s2926_s8 + $0x24] sm:$0x1] }
  0x49   : > { %2632 = vmatprep.subr.bf16.mxu0 %v2773_v55  ;;  %2594 = vmatprep.subr.bf16.mxu1 %v3183_v2  ;;  %v2293_v49 = vcombine.low %v623_v36, %v627_v12  ;;  %v1461_v35 = vor.u32 %v1460_v23, %v1457_v1  ;;  %v1469_v39 = vshrl.u32 %v2409_v21, 16  ;;  %v1472_v3 = vshll.u32 %v2409_v21, 16  ;;  %v3264_v19 = vld [vmem:[%s2926_s8 + $0x3c] sm:$0x1]  ;;  %v2417_v33 = vld [vmem:[%s2926_s8 + $0x40] sm:$0xf] }
  0x4a   : > { %2579 = vmatmul.mubr.msk.bf16.gmra.mrb[4].mxu1 %vm390_vm3, %v2272_v10  ;;  %v1447_v8 = vor.u32 %v1446_v22, %v1443_v53  ;;  %v1483_v26 = vshrl.u32 %v2411_v44, 16  ;;  %v1486_v50 = vshll.u32 %v2411_v44, 16  ;;  %v1452_v48 = vrot.slane %v1450_v37, 5  ;;  %v2419_v29 = vld [vmem:[%s2926_s8 + $0x48] sm:$0xf]  ;;  %v2786_v12 = vld [vmem:[%s3437_s1 + $0x80] sm:$0xff]  }
  0x4b   : > { %2586 = vmatprep.mubr.msk.bf16.mxu1 %vm390_vm3, %v2291_v11  ;;  %v1466_v38 = vrot.slane %v1464_v42, 5  ;;  %v631_v4 = vsel %vm3111_vm6, %v2285_v43, %v630_v41  ;;  %v635_v52 = vsel %vm3111_vm6, %v2286_v46, %v634_v57  ;;  %v1497_v56 = vshrl.u32 %v2413_v40, 16  ;;  %v2783_v43 = vld [vmem:[%s2926_s8 + $0x40] ss:$8 sps:$4 sm:$0xff]  }
  0x4c   : > { %2633 = vmatpush3.bf16.msra.mxu0 %v2773_v55  ;;  %v2415_v55 = vld [vmem:[%s2926_s8 + $0x38] sm:$0xf]  ;;  %v1500_v59 = vshll.u32 %v2413_v40, 16  ;;  %v1448_v60 = vrot.slane %v1447_v8, 4  ;;  %v1462_v61 = vrot.slane %v1461_v35, 4  ;;  %v1471_v0 = vrot.slane %v1469_v39, 4 }
  0x4d   : > { %2642 = vmatprep.subr.bf16.mxu0 %v3197_v16  ;;  %v1511_v63 = vshrl.u32 %v2415_v55, 16  ;;  %v1514_v10 = vshll.u32 %v2415_v55, 16  ;;  %v1474_v9 = vrot.slane %v1472_v3, 5  ;;  %v1485_v11 = vrot.slane %v1483_v26, 4  ;;  %v2787_v40 = vld [vmem:[%s2926_s8 + $0x18] ss:$8 sps:$4 sm:$0xff]  }
  0x4e   : > { %v1488_v13 = vrot.slane %v1486_v50, 5  ;;  %v1478_v15 = vshll.u32 %v3244_v54, 16  ;;  %v1499_v17 = vrot.slane %v1497_v56, 4  ;;  %v1502_v5 = vrot.slane %v1500_v59, 5 }
  0x4f   : > { %2627 = vmatmul.mubr.msk.bf16.gmra.mrb[4].mxu0 %vm390_vm3, %v2376_v7  ;;  %v1513_v6 = vrot.slane %v1511_v63, 4  ;;  %v2294_v18 = vcombine.low %v631_v4, %v635_v52  ;;  %v1453_v32 = vsel %vm2963_vm2, %v1448_v60, %v1452_v48  ;;  %v2785_v7 = vld [vmem:[%s2926_s8 + $0x8] ss:$8 sps:$4 sm:$0xff]   ;;  %v1467_v53 = vsel %vm2963_vm2, %v1462_v61, %v1466_v38  ;;  %v3287_v38 = vld [vmem:[%s2926_s8 + $0x4c] sm:$0x1] }
  0x50   : > { %2634 = vmatprep.mubr.msk.bf16.mxu0 %vm390_vm3, %v2777_v25  ;;  %v1475_v22 = vor.u32 %v1474_v9, %v1471_v0  ;;  %v1489_v1 = vor.u32 %v1488_v13, %v1485_v11  ;;  %v1492_v23 = vshll.u32 %v3250_v62, 16  ;;  %v1525_v25 = vshrl.u32 %v2417_v33, 16  ;;  %v2788_v4 = vld [vmem:[%s2926_s8 + $0x28] ss:$8 sps:$4 sm:$0xff]  }
  0x51   : > { %v1528_v27 = vshll.u32 %v2417_v33, 16  ;;  %v1539_v34 = vshrl.u32 %v2419_v29, 16  ;;  %v1542_v36 = vshll.u32 %v2419_v29, 16  ;;  %v1503_v37 = vor.u32 %v1502_v5, %v1499_v17  ;;  %v2435_v63 = vld [vmem:[%s2926_s8 + $0x10] sm:$0xe]  ;;  %v2789_v17 = vld [vmem:[%s3437_s1 + $0x88] sm:$0xff]  }
  0x52   : > { %2587 = vmatmul.mubr.msk.bf16.vlgmr.msra.gmra.mrb[0].mxu1 %vm390_vm3, %v2292_v47  ;;  %v1506_v42 = vshll.u32 %v3259_v28, 16  ;;  %v1520_v44 = vshll.u32 %v3264_v19, 16  ;;  %v2425_v41 = vcombine.low %v1453_v32, %v1467_v53  ;;  %v1476_v46 = vrot.slane %v1475_v22, 4  ;;  %v2790_v32 = vld [vmem:[%s2926_s8 + $0x38] ss:$8 sps:$4 sm:$0xff]  }
  0x53   : > { %2590 = vmatprep.mubr.msk.bf16.mxu1 %vm390_vm3, %v2293_v49  ;;  %2595 = vmatpush3.bf16.msra.mxu1 %v3183_v2  ;;  %v1516_v2 = vrot.slane %v1514_v10, 5  ;;  %v1490_v57 = vrot.slane %v1489_v1, 4  ;;  %v1494_v47 = vrot.slane %v1492_v23, 5  ;;  %v3284_v49 = vld [vmem:[%s2926_s8 + $0x44] sm:$0x1]  ;;  %v1527_v8 = vrot.slane %v1525_v25, 4 }
  0x54   : > { %2596 = vmatprep.subr.bf16.mxu1 %v2784_v31  ;;  %v1530_v35 = vrot.slane %v1528_v27, 5  ;;  %v1541_v39 = vrot.slane %v1539_v34, 4  ;;  %v1544_v3 = vrot.slane %v1542_v36, 5  ;;  %v1504_v26 = vrot.slane %v1503_v37, 4  ;;  %v2436_v10 = vld [vmem:[%s2926_s8 + $0x18] sm:$0xe] }
  0x55   : > { %v1517_v21 = vor.u32 %v1516_v2, %v1513_v6  ;;  %v1508_v50 = vrot.slane %v1506_v42, 5  ;;  %v1522_v48 = vrot.slane %v1520_v44, 5  ;;  %v1534_v52 = vshll.u32 %v3284_v49, 16  ;;  %v2438_v53 = vld [vmem:[%s2926_s8 + $0x28] sm:$0xe] }
  0x56   : > { %v1495_v55 = vsel %vm2963_vm2, %v1490_v57, %v1494_v47  ;;  %v1531_v56 = vor.u32 %v1530_v35, %v1527_v8  ;;  %v1545_v59 = vor.u32 %v1544_v3, %v1541_v39  ;;  %v2443_v5 = vrot.slane %v2435_v63, 9  ;;  %v2439_v22 = vld [vmem:[%s2926_s8 + $0x30] sm:$0xe]  ;;  %v2440_v1 = vld [vmem:[%s2926_s8 + $0x38] sm:$0xe] }
  0x57   : > { %2635 = vmatmul.mubr.msk.bf16.vlgmr.msra.gmra.mrb[0].mxu0 %vm390_vm3, %v2779_v51  ;;  %2597 = vmatpush3.bf16.msra.mxu1 %v2784_v31  ;;  %v1518_v31 = vrot.slane %v1517_v21, 4  ;;  %v1509_v60 = vsel %vm2963_vm2, %v1504_v26, %v1508_v50  ;;  %v1536_v9 = vrot.slane %v1534_v52, 5  ;;  %v1692_v6 = vrot.slane %v3206_v20, 5  ;;  %v1860_v26 = vld [vmem:[%s3439_s3 + $0x8] sm:$0xff] }
  0x58   : > { %2643 = vmatpush3.bf16.msra.mxu0 %v3197_v16  ;;  %2638 = vmatprep.mubr.msk.bf16.mxu0 %vm390_vm3, %v2780_v58  ;;  %v1480_v16 = vrot.slane %v1478_v15, 5  ;;  %v1548_v58 = vshll.u32 %v3287_v38, 16  ;;  %v1532_v13 = vrot.slane %v1531_v56, 4  ;;  %v2444_v2 = vrot.slane %v2436_v10, 9 }
  0x59   : > { %2644 = vmatprep.subr.bf16.mxu0 %v2781_v14  ;;  %v1523_v61 = vsel %vm2963_vm2, %v1518_v31, %v1522_v48  ;;  %v1693_v20 = vsel %vm3111_vm6, %v2443_v5, %v1692_v6  ;;  %v1700_v27 = vrot.slane %v3244_v54, 5  ;;  %v2446_v34 = vrot.slane %v2438_v53, 9  ;;  %v2441_v54 = vld [vmem:[%s2926_s8 + $0x40] sm:$0xe] }
  0x5a   : > { %2591 = vmatmul.mubr.msk.bf16.gmra.mrb[4].mxu1 %vm390_vm3, %v2294_v18  ;;  %v1481_v51 = vsel %vm2963_vm2, %v1476_v46, %v1480_v16  ;;  %v2427_v11 = vcombine.low %v1509_v60, %v1523_v61  ;;  %v1550_v15 = vrot.slane %v1548_v58, 5  ;;  %v1696_v18 = vrot.slane %v3210_v45, 5 }
  0x5b   : > { %2598 = vmatprep.mubr.msk.bf16.mxu1 %vm390_vm3, %v2785_v7  ;;  %v2426_v0 = vcombine.low %v1481_v51, %v1495_v55  ;;  %v1537_v33 = vsel %vm2963_vm2, %v1532_v13, %v1536_v9  ;;  %v2437_v7 = vld [vmem:[%s2926_s8 + $0x20] sm:$0xe]  ;;  %v1704_v36 = vrot.slane %v3250_v62, 5  ;;  %v1708_v37 = vrot.slane %v3259_v28, 5 }
  0x5c   : > { %2645 = vmatpush3.bf16.msra.mxu0 %v2781_v14  ;;  %v1546_v14 = vrot.slane %v1545_v59, 4  ;;  %v1697_v45 = vsel %vm3111_vm6, %v2444_v2, %v1696_v18  ;;  %v2445_v25 = vrot.slane %v2437_v7, 9  ;;  %v2448_v42 = vrot.slane %v2440_v1, 9  ;;  %v2465_v59 = vld [vmem:[%s3438_s2] ss:$0 sm:$0xff] }
  0x5d   : > { %2654 = vmatprep.subr.bf16.mxu0 %v2786_v12  ;;  %v2455_v30 = vcombine.low %v1693_v20, %v1697_v45  ;;  %v1712_v21 = vrot.slane %v3264_v19, 5  ;;  %v1705_v16 = vsel %vm3111_vm6, %v2446_v34, %v1704_v36  ;;  %v2449_v19 = vrot.slane %v2441_v54, 9  ;;  %v2466_v36 = vld [vmem:[%s3440_s4] ss:$0 sm:$0xff] }
  0x5e   : > { %v1551_v29 = vsel %vm2963_vm2, %v1546_v14, %v1550_v15  ;;  %v1701_v44 = vsel %vm3111_vm6, %v2445_v25, %v1700_v27  ;;  %v1716_v57 = vrot.slane %v3284_v49, 5  ;;  %v1720_v8 = vrot.slane %v3287_v38, 5  ;;  %v1859_v49 = vld [vmem:[%s3439_s3] sm:$0xff] }
  0x5f   : > { %2639 = vmatmul.mubr.msk.bf16.gmra.mrb[4].mxu0 %vm390_vm3, %v2783_v43  ;;  %v2428_v23 = vcombine.low %v1537_v33, %v1551_v29  ;;  %v1713_v28 = vsel %vm3111_vm6, %v2448_v42, %v1712_v21  ;;  %v2442_v43 = vld [vmem:[%s2926_s8 + $0x48] sm:$0xe]  ;;  %v2682_v50 = vpack.c.bf16 %v1860_v26, %v1859_v49 }
  0x60   : > { %2646 = vmatprep.mubr.msk.bf16.mxu0 %vm390_vm3, %v2425_v41  ;;  %v2456_v41 = vcombine.low %v1701_v44, %v1705_v16  ;;  %v2450_v47 = vrot.slane %v2442_v43, 9  ;;  %v1717_v35 = vsel %vm3111_vm6, %v2449_v19, %v1716_v57 }
  0x61   : > { %2683 = vmatprep.subr.bf16.mxu1 %v2682_v50 }
  0x62   : > { %2599 = vmatmul.mubr.msk.bf16.vlgmr.msra.gmra.mrb[0].mxu1 %vm390_vm3, %v2787_v40  ;;  %v1721_v39 = vsel %vm3111_vm6, %v2450_v47, %v1720_v8 }
  0x63   : > { %2602 = vmatprep.mubr.msk.bf16.mxu1 %vm390_vm3, %v2788_v4  ;;  %v2458_v3 = vcombine.low %v1717_v35, %v1721_v39  ;;  %2685 = vmatpush3.bf16.msra.mxu1 %v2682_v50 }
  0x67   : > { %2647 = vmatmul.mubr.msk.bf16.vlgmr.msra.gmra.mrb[0].mxu0 %vm390_vm3, %v2426_v0 }
  0x68   : > { %2655 = vmatpush3.bf16.msra.mxu0 %v2786_v12  ;;  %2650 = vmatprep.mubr.msk.bf16.mxu0 %vm390_vm3, %v2427_v11  ;;  %v2447_v12 = vrot.slane %v2439_v22, 9 }
  0x69   : > { %2656 = vmatprep.subr.bf16.mxu0 %v2789_v17 }
  0x6a   : > { %2603 = vmatmul.mubr.msk.bf16.gmra.mrb[4].mxu1 %vm390_vm3, %v2790_v32  ;;  %v1709_v62 = vsel %vm3111_vm6, %v2447_v12, %v1708_v37 }
  0x6b   : > { %v2457_v46 = vcombine.low %v1709_v62, %v1713_v28 }
  0x6c   : > { %2657 = vmatpush3.bf16.msra.mxu0 %v2789_v17 }
  0x6f   : > { %2651 = vmatmul.mubr.msk.bf16.gmra.mrb[4].mxu0 %vm390_vm3, %v2428_v23 }
  0x70   : > { %2658 = vmatprep.mubr.msk.bf16.mxu0 %vm390_vm3, %v2455_v30 }
  0x77   : > { %2659 = vmatmul.mubr.msk.bf16.vlgmr.msra.gmra.mrb[0].mxu0 %vm390_vm3, %v2456_v41 }
  0x78   : > { %2662 = vmatprep.mubr.msk.bf16.mxu0 %vm390_vm3, %v2457_v46 }
  0x7f   : > { %2663 = vmatmul.mubr.msk.bf16.gmra.mrb[4].mxu0 %vm390_vm3, %v2458_v3 }
 0x135   : > { %v2600_v31 = vpop.f32.mrb[0].mxu1 }
 0x136   : > { %v842_v48 = vpop.f32.mrb[1].mxu1 }
 0x137   : > { %v2601_v38 = vpop.f32.mrb[2].mxu1 }
 0x138   : > { %v845_v40 = vpop.f32.mrb[3].mxu1 }
 0x13d   : > { %v2604_v24 = vpop.f32.mrb[4].mxu1 }
 0x13e   : > { %v858_v51 = vpop.f32.mrb[5].mxu1 }
 0x13f   : > { %v2605_v4 = vpop.f32.mrb[6].mxu1 }
 0x140   : > { %v861_v52 = vpop.f32.mrb[7].mxu1 }
 0x14a   : > { %v2660_v55 = vpop.f32.mrb[0].mxu0 }
 0x14b   : > { %v2686_v56 = vadd.f32 %v2660_v55, %v2600_v31  ;;  %v1797_v58 = vpop.f32.mrb[1].mxu0 }
 0x14c   : > { %v2687_v60 = vadd.f32 %v1797_v58, %v842_v48  ;;  %v2661_v61 = vpop.f32.mrb[2].mxu0 }
 0x14d   : > { %v2688_v63 = vadd.f32 %v2661_v61, %v2601_v38  ;;  %v1800_v10 = vpop.f32.mrb[3].mxu0  ;;  %v1845_v11 = vadd.f32 %v2686_v56, %v2465_v59 }
 0x14e   : > { %v1843_v0 = vadd.f32 %v2687_v60, %v2465_v59  ;;  %v2689_v9 = vadd.f32 %v1800_v10, %v845_v40 }
 0x14f   : > { %v1846_v15 = vadd.f32 %v2688_v63, %v2465_v59  ;;  %v1853_v6 = vmax.f32 %v1845_v11, 0.0 }
 0x150   : > { %v1851_v13 = vmax.f32 %v1843_v0, 0.0  ;;  %v1844_v14 = vadd.f32 %v2689_v9, %v2465_v59 }
 0x151   : > { %v1854_v20 = vmax.f32 %v1846_v15, 0.0 }
 0x152   : > { %v1852_v17 = vmax.f32 %v1844_v14, 0.0  ;;  %v2664_v5 = vpop.f32.mrb[4].mxu0  ;;  %2670 = vmatprep.mubr.msk.f32.mxu1 %vm1868_vm7, %v1851_v13 }
 0x153   : > { %v2690_v2 = vadd.f32 %v2664_v5, %v2604_v24  ;;  %v1813_v18 = vpop.f32.mrb[5].mxu0 }
 0x154   : > { %v2691_v32 = vadd.f32 %v1813_v18, %v858_v51  ;;  %v2665_v33 = vpop.f32.mrb[6].mxu0  ;;  %2671 = vmatmul.mubr.msk.f32.vlgmr.msra.gmra.mrb[8].mxu1 %vm1868_vm7, %v1852_v17 }
 0x155   : > { %v2692_v29 = vadd.f32 %v2665_v33, %v2605_v4  ;;  %v1816_v7 = vpop.f32.mrb[7].mxu0  ;;  %2673 = vmatprep.mubr.msk.f32.mxu1 %vm1868_vm7, %v1853_v6  ;;  %v1849_v22 = vadd.f32 %v2690_v2, %v2465_v59 }
 0x156   : > { %v1847_v45 = vadd.f32 %v2691_v32, %v2465_v59  ;;  %v2693_v53 = vadd.f32 %v1816_v7, %v861_v52 }
 0x157   : > { %v1850_v25 = vadd.f32 %v2692_v29, %v2465_v59  ;;  %v1857_v27 = vmax.f32 %v1849_v22, 0.0 }
 0x158   : > { %v1855_v1 = vmax.f32 %v1847_v45, 0.0  ;;  %v1848_v23 = vadd.f32 %v2693_v53, %v2465_v59  ;;  %2674 = vmatmul.mubr.msk.f32.gmra.mrb[10].mxu1 %vm1868_vm7, %v1854_v20 }
 0x159   : > { %v1858_v34 = vmax.f32 %v1850_v25, 0.0 }
 0x15a   : > { %v1856_v30 = vmax.f32 %v1848_v23, 0.0  ;;  %2676 = vmatprep.mubr.msk.f32.mxu1 %vm1868_vm7, %v1855_v1 }
 0x15c   : > { %2677 = vmatmul.mubr.msk.f32.gmra.mrb[12].mxu1 %vm1868_vm7, %v1856_v30 }
 0x15d   : > { %2679 = vmatprep.mubr.msk.f32.mxu1 %vm1868_vm7, %v1857_v27 }
 0x160   : > { %2680 = vmatmul.mubr.msk.f32.gmra.mrb[14].mxu1 %vm1868_vm7, %v1858_v34 }
 0x227   : > { %v2672_v12 = vpop.f32.mrb[8].mxu1 }
 0x228   : > { %v1965_v37 = vadd.f32 %v2672_v12, %v2466_v36  ;;  %v1959_v42 = vpop.f32.mrb[9].mxu1 }
 0x229   : > { %v1960_v21 = vadd.f32 %v2466_v36, %v1959_v42 }
 0x22a   : > { %v2476_v44 = vmul.f32 -1.442695, %v1965_v37 }
 0x22b   : > { %v2475_v16 = vmul.f32 -1.442695, %v1960_v21  ;;  %v2675_v54 = vpop.f32.mrb[10].mxu1 }
 0x22c   : > { %2791 = vpow2.f32 %v2476_v44  ;;  %v1975_v62 = vadd.f32 %v2675_v54, %v2466_v36  ;;  %v1969_v28 = vpop.f32.mrb[11].mxu1 }
 0x22d   : > { %2793 = vpow2.f32 %v2475_v16  ;;  %v1970_v43 = vadd.f32 %v2466_v36, %v1969_v28 }
 0x22e   : > { %v2478_v41 = vmul.f32 -1.442695, %v1975_v62 }
 0x22f   : > { %v2477_v19 = vmul.f32 -1.442695, %v1970_v43  ;;  %v2678_v46 = vpop.f32.mrb[12].mxu1 }
 0x230   : > { %2795 = vpow2.f32 %v2478_v41  ;;  %v1985_v57 = vadd.f32 %v2678_v46, %v2466_v36  ;;  %v1979_v47 = vpop.f32.mrb[13].mxu1 }
 0x231   : > { %2797 = vpow2.f32 %v2477_v19  ;;  %v1980_v8 = vadd.f32 %v2466_v36, %v1979_v47 }
 0x232   : > { %v2480_v35 = vmul.f32 -1.442695, %v1985_v57 }
 0x233   : > { %v2479_v39 = vmul.f32 -1.442695, %v1980_v8  ;;  %v2681_v3 = vpop.f32.mrb[14].mxu1 }
 0x234   : > { %2799 = vpow2.f32 %v2480_v35  ;;  %v1995_v49 = vadd.f32 %v2681_v3, %v2466_v36  ;;  %v1989_v26 = vpop.f32.mrb[15].mxu1 }
 0x235   : > { %2801 = vpow2.f32 %v2479_v39  ;;  %v1990_v50 = vadd.f32 %v2466_v36, %v1989_v26 }
 0x236   : > { %v2792_v31 = vpop.eup %2791  ;;  %v2482_v48 = vmul.f32 -1.442695, %v1995_v49 }
 0x237   : > { %v2794_v38 = vpop.eup %2793  ;;  %v2023_v40 = vadd.f32 1.0, %v2792_v31  ;;  %v2481_v24 = vmul.f32 -1.442695, %v1990_v50 }
 0x238   : > { %v2022_v51 = vadd.f32 1.0, %v2794_v38  ;;  %2803 = vpow2.f32 %v2482_v48 }
 0x239   : > { %2805 = vrcp.f32 %v2023_v40 }
 0x23a   : > { %v2796_v4 = vpop.eup %2795  ;;  %2807 = vpow2.f32 %v2481_v24 }
 0x23b   : > { %v2798_v52 = vpop.eup %2797  ;;  %v2025_v55 = vadd.f32 1.0, %v2796_v4  ;;  %2809 = vrcp.f32 %v2022_v51 }
 0x23c   : > { %v2024_v56 = vadd.f32 1.0, %v2798_v52 }
 0x23d   : > { %2811 = vrcp.f32 %v2025_v55 }
 0x23e   : > { %v2800_v59 = vpop.eup %2799  ;;  %2813 = vrcp.f32 %v2024_v56 }
 0x23f   : > { %v2802_v58 = vpop.eup %2801  ;;  %v2027_v61 = vadd.f32 1.0, %v2800_v59 }
 0x240   : > { %v2026_v60 = vadd.f32 1.0, %v2802_v58 }
 0x242   : > { %v2804_v63 = vpop.eup %2803  ;;  %2815 = vrcp.f32 %v2026_v60 }
 0x243   : > { %v3373_v10 = vpop.eup %2805  ;;  %2817 = vrcp.f32 %v2027_v61  ;;  %v2029_v9 = vadd.f32 1.0, %v2804_v63 }
 0x244   : > { %2056 = vrot.lane.b32.xlu0 %v3373_v10, %s2863_s22  ;;  %v2808_v0 = vpop.eup %2807 }
 0x245   : > { %v3376_v11 = vpop.eup %2809  ;;  %v2028_v13 = vadd.f32 1.0, %v2808_v0 }
 0x247   : > { %v3378_v14 = vpop.eup %2811  ;;  %2819 = vrcp.f32 %v2028_v13 }
 0x248   : > { %2060 = vrot.lane.b32.xlu1 %v3378_v14, %s2863_s22  ;;  %2054 = vrot.lane.b32.xlu0 %v3376_v11, %s2863_s22  ;;  %2821 = vrcp.f32 %v2029_v9  ;;  %v3382_v15 = vpop.eup %2813 }
 0x24c   : > { %v3384_v17 = vpop.eup %2815  ;;  %2058 = vrot.lane.b32.xlu1 %v3382_v15, %s2863_s22 }
 0x24d   : > { %2062 = vrot.lane.b32.xlu0 %v3384_v17, %s2863_s22  ;;  %v3388_v5 = vpop.eup %2817 }
 0x250   : > { %2064 = vrot.lane.b32.xlu1 %v3388_v5, %s2863_s22 }
 0x251   : > { %v3391_v6 = vpop.eup %2819 }
 0x252   : > { %v3393_v2 = vpop.eup %2821  ;;  %2066 = vrot.lane.b32.xlu0 %v3391_v6, %s2863_s22 }
 0x254   : > { %2068 = vrot.lane.b32.xlu1 %v3393_v2, %s2863_s22 }
 0x2b6   : > { %v2057_v18 = vpop.permute.xlu0 %2056 }
 0x2b7   : > { %v2079_v32 = vsub.f32 %v3373_v10, %v2057_v18 }
 0x2b9   : > { %v2484_v33 = vmul.f32 -50.0, %v2079_v32 }
 0x2ba   : > { %v2061_v29 = vpop.permute.xlu1 %2060  ;;  %v2055_v7 = vpop.permute.xlu0 %2054 }
 0x2bb   : > { %v2104_v20 = vmul.f32 1.442695, %v2484_v33  ;;  %v2081_v45 = vsub.f32 %v3378_v14, %v2061_v29  ;;  %v2078_v53 = vsub.f32 %v3376_v11, %v2055_v7 }
 0x2bd   : > { %2823 = vpow2.f32 %v2104_v20  ;;  %v2486_v22 = vmul.f32 -50.0, %v2081_v45  ;;  %v2483_v1 = vmul.f32 -50.0, %v2078_v53 }
 0x2be   : > { %v2059_v23 = vpop.permute.xlu1 %2058 }
 0x2bf   : > { %v2108_v25 = vmul.f32 1.442695, %v2486_v22  ;;  %v2102_v30 = vmul.f32 1.442695, %v2483_v1  ;;  %v2080_v27 = vsub.f32 %v3382_v15, %v2059_v23  ;;  %v2063_v34 = vpop.permute.xlu0 %2062 }
 0x2c0   : > { %v2082_v36 = vsub.f32 %v3384_v17, %v2063_v34 }
 0x2c1   : > { %2825 = vpow2.f32 %v2108_v25  ;;  %v2485_v12 = vmul.f32 -50.0, %v2080_v27 }
 0x2c2   : > { %2827 = vpow2.f32 %v2102_v30  ;;  %v2487_v37 = vmul.f32 -50.0, %v2082_v36  ;;  %v2065_v42 = vpop.permute.xlu1 %2064 }
 0x2c3   : > { %v2106_v21 = vmul.f32 1.442695, %v2485_v12  ;;  %v2083_v44 = vsub.f32 %v3388_v5, %v2065_v42 }
 0x2c4   : > { %v2110_v16 = vmul.f32 1.442695, %v2487_v37  ;;  %v2067_v62 = vpop.permute.xlu0 %2066 }
 0x2c5   : > { %2829 = vpow2.f32 %v2106_v21  ;;  %v2488_v54 = vmul.f32 -50.0, %v2083_v44  ;;  %v2084_v28 = vsub.f32 %v3391_v6, %v2067_v62 }
 0x2c6   : > { %2831 = vpow2.f32 %v2110_v16  ;;  %v2069_v43 = vpop.permute.xlu1 %2068 }
 0x2c7   : > { %v2824_v41 = vpop.eup %2823  ;;  %v2112_v19 = vmul.f32 1.442695, %v2488_v54  ;;  %v2085_v46 = vsub.f32 %v3393_v2, %v2069_v43  ;;  %v2489_v47 = vmul.f32 -50.0, %v2084_v28 }
 0x2c8   : > { %v2119_v57 = vadd.f32 1.0, %v2824_v41 }
 0x2c9   : > { %2833 = vpow2.f32 %v2112_v19  ;;  %v2490_v8 = vmul.f32 -50.0, %v2085_v46  ;;  %v2114_v35 = vmul.f32 1.442695, %v2489_v47 }
 0x2ca   : > { %2835 = vrcp.f32 %v2119_v57 }
 0x2cb   : > { %v2826_v39 = vpop.eup %2825  ;;  %v2116_v3 = vmul.f32 1.442695, %v2490_v8  ;;  %2837 = vpow2.f32 %v2114_v35 }
 0x2cc   : > { %v2828_v49 = vpop.eup %2827  ;;  %v2121_v26 = vadd.f32 1.0, %v2826_v39 }
 0x2cd   : > { %v2118_v50 = vadd.f32 1.0, %v2828_v49  ;;  %2839 = vpow2.f32 %v2116_v3 }
 0x2ce   : > { %2841 = vrcp.f32 %v2121_v26 }
 0x2cf   : > { %v2830_v31 = vpop.eup %2829  ;;  %2843 = vrcp.f32 %v2118_v50 }
 0x2d0   : > { %v2832_v48 = vpop.eup %2831  ;;  %v2120_v38 = vadd.f32 1.0, %v2830_v31 }
 0x2d1   : > { %v2122_v24 = vadd.f32 1.0, %v2832_v48 }
 0x2d2   : > { %2845 = vrcp.f32 %v2120_v38 }
 0x2d3   : > { %v2834_v40 = vpop.eup %2833 }
 0x2d4   : > { %v2836_v51 = vpop.eup %2835  ;;  %v2123_v4 = vadd.f32 1.0, %v2834_v40 }
 0x2d5   : > { %2152 = vrot.lane.b32.xlu1 %v2836_v51, %s2864_s23  ;;  %v2838_v52 = vpop.eup %2837 }
 0x2d6   : > { %2847 = vrcp.f32 %v2123_v4  ;;  %v2124_v56 = vadd.f32 1.0, %v2838_v52 }
 0x2d7   : > { %v2840_v55 = vpop.eup %2839  ;;  %2849 = vrcp.f32 %v2122_v24 }
 0x2d8   : > { %v2842_v59 = vpop.eup %2841  ;;  %v2125_v58 = vadd.f32 1.0, %v2840_v55 }
 0x2d9   : > { %v2844_v60 = vpop.eup %2843  ;;  %2156 = vrot.lane.b32.xlu1 %v2842_v59, %s2864_s23 }
 0x2da   : > { %2851 = vrcp.f32 %v2125_v58  ;;  %2150 = vrot.lane.b32.xlu0 %v2844_v60, %s2864_s23 }
 0x2db   : > { %2853 = vrcp.f32 %v2124_v56 }
 0x2dc   : > { %v2846_v61 = vpop.eup %2845 }
 0x2de   : > { %2154 = vrot.lane.b32.xlu0 %v2846_v61, %s2864_s23 }
 0x2e0   : > { %v2848_v63 = vpop.eup %2847 }
 0x2e1   : > { %v2850_v0 = vpop.eup %2849  ;;  %2160 = vrot.lane.b32.xlu1 %v2848_v63, %s2864_s23 }
 0x2e2   : > { %2158 = vrot.lane.b32.xlu0 %v2850_v0, %s2864_s23 }
 0x2e4   : > { %v2852_v9 = vpop.eup %2851 }
 0x2e5   : > { %v2854_v13 = vpop.eup %2853  ;;  %2164 = vrot.lane.b32.xlu1 %v2852_v9, %s2864_s23 }
 0x2e6   : > { %2162 = vrot.lane.b32.xlu0 %v2854_v13, %s2864_s23 }
 0x347   : > { %v2153_v18 = vpop.permute.xlu1 %2152 }
 0x348   : > { %v2176_v32 = vsel %vm2174_vm8, %v3373_v10, %v2153_v18 }
 0x349   : > { %2185 = vst.msk [vmem:[%s224_s27 + $0x8] sm:$0xff] %vm2183_vm9, %v2176_v32 }
 0x34b   : > { %v2157_v33 = vpop.permute.xlu1 %2156 }
 0x34c   : > { %v2178_v29 = vsel %vm2174_vm8, %v3378_v14, %v2157_v33  ;;  %v2151_v7 = vpop.permute.xlu0 %2150 }
 0x34d   : > { %2187 = vst.msk [vmem:[%s224_s27 + $0x18] sm:$0xff] %vm2183_vm9, %v2178_v29  ;;  %v2175_v20 = vsel %vm2174_vm8, %v3376_v11, %v2151_v7 }
 0x34e   : > { %2184 = vst.msk [vmem:[%s224_s27] sm:$0xff] %vm2183_vm9, %v2175_v20 }
 0x350   : > { %v2155_v45 = vpop.permute.xlu0 %2154 }
 0x351   : > { %v2177_v53 = vsel %vm2174_vm8, %v3382_v15, %v2155_v45 }
 0x352   : > { %2186 = vst.msk [vmem:[%s224_s27 + $0x10] sm:$0xff] %vm2183_vm9, %v2177_v53 }
 0x353   : > { %v2161_v10 = vpop.permute.xlu1 %2160 }
 0x354   : > { %v2180_v22 = vsel %vm2174_vm8, %v3388_v5, %v2161_v10  ;;  %v2159_v1 = vpop.permute.xlu0 %2158 }
 0x355   : > { %2189 = vst.msk [vmem:[%s224_s27 + $0x28] sm:$0xff] %vm2183_vm9, %v2180_v22  ;;  %v2179_v14 = vsel %vm2174_vm8, %v3384_v17, %v2159_v1 }
 0x356   : > { %2188 = vst.msk [vmem:[%s224_s27 + $0x20] sm:$0xff] %vm2183_vm9, %v2179_v14 }
 0x357   : > { %v2165_v11 = vpop.permute.xlu1 %2164 }
 0x358   : > { %v2182_v23 = vsel %vm2174_vm8, %v3393_v2, %v2165_v11  ;;  %v2163_v25 = vpop.permute.xlu0 %2162 }
 0x359   : > { %2191 = vst.msk [vmem:[%s224_s27 + $0x38] sm:$0xff] %vm2183_vm9, %v2182_v23  ;;  %v2181_v15 = vsel %vm2174_vm8, %v3391_v6, %v2163_v25 }
 0x35a   : > { %2190 = vst.msk [vmem:[%s224_s27 + $0x30] sm:$0xff] %vm2183_vm9, %v2181_v15 }
 0x35b PF: > { %s15_s18 = sadd.s32 1, %s2861_s18  }
 0x35c   : > { %p12_p4 = scmp.ge.s32.totalorder %s15_s18, 4  }
 0x35e   :  { %14 = sbr.rel (!%p12_p4) target bundleno = 1 (0x1), region = 80 }

</bundles_post_ra>
